<compile_context>
chip_gen: v5e
topology: v5e:2x2
jax: 0.10.0
libtpu: 0.0.40
codegen_flags: <defaults>
</compile_context>

<pallas_src>
import math

import jax
import jax.numpy as jnp
from jax.experimental import pallas as pl
from jax.experimental.pallas import tpu as pltpu

_MODE = 128          # lane width reserved for the (2H -> 1) mode head
_NEG = -1.0e30       # "minus infinity" bias for padded softmax columns


def _round_up(x, m):
  return ((x + m - 1) // m) * m


# ---------------------------------------------------------------------------
# Kernel: one decode step per grid iteration, recurrent hidden in VMEM scratch.
# ---------------------------------------------------------------------------
def copy_decoder_kernel(
    pre_ref,        # (T, Bp, 2*Lp + H) f32  resident: emb@W_pre + biases (hoisted)
    hid0_ref,       # (Bp, 2H)          f32  resident: initial hidden
    encp_ref,       # (Bp, Lp, H)       f32  resident: enc @ W_comb_attn
    summp_ref,      # (Bp, Lp, H)       f32  resident: summ @ W_comb_query
    w_aq_h_ref,     # (2H, 2*Lp)        bf16 resident: hidden part of attn|query
    w_ih_ref,       # (H, 3G)           bf16 resident (gate-padded)
    b_ih_ref,       # (1, 3G)           f32
    w_hh_ref,       # (2H, 3G)          bf16
    b_hh_ref,       # (1, 3G)           f32
    w_heads_ref,    # (2H, 128+Lp+Vp)   bf16 resident fused [mode|ptr|out]
    b_heads_ref,    # (1, 128+Lp+Vp)    f32 (padding cols of ptr/out = -1e30)
    # outputs
    slab_ref,       # (1, Bp, 128+2*Lp+Vp) f32  per-step fused output slab
    hid_ref,        # (Bp, 2H)             f32  final hidden (written last step)
    # scratch
    h_state,        # (Bp, 2H) f32 recurrent hidden
):
  t = pl.program_id(0)

  H2 = hid0_ref.shape[1]
  Lp = encp_ref.shape[1]
  G = w_ih_ref.shape[1] // 3

  @pl.when(t == 0)
  def _():
    h_state[...] = hid0_ref[...]

  hid = h_state[...]                                   # (Bp, 2H) f32
  hid_b = hid.astype(jnp.bfloat16)
  pre = pre_ref[t]                                     # (Bp, 2*Lp + H) f32

  def softmax(x):                                      # exact (attn_w is exported)
    m = jnp.max(x, axis=1, keepdims=True)
    e = jnp.exp(x - m)
    return e / jnp.sum(e, axis=1, keepdims=True)

  def log_softmax(x):
    m = jnp.max(x, axis=1, keepdims=True)
    s = x - m
    return s - jnp.log(jnp.sum(jnp.exp(s), axis=1, keepdims=True))

  # ---- attn / query logits: hoisted emb part + hidden part ------------------
  aq = pre[:, :2 * Lp] + jnp.dot(hid_b, w_aq_h_ref[...],
                                 preferred_element_type=jnp.float32)
  attn_w = softmax(aq[:, :Lp])                         # (Bp, Lp); padded cols == 0
  query = softmax(aq[:, Lp:])                          # (Bp, Lp)

  # ---- attn_combine with hoisted context projections + SELU -----------------
  comb = (pre[:, 2 * Lp:]
          + jnp.sum(attn_w[:, :, None] * encp_ref[...], axis=1)
          + jnp.sum(query[:, :, None] * summp_ref[...], axis=1))   # (Bp, H)
  selu_alpha = 1.6732632423543772
  selu_scale = 1.0507009873554805
  x = selu_scale * jnp.where(
      comb > 0.0, comb, selu_alpha * (jnp.exp(jnp.minimum(comb, 0.0)) - 1.0))

  # ---- single-step GRU(H -> 2H); gates 128-lane aligned ----------------------
  gi = jnp.dot(x.astype(jnp.bfloat16), w_ih_ref[...],
               preferred_element_type=jnp.float32) + b_ih_ref[...]
  gh = jnp.dot(hid_b, w_hh_ref[...],
               preferred_element_type=jnp.float32) + b_hh_ref[...]
  r = jax.nn.sigmoid(gi[:, :H2] + gh[:, :H2])
  z = jax.nn.sigmoid(gi[:, G:G + H2] + gh[:, G:G + H2])
  n = jnp.tanh(gi[:, 2 * G:2 * G + H2] + r * gh[:, 2 * G:2 * G + H2])
  h_new = (1.0 - z) * n + z * hid                      # (Bp, 2H)

  # ---- fused heads [mode | pointer | out], 128-aligned sections --------------
  heads = jnp.dot(h_new.astype(jnp.bfloat16), w_heads_ref[...],
                  preferred_element_type=jnp.float32) + b_heads_ref[...]
  pc_sec = jax.nn.sigmoid(heads[:, :_MODE])            # col 0 real, rest sliced off
  cw_sec = log_softmax(heads[:, _MODE:_MODE + Lp])     # padding logits = -1e30
  out_sec = log_softmax(heads[:, _MODE + Lp:])

  # ---- state update + single lane-dense output store -------------------------
  h_state[...] = h_new
  slab_ref[0] = jnp.concatenate([pc_sec, cw_sec, out_sec, attn_w], axis=1)

  @pl.when(t == pl.num_programs(0) - 1)
  def _():
    hid_ref[...] = h_new


# ---------------------------------------------------------------------------
# Parameter packing: fuse / pad / cast PyTorch-layout params into kernel form.
# ---------------------------------------------------------------------------
def _pack_params(params):
  H = params["w_comb"].shape[1]
  L = params["w_attn"].shape[1]
  V = params["w_out"].shape[1]
  H2 = 2 * H
  Lp = _round_up(L, 128)
  Vp = _round_up(V, 128)
  G = _round_up(H2, 128)
  bf16, f32 = jnp.bfloat16, jnp.float32

  def pad_cols(w, width, value=0.0):
    return jnp.pad(w, ((0, 0), (0, width - w.shape[1])), constant_values=value)

  # emb-side precompute weight/bias: [attn(Lp) | query(Lp) | comb(H)]
  w_pre = jnp.concatenate([
      pad_cols(params["w_attn"][:H], Lp),
      pad_cols(params["w_query"][:H], Lp),
      params["w_comb"][:H],
  ], axis=1).astype(f32)
  b_pre = jnp.concatenate([
      pad_cols(params["b_attn"], Lp, _NEG),
      pad_cols(params["b_query"], Lp, _NEG),
      params["b_comb"],
  ], axis=1).astype(f32)

  # hidden-side attn|query weight (padding columns zero)
  w_aq_h = jnp.concatenate([
      pad_cols(params["w_attn"][H:], Lp),
      pad_cols(params["w_query"][H:], Lp),
  ], axis=1).astype(bf16)

  # GRU gate padding (gate order r, z, n)
  def pad_gates(w):
    parts = [w[:, g * H2:(g + 1) * H2] for g in range(3)]
    return jnp.concatenate([pad_cols(p, G) for p in parts], axis=1)

  # fused heads with 128-aligned sections [mode(128) | ptr(Lp) | out(Vp)]
  w_heads = jnp.concatenate([
      pad_cols(params["w_mode"], _MODE),
      pad_cols(params["w_ptr"], Lp),
      pad_cols(params["w_out"], Vp),
  ], axis=1).astype(bf16)
  b_heads = jnp.concatenate([
      pad_cols(params["b_mode"], _MODE),
      pad_cols(params["b_ptr"], Lp, _NEG),
      pad_cols(params["b_out"], Vp, _NEG),
  ], axis=1).astype(f32)

  packed = dict(
      w_pre=w_pre, b_pre=b_pre, w_aq_h=w_aq_h,
      w_comb_a=params["w_comb"][H:3 * H].astype(f32),   # (2H, H)
      w_comb_q=params["w_comb"][3 * H:].astype(f32),    # (H, H)
      w_ih=pad_gates(params["w_ih"]).astype(bf16),
      b_ih=pad_gates(params["b_ih"]).astype(f32),
      w_hh=pad_gates(params["w_hh"]).astype(bf16),
      b_hh=pad_gates(params["b_hh"]).astype(f32),
      w_heads=w_heads, b_heads=b_heads,
  )
  dims = dict(H=H, L=L, V=V, Lp=Lp, Vp=Vp, G=G)
  return packed, dims


# ---------------------------------------------------------------------------
# Wrapper: T decode steps (teacher-forced token ids) in one pallas_call.
# ---------------------------------------------------------------------------
def copy_decoder_decode(params, input_ids, hidden, encoder_outputs, summary_outputs):
  """input_ids: (T, B) int; hidden: (1, B, 2H); encoder_outputs: (B, L, 2H);
  summary_outputs: (B, L, H).  Returns p_copy (T,B,1), copy_word (T,B,L),
  out_log (T,B,V), final hidden (1,B,2H), attn_w (T,B,L)."""
  T, B = input_ids.shape
  packed, d = _pack_params(params)
  H, L, V = d["H"], d["L"], d["V"]
  Lp, Vp, G = d["Lp"], d["Vp"], d["G"]
  H2 = 2 * H
  PRE = 2 * Lp + H
  HEADS_P = _MODE + Lp + Vp
  SLAB = HEADS_P + Lp

  Bp = _round_up(max(B, 1), 16)        # 16 sublanes: clean bf16 packing on v6e/v7x
  pad_b = Bp - B

  # Hoisted emb-dependent matmul: one (T*B, H) x (H, PRE) matmul in the wrapper.
  emb = jnp.take(params["embedding"], input_ids.reshape(-1), axis=0)      # (T*B, H)
  pre = (emb.astype(jnp.float32) @ packed["w_pre"] + packed["b_pre"]).reshape(T, B, PRE)
  pre = jnp.pad(pre, ((0, 0), (0, pad_b), (0, 0)))

  hid0 = jnp.pad(hidden.reshape(B, H2).astype(jnp.float32), ((0, pad_b), (0, 0)))

  # Hoisted attn_combine context projections (exact f32, computed once).
  enc_proj = jnp.einsum("blk,kh->blh",
                        encoder_outputs.astype(jnp.float32), packed["w_comb_a"])
  summ_proj = jnp.einsum("blk,kh->blh",
                         summary_outputs.astype(jnp.float32), packed["w_comb_q"])
  enc_proj = jnp.pad(enc_proj, ((0, pad_b), (0, Lp - L), (0, 0)))
  summ_proj = jnp.pad(summ_proj, ((0, pad_b), (0, Lp - L), (0, 0)))

  res2 = lambda t: (0, 0)              # constant block index -> VMEM resident
  res3 = lambda t: (0, 0, 0)
  step3 = lambda t: (t, 0, 0)          # streamed per time-step

  in_specs = [
      pl.BlockSpec((T, Bp, PRE), res3),        # pre (fully resident; ref[t] in-kernel)
      pl.BlockSpec((Bp, H2), res2),            # hid0
      pl.BlockSpec((Bp, Lp, H), res3),         # enc_proj
      pl.BlockSpec((Bp, Lp, H), res3),         # summ_proj
      pl.BlockSpec((H2, 2 * Lp), res2),        # w_aq_h
      pl.BlockSpec((H, 3 * G), res2),          # w_ih
      pl.BlockSpec((1, 3 * G), res2),          # b_ih
      pl.BlockSpec((H2, 3 * G), res2),         # w_hh
      pl.BlockSpec((1, 3 * G), res2),          # b_hh
      pl.BlockSpec((H2, HEADS_P), res2),       # w_heads
      pl.BlockSpec((1, HEADS_P), res2),        # b_heads
  ]
  out_shape = (
      jax.ShapeDtypeStruct((T, Bp, SLAB), jnp.float32),   # fused output slab
      jax.ShapeDtypeStruct((Bp, H2), jnp.float32),        # final hidden
  )
  out_specs = (
      pl.BlockSpec((1, Bp, SLAB), step3),
      pl.BlockSpec((Bp, H2), res2),
  )

  slab, hid_final = pl.pallas_call(
      copy_decoder_kernel,
      out_shape=out_shape,
      grid_spec=pltpu.PrefetchScalarGridSpec(
          num_scalar_prefetch=0,
          grid=(T,),
          in_specs=in_specs,
          out_specs=out_specs,
          scratch_shapes=[pltpu.VMEM((Bp, H2), jnp.float32)],
      ),
      compiler_params=pltpu.CompilerParams(
          dimension_semantics=("arbitrary",),     # hidden state carries across steps
          vmem_limit_bytes=32 * 1024 * 1024),
  )(pre, hid0, enc_proj, summ_proj,
    packed["w_aq_h"], packed["w_ih"], packed["b_ih"], packed["w_hh"], packed["b_hh"],
    packed["w_heads"], packed["b_heads"])

  p_copy = slab[:, :B, :1]
  copy_word = slab[:, :B, _MODE:_MODE + L]
  out_log = slab[:, :B, _MODE + Lp:_MODE + Lp + V]
  attn_w = slab[:, :B, HEADS_P:HEADS_P + L]
  return p_copy, copy_word, out_log, hid_final[:B].reshape(1, B, H2), attn_w


def copy_decoder_forward(params, input_ids, hidden, encoder_outputs, summary_outputs):
  """Mirrors Copy_decoder.forward (single step; dropout is eval-mode identity)."""
  B = input_ids.shape[0]
  p_copy, copy_word, out_log, hid, attn_w = copy_decoder_decode(
      params, input_ids.reshape(1, B), hidden, encoder_outputs, summary_outputs)
  return p_copy, copy_word[0], out_log[0], hid, attn_w[0]


# ---------------------------------------------------------------------------
# Pure-JAX f32 reference (mirrors the PyTorch forward) for tolerance checks.
# ---------------------------------------------------------------------------
def copy_decoder_reference(params, input_ids, hidden, encoder_outputs, summary_outputs):
  T, B = input_ids.shape
  H = params["w_comb"].shape[1]
  H2 = 2 * H
  emb_all = jnp.take(params["embedding"], input_ids, axis=0)        # (T, B, H)

  def step(h, emb):
    cat_eh = jnp.concatenate([emb, h], axis=1)
    attn_w = jax.nn.softmax(cat_eh @ params["w_attn"] + params["b_attn"], axis=1)
    query = jax.nn.softmax(cat_eh @ params["w_query"] + params["b_query"], axis=1)
    attn_applied = jnp.einsum("bl,blk->bk", attn_w, encoder_outputs)
    query_applied = jnp.einsum("bl,blk->bk", query, summary_outputs)
    comb_in = jnp.concatenate([emb, attn_applied, query_applied], axis=1)
    x = jax.nn.selu(comb_in @ params["w_comb"] + params["b_comb"])
    gi = x @ params["w_ih"] + params["b_ih"]
    gh = h @ params["w_hh"] + params["b_hh"]
    r = jax.nn.sigmoid(gi[:, :H2] + gh[:, :H2])
    z = jax.nn.sigmoid(gi[:, H2:2 * H2] + gh[:, H2:2 * H2])
    n = jnp.tanh(gi[:, 2 * H2:] + r * gh[:, 2 * H2:])
    h_new = (1.0 - z) * n + z * h
    p_copy = jax.nn.sigmoid(h_new @ params["w_mode"] + params["b_mode"])
    copy_word = jax.nn.log_softmax(h_new @ params["w_ptr"] + params["b_ptr"], axis=1)
    out_log = jax.nn.log_softmax(h_new @ params["w_out"] + params["b_out"], axis=1)
    return h_new, (p_copy, copy_word, out_log, attn_w)

  h0 = hidden.reshape(B, H2)
  h_final, (p, cw, ol, aw) = jax.lax.scan(step, h0, emb_all)
  return p, cw, ol, h_final.reshape(1, B, H2), aw


def init_params(key, hidden_size, output_size, max_length, vocab_size):
  """Deterministic synthetic parameters (PyTorch-style uniform fan-in init)."""
  H, V, L = hidden_size, output_size, max_length
  keys = iter(jax.random.split(key, 16))

  def linear(k, fan_in, fan_out):
    bound = 1.0 / math.sqrt(fan_in)
    kw, kb = jax.random.split(k)
    w = jax.random.uniform(kw, (fan_in, fan_out), jnp.float32, -bound, bound)
    b = jax.random.uniform(kb, (1, fan_out), jnp.float32, -bound, bound)
    return w, b

  p = {}
  p["embedding"] = 0.1 * jax.random.normal(next(keys), (vocab_size, H), jnp.float32)
  p["w_attn"], p["b_attn"] = linear(next(keys), 3 * H, L)       # attn: Linear(3H, L)
  p["w_query"], p["b_query"] = linear(next(keys), 3 * H, L)     # query: Linear(3H, L)
  p["w_comb"], p["b_comb"] = linear(next(keys), 4 * H, H)       # attn_combine: Linear(4H, H)
  # GRU(input=H, hidden=2H): stored transposed for x @ W; gate order (r, z, n).
  gb = 1.0 / math.sqrt(2 * H)
  p["w_ih"] = jax.random.uniform(next(keys), (H, 6 * H), jnp.float32, -gb, gb)
  p["b_ih"] = jax.random.uniform(next(keys), (1, 6 * H), jnp.float32, -gb, gb)
  p["w_hh"] = jax.random.uniform(next(keys), (2 * H, 6 * H), jnp.float32, -gb, gb)
  p["b_hh"] = jax.random.uniform(next(keys), (1, 6 * H), jnp.float32, -gb, gb)
  p["w_mode"], p["b_mode"] = linear(next(keys), 2 * H, 1)       # mode_linear: Linear(2H, 1)
  p["w_ptr"], p["b_ptr"] = linear(next(keys), 2 * H, L)         # pointer: Linear(2H, L)
  p["w_out"], p["b_out"] = linear(next(keys), 2 * H, V)         # out: Linear(2H, V)
  # NOTE: attn_summary and linear_copy exist in __init__ but are unused in forward.
  return p


if __name__ == "__main__":
  B, H, L, V, VOCAB, T = 2, 32, 32, 40, 50, 8

  key = jax.random.PRNGKey(0)
  kp, k1, k2, k3, k4 = jax.random.split(key, 5)
  params = init_params(kp, hidden_size=H, output_size=V, max_length=L, vocab_size=VOCAB)

  input_ids = jax.random.randint(k1, (B,), 0, VOCAB)                       # (B,)
  hidden = jnp.zeros((1, B, 2 * H), jnp.float32)                           # initHidden()
  encoder_outputs = jax.random.normal(k2, (B, L, 2 * H), jnp.float32)      # (B, max_length, 2H)
  summary_outputs = jax.random.normal(k3, (B, L, H), jnp.float32)          # (B, max_length, H)

  # Single-step call (matches Copy_decoder.forward output shapes).
  outs = copy_decoder_forward(params, input_ids, hidden, encoder_outputs, summary_outputs)
  outs = jax.block_until_ready(outs)
  p_copy, copy_word, out_log, new_hidden, attn_w = outs
  assert p_copy.shape == (1, B, 1)
  assert copy_word.shape == (B, L)
  assert out_log.shape == (B, V)
  assert new_hidden.shape == (1, B, 2 * H)
  assert attn_w.shape == (B, L)
  for a in outs:
    assert bool(jnp.all(jnp.isfinite(a)))

  # Multi-step decode: whole recurrent loop in one pallas_call.
  step_ids = jax.random.randint(k4, (T, B), 0, VOCAB)                      # (T, B)
  d_outs = copy_decoder_decode(params, step_ids, hidden, encoder_outputs, summary_outputs)
  d_outs = jax.block_until_ready(d_outs)
  dp, dcw, dout, dhid, dattn = d_outs
  assert dp.shape == (T, B, 1)
  assert dcw.shape == (T, B, L)
  assert dout.shape == (T, B, V)
  assert dhid.shape == (1, B, 2 * H)
  assert dattn.shape == (T, B, L)

  # Tolerance check against a pure-JAX f32 reference (bf16 MXU weights in kernel).
  r_outs = copy_decoder_reference(params, step_ids, hidden, encoder_outputs, summary_outputs)
  names = ("p_copy", "copy_word", "out_log", "hidden", "attn_w")
  for name, got, ref in zip(names, d_outs, r_outs):
    assert got.shape == ref.shape, (name, got.shape, ref.shape)
    assert bool(jnp.all(jnp.isfinite(got))), name
    err = float(jnp.max(jnp.abs(got - ref)))
    assert err < 1e-1, (name, err)

  print("KERNEL_OK")
</pallas_src>

<mosaic_0001>
module attributes {stable_mosaic.version = 11 : i64} {
  func.func @copy_decoder_kernel(%arg0: i32, %arg1: memref<1x16x288xf32, #tpu.memory_space<vmem>>, %arg2: memref<16x64xf32, #tpu.memory_space<vmem>>, %arg3: memref<16x128x32xf32, #tpu.memory_space<vmem>>, %arg4: memref<16x128x32xf32, #tpu.memory_space<vmem>>, %arg5: memref<64x256xbf16, #tpu.memory_space<vmem>>, %arg6: memref<32x384xbf16, #tpu.memory_space<vmem>>, %arg7: memref<1x384xf32, #tpu.memory_space<vmem>>, %arg8: memref<64x384xbf16, #tpu.memory_space<vmem>>, %arg9: memref<1x384xf32, #tpu.memory_space<vmem>>, %arg10: memref<64x384xbf16, #tpu.memory_space<vmem>>, %arg11: memref<1x384xf32, #tpu.memory_space<vmem>>, %arg12: memref<1x16x512xf32, #tpu.memory_space<vmem>>, %arg13: memref<16x64xf32, #tpu.memory_space<vmem>>, %arg14: memref<16x64xf32, #tpu.memory_space<vmem>>) attributes {dimension_semantics = [#tpu.dimension_semantics<arbitrary>], iteration_bounds = array<i64: 1>, scalar_prefetch = 0 : i64, scratch_operands = 1 : i64, tpu.core_type = #tpu.core_type<tc>, window_params = [{pipeline_mode = #tpu.pipeline_mode<synchronous>, transform_indices = @transform_0, window_bounds = array<i64: 1, 16, 288>}, {pipeline_mode = #tpu.pipeline_mode<synchronous>, transform_indices = @transform_1, window_bounds = array<i64: 16, 64>}, {pipeline_mode = #tpu.pipeline_mode<synchronous>, transform_indices = @transform_2, window_bounds = array<i64: 16, 128, 32>}, {pipeline_mode = #tpu.pipeline_mode<synchronous>, transform_indices = @transform_3, window_bounds = array<i64: 16, 128, 32>}, {pipeline_mode = #tpu.pipeline_mode<synchronous>, transform_indices = @transform_4, window_bounds = array<i64: 64, 256>}, {pipeline_mode = #tpu.pipeline_mode<synchronous>, transform_indices = @transform_5, window_bounds = array<i64: 32, 384>}, {pipeline_mode = #tpu.pipeline_mode<synchronous>, transform_indices = @transform_6, window_bounds = array<i64: 1, 384>}, {pipeline_mode = #tpu.pipeline_mode<synchronous>, transform_indices = @transform_7, window_bounds = array<i64: 64, 384>}, {pipeline_mode = #tpu.pipeline_mode<synchronous>, transform_indices = @transform_8, window_bounds = array<i64: 1, 384>}, {pipeline_mode = #tpu.pipeline_mode<synchronous>, transform_indices = @transform_9, window_bounds = array<i64: 64, 384>}, {pipeline_mode = #tpu.pipeline_mode<synchronous>, transform_indices = @transform_10, window_bounds = array<i64: 1, 384>}, {transform_indices = @transform_11, window_bounds = array<i64: 1, 16, 512>}, {pipeline_mode = #tpu.pipeline_mode<synchronous>, transform_indices = @transform_12, window_bounds = array<i64: 16, 64>}]} {
    %c0_i32 = arith.constant 0 : i32
    %0 = arith.cmpi eq, %arg0, %c0_i32 : i32
    %1 = arith.extui %0 : i1 to i32
    %c0_i32_0 = arith.constant 0 : i32
    %2 = arith.cmpi ne, %1, %c0_i32_0 : i32
    scf.if %2 {
      %c0_53 = arith.constant 0 : index
      %c0_54 = arith.constant 0 : index
      %136 = vector.load %arg2[%c0_53, %c0_54] : memref<16x64xf32, #tpu.memory_space<vmem>>, vector<16x64xf32>
      %c0_55 = arith.constant 0 : index
      %c0_56 = arith.constant 0 : index
      %137 = vector.load %arg14[%c0_55, %c0_56] : memref<16x64xf32, #tpu.memory_space<vmem>>, vector<16x64xf32>
      tpu.vector_store %arg14[%c0_55, %c0_56], %136 {strides = array<i32>} : memref<16x64xf32, #tpu.memory_space<vmem>>, vector<16x64xf32>,
    } else {
    }
    %c0 = arith.constant 0 : index
    %c0_1 = arith.constant 0 : index
    %3 = vector.load %arg14[%c0, %c0_1] : memref<16x64xf32, #tpu.memory_space<vmem>>, vector<16x64xf32>
    %4 = arith.truncf %3 : vector<16x64xf32> to vector<16x64xbf16>
    %5 = arith.index_cast %arg0 : i32 to index
    %c0_2 = arith.constant 0 : index
    %c0_3 = arith.constant 0 : index
    %6 = vector.load %arg1[%5, %c0_2, %c0_3] : memref<1x16x288xf32, #tpu.memory_space<vmem>>, vector<1x16x288xf32>
    %7 = vector.shape_cast %6 : vector<1x16x288xf32> to vector<16x288xf32>
    %8 = vector.extract_strided_slice %7 {offsets = [0, 0], sizes = [16, 256], strides = [1, 1]} : vector<16x288xf32> to vector<16x256xf32>
    %c0_4 = arith.constant 0 : index
    %c0_5 = arith.constant 0 : index
    %9 = vector.load %arg5[%c0_4, %c0_5] : memref<64x256xbf16, #tpu.memory_space<vmem>>, vector<64x256xbf16>
    %cst = arith.constant dense<0.000000e+00> : vector<16x256xf32>
    %10 = tpu.matmul %4, %9, %cst {dimension_numbers = #tpu.dot_dimension_numbers<[1], [0], [0], [1], [0, 0, 1, 1], [], []>} : vector<16x64xbf16>, vector<64x256xbf16>, vector<16x256xf32> -> vector<16x256xf32>
    %11 = arith.addf %8, %10 : vector<16x256xf32>
    %12 = vector.extract_strided_slice %11 {offsets = [0, 0], sizes = [16, 128], strides = [1, 1]} : vector<16x256xf32> to vector<16x128xf32>
    %cst_6 = arith.constant dense<0xFF800000> : vector<16xf32>
    %13 = vector.multi_reduction <maximumf>, %12, %cst_6 [1] : vector<16x128xf32> to vector<16xf32>
    %14 = vector.shape_cast %13 : vector<16xf32> to vector<16x1xf32>
    %15 = vector.broadcast %14 : vector<16x1xf32> to vector<16x128xf32>
    %16 = arith.subf %12, %15 : vector<16x128xf32>
    %17 = math.exp %16 : vector<16x128xf32>
    %cst_7 = arith.constant dense<0.000000e+00> : vector<16xf32>
    %18 = vector.multi_reduction <add>, %17, %cst_7 [1] : vector<16x128xf32> to vector<16xf32>
    %19 = vector.shape_cast %18 : vector<16xf32> to vector<16x1xf32>
    %20 = vector.broadcast %19 : vector<16x1xf32> to vector<16x128xf32>
    %21 = arith.divf %17, %20 : vector<16x128xf32>
    %22 = vector.extract_strided_slice %11 {offsets = [0, 128], sizes = [16, 128], strides = [1, 1]} : vector<16x256xf32> to vector<16x128xf32>
    %cst_8 = arith.constant dense<0xFF800000> : vector<16xf32>
    %23 = vector.multi_reduction <maximumf>, %22, %cst_8 [1] : vector<16x128xf32> to vector<16xf32>
    %24 = vector.shape_cast %23 : vector<16xf32> to vector<16x1xf32>
    %25 = vector.broadcast %24 : vector<16x1xf32> to vector<16x128xf32>
    %26 = arith.subf %22, %25 : vector<16x128xf32>
    %27 = math.exp %26 : vector<16x128xf32>
    %cst_9 = arith.constant dense<0.000000e+00> : vector<16xf32>
    %28 = vector.multi_reduction <add>, %27, %cst_9 [1] : vector<16x128xf32> to vector<16xf32>
    %29 = vector.shape_cast %28 : vector<16xf32> to vector<16x1xf32>
    %30 = vector.broadcast %29 : vector<16x1xf32> to vector<16x128xf32>
    %31 = arith.divf %27, %30 : vector<16x128xf32>
    %32 = vector.extract_strided_slice %7 {offsets = [0, 256], sizes = [16, 32], strides = [1, 1]} : vector<16x288xf32> to vector<16x32xf32>
    %33 = vector.shape_cast %21 : vector<16x128xf32> to vector<16x128x1xf32>
    %c0_10 = arith.constant 0 : index
    %c0_11 = arith.constant 0 : index
    %c0_12 = arith.constant 0 : index
    %34 = vector.load %arg3[%c0_10, %c0_11, %c0_12] : memref<16x128x32xf32, #tpu.memory_space<vmem>>, vector<16x128x32xf32>
    %35 = vector.broadcast %33 : vector<16x128x1xf32> to vector<16x128x32xf32>
    %36 = arith.mulf %35, %34 : vector<16x128x32xf32>
    %cst_13 = arith.constant dense<0.000000e+00> : vector<16x32xf32>
    %37 = vector.multi_reduction <add>, %36, %cst_13 [1] : vector<16x128x32xf32> to vector<16x32xf32>
    %38 = arith.addf %32, %37 : vector<16x32xf32>
    %39 = vector.shape_cast %31 : vector<16x128xf32> to vector<16x128x1xf32>
    %c0_14 = arith.constant 0 : index
    %c0_15 = arith.constant 0 : index
    %c0_16 = arith.constant 0 : index
    %40 = vector.load %arg4[%c0_14, %c0_15, %c0_16] : memref<16x128x32xf32, #tpu.memory_space<vmem>>, vector<16x128x32xf32>
    %41 = vector.broadcast %39 : vector<16x128x1xf32> to vector<16x128x32xf32>
    %42 = arith.mulf %41, %40 : vector<16x128x32xf32>
    %cst_17 = arith.constant dense<0.000000e+00> : vector<16x32xf32>
    %43 = vector.multi_reduction <add>, %42, %cst_17 [1] : vector<16x128x32xf32> to vector<16x32xf32>
    %44 = arith.addf %38, %43 : vector<16x32xf32>
    %cst_18 = arith.constant 0.000000e+00 : f32
    %45 = vector.broadcast %cst_18 : f32 to vector<16x32xf32>
    %46 = arith.cmpf ogt, %44, %45 : vector<16x32xf32>
    %cst_19 = arith.constant 0.000000e+00 : f32
    %47 = vector.broadcast %cst_19 : f32 to vector<16x32xf32>
    %48 = arith.minimumf %44, %47 : vector<16x32xf32>
    %49 = math.exp %48 : vector<16x32xf32>
    %cst_20 = arith.constant 1.000000e+00 : f32
    %50 = vector.broadcast %cst_20 : f32 to vector<16x32xf32>
    %51 = arith.subf %49, %50 : vector<16x32xf32>
    %cst_21 = arith.constant 1.67326319 : f32
    %52 = vector.broadcast %cst_21 : f32 to vector<16x32xf32>
    %53 = arith.mulf %52, %51 : vector<16x32xf32>
    %54 = arith.select %46, %44, %53 : vector<16x32xi1>, vector<16x32xf32>
    %cst_22 = arith.constant 1.05070102 : f32
    %55 = vector.broadcast %cst_22 : f32 to vector<16x32xf32>
    %56 = arith.mulf %55, %54 : vector<16x32xf32>
    %57 = arith.truncf %56 : vector<16x32xf32> to vector<16x32xbf16>
    %c0_23 = arith.constant 0 : index
    %c0_24 = arith.constant 0 : index
    %58 = vector.load %arg6[%c0_23, %c0_24] : memref<32x384xbf16, #tpu.memory_space<vmem>>, vector<32x384xbf16>
    %cst_25 = arith.constant dense<0.000000e+00> : vector<16x384xf32>
    %59 = tpu.matmul %57, %58, %cst_25 {dimension_numbers = #tpu.dot_dimension_numbers<[1], [0], [0], [1], [0, 0, 1, 1], [], []>} : vector<16x32xbf16>, vector<32x384xbf16>, vector<16x384xf32> -> vector<16x384xf32>
    %c0_26 = arith.constant 0 : index
    %c0_27 = arith.constant 0 : index
    %60 = vector.load %arg7[%c0_26, %c0_27] : memref<1x384xf32, #tpu.memory_space<vmem>>, vector<1x384xf32>
    %61 = vector.broadcast %60 : vector<1x384xf32> to vector<16x384xf32>
    %62 = arith.addf %59, %61 : vector<16x384xf32>
    %c0_28 = arith.constant 0 : index
    %c0_29 = arith.constant 0 : index
    %63 = vector.load %arg8[%c0_28, %c0_29] : memref<64x384xbf16, #tpu.memory_space<vmem>>, vector<64x384xbf16>
    %cst_30 = arith.constant dense<0.000000e+00> : vector<16x384xf32>
    %64 = tpu.matmul %4, %63, %cst_30 {dimension_numbers = #tpu.dot_dimension_numbers<[1], [0], [0], [1], [0, 0, 1, 1], [], []>} : vector<16x64xbf16>, vector<64x384xbf16>, vector<16x384xf32> -> vector<16x384xf32>
    %c0_31 = arith.constant 0 : index
    %c0_32 = arith.constant 0 : index
    %65 = vector.load %arg9[%c0_31, %c0_32] : memref<1x384xf32, #tpu.memory_space<vmem>>, vector<1x384xf32>
    %66 = vector.broadcast %65 : vector<1x384xf32> to vector<16x384xf32>
    %67 = arith.addf %64, %66 : vector<16x384xf32>
    %68 = vector.extract_strided_slice %62 {offsets = [0, 0], sizes = [16, 64], strides = [1, 1]} : vector<16x384xf32> to vector<16x64xf32>
    %69 = vector.extract_strided_slice %67 {offsets = [0, 0], sizes = [16, 64], strides = [1, 1]} : vector<16x384xf32> to vector<16x64xf32>
    %70 = arith.addf %68, %69 : vector<16x64xf32>
    %71 = arith.negf %70 : vector<16x64xf32>
    %72 = math.exp %71 : vector<16x64xf32>
    %cst_33 = arith.constant 1.000000e+00 : f32
    %73 = vector.broadcast %cst_33 : f32 to vector<16x64xf32>
    %74 = arith.addf %73, %72 : vector<16x64xf32>
    %75 = arith.divf %73, %74 : vector<16x64xf32>
    %76 = vector.extract_strided_slice %62 {offsets = [0, 128], sizes = [16, 64], strides = [1, 1]} : vector<16x384xf32> to vector<16x64xf32>
    %77 = vector.extract_strided_slice %67 {offsets = [0, 128], sizes = [16, 64], strides = [1, 1]} : vector<16x384xf32> to vector<16x64xf32>
    %78 = arith.addf %76, %77 : vector<16x64xf32>
    %79 = arith.negf %78 : vector<16x64xf32>
    %80 = math.exp %79 : vector<16x64xf32>
    %cst_34 = arith.constant 1.000000e+00 : f32
    %81 = vector.broadcast %cst_34 : f32 to vector<16x64xf32>
    %82 = arith.addf %81, %80 : vector<16x64xf32>
    %83 = arith.divf %81, %82 : vector<16x64xf32>
    %84 = vector.extract_strided_slice %62 {offsets = [0, 256], sizes = [16, 64], strides = [1, 1]} : vector<16x384xf32> to vector<16x64xf32>
    %85 = vector.extract_strided_slice %67 {offsets = [0, 256], sizes = [16, 64], strides = [1, 1]} : vector<16x384xf32> to vector<16x64xf32>
    %86 = arith.mulf %75, %85 : vector<16x64xf32>
    %87 = arith.addf %84, %86 : vector<16x64xf32>
    %88 = math.tanh %87 : vector<16x64xf32>
    %cst_35 = arith.constant 1.000000e+00 : f32
    %89 = vector.broadcast %cst_35 : f32 to vector<16x64xf32>
    %90 = arith.subf %89, %83 : vector<16x64xf32>
    %91 = arith.mulf %90, %88 : vector<16x64xf32>
    %92 = arith.mulf %83, %3 : vector<16x64xf32>
    %93 = arith.addf %91, %92 : vector<16x64xf32>
    %94 = arith.truncf %93 : vector<16x64xf32> to vector<16x64xbf16>
    %c0_36 = arith.constant 0 : index
    %c0_37 = arith.constant 0 : index
    %95 = vector.load %arg10[%c0_36, %c0_37] : memref<64x384xbf16, #tpu.memory_space<vmem>>, vector<64x384xbf16>
    %cst_38 = arith.constant dense<0.000000e+00> : vector<16x384xf32>
    %96 = tpu.matmul %94, %95, %cst_38 {dimension_numbers = #tpu.dot_dimension_numbers<[1], [0], [0], [1], [0, 0, 1, 1], [], []>} : vector<16x64xbf16>, vector<64x384xbf16>, vector<16x384xf32> -> vector<16x384xf32>
    %c0_39 = arith.constant 0 : index
    %c0_40 = arith.constant 0 : index
    %97 = vector.load %arg11[%c0_39, %c0_40] : memref<1x384xf32, #tpu.memory_space<vmem>>, vector<1x384xf32>
    %98 = vector.broadcast %97 : vector<1x384xf32> to vector<16x384xf32>
    %99 = arith.addf %96, %98 : vector<16x384xf32>
    %100 = vector.extract_strided_slice %99 {offsets = [0, 0], sizes = [16, 128], strides = [1, 1]} : vector<16x384xf32> to vector<16x128xf32>
    %101 = arith.negf %100 : vector<16x128xf32>
    %102 = math.exp %101 : vector<16x128xf32>
    %cst_41 = arith.constant 1.000000e+00 : f32
    %103 = vector.broadcast %cst_41 : f32 to vector<16x128xf32>
    %104 = arith.addf %103, %102 : vector<16x128xf32>
    %105 = arith.divf %103, %104 : vector<16x128xf32>
    %106 = vector.extract_strided_slice %99 {offsets = [0, 128], sizes = [16, 128], strides = [1, 1]} : vector<16x384xf32> to vector<16x128xf32>
    %cst_42 = arith.constant dense<0xFF800000> : vector<16xf32>
    %107 = vector.multi_reduction <maximumf>, %106, %cst_42 [1] : vector<16x128xf32> to vector<16xf32>
    %108 = vector.shape_cast %107 : vector<16xf32> to vector<16x1xf32>
    %109 = vector.broadcast %108 : vector<16x1xf32> to vector<16x128xf32>
    %110 = arith.subf %106, %109 : vector<16x128xf32>
    %111 = math.exp %110 : vector<16x128xf32>
    %cst_43 = arith.constant dense<0.000000e+00> : vector<16xf32>
    %112 = vector.multi_reduction <add>, %111, %cst_43 [1] : vector<16x128xf32> to vector<16xf32>
    %113 = vector.shape_cast %112 : vector<16xf32> to vector<16x1xf32>
    %114 = math.log %113 : vector<16x1xf32>
    %115 = vector.broadcast %114 : vector<16x1xf32> to vector<16x128xf32>
    %116 = arith.subf %110, %115 : vector<16x128xf32>
    %117 = vector.extract_strided_slice %99 {offsets = [0, 256], sizes = [16, 128], strides = [1, 1]} : vector<16x384xf32> to vector<16x128xf32>
    %cst_44 = arith.constant dense<0xFF800000> : vector<16xf32>
    %118 = vector.multi_reduction <maximumf>, %117, %cst_44 [1] : vector<16x128xf32> to vector<16xf32>
    %119 = vector.shape_cast %118 : vector<16xf32> to vector<16x1xf32>
    %120 = vector.broadcast %119 : vector<16x1xf32> to vector<16x128xf32>
    %121 = arith.subf %117, %120 : vector<16x128xf32>
    %122 = math.exp %121 : vector<16x128xf32>
    %cst_45 = arith.constant dense<0.000000e+00> : vector<16xf32>
    %123 = vector.multi_reduction <add>, %122, %cst_45 [1] : vector<16x128xf32> to vector<16xf32>
    %124 = vector.shape_cast %123 : vector<16xf32> to vector<16x1xf32>
    %125 = math.log %124 : vector<16x1xf32>
    %126 = vector.broadcast %125 : vector<16x1xf32> to vector<16x128xf32>
    %127 = arith.subf %121, %126 : vector<16x128xf32>
    %c0_46 = arith.constant 0 : index
    %c0_47 = arith.constant 0 : index
    %128 = vector.load %arg14[%c0_46, %c0_47] : memref<16x64xf32, #tpu.memory_space<vmem>>, vector<16x64xf32>
    tpu.vector_store %arg14[%c0_46, %c0_47], %93 {strides = array<i32>} : memref<16x64xf32, #tpu.memory_space<vmem>>, vector<16x64xf32>,
    %129 = tpu.concatenate %105, %116, %127, %21 in 1 : vector<16x128xf32>, vector<16x128xf32>, vector<16x128xf32>, vector<16x128xf32> -> vector<16x512xf32>
    %c0_48 = arith.constant 0 : index
    %c0_49 = arith.constant 0 : index
    %c0_50 = arith.constant 0 : index
    %130 = vector.load %arg12[%c0_48, %c0_49, %c0_50] : memref<1x16x512xf32, #tpu.memory_space<vmem>>, vector<1x16x512xf32>
    %131 = vector.shape_cast %130 : vector<1x16x512xf32> to vector<16x512xf32>
    %132 = vector.shape_cast %129 : vector<16x512xf32> to vector<1x16x512xf32>
    tpu.vector_store %arg12[%c0_48, %c0_49, %c0_50], %132 {strides = array<i32>} : memref<1x16x512xf32, #tpu.memory_space<vmem>>, vector<1x16x512xf32>,
    %c0_i32_51 = arith.constant 0 : i32
    %133 = arith.cmpi eq, %arg0, %c0_i32_51 : i32
    %134 = arith.extui %133 : i1 to i32
    %c0_i32_52 = arith.constant 0 : i32
    %135 = arith.cmpi ne, %134, %c0_i32_52 : i32
    scf.if %135 {
      %c0_53 = arith.constant 0 : index
      %c0_54 = arith.constant 0 : index
      %136 = vector.load %arg13[%c0_53, %c0_54] : memref<16x64xf32, #tpu.memory_space<vmem>>, vector<16x64xf32>
      tpu.vector_store %arg13[%c0_53, %c0_54], %93 {strides = array<i32>} : memref<16x64xf32, #tpu.memory_space<vmem>>, vector<16x64xf32>,
    } else {
    }
    return
  }
  func.func @transform_0(%arg0: i32) -> (i32, i32, i32) {
    %c0_i32 = arith.constant 0 : i32
    %c0_i32_0 = arith.constant 0 : i32
    %c0_i32_1 = arith.constant 0 : i32
    %c0_i32_2 = arith.constant 0 : i32
    return %c0_i32, %c0_i32_0, %c0_i32_1 : i32, i32, i32
  }
  func.func @transform_1(%arg0: i32) -> (i32, i32) {
    %c0_i32 = arith.constant 0 : i32
    %c0_i32_0 = arith.constant 0 : i32
    %c0_i32_1 = arith.constant 0 : i32
    return %c0_i32, %c0_i32_0 : i32, i32
  }
  func.func @transform_2(%arg0: i32) -> (i32, i32, i32) {
    %c0_i32 = arith.constant 0 : i32
    %c0_i32_0 = arith.constant 0 : i32
    %c0_i32_1 = arith.constant 0 : i32
    %c0_i32_2 = arith.constant 0 : i32
    return %c0_i32, %c0_i32_0, %c0_i32_1 : i32, i32, i32
  }
  func.func @transform_3(%arg0: i32) -> (i32, i32, i32) {
    %c0_i32 = arith.constant 0 : i32
    %c0_i32_0 = arith.constant 0 : i32
    %c0_i32_1 = arith.constant 0 : i32
    %c0_i32_2 = arith.constant 0 : i32
    return %c0_i32, %c0_i32_0, %c0_i32_1 : i32, i32, i32
  }
  func.func @transform_4(%arg0: i32) -> (i32, i32) {
    %c0_i32 = arith.constant 0 : i32
    %c0_i32_0 = arith.constant 0 : i32
    %c0_i32_1 = arith.constant 0 : i32
    return %c0_i32, %c0_i32_0 : i32, i32
  }
  func.func @transform_5(%arg0: i32) -> (i32, i32) {
    %c0_i32 = arith.constant 0 : i32
    %c0_i32_0 = arith.constant 0 : i32
    %c0_i32_1 = arith.constant 0 : i32
    return %c0_i32, %c0_i32_0 : i32, i32
  }
  func.func @transform_6(%arg0: i32) -> (i32, i32) {
    %c0_i32 = arith.constant 0 : i32
    %c0_i32_0 = arith.constant 0 : i32
    %c0_i32_1 = arith.constant 0 : i32
    return %c0_i32, %c0_i32_0 : i32, i32
  }
  func.func @transform_7(%arg0: i32) -> (i32, i32) {
    %c0_i32 = arith.constant 0 : i32
    %c0_i32_0 = arith.constant 0 : i32
    %c0_i32_1 = arith.constant 0 : i32
    return %c0_i32, %c0_i32_0 : i32, i32
  }
  func.func @transform_8(%arg0: i32) -> (i32, i32) {
    %c0_i32 = arith.constant 0 : i32
    %c0_i32_0 = arith.constant 0 : i32
    %c0_i32_1 = arith.constant 0 : i32
    return %c0_i32, %c0_i32_0 : i32, i32
  }
  func.func @transform_9(%arg0: i32) -> (i32, i32) {
    %c0_i32 = arith.constant 0 : i32
    %c0_i32_0 = arith.constant 0 : i32
    %c0_i32_1 = arith.constant 0 : i32
    return %c0_i32, %c0_i32_0 : i32, i32
  }
  func.func @transform_10(%arg0: i32) -> (i32, i32) {
    %c0_i32 = arith.constant 0 : i32
    %c0_i32_0 = arith.constant 0 : i32
    %c0_i32_1 = arith.constant 0 : i32
    return %c0_i32, %c0_i32_0 : i32, i32
  }
  func.func @transform_11(%arg0: i32) -> (i32, i32, i32) {
    %c0_i32 = arith.constant 0 : i32
    %c0_i32_0 = arith.constant 0 : i32
    %c0_i32_1 = arith.constant 0 : i32
    return %arg0, %c0_i32, %c0_i32_0 : i32, i32, i32
  }
  func.func @transform_12(%arg0: i32) -> (i32, i32) {
    %c0_i32 = arith.constant 0 : i32
    %c0_i32_0 = arith.constant 0 : i32
    %c0_i32_1 = arith.constant 0 : i32
    return %c0_i32, %c0_i32_0 : i32, i32
  }
}

</mosaic_0001>

<bundles_post_ra>
// kernel: tpu_custom_call.1
= control target key start
LH: loop header
LB: loop body
LE: loop exit
PB: predicated region body
PF: predicated region fallthrough
CT: control target
= control target key end

     0   :  { %18 = vsyncpa [#allocation4], 0  ;;  %vm49_vm0 = vcmask 523264   ;;  %s11336_s0 = inlined_call_operand.vmem [shape: f32[1,16,288], index: 0, kind: input, shape index: {}]   ;;  %s11337_s1 = inlined_call_operand.vmem [shape: f32[16,64], index: 1, kind: input, shape index: {}]   ;;  %s11338_s2 = inlined_call_operand.vmem [shape: f32[16,128,32], index: 2, kind: input, shape index: {}]   ;;  %s11339_s3 = inlined_call_operand.vmem [shape: f32[16,128,32], index: 3, kind: input, shape index: {}]   ;;  %s11340_s4 = inlined_call_operand.vmem [shape: bf16[64,256], index: 4, kind: input, shape index: {}]   ;;  %s11341_s5 = inlined_call_operand.vmem [shape: bf16[32,384], index: 5, kind: input, shape index: {}]   ;;  %s11342_s6 = inlined_call_operand.vmem [shape: f32[1,384], index: 6, kind: input, shape index: {}]   ;;  %s11343_s7 = inlined_call_operand.vmem [shape: bf16[64,384], index: 7, kind: input, shape index: {}]   ;;  %s11344_s8 = inlined_call_operand.vmem [shape: f32[1,384], index: 8, kind: input, shape index: {}]   ;;  %s11345_s9 = inlined_call_operand.vmem [shape: bf16[64,384], index: 9, kind: input, shape index: {}]   ;;  %s11346_s10 = inlined_call_operand.vmem [shape: f32[1,384], index: 10, kind: input, shape index: {}]   ;;  %s11347_s11 = inlined_call_operand.hbm [shape: f32[1,16,512], index: 11, kind: output, shape index: {0}]   ;;  %s11348_s12 = inlined_call_operand.hbm [shape: f32[16,64], index: 12, kind: output, shape index: {1}]  }
   0x1   :  { %v6247_v0 = vld [vmem:[%s11340_s4 + $0x30] sm:$0xf]  ;;  %v6399_v1 = vld [vmem:[%s11340_s4 + $0x34] sm:$0xf0]  ;;  %v6398_v2 = vld [vmem:[%s11340_s4 + $0x34] sm:$0xf] }
   0x2   :  { %v6248_v3 = vor.u32 %v6399_v1, %v6247_v0  ;;  %v6249_v4 = vld [vmem:[%s11340_s4 + $0x38] sm:$0xf0]  ;;  %v6239_v5 = vld [vmem:[%s11340_s4 + $0x20] sm:$0xf]  ;;  %v6397_v6 = vld [vmem:[%s11340_s4 + $0x24] sm:$0xf0] }
   0x3   :  { %v6252_v7 = vor.u32 %v6398_v2, %v6249_v4  ;;  %v6396_v8 = vld [vmem:[%s11340_s4 + $0x24] sm:$0xf]  ;;  %v6241_v9 = vld [vmem:[%s11340_s4 + $0x28] sm:$0xf0]  ;;  %v6240_v10 = vor.u32 %v6397_v6, %v6239_v5  ;;  %v6231_v12 = vld [vmem:[%s11340_s4 + $0x10] sm:$0xf] }
   0x4   :  { %120 = vmatpush.bf16.msra.mxu0 %v6248_v3  ;;  %v6244_v11 = vor.u32 %v6396_v8, %v6241_v9  ;;  %v6395_v13 = vld [vmem:[%s11340_s4 + $0x14] sm:$0xf0]  ;;  %v6394_v14 = vld [vmem:[%s11340_s4 + $0x14] sm:$0xf]  ;;  %v6233_v15 = vld [vmem:[%s11340_s4 + $0x18] sm:$0xf0] }
   0x5   :  { %134 = vmatpush.bf16.msra.mxu1 %v6252_v7  ;;  %v47_v16 = vld [vmem:[%s11337_s1] sm:$0xff]  ;;  %v48_v17 = vld [vmem:[%s11337_s1 + $0x8] sm:$0xff] }
   0x6   :  { %50 = vst.msk [vmem:[#allocation2] sm:$0xff] %vm49_vm0, %v47_v16 }
   0x7   :  { %19 = vsyncpa [#allocation6], 0  ;;  %v6232_v18 = vor.u32 %v6395_v13, %v6231_v12  ;;  %51 = vst.msk [vmem:[#allocation2 + $0x8] sm:$0xff] %vm49_vm0, %v48_v17  ;;  %v6236_v19 = vor.u32 %v6394_v14, %v6233_v15  ;;  %v6223_v20 = vld [vmem:[%s11340_s4] sm:$0xf]  ;;  %v59_v30 = vld [vmem:[%s11336_s0 + $0x8] sm:$0xff]  ;;  %v237_v57 = vlaneseq }
   0x8   :  { %121 = vmatpush.bf16.msra.mxu0 %v6240_v10  ;;  %v6393_v21 = vld [vmem:[%s11340_s4 + $0x4] sm:$0xf0]  ;;  %v6392_v22 = vld [vmem:[%s11340_s4 + $0x4] sm:$0xf]  ;;  %v6225_v23 = vld [vmem:[%s11340_s4 + $0x8] sm:$0xf0] }
   0x9   :  { %135 = vmatpush.bf16.msra.mxu1 %v6244_v11  ;;  %v6224_v24 = vor.u32 %v6393_v21, %v6223_v20  ;;  %v6228_v25 = vor.u32 %v6392_v22, %v6225_v23  ;;  %v58_v29 = vld [vmem:[%s11336_s0] sm:$0xff]  ;;  %v61_v35 = vld [vmem:[%s11336_s0 + $0x18] sm:$0xff]  ;;  %v7113_v58 = vshrl.u32 %v237_v57, 7  ;;  %s6963_s1 = smov 128  }
   0xa   :  { %v62_v36 = vld [vmem:[%s11336_s0 + $0x20] sm:$0xff] }
   0xb   :  { %6436 = vset.pattern.permute.xlu2 %v7113_v58  ;;  %v7117_v59 = vadd.s32 16, %v7113_v58  ;;  %v7120_v60 = vadd.s32 8, %v7113_v58  ;;  %v7137_v20 = vadd.s32 56, %v7113_v58  ;;  %v7140_v22 = vadd.s32 40, %v7113_v58 }
   0xc   :  { %122 = vmatpush.bf16.msra.mxu0 %v6232_v18 }
   0xd   :  { %136 = vmatpush.bf16.msra.mxu1 %v6236_v19  ;;  %v52_v26 = vld [vmem:[#allocation2] sm:$0xff]  ;;  %6438 = vset.pattern.permute.xlu1 %v7117_v59  ;;  %v7134_v19 = vadd.s32 24, %v7113_v58  ;;  %11401 = vst [vmem:[#allocation10_spill] sm:$0xff] %v7140_v22 }
   0xe   :  { %v53_v27 = vld [vmem:[#allocation2 + $0x8] sm:$0xff]  ;;  %6437 = vset.pattern.permute.xlu0 %v7120_v60 }
   0xf   :  { %v7089_v28 = vpack.c.bf16 %v53_v27, %v52_v26 }
  0x10   :  { %123 = vmatpush.bf16.msra.mxu0 %v6224_v24 }
  0x11   :  { %11400 = vst [vmem:[#allocation9_spill] sm:$0xff] %v7089_v28  ;;  %137 = vmatpush.bf16.msra.mxu1 %v6228_v25 }
  0x13   :  { %6253 = vmatmul.msk.bf16.vlgmr.msra.gmra.mxu0 %vm49_vm0, %v7089_v28 }
  0x14   :  { %6254 = vmatmul.msk.bf16.vlgmr.msra.gmra.mxu1 %vm49_vm0, %v7089_v28 }
  0x90   :  { %v125_v31 = vpop.f32.mrf.mxu0 }
  0x91   :  { %v144_v32 = vadd.f32 %v125_v31, %v58_v29  ;;  %v139_v33 = vpop.f32.mrf.mxu1 }
  0x92   :  { %v145_v34 = vadd.f32 %v139_v33, %v59_v30 }
  0x93   :  { %148 = vmax.xlane.f32.xlu0 %v144_v32 }
  0x94   :  { %192 = vmax.xlane.f32.xlu2 %v145_v34 }
  0x98   :  { %v127_v37 = vpop.f32.mrf.mxu0 }
  0x99   :  { %v146_v38 = vadd.f32 %v127_v37, %v61_v35  ;;  %v141_v39 = vpop.f32.mrf.mxu1 }
  0x9a   :  { %v147_v40 = vadd.f32 %v141_v39, %v62_v36 }
  0x9b   :  { %150 = vmax.xlane.f32.xlu0 %v146_v38 }
  0x9c   :  { %194 = vmax.xlane.f32.xlu2 %v147_v40 }
 0x106   :  { %v149_v41 = vpop.xlane.xlu0 %148 }
 0x107   :  { %v193_v42 = vpop.xlane.xlu2 %192  ;;  %v152_v43 = vsub.f32 %v144_v32, %v149_v41  ;;  %v7155_v32 = vadd.s32 32, %v7113_v58 }
 0x108   :  { %v196_v44 = vsub.f32 %v145_v34, %v193_v42  ;;  %v7173_v42 = vadd.s32 48, %v7113_v58 }
 0x109   :  { %v154_v45 = vmul.f32 1.442695, %v152_v43  ;;  %11402 = vst [vmem:[#allocation11_spill] sm:$0xff] %v7155_v32  ;;  %v7176_v43 = vadd.s32 80, %v7113_v58 }
 0x10a   :  { %v198_v46 = vmul.f32 1.442695, %v196_v44 }
 0x10b   :  { %6844 = vpow2.f32 %v154_v45  ;;  %11404 = vst [vmem:[#allocation13_spill] sm:$0xff] %v7176_v43 }
 0x10c   :  { %6846 = vpow2.f32 %v198_v46  ;;  %v7191_v46 = vadd.s32 72, %v7113_v58 }
 0x10e   :  { %v151_v47 = vpop.xlane.xlu0 %150  ;;  %11407 = vst [vmem:[#allocation16_spill] sm:$0xff] %v7191_v46 }
 0x10f   :  { %v153_v48 = vsub.f32 %v146_v38, %v151_v47  ;;  %v195_v49 = vpop.xlane.xlu2 %194  ;;  %v7194_v47 = vadd.s32 96, %v7113_v58 }
 0x110   :  { %v197_v53 = vsub.f32 %v147_v40, %v195_v49  ;;  %v7206_v49 = vadd.s32 120, %v7113_v58 }
 0x111   :  { %v6845_v50 = vpop.eup %6844  ;;  %v156_v51 = vmul.f32 1.442695, %v153_v48  ;;  %11408 = vst [vmem:[#allocation17_spill] sm:$0xff] %v7194_v47  ;;  %v7203_v48 = vadd.s32 88, %v7113_v58 }
 0x112   :  { %v7107_v52 = vpop.eup %6846  ;;  %158 = vadd.xlane.f32.xlu1 %v6845_v50  ;;  %v200_v54 = vmul.f32 1.442695, %v197_v53 }
 0x113   :  { %6848 = vpow2.f32 %v156_v51  ;;  %202 = vadd.xlane.f32.xlu0 %v7107_v52 }
 0x114   :  { %6850 = vpow2.f32 %v200_v54 }
 0x119   :  { %v6849_v55 = vpop.eup %6848 }
 0x11a   :  { %160 = vadd.xlane.f32.xlu1 %v6849_v55  ;;  %v7110_v56 = vpop.eup %6850 }
 0x122   :  { %204 = vadd.xlane.f32.xlu1 %v7110_v56 }
 0x185   :  { %v159_v61 = vpop.xlane.xlu1 %158 }
 0x186   :  { %6852 = vrcp.f32 %v159_v61  ;;  %v173_v2 = vand.u32 2147483648, %v159_v61  ;;  %v171_v4 = vand.u32 2147483647, %v159_v61  ;;  %vm167_vm2 = vweird.f32 %v159_v61  ;;  %v203_v14 = vpop.xlane.xlu0 %202 }
 0x187   :  { %v217_v35 = vand.u32 2147483648, %v203_v14  ;;  %vm211_vm10 = vweird.f32 %v203_v14  ;;  %v215_v36 = vand.u32 2147483647, %v203_v14 }
 0x188   :  { %v174_v7 = vor.u32 1.1754944e-38, %v173_v2  ;;  %vm172_vm4 = vcmp.eq.f32.partialorder %v171_v4, 8.507059e+37 }
 0x189   :  { %v218_v38 = vor.u32 1.1754944e-38, %v217_v35  ;;  %vm216_vm12 = vcmp.eq.f32.partialorder %v215_v36, 8.507059e+37 }
 0x18c   :  { %v6853_v62 = vpop.eup %6852 }
 0x18d   :  { %v163_v63 = vmul.f32 %v6853_v62, %v159_v61  ;;  %v161_v0 = vpop.xlane.xlu1 %160  ;;  %vm168_vm1 = vweird.f32 %v6853_v62 }
 0x18e   :  { %6854 = vrcp.f32 %v161_v0  ;;  %vm169_vm3 = vmor %vm167_vm2, %vm168_vm1  ;;  %v188_v15 = vand.u32 2147483648, %v161_v0  ;;  %v186_v17 = vand.u32 2147483647, %v161_v0  ;;  %vm182_vm6 = vweird.f32 %v161_v0 }
 0x18f   :  { %v164_v1 = vsub.f32 1.0, %v163_v63  ;;  %6856 = vrcp.f32 %v203_v14  ;;  %vm2300_vm2 = vcmask 261120  }
 0x190   :  { %v189_v21 = vor.u32 1.1754944e-38, %v188_v15  ;;  %vm187_vm8 = vcmp.eq.f32.partialorder %v186_v17, 8.507059e+37 }
 0x191   :  { %v165_v3 = vmul.f32 %v6853_v62, %v164_v1 }
 0x193   :  { %v166_v5 = vadd.f32 %v6853_v62, %v165_v3 }
 0x194   :  { %v6855_v6 = vpop.eup %6854 }
 0x195   :  { %v170_v8 = vsel %vm169_vm3, %v6853_v62, %v166_v5  ;;  %v178_v9 = vmul.f32 %v6855_v6, %v161_v0  ;;  %vm183_vm5 = vweird.f32 %v6855_v6  ;;  %v6857_v26 = vpop.eup %6856  ;;  %v7261_v62 = vadd.s32 64, %v7113_v58  ;;  %v205_v63 = vpop.xlane.xlu1 %204 }
 0x196   :  { %v175_v10 = vsel %vm172_vm4, %v174_v7, %v170_v8  ;;  %vm184_vm7 = vmor %vm182_vm6, %vm183_vm5  ;;  %v207_v27 = vmul.f32 %v6857_v26, %v203_v14  ;;  %vm212_vm9 = vweird.f32 %v6857_v26  ;;  %6858 = vrcp.f32 %v205_v63 }
 0x197   :  { %v7124_v11 = vmul.f32 %v6845_v50, %v175_v10  ;;  %v179_v13 = vsub.f32 1.0, %v178_v9  ;;  %vm213_vm11 = vmor %vm211_vm10, %vm212_vm9  ;;  %v7215_v50 = vadd.s32 112, %v7113_v58  ;;  %vm226_vm14 = vweird.f32 %v205_v63 }
 0x198   :  { %v208_v30 = vsub.f32 1.0, %v207_v27  ;;  %v230_v14 = vand.u32 2147483647, %v205_v63  ;;  %vm2909_vm3 = vcmask 1041409   ;;  %vm2911_vm4 = vcmask 1042434  }
 0x199   :  { %v7127_v12 = vperm.slane %v7124_v11, 0  ;;  %6175 = vst [vmem:[#allocation3 + $0x18] sm:$0xff] %v7124_v11  ;;  %v180_v16 = vmul.f32 %v6855_v6, %v179_v13  ;;  %v7149_v29 = vperm.slane %v7124_v11, 1  ;;  %v7158_v33 = vperm.slane %v7124_v11, 6 }
 0x19a   :  { %v209_v31 = vmul.f32 %v6857_v26, %v208_v30  ;;  %v7227_v51 = vperm.slane %v7124_v11, 3  ;;  %v7269_v1 = vperm.slane %v7124_v11, 4  ;;  %v232_v13 = vand.u32 2147483648, %v205_v63 }
 0x19b   :  { %241 = vperm.xlu2 %6436, %v7127_v12   ;;  %247 = vperm.xlu0 %6437, %v7127_v12   ;;  %v181_v18 = vadd.f32 %v6855_v6, %v180_v16  ;;  %v7291_v16 = vadd.s32 104, %v7113_v58  ;;  %vm231_vm1 = vcmp.eq.f32.partialorder %v230_v14, 8.507059e+37  ;;  %v7308_v27 = vperm.slane %v7124_v11, 2 }
 0x19c   :  { %253 = vperm.xlu1 %6438, %v7127_v12   ;;  %v210_v34 = vadd.f32 %v6857_v26, %v209_v31  ;;  %11409 = vst [vmem:[#allocation18_spill] sm:$0xff] %v7227_v51  ;;  %v6859_v2 = vpop.eup %6858  ;;  %v233_v17 = vor.u32 1.1754944e-38, %v232_v13  ;;  %vm2913_vm5 = vcmask 1043459   ;;  %vm2915_vm6 = vcmask 1044484  }
 0x19d   :  { %v185_v23 = vsel %vm184_vm7, %v6855_v6, %v181_v18  ;;  %v222_v3 = vmul.f32 %v6859_v2, %v205_v63  ;;  %vm227_vm13 = vweird.f32 %v6859_v2  ;;  %vm2917_vm7 = vcmask 1045509  }
 0x19e   :  { %v190_v24 = vsel %vm187_vm8, %v189_v21, %v185_v23  ;;  %v214_v37 = vsel %vm213_vm11, %v6857_v26, %v210_v34  ;;  %vm228_vm15 = vmor %vm226_vm14, %vm227_vm13  ;;  %vm2919_vm8 = vcmask 1046534   ;;  %vm2921_vm9 = vcmask 1047559  }
 0x19f   :  { %v7142_v25 = vmul.f32 %v6849_v55, %v190_v24  ;;  %v219_v40 = vsel %vm216_vm12, %v218_v38, %v214_v37  ;;  %v223_v6 = vsub.f32 1.0, %v222_v3 }
 0x1a0   :  { %v7170_v41 = vmul.f32 %v7107_v52, %v219_v40  ;;  %v7350_v40 = vperm.slane %v7124_v11, 7 }
 0x1a1   :  { %6179 = vst [vmem:[#allocation3 + $0x38] sm:$0xff] %v7142_v25  ;;  %v7164_v39 = vperm.slane %v7142_v25, 3  ;;  %v7233_v52 = vperm.slane %v7142_v25, 0  ;;  %v7239_v53 = vperm.slane %v7142_v25, 5  ;;  %v7275_v4 = vperm.slane %v7142_v25, 1 }
 0x1a2   :  { %v7179_v44 = vperm.slane %v7170_v41, 0  ;;  %v7185_v45 = vperm.slane %v7170_v41, 5  ;;  %v7245_v54 = vperm.slane %v7170_v41, 2  ;;  %v7253_v57 = vperm.slane %v7170_v41, 7 }
 0x1a3   :  { %6439 = vset.pattern.permute.xlu2 %v7134_v19  ;;  %6456 = vset.pattern.permute.xlu0 %v7137_v20  ;;  %11403 = vst [vmem:[#allocation12_spill] sm:$0xff] %v7164_v39  ;;  %v224_v7 = vmul.f32 %v6859_v2, %v223_v6  ;;  %v7283_v8 = vperm.slane %v7142_v25, 6  ;;  %v7294_v18 = vperm.slane %v7170_v41, 3  ;;  %v7364_v3 = vperm.slane %v7170_v41, 1 }
 0x1a4   :  { %6441 = vset.pattern.permute.xlu1 %v7140_v22  ;;  %11405 = vst [vmem:[#allocation14_spill] sm:$0xff] %v7179_v44 }
 0x1a5   :  { %11406 = vst [vmem:[#allocation15_spill] sm:$0xff] %v7185_v45  ;;  %v225_v9 = vadd.f32 %v6859_v2, %v224_v7  ;;  %v7372_v7 = vperm.slane %v7170_v41, 6 }
 0x1a6   :  { %11414 = vst [vmem:[#allocation23_spill] sm:$0xff] %v7283_v8 }
 0x1a7   :  { %v229_v15 = vsel %vm228_vm15, %v6859_v2, %v225_v9  ;;  %11416 = vst [vmem:[#allocation25_spill] sm:$0xff] %v7294_v18  ;;  %v7358_v2 = vperm.slane %v7142_v25, 4 }
 0x1a8   :  { %v234_v21 = vsel %vm231_vm1, %v233_v17, %v229_v15  ;;  %11429 = vst [vmem:[#allocation38_spill] sm:$0xff] %v7364_v3 }
 0x1a9   :  { %v7300_v23 = vmul.f32 %v7110_v56, %v234_v21  ;;  %11428 = vst [vmem:[#allocation37_spill] sm:$0xff] %v7358_v2 }
 0x1aa   :  { %11431 = vst [vmem:[#allocation40_spill] sm:$0xff] %v7372_v7 }
 0x1ab   :  { %259 = vperm.xlu2 %6439, %v7127_v12   ;;  %380 = vperm.xlu0 %6456, %v7149_v29   ;;  %v7305_v26 = vperm.slane %v7300_v23, 0  ;;  %v7321_v31 = vperm.slane %v7300_v23, 2  ;;  %v7332_v35 = vperm.slane %v7300_v23, 6  ;;  %v7380_v13 = vperm.slane %v7300_v23, 4 }
 0x1ac   :  { %271 = vperm.xlu1 %6441, %v7127_v12   ;;  %v7388_v15 = vperm.slane %v7300_v23, 7 }
 0x1ad   :  { %11418 = vst [vmem:[#allocation27_spill] sm:$0xff] %v7305_v26 }
 0x1ae   :  { %11421 = vst [vmem:[#allocation30_spill] sm:$0xff] %v7321_v31 }
 0x1af   :  { %11423 = vst [vmem:[#allocation32_spill] sm:$0xff] %v7332_v35 }
 0x1b0   :  { %11433 = vst [vmem:[#allocation42_spill] sm:$0xff] %v7380_v13 }
 0x1b1   :  { %11435 = vst [vmem:[#allocation44_spill] sm:$0xff] %v7388_v15 }
 0x1b3   :  { %6440 = vset.pattern.permute.xlu2 %v7155_v32  ;;  %865 = vperm.xlu0 %6456, %v7158_v33  }
 0x1b4   :  { %6443 = vset.pattern.permute.xlu1 %v7137_v20 }
 0x1bb   :  { %265 = vperm.xlu2 %6440, %v7127_v12   ;;  %1350 = vperm.xlu0 %6456, %v7164_v39  }
 0x1bc   :  { %283 = vperm.xlu1 %6443, %v7127_v12  }
 0x1c3   :  { %6442 = vset.pattern.permute.xlu2 %v7173_v42  ;;  %2981 = vperm.xlu0 %6456, %v7179_v44  }
 0x1c4   :  { %6445 = vset.pattern.permute.xlu1 %v7176_v43 }
 0x1cb   :  { %277 = vperm.xlu2 %6442, %v7127_v12   ;;  %3466 = vperm.xlu0 %6456, %v7185_v45  }
 0x1cc   :  { %301 = vperm.xlu1 %6445, %v7127_v12  }
 0x1d3   :  { %6444 = vset.pattern.permute.xlu2 %v7191_v46  ;;  %6713 = vset.pattern.permute.xlu0 %v7194_v47 }
 0x1d4   :  { %6447 = vset.pattern.permute.xlu1 %v7194_v47 }
 0x1db   :  { %295 = vperm.xlu2 %6444, %v7127_v12   ;;  %410 = vperm.xlu0 %6713, %v7149_v29  }
 0x1dc   :  { %313 = vperm.xlu1 %6447, %v7127_v12  }
 0x1e3   :  { %6446 = vset.pattern.permute.xlu2 %v7203_v48  ;;  %895 = vperm.xlu0 %6713, %v7158_v33  }
 0x1e4   :  { %6449 = vset.pattern.permute.xlu1 %v7206_v49 }
 0x1eb   :  { %307 = vperm.xlu2 %6446, %v7127_v12   ;;  %1380 = vperm.xlu0 %6713, %v7164_v39  }
 0x1ec   :  { %331 = vperm.xlu1 %6449, %v7127_v12  }
 0x1f3   :  { %6448 = vset.pattern.permute.xlu2 %v7215_v50  ;;  %3011 = vperm.xlu0 %6713, %v7179_v44  }
 0x1f4   :  { %6451 = vset.pattern.permute.xlu1 %v7120_v60 }
 0x1fb   :  { %325 = vperm.xlu2 %6448, %v7127_v12   ;;  %3496 = vperm.xlu0 %6713, %v7185_v45  }
 0x1fc   :  { %344 = vperm.xlu1 %6451, %v7149_v29  }
 0x203   :  { %6450 = vset.pattern.permute.xlu2 %v7113_v58  ;;  %6718 = vset.pattern.permute.xlu0 %v7113_v58 }
 0x204   :  { %6453 = vset.pattern.permute.xlu1 %v7155_v32 }
 0x20b   :  { %338 = vperm.xlu2 %6450, %v7149_v29   ;;  %532 = vperm.xlu0 %6718, %v7227_v51  }
 0x20c   :  { %362 = vperm.xlu1 %6453, %v7149_v29  }
 0x20d   :  { %v7250_v55 = vpop.permute.xlu0 %247 }
 0x20e   :  { %11410 = vst [vmem:[#allocation19_spill] sm:$0xff] %v7250_v55 }
 0x213   :  { %6452 = vset.pattern.permute.xlu2 %v7134_v19  ;;  %1017 = vperm.xlu0 %6718, %v7233_v52  }
 0x214   :  { %6455 = vset.pattern.permute.xlu1 %v7173_v42 }
 0x21b   :  { %356 = vperm.xlu2 %6452, %v7149_v29   ;;  %1502 = vperm.xlu0 %6718, %v7239_v53  }
 0x21c   :  { %374 = vperm.xlu1 %6455, %v7149_v29  }
 0x21d   :  { %v7258_v61 = vpop.permute.xlu0 %380 }
 0x21e   :  { %11411 = vst [vmem:[#allocation20_spill] sm:$0xff] %v7258_v61 }
 0x223   :  { %6454 = vset.pattern.permute.xlu2 %v7140_v22  ;;  %3133 = vperm.xlu0 %6718, %v7245_v54  }
 0x224   :  { %6458 = vset.pattern.permute.xlu1 %v7191_v46 }
 0x225   :  { %v7266_v0 = vpop.permute.xlu0 %865 }
 0x226   :  { %11412 = vst [vmem:[#allocation21_spill] sm:$0xff] %v7266_v0 }
 0x22b   :  { %368 = vperm.xlu2 %6454, %v7149_v29   ;;  %3618 = vperm.xlu0 %6718, %v7253_v57  }
 0x22c   :  { %392 = vperm.xlu1 %6458, %v7149_v29  }
 0x22d   :  { %v7277_v5 = vpop.permute.xlu0 %1350 }
 0x22e   :  { %11413 = vst [vmem:[#allocation22_spill] sm:$0xff] %v7277_v5 }
 0x233   :  { %6457 = vset.pattern.permute.xlu2 %v7261_v62  ;;  %6735 = vset.pattern.permute.xlu0 %v7215_v50 }
 0x234   :  { %6460 = vset.pattern.permute.xlu1 %v7203_v48 }
 0x235   :  { %v7285_v10 = vpop.permute.xlu0 %2981 }
 0x236   :  { %11415 = vst [vmem:[#allocation24_spill] sm:$0xff] %v7285_v10  ;;  %v7461_v10 = vperm.slane %v7170_v41, 4 }
 0x238   :  { %11447 = vst [vmem:[#allocation56_spill] sm:$0xff] %v7461_v10 }
 0x23b   :  { %386 = vperm.xlu2 %6457, %v7149_v29   ;;  %713 = vperm.xlu0 %6735, %v7269_v1  }
 0x23c   :  { %404 = vperm.xlu1 %6460, %v7149_v29  }
 0x23d   :  { %v7302_v24 = vpop.permute.xlu0 %3466 }
 0x23e   :  { %11417 = vst [vmem:[#allocation26_spill] sm:$0xff] %v7302_v24 }
 0x243   :  { %6459 = vset.pattern.permute.xlu2 %v7176_v43  ;;  %1198 = vperm.xlu0 %6735, %v7275_v4  }
 0x244   :  { %6462 = vset.pattern.permute.xlu1 %v7215_v50 }
 0x24b   :  { %398 = vperm.xlu2 %6459, %v7149_v29   ;;  %1683 = vperm.xlu0 %6735, %v7283_v8  }
 0x24c   :  { %422 = vperm.xlu1 %6462, %v7149_v29  }
 0x24d   :  { %v7313_v30 = vpop.permute.xlu0 %410 }
 0x24e   :  { %11419 = vst [vmem:[#allocation28_spill] sm:$0xff] %v7313_v30 }
 0x253   :  { %6461 = vset.pattern.permute.xlu2 %v7291_v16  ;;  %3314 = vperm.xlu0 %6735, %v7294_v18  }
 0x254   :  { %6464 = vset.pattern.permute.xlu1 %v7113_v58 }
 0x255   :  { %v7318_v56 = vpop.permute.xlu0 %895 }
 0x256   :  { %11420 = vst [vmem:[#allocation29_spill] sm:$0xff] %v7318_v56 }
 0x25b   :  { %416 = vperm.xlu2 %6461, %v7149_v29   ;;  %3799 = vperm.xlu0 %6735, %v7305_v26  }
 0x25c   :  { %435 = vperm.xlu1 %6464, %v7308_v27  }
 0x25d   :  { %v7326_v34 = vpop.permute.xlu0 %1380 }
 0x25e   :  { %11422 = vst [vmem:[#allocation31_spill] sm:$0xff] %v7326_v34 }
 0x263   :  { %6463 = vset.pattern.permute.xlu2 %v7206_v49  ;;  %6780 = vset.pattern.permute.xlu0 %v7137_v20 }
 0x264   :  { %6466 = vset.pattern.permute.xlu1 %v7134_v19 }
 0x265   :  { %v7334_v36 = vpop.permute.xlu0 %3011 }
 0x266   :  { %11424 = vst [vmem:[#allocation33_spill] sm:$0xff] %v7334_v36 }
 0x26b   :  { %428 = vperm.xlu2 %6463, %v7149_v29   ;;  %3951 = vperm.xlu0 %6780, %v7321_v31  }
 0x26c   :  { %453 = vperm.xlu1 %6466, %v7308_v27  }
 0x26d   :  { %v7342_v37 = vpop.permute.xlu0 %3496 }
 0x26e   :  { %11425 = vst [vmem:[#allocation34_spill] sm:$0xff] %v7342_v37 }
 0x273   :  { %6465 = vset.pattern.permute.xlu2 %v7117_v59  ;;  %6787 = vset.pattern.permute.xlu0 %v7113_v58 }
 0x274   :  { %6468 = vset.pattern.permute.xlu1 %v7140_v22 }
 0x27b   :  { %447 = vperm.xlu2 %6465, %v7308_v27   ;;  %4297 = vperm.xlu0 %6787, %v7332_v35  }
 0x27c   :  { %465 = vperm.xlu1 %6468, %v7308_v27  }
 0x27d   :  { %v7347_v38 = vpop.permute.xlu0 %532 }
 0x27e   :  { %11426 = vst [vmem:[#allocation35_spill] sm:$0xff] %v7347_v38 }
 0x283   :  { %6467 = vset.pattern.permute.xlu2 %v7155_v32  ;;  %6788 = vset.pattern.permute.xlu0 %v7120_v60 }
 0x284   :  { %6470 = vset.pattern.permute.xlu1 %v7261_v62 }
 0x285   :  { %v7355_v63 = vpop.permute.xlu0 %1017 }
 0x286   :  { %11427 = vst [vmem:[#allocation36_spill] sm:$0xff] %v7355_v63 }
 0x28b   :  { %459 = vperm.xlu2 %6467, %v7308_v27   ;;  %441 = vperm.xlu0 %6788, %v7308_v27  }
 0x28c   :  { %483 = vperm.xlu1 %6470, %v7308_v27  }
 0x28d   :  { %v7366_v6 = vpop.permute.xlu0 %1502 }
 0x28e   :  { %11430 = vst [vmem:[#allocation39_spill] sm:$0xff] %v7366_v6 }
 0x293   :  { %6469 = vset.pattern.permute.xlu2 %v7137_v20  ;;  %926 = vperm.xlu0 %6788, %v7350_v40  }
 0x294   :  { %6472 = vset.pattern.permute.xlu1 %v7176_v43 }
 0x295   :  { %v7374_v9 = vpop.permute.xlu0 %3133 }
 0x296   :  { %11432 = vst [vmem:[#allocation41_spill] sm:$0xff] %v7374_v9 }
 0x29b   :  { %477 = vperm.xlu2 %6469, %v7308_v27   ;;  %1411 = vperm.xlu0 %6788, %v7358_v2  }
 0x29c   :  { %495 = vperm.xlu1 %6472, %v7308_v27  }
 0x29d   :  { %v7385_v14 = vpop.permute.xlu0 %3618 }
 0x29e   :  { %11434 = vst [vmem:[#allocation43_spill] sm:$0xff] %v7385_v14 }
 0x2a3   :  { %6471 = vset.pattern.permute.xlu2 %v7191_v46  ;;  %3042 = vperm.xlu0 %6788, %v7364_v3  }
 0x2a4   :  { %6474 = vset.pattern.permute.xlu1 %v7291_v16 }
 0x2ab   :  { %489 = vperm.xlu2 %6471, %v7308_v27   ;;  %3527 = vperm.xlu0 %6788, %v7372_v7  }
 0x2ac   :  { %513 = vperm.xlu1 %6474, %v7308_v27  }
 0x2ad   :  { %v7393_v17 = vpop.permute.xlu0 %713 }
 0x2ae   :  { %11436 = vst [vmem:[#allocation45_spill] sm:$0xff] %v7393_v17 }
 0x2b3   :  { %6473 = vset.pattern.permute.xlu2 %v7194_v47  ;;  %4109 = vperm.xlu0 %6788, %v7380_v13  }
 0x2b4   :  { %6476 = vset.pattern.permute.xlu1 %v7206_v49 }
 0x2b5   :  { %v7398_v21 = vpop.permute.xlu0 %1198 }
 0x2b6   :  { %11437 = vst [vmem:[#allocation46_spill] sm:$0xff] %v7398_v21 }
 0x2bb   :  { %507 = vperm.xlu2 %6473, %v7308_v27   ;;  %4400 = vperm.xlu0 %6788, %v7388_v15  }
 0x2bc   :  { %525 = vperm.xlu1 %6476, %v7308_v27  }
 0x2bd   :  { %v7403_v28 = vpop.permute.xlu0 %1683 }
 0x2be   :  { %11438 = vst [vmem:[#allocation47_spill] sm:$0xff] %v7403_v28 }
 0x2c3   :  { %6475 = vset.pattern.permute.xlu2 %v7215_v50  ;;  %6792 = vset.pattern.permute.xlu0 %v7117_v59 }
 0x2c4   :  { %6478 = vset.pattern.permute.xlu1 %v7117_v59 }
 0x2c5   :  { %v7408_v14 = vpop.permute.xlu0 %3314 }
 0x2c6   :  { %11439 = vst [vmem:[#allocation48_spill] sm:$0xff] %v7408_v14  ;;  %v7447_v14 = vperm.slane %v7142_v25, 2 }
 0x2c8   :  { %11444 = vst [vmem:[#allocation53_spill] sm:$0xff] %v7447_v14 }
 0x2cb   :  { %519 = vperm.xlu2 %6475, %v7308_v27   ;;  %350 = vperm.xlu0 %6792, %v7149_v29  }
 0x2cc   :  { %544 = vperm.xlu1 %6478, %v7227_v51  }
 0x2cd   :  { %v7416_v29 = vpop.permute.xlu0 %3799 }
 0x2ce   :  { %11440 = vst [vmem:[#allocation49_spill] sm:$0xff] %v7416_v29 }
 0x2d3   :  { %6477 = vset.pattern.permute.xlu2 %v7120_v60  ;;  %835 = vperm.xlu0 %6792, %v7158_v33  }
 0x2d4   :  { %6480 = vset.pattern.permute.xlu1 %v7155_v32 }
 0x2db   :  { %538 = vperm.xlu2 %6477, %v7227_v51   ;;  %1320 = vperm.xlu0 %6792, %v7164_v39  }
 0x2dc   :  { %556 = vperm.xlu1 %6480, %v7227_v51  }
 0x2dd   :  { %v7421_v37 = vpop.permute.xlu0 %3951 }
 0x2de   :  { %11441 = vst [vmem:[#allocation50_spill] sm:$0xff] %v7421_v37 }
 0x2e3   :  { %6479 = vset.pattern.permute.xlu2 %v7134_v19  ;;  %2951 = vperm.xlu0 %6792, %v7179_v44  }
 0x2e4   :  { %6482 = vset.pattern.permute.xlu1 %v7137_v20 }
 0x2eb   :  { %550 = vperm.xlu2 %6479, %v7227_v51   ;;  %3436 = vperm.xlu0 %6792, %v7185_v45   ;;  %v7439_v45 = vperm.slane %v7124_v11, 5  ;;  %v7455_v11 = vperm.slane %v7142_v25, 7  ;;  %v7469_v25 = vperm.slane %v7300_v23, 1 }
 0x2ec   :  { %574 = vperm.xlu1 %6482, %v7227_v51  }
 0x2ed   :  { %v7426_v24 = vpop.permute.xlu0 %4297  ;;  %11446 = vst [vmem:[#allocation55_spill] sm:$0xff] %v7455_v11 }
 0x2ee   :  { %11442 = vst [vmem:[#allocation51_spill] sm:$0xff] %v7426_v24 }
 0x2ef   :  { %11449 = vst [vmem:[#allocation58_spill] sm:$0xff] %v7469_v25 }
 0x2f3   :  { %6481 = vset.pattern.permute.xlu2 %v7173_v42  ;;  %3921 = vperm.xlu0 %6792, %v7321_v31  }
 0x2f4   :  { %6484 = vset.pattern.permute.xlu1 %v7191_v46 }
 0x2fb   :  { %568 = vperm.xlu2 %6481, %v7227_v51   ;;  %4406 = vperm.xlu0 %6792, %v7388_v15  }
 0x2fc   :  { %586 = vperm.xlu1 %6484, %v7227_v51  }
 0x2fd   :  { %v7431_v29 = vpop.permute.xlu0 %441 }
 0x303   :  { %6483 = vset.pattern.permute.xlu2 %v7261_v62  ;;  %6797 = vset.pattern.permute.xlu0 %v7134_v19 }
 0x304   :  { %6486 = vset.pattern.permute.xlu1 %v7194_v47 }
 0x305   :  { %v7436_v37 = vpop.permute.xlu0 %926 }
 0x30b   :  { %580 = vperm.xlu2 %6483, %v7227_v51   ;;  %744 = vperm.xlu0 %6797, %v7439_v45  }
 0x30c   :  { %604 = vperm.xlu1 %6486, %v7227_v51  }
 0x30d   :  { %v7444_v24 = vpop.permute.xlu0 %1411 }
 0x30e   :  { %11443 = vst [vmem:[#allocation52_spill] sm:$0xff] %v7444_v24 }
 0x313   :  { %6485 = vset.pattern.permute.xlu2 %v7203_v48  ;;  %1229 = vperm.xlu0 %6797, %v7447_v14  }
 0x314   :  { %6488 = vset.pattern.permute.xlu1 %v7215_v50 }
 0x315   :  { %v7452_v36 = vpop.permute.xlu0 %3042 }
 0x316   :  { %11445 = vst [vmem:[#allocation54_spill] sm:$0xff] %v7452_v36 }
 0x31b   :  { %598 = vperm.xlu2 %6485, %v7227_v51   ;;  %1714 = vperm.xlu0 %6797, %v7455_v11  }
 0x31c   :  { %616 = vperm.xlu1 %6488, %v7227_v51  }
 0x31d   :  { %v7463_v9 = vpop.permute.xlu0 %3527 }
 0x31e   :  { %11448 = vst [vmem:[#allocation57_spill] sm:$0xff] %v7463_v9 }
 0x323   :  { %6487 = vset.pattern.permute.xlu2 %v7291_v16  ;;  %3345 = vperm.xlu0 %6797, %v7461_v10  }
 0x324   :  { %6490 = vset.pattern.permute.xlu1 %v7120_v60 }
 0x325   :  { %v7471_v36 = vpop.permute.xlu0 %4109 }
 0x326   :  { %11450 = vst [vmem:[#allocation59_spill] sm:$0xff] %v7471_v36 }
 0x32b   :  { %610 = vperm.xlu2 %6487, %v7227_v51   ;;  %3830 = vperm.xlu0 %6797, %v7469_v25  }
 0x32c   :  { %635 = vperm.xlu1 %6490, %v7269_v1  }
 0x32d   :  { %v7479_v41 = vpop.permute.xlu0 %4400 }
 0x32e   :  { %11451 = vst [vmem:[#allocation60_spill] sm:$0xff] %v7479_v41 }
 0x333   :  { %6489 = vset.pattern.permute.xlu2 %v7113_v58  ;;  %4412 = vperm.xlu0 %6797, %v7388_v15  }
 0x334   :  { %6492 = vset.pattern.permute.xlu1 %v7134_v19 }
 0x33b   :  { %629 = vperm.xlu2 %6489, %v7269_v1   ;;  %6800 = vset.pattern.permute.xlu0 %v7155_v32 }
 0x33c   :  { %647 = vperm.xlu1 %6492, %v7269_v1  }
 0x33d   :  { %v7484_v36 = vpop.permute.xlu0 %350 }
 0x343   :  { %6491 = vset.pattern.permute.xlu2 %v7117_v59  ;;  %653 = vperm.xlu0 %6800, %v7269_v1  }
 0x344   :  { %6494 = vset.pattern.permute.xlu1 %v7173_v42 }
 0x345   :  { %v7489_v9 = vpop.permute.xlu0 %835 }
 0x346   :  { %11452 = vst [vmem:[#allocation61_spill] sm:$0xff] %v7489_v9 }
 0x34b   :  { %641 = vperm.xlu2 %6491, %v7269_v1   ;;  %1138 = vperm.xlu0 %6800, %v7275_v4  }
 0x34c   :  { %665 = vperm.xlu1 %6494, %v7269_v1  }
 0x34d   :  { %v7494_v41 = vpop.permute.xlu0 %1320 }
 0x34e   :  { %11453 = vst [vmem:[#allocation62_spill] sm:$0xff] %v7494_v41 }
 0x353   :  { %6493 = vset.pattern.permute.xlu2 %v7140_v22  ;;  %1623 = vperm.xlu0 %6800, %v7283_v8  }
 0x354   :  { %6496 = vset.pattern.permute.xlu1 %v7261_v62 }
 0x355   :  { %v7499_v44 = vpop.permute.xlu0 %2951 }
 0x356   :  { %11454 = vst [vmem:[#allocation63_spill] sm:$0xff] %v7499_v44  ;;  %v7524_v44 = vpop.permute.xlu2 %241 }
 0x357   :  { %11459 = vst [vmem:[#allocation68_spill] sm:$0xff] %v7524_v44 }
 0x35b   :  { %659 = vperm.xlu2 %6493, %v7269_v1   ;;  %3254 = vperm.xlu0 %6800, %v7294_v18  }
 0x35c   :  { %677 = vperm.xlu1 %6496, %v7269_v1  }
 0x35d   :  { %v7504_v28 = vpop.permute.xlu0 %3436 }
 0x35e   :  { %11455 = vst [vmem:[#allocation64_spill] sm:$0xff] %v7504_v28  ;;  %v7531_v5 = vpop.permute.xlu2 %259 }
 0x35f   :  { %11461 = vst [vmem:[#allocation70_spill] sm:$0xff] %v7531_v5 }
 0x363   :  { %6495 = vset.pattern.permute.xlu2 %v7137_v20  ;;  %3739 = vperm.xlu0 %6800, %v7305_v26  }
 0x364   :  { %6498 = vset.pattern.permute.xlu1 %v7203_v48 }
 0x365   :  { %v7509_v6 = vpop.permute.xlu0 %3921 }
 0x366   :  { %11456 = vst [vmem:[#allocation65_spill] sm:$0xff] %v7509_v6  ;;  %v7540_v24 = vpop.permute.xlu2 %265 }
 0x367   :  { %11464 = vst [vmem:[#allocation73_spill] sm:$0xff] %v7540_v24 }
 0x36b   :  { %671 = vperm.xlu2 %6495, %v7269_v1   ;;  %4418 = vperm.xlu0 %6800, %v7388_v15  }
 0x36c   :  { %695 = vperm.xlu1 %6498, %v7269_v1  }
 0x36d   :  { %v7517_v28 = vpop.permute.xlu0 %4406 }
 0x36e   :  { %11457 = vst [vmem:[#allocation66_spill] sm:$0xff] %v7517_v28  ;;  %v7536_v28 = vpop.permute.xlu1 %253  ;;  %v7549_v21 = vpop.permute.xlu2 %277 }
 0x36f   :  { %11462 = vst [vmem:[#allocation71_spill] sm:$0xff] %v7536_v28 }
 0x370   :  { %11467 = vst [vmem:[#allocation76_spill] sm:$0xff] %v7549_v21 }
 0x373   :  { %6497 = vset.pattern.permute.xlu2 %v7176_v43  ;;  %6803 = vset.pattern.permute.xlu0 %v7140_v22 }
 0x374   :  { %6500 = vset.pattern.permute.xlu1 %v7291_v16 }
 0x376   :  { %v7556_v63 = vpop.permute.xlu2 %295 }
 0x377   :  { %11469 = vst [vmem:[#allocation78_spill] sm:$0xff] %v7556_v63 }
 0x37b   :  { %689 = vperm.xlu2 %6497, %v7269_v1   ;;  %562 = vperm.xlu0 %6803, %v7227_v51  }
 0x37c   :  { %707 = vperm.xlu1 %6500, %v7269_v1  }
 0x37d   :  { %v7522_v6 = vpop.permute.xlu0 %744 }
 0x37e   :  { %11458 = vst [vmem:[#allocation67_spill] sm:$0xff] %v7522_v6  ;;  %v7565_v56 = vpop.permute.xlu2 %307 }
 0x37f   :  { %11472 = vst [vmem:[#allocation81_spill] sm:$0xff] %v7565_v56 }
 0x383   :  { %6499 = vset.pattern.permute.xlu2 %v7194_v47  ;;  %1047 = vperm.xlu0 %6803, %v7233_v52  }
 0x384   :  { %6502 = vset.pattern.permute.xlu1 %v7113_v58 }
 0x385   :  { %v7529_v34 = vpop.permute.xlu0 %1229 }
 0x386   :  { %11460 = vst [vmem:[#allocation69_spill] sm:$0xff] %v7529_v34  ;;  %v7545_v34 = vpop.permute.xlu1 %271 }
 0x387   :  { %11465 = vst [vmem:[#allocation74_spill] sm:$0xff] %v7545_v34 }
 0x38b   :  { %701 = vperm.xlu2 %6499, %v7269_v1   ;;  %1532 = vperm.xlu0 %6803, %v7239_v53  }
 0x38c   :  { %726 = vperm.xlu1 %6502, %v7439_v45  }
 0x38d   :  { %v7538_v41 = vpop.permute.xlu0 %1714 }
 0x38e   :  { %11463 = vst [vmem:[#allocation72_spill] sm:$0xff] %v7538_v41  ;;  %v7554_v41 = vpop.permute.xlu1 %283 }
 0x38f   :  { %11468 = vst [vmem:[#allocation77_spill] sm:$0xff] %v7554_v41 }
 0x393   :  { %6501 = vset.pattern.permute.xlu2 %v7206_v49  ;;  %3163 = vperm.xlu0 %6803, %v7245_v54  }
 0x394   :  { %6504 = vset.pattern.permute.xlu1 %v7117_v59 }
 0x395   :  { %v7547_v39 = vpop.permute.xlu0 %3345 }
 0x396   :  { %11466 = vst [vmem:[#allocation75_spill] sm:$0xff] %v7547_v39  ;;  %v7563_v39 = vpop.permute.xlu1 %301 }
 0x397   :  { %11471 = vst [vmem:[#allocation80_spill] sm:$0xff] %v7563_v39 }
 0x39b   :  { %719 = vperm.xlu2 %6501, %v7269_v1   ;;  %3648 = vperm.xlu0 %6803, %v7253_v57  }
 0x39c   :  { %738 = vperm.xlu1 %6504, %v7439_v45  }
 0x39d   :  { %v7558_v17 = vpop.permute.xlu0 %3830 }
 0x39e   :  { %11470 = vst [vmem:[#allocation79_spill] sm:$0xff] %v7558_v17  ;;  %v7572_v9 = vpop.permute.xlu1 %313  ;;  %v7574_v17 = vpop.permute.xlu2 %325 }
 0x39f   :  { %11474 = vst [vmem:[#allocation83_spill] sm:$0xff] %v7572_v9 }
 0x3a0   :  { %11475 = vst [vmem:[#allocation84_spill] sm:$0xff] %v7574_v17 }
 0x3a3   :  { %6503 = vset.pattern.permute.xlu2 %v7120_v60  ;;  %4424 = vperm.xlu0 %6803, %v7388_v15  }
 0x3a4   :  { %6506 = vset.pattern.permute.xlu1 %v7140_v22 }
 0x3a5   :  { %v7570_v0 = vpop.permute.xlu0 %4412 }
 0x3a6   :  { %11473 = vst [vmem:[#allocation82_spill] sm:$0xff] %v7570_v0  ;;  %v7581_v56 = vpop.permute.xlu1 %331  ;;  %v7583_v39 = vpop.permute.xlu2 %338 }
 0x3a7   :  { %11477 = vst [vmem:[#allocation86_spill] sm:$0xff] %v7581_v56 }
 0x3ab   :  { %732 = vperm.xlu2 %6503, %v7439_v45   ;;  %6806 = vset.pattern.permute.xlu0 %v7173_v42 }
 0x3ac   :  { %756 = vperm.xlu1 %6506, %v7439_v45  }
 0x3ae   :  { %v7590_v17 = vpop.permute.xlu1 %344  ;;  %v7592_v9 = vpop.permute.xlu2 %356 }
 0x3b3   :  { %6505 = vset.pattern.permute.xlu2 %v7155_v32  ;;  %471 = vperm.xlu0 %6806, %v7308_v27  }
 0x3b4   :  { %6508 = vset.pattern.permute.xlu1 %v7137_v20 }
 0x3b5   :  { %v7579_v38 = vpop.permute.xlu0 %653 }
 0x3b6   :  { %11476 = vst [vmem:[#allocation85_spill] sm:$0xff] %v7579_v38  ;;  %v7597_v38 = vpop.permute.xlu1 %362  ;;  %v7601_v63 = vpop.permute.xlu2 %368 }
 0x3bb   :  { %750 = vperm.xlu2 %6505, %v7439_v45   ;;  %956 = vperm.xlu0 %6806, %v7350_v40  }
 0x3bc   :  { %768 = vperm.xlu1 %6508, %v7439_v45  }
 0x3bd   :  { %v7588_v0 = vpop.permute.xlu0 %1138 }
 0x3be   :  { %11478 = vst [vmem:[#allocation87_spill] sm:$0xff] %v7588_v0  ;;  %v7606_v0 = vpop.permute.xlu1 %374  ;;  %v7610_v30 = vpop.permute.xlu2 %386 }
 0x3bf   :  { %11481 = vst [vmem:[#allocation90_spill] sm:$0xff] %v7610_v30 }
 0x3c3   :  { %6507 = vset.pattern.permute.xlu2 %v7173_v42  ;;  %1441 = vperm.xlu0 %6806, %v7358_v2  }
 0x3c4   :  { %6510 = vset.pattern.permute.xlu1 %v7176_v43 }
 0x3c5   :  { %v7599_v56 = vpop.permute.xlu0 %1623 }
 0x3c6   :  { %11479 = vst [vmem:[#allocation88_spill] sm:$0xff] %v7599_v56  ;;  %v7615_v56 = vpop.permute.xlu1 %392  ;;  %v7617_v41 = vpop.permute.xlu2 %398 }
 0x3c7   :  { %11482 = vst [vmem:[#allocation91_spill] sm:$0xff] %v7615_v56 }
 0x3c8   :  { %11483 = vst [vmem:[#allocation92_spill] sm:$0xff] %v7617_v41 }
 0x3cb   :  { %762 = vperm.xlu2 %6507, %v7439_v45   ;;  %3072 = vperm.xlu0 %6806, %v7364_v3  }
 0x3cc   :  { %786 = vperm.xlu1 %6510, %v7439_v45  }
 0x3cd   :  { %v7608_v6 = vpop.permute.xlu0 %3254 }
 0x3ce   :  { %11480 = vst [vmem:[#allocation89_spill] sm:$0xff] %v7608_v6  ;;  %v7624_v6 = vpop.permute.xlu1 %404  ;;  %v7626_v34 = vpop.permute.xlu2 %416 }
 0x3cf   :  { %11485 = vst [vmem:[#allocation94_spill] sm:$0xff] %v7624_v6 }
 0x3d0   :  { %11486 = vst [vmem:[#allocation95_spill] sm:$0xff] %v7626_v34 }
 0x3d3   :  { %6509 = vset.pattern.permute.xlu2 %v7191_v46  ;;  %3557 = vperm.xlu0 %6806, %v7372_v7  }
 0x3d4   :  { %6512 = vset.pattern.permute.xlu1 %v7194_v47 }
 0x3d5   :  { %v7619_v21 = vpop.permute.xlu0 %3739 }
 0x3d6   :  { %11484 = vst [vmem:[#allocation93_spill] sm:$0xff] %v7619_v21  ;;  %v7633_v41 = vpop.permute.xlu1 %422  ;;  %v7635_v21 = vpop.permute.xlu2 %428 }
 0x3d7   :  { %11488 = vst [vmem:[#allocation97_spill] sm:$0xff] %v7633_v41 }
 0x3d8   :  { %11489 = vst [vmem:[#allocation98_spill] sm:$0xff] %v7635_v21 }
 0x3db   :  { %780 = vperm.xlu2 %6509, %v7439_v45   ;;  %4430 = vperm.xlu0 %6806, %v7388_v15  }
 0x3dc   :  { %798 = vperm.xlu1 %6512, %v7439_v45  }
 0x3dd   :  { %v7631_v24 = vpop.permute.xlu0 %4418 }
 0x3de   :  { %11487 = vst [vmem:[#allocation96_spill] sm:$0xff] %v7631_v24  ;;  %v7642_v34 = vpop.permute.xlu1 %435  ;;  %v7644_v5 = vpop.permute.xlu2 %447 }
 0x3e3   :  { %6511 = vset.pattern.permute.xlu2 %v7203_v48  ;;  %6809 = vset.pattern.permute.xlu0 %v7261_v62 }
 0x3e4   :  { %6514 = vset.pattern.permute.xlu1 %v7206_v49 }
 0x3e6   :  { %v7651_v21 = vpop.permute.xlu1 %453  ;;  %v7653_v41 = vpop.permute.xlu2 %459 }
 0x3eb   :  { %792 = vperm.xlu2 %6511, %v7439_v45   ;;  %289 = vperm.xlu0 %6809, %v7127_v12  }
 0x3ec   :  { %816 = vperm.xlu1 %6514, %v7439_v45  }
 0x3ed   :  { %v7640_v6 = vpop.permute.xlu0 %562 }
 0x3ee   :  { %11490 = vst [vmem:[#allocation99_spill] sm:$0xff] %v7640_v6  ;;  %v7658_v6 = vpop.permute.xlu1 %465  ;;  %v7662_v28 = vpop.permute.xlu2 %477 }
 0x3ef   :  { %11493 = vst [vmem:[#allocation102_spill] sm:$0xff] %v7662_v28 }
 0x3f3   :  { %6513 = vset.pattern.permute.xlu2 %v7215_v50  ;;  %774 = vperm.xlu0 %6809, %v7439_v45  }
 0x3f4   :  { %6516 = vset.pattern.permute.xlu1 %v7120_v60 }
 0x3f5   :  { %v7649_v24 = vpop.permute.xlu0 %1047 }
 0x3f6   :  { %11491 = vst [vmem:[#allocation100_spill] sm:$0xff] %v7649_v24  ;;  %v7667_v24 = vpop.permute.xlu1 %483  ;;  %v7671_v44 = vpop.permute.xlu2 %489 }
 0x3f7   :  { %11494 = vst [vmem:[#allocation103_spill] sm:$0xff] %v7667_v24 }
 0x3f8   :  { %11496 = vst [vmem:[#allocation105_spill] sm:$0xff] %v7671_v44  ;;  %v7688_v44 = vperm.slane %v7300_v23, 5 }
 0x3fa   :  { %11501 = vst [vmem:[#allocation110_spill] sm:$0xff] %v7688_v44 }
 0x3fb   :  { %810 = vperm.xlu2 %6513, %v7439_v45   ;;  %1259 = vperm.xlu0 %6809, %v7447_v14  }
 0x3fc   :  { %829 = vperm.xlu1 %6516, %v7158_v33  }
 0x3fd   :  { %v7660_v56 = vpop.permute.xlu0 %1532 }
 0x3fe   :  { %11492 = vst [vmem:[#allocation101_spill] sm:$0xff] %v7660_v56  ;;  %v7676_v56 = vpop.permute.xlu1 %495  ;;  %v7678_v28 = vpop.permute.xlu2 %507 }
 0x3ff   :  { %11497 = vst [vmem:[#allocation106_spill] sm:$0xff] %v7676_v56 }
 0x400   :  { %11498 = vst [vmem:[#allocation107_spill] sm:$0xff] %v7678_v28 }
 0x403   :  { %6515 = vset.pattern.permute.xlu2 %v7113_v58  ;;  %1744 = vperm.xlu0 %6809, %v7455_v11  }
 0x404   :  { %6518 = vset.pattern.permute.xlu1 %v7155_v32 }
 0x405   :  { %v7669_v30 = vpop.permute.xlu0 %3163 }
 0x406   :  { %11495 = vst [vmem:[#allocation104_spill] sm:$0xff] %v7669_v30  ;;  %v7685_v30 = vpop.permute.xlu1 %513  ;;  %v7690_v24 = vpop.permute.xlu2 %519 }
 0x407   :  { %11500 = vst [vmem:[#allocation109_spill] sm:$0xff] %v7685_v30 }
 0x408   :  { %11502 = vst [vmem:[#allocation111_spill] sm:$0xff] %v7690_v24 }
 0x40b   :  { %823 = vperm.xlu2 %6515, %v7158_v33   ;;  %3375 = vperm.xlu0 %6809, %v7461_v10  }
 0x40c   :  { %847 = vperm.xlu1 %6518, %v7158_v33  }
 0x40d   :  { %v7680_v61 = vpop.permute.xlu0 %3648 }
 0x40e   :  { %11499 = vst [vmem:[#allocation108_spill] sm:$0xff] %v7680_v61  ;;  %v7697_v28 = vpop.permute.xlu1 %525  ;;  %v7699_v56 = vpop.permute.xlu2 %538 }
 0x40f   :  { %11504 = vst [vmem:[#allocation113_spill] sm:$0xff] %v7697_v28 }
 0x410   :  { %11505 = vst [vmem:[#allocation114_spill] sm:$0xff] %v7699_v56 }
 0x413   :  { %6517 = vset.pattern.permute.xlu2 %v7134_v19  ;;  %3860 = vperm.xlu0 %6809, %v7469_v25  }
 0x414   :  { %6520 = vset.pattern.permute.xlu1 %v7173_v42 }
 0x415   :  { %v7695_v61 = vpop.permute.xlu0 %4424 }
 0x416   :  { %11503 = vst [vmem:[#allocation112_spill] sm:$0xff] %v7695_v61  ;;  %v7706_v24 = vpop.permute.xlu1 %544  ;;  %v7708_v55 = vpop.permute.xlu2 %550 }
 0x417   :  { %11507 = vst [vmem:[#allocation116_spill] sm:$0xff] %v7706_v24 }
 0x418   :  { %11508 = vst [vmem:[#allocation117_spill] sm:$0xff] %v7708_v55 }
 0x41b   :  { %841 = vperm.xlu2 %6517, %v7158_v33   ;;  %4248 = vperm.xlu0 %6809, %v7688_v44  }
 0x41c   :  { %859 = vperm.xlu1 %6520, %v7158_v33  }
 0x41e   :  { %v7715_v56 = vpop.permute.xlu1 %556  ;;  %v7717_v28 = vpop.permute.xlu2 %568 }
 0x41f   :  { %11509 = vst [vmem:[#allocation118_spill] sm:$0xff] %v7715_v56 }
 0x420   :  { %11510 = vst [vmem:[#allocation119_spill] sm:$0xff] %v7717_v28 }
 0x423   :  { %6519 = vset.pattern.permute.xlu2 %v7140_v22  ;;  %6814 = vset.pattern.permute.xlu0 %v7176_v43 }
 0x424   :  { %6522 = vset.pattern.permute.xlu1 %v7191_v46 }
 0x425   :  { %v7704_v30 = vpop.permute.xlu0 %471 }
 0x426   :  { %11506 = vst [vmem:[#allocation115_spill] sm:$0xff] %v7704_v30  ;;  %v7722_v24 = vpop.permute.xlu1 %574  ;;  %v7726_v30 = vpop.permute.xlu2 %580 }
 0x427   :  { %11511 = vst [vmem:[#allocation120_spill] sm:$0xff] %v7722_v24 }
 0x428   :  { %11513 = vst [vmem:[#allocation122_spill] sm:$0xff] %v7726_v30 }
 0x42b   :  { %853 = vperm.xlu2 %6519, %v7158_v33   ;;  %592 = vperm.xlu0 %6814, %v7227_v51  }
 0x42c   :  { %877 = vperm.xlu1 %6522, %v7158_v33  }
 0x42d   :  { %v7713_v61 = vpop.permute.xlu0 %956 }
 0x42e   :  { %v7731_v56 = vpop.permute.xlu1 %586  ;;  %v7735_v51 = vpop.permute.xlu2 %598 }
 0x42f   :  { %11514 = vst [vmem:[#allocation123_spill] sm:$0xff] %v7731_v56 }
 0x430   :  { %11516 = vst [vmem:[#allocation125_spill] sm:$0xff] %v7735_v51  ;;  %v7752_v51 = vperm.slane %v7300_v23, 3 }
 0x432   :  { %11521 = vst [vmem:[#allocation130_spill] sm:$0xff] %v7752_v51 }
 0x433   :  { %6521 = vset.pattern.permute.xlu2 %v7261_v62  ;;  %1077 = vperm.xlu0 %6814, %v7233_v52  }
 0x434   :  { %6524 = vset.pattern.permute.xlu1 %v7203_v48 }
 0x435   :  { %v7724_v55 = vpop.permute.xlu0 %1441 }
 0x436   :  { %11512 = vst [vmem:[#allocation121_spill] sm:$0xff] %v7724_v55  ;;  %v7740_v55 = vpop.permute.xlu1 %604  ;;  %v7742_v30 = vpop.permute.xlu2 %610 }
 0x437   :  { %11517 = vst [vmem:[#allocation126_spill] sm:$0xff] %v7740_v55 }
 0x438   :  { %11518 = vst [vmem:[#allocation127_spill] sm:$0xff] %v7742_v30 }
 0x43b   :  { %871 = vperm.xlu2 %6521, %v7158_v33   ;;  %1562 = vperm.xlu0 %6814, %v7239_v53  }
 0x43c   :  { %889 = vperm.xlu1 %6524, %v7158_v33  }
 0x43d   :  { %v7733_v28 = vpop.permute.xlu0 %3072 }
 0x43e   :  { %11515 = vst [vmem:[#allocation124_spill] sm:$0xff] %v7733_v28  ;;  %v7749_v28 = vpop.permute.xlu1 %616  ;;  %v7754_v56 = vpop.permute.xlu2 %629 }
 0x43f   :  { %11520 = vst [vmem:[#allocation129_spill] sm:$0xff] %v7749_v28 }
 0x440   :  { %11522 = vst [vmem:[#allocation131_spill] sm:$0xff] %v7754_v56 }
 0x443   :  { %6523 = vset.pattern.permute.xlu2 %v7176_v43  ;;  %3193 = vperm.xlu0 %6814, %v7245_v54  }
 0x444   :  { %6526 = vset.pattern.permute.xlu1 %v7215_v50 }
 0x445   :  { %v7744_v24 = vpop.permute.xlu0 %3557 }
 0x446   :  { %11519 = vst [vmem:[#allocation128_spill] sm:$0xff] %v7744_v24  ;;  %v7761_v30 = vpop.permute.xlu1 %635  ;;  %v7763_v55 = vpop.permute.xlu2 %641 }
 0x447   :  { %11524 = vst [vmem:[#allocation133_spill] sm:$0xff] %v7761_v30 }
 0x448   :  { %11525 = vst [vmem:[#allocation134_spill] sm:$0xff] %v7763_v55 }
 0x44b   :  { %883 = vperm.xlu2 %6523, %v7158_v33   ;;  %3678 = vperm.xlu0 %6814, %v7253_v57  }
 0x44c   :  { %907 = vperm.xlu1 %6526, %v7158_v33  }
 0x44d   :  { %v7759_v24 = vpop.permute.xlu0 %4430 }
 0x44e   :  { %11523 = vst [vmem:[#allocation132_spill] sm:$0xff] %v7759_v24  ;;  %v7770_v28 = vpop.permute.xlu1 %647  ;;  %v7772_v56 = vpop.permute.xlu2 %659 }
 0x44f   :  { %11526 = vst [vmem:[#allocation135_spill] sm:$0xff] %v7770_v28 }
 0x450   :  { %11527 = vst [vmem:[#allocation136_spill] sm:$0xff] %v7772_v56 }
 0x453   :  { %6525 = vset.pattern.permute.xlu2 %v7291_v16  ;;  %4066 = vperm.xlu0 %6814, %v7752_v51  }
 0x454   :  { %6528 = vset.pattern.permute.xlu1 %v7113_v58 }
 0x456   :  { %v7779_v55 = vpop.permute.xlu1 %665  ;;  %v7781_v30 = vpop.permute.xlu2 %671 }
 0x457   :  { %11528 = vst [vmem:[#allocation137_spill] sm:$0xff] %v7779_v55 }
 0x458   :  { %11529 = vst [vmem:[#allocation138_spill] sm:$0xff] %v7781_v30 }
 0x45b   :  { %901 = vperm.xlu2 %6525, %v7158_v33   ;;  %6818 = vset.pattern.permute.xlu0 %v7191_v46 }
 0x45c   :  { %920 = vperm.xlu1 %6528, %v7350_v40  }
 0x45d   :  { %v7768_v23 = vpop.permute.xlu0 %289 }
 0x45e   :  { %v7788_v56 = vpop.permute.xlu1 %677  ;;  %v7790_v51 = vpop.permute.xlu2 %689 }
 0x45f   :  { %11531 = vst [vmem:[#allocation140_spill] sm:$0xff] %v7788_v56 }
 0x460   :  { %11532 = vst [vmem:[#allocation141_spill] sm:$0xff] %v7790_v51 }
 0x463   :  { %6527 = vset.pattern.permute.xlu2 %v7206_v49  ;;  %683 = vperm.xlu0 %6818, %v7269_v1  }
 0x464   :  { %6530 = vset.pattern.permute.xlu1 %v7134_v19 }
 0x465   :  { %v7777_v24 = vpop.permute.xlu0 %774 }
 0x466   :  { %v7795_v1 = vpop.permute.xlu1 %695 }
 0x467   :  { %11533 = vst [vmem:[#allocation142_spill] sm:$0xff] %v7795_v1 }
 0x46b   :  { %913 = vperm.xlu2 %6527, %v7158_v33   ;;  %1168 = vperm.xlu0 %6818, %v7275_v4   ;;  %v7799_v33 = vpop.permute.xlu2 %701 }
 0x46c   :  { %938 = vperm.xlu1 %6530, %v7350_v40   ;;  %11535 = vst [vmem:[#allocation144_spill] sm:$0xff] %v7799_v33 }
 0x46d   :  { %v7786_v28 = vpop.permute.xlu0 %1259 }
 0x46e   :  { %11530 = vst [vmem:[#allocation139_spill] sm:$0xff] %v7786_v28  ;;  %v7804_v28 = vpop.permute.xlu1 %707 }
 0x46f   :  { %11536 = vst [vmem:[#allocation145_spill] sm:$0xff] %v7804_v28 }
 0x473   :  { %6529 = vset.pattern.permute.xlu2 %v7117_v59  ;;  %1653 = vperm.xlu0 %6818, %v7283_v8   ;;  %v7808_v56 = vpop.permute.xlu2 %719 }
 0x474   :  { %6532 = vset.pattern.permute.xlu1 %v7140_v22  ;;  %11538 = vst [vmem:[#allocation147_spill] sm:$0xff] %v7808_v56 }
 0x475   :  { %v7797_v30 = vpop.permute.xlu0 %1744 }
 0x476   :  { %11534 = vst [vmem:[#allocation143_spill] sm:$0xff] %v7797_v30  ;;  %v7813_v30 = vpop.permute.xlu1 %726 }
 0x47b   :  { %932 = vperm.xlu2 %6529, %v7350_v40   ;;  %3284 = vperm.xlu0 %6818, %v7294_v18   ;;  %v7815_v8 = vpop.permute.xlu2 %732 }
 0x47c   :  { %950 = vperm.xlu1 %6532, %v7350_v40  }
 0x47d   :  { %v7806_v51 = vpop.permute.xlu0 %3375 }
 0x47e   :  { %11537 = vst [vmem:[#allocation146_spill] sm:$0xff] %v7806_v51  ;;  %v7822_v51 = vpop.permute.xlu1 %738 }
 0x483   :  { %6531 = vset.pattern.permute.xlu2 %v7155_v32  ;;  %3769 = vperm.xlu0 %6818, %v7305_v26   ;;  %v7824_v18 = vpop.permute.xlu2 %750 }
 0x484   :  { %6534 = vset.pattern.permute.xlu1 %v7261_v62 }
 0x485   :  { %v7817_v33 = vpop.permute.xlu0 %3860 }
 0x486   :  { %11539 = vst [vmem:[#allocation148_spill] sm:$0xff] %v7817_v33  ;;  %v7831_v56 = vpop.permute.xlu1 %756 }
 0x48b   :  { %944 = vperm.xlu2 %6531, %v7350_v40   ;;  %4351 = vperm.xlu0 %6818, %v7332_v35   ;;  %v7833_v33 = vpop.permute.xlu2 %762 }
 0x48c   :  { %968 = vperm.xlu1 %6534, %v7350_v40  }
 0x48d   :  { %v7829_v26 = vpop.permute.xlu0 %4248 }
 0x48e   :  { %11540 = vst [vmem:[#allocation149_spill] sm:$0xff] %v7829_v26  ;;  %v7840_v28 = vpop.permute.xlu1 %768 }
 0x493   :  { %6533 = vset.pattern.permute.xlu2 %v7137_v20  ;;  %6821 = vset.pattern.permute.xlu0 %v7203_v48  ;;  %v7842_v1 = vpop.permute.xlu2 %780 }
 0x494   :  { %6536 = vset.pattern.permute.xlu1 %v7176_v43 }
 0x496   :  { %v7849_v43 = vpop.permute.xlu1 %786 }
 0x497   :  { %11543 = vst [vmem:[#allocation152_spill] sm:$0xff] %v7849_v43 }
 0x49b   :  { %962 = vperm.xlu2 %6533, %v7350_v40   ;;  %501 = vperm.xlu0 %6821, %v7308_v27   ;;  %v7851_v55 = vpop.permute.xlu2 %792 }
 0x49c   :  { %980 = vperm.xlu1 %6536, %v7350_v40   ;;  %11544 = vst [vmem:[#allocation153_spill] sm:$0xff] %v7851_v55 }
 0x49d   :  { %v7838_v35 = vpop.permute.xlu0 %592 }
 0x49e   :  { %11541 = vst [vmem:[#allocation150_spill] sm:$0xff] %v7838_v35  ;;  %v7856_v27 = vpop.permute.xlu1 %798 }
 0x4a3   :  { %6535 = vset.pattern.permute.xlu2 %v7191_v46  ;;  %986 = vperm.xlu0 %6821, %v7350_v40   ;;  %v7860_v22 = vpop.permute.xlu2 %810 }
 0x4a4   :  { %6538 = vset.pattern.permute.xlu1 %v7291_v16  ;;  %11546 = vst [vmem:[#allocation155_spill] sm:$0xff] %v7860_v22 }
 0x4a5   :  { %v7847_v26 = vpop.permute.xlu0 %1077 }
 0x4a6   :  { %11542 = vst [vmem:[#allocation151_spill] sm:$0xff] %v7847_v26  ;;  %v7865_v26 = vpop.permute.xlu1 %816 }
 0x4a7   :  { %11547 = vst [vmem:[#allocation156_spill] sm:$0xff] %v7865_v26 }
 0x4ab   :  { %974 = vperm.xlu2 %6535, %v7350_v40   ;;  %1471 = vperm.xlu0 %6821, %v7358_v2   ;;  %v7869_v43 = vpop.permute.xlu2 %823 }
 0x4ac   :  { %998 = vperm.xlu1 %6538, %v7350_v40   ;;  %11549 = vst [vmem:[#allocation158_spill] sm:$0xff] %v7869_v43 }
 0x4ad   :  { %v7858_v35 = vpop.permute.xlu0 %1562 }
 0x4ae   :  { %11545 = vst [vmem:[#allocation154_spill] sm:$0xff] %v7858_v35  ;;  %v7874_v35 = vpop.permute.xlu1 %829 }
 0x4af   :  { %11550 = vst [vmem:[#allocation159_spill] sm:$0xff] %v7874_v35 }
 0x4b3   :  { %6537 = vset.pattern.permute.xlu2 %v7194_v47  ;;  %3102 = vperm.xlu0 %6821, %v7364_v3   ;;  %v7876_v2 = vpop.permute.xlu2 %841 }
 0x4b4   :  { %6540 = vset.pattern.permute.xlu1 %v7206_v49  ;;  %11551 = vst [vmem:[#allocation160_spill] sm:$0xff] %v7876_v2 }
 0x4b5   :  { %v7867_v55 = vpop.permute.xlu0 %3193 }
 0x4b6   :  { %11548 = vst [vmem:[#allocation157_spill] sm:$0xff] %v7867_v55  ;;  %v7883_v55 = vpop.permute.xlu1 %847 }
 0x4b7   :  { %11553 = vst [vmem:[#allocation162_spill] sm:$0xff] %v7883_v55 }
 0x4bb   :  { %992 = vperm.xlu2 %6537, %v7350_v40   ;;  %3587 = vperm.xlu0 %6821, %v7372_v7   ;;  %v7885_v3 = vpop.permute.xlu2 %853 }
 0x4bc   :  { %1010 = vperm.xlu1 %6540, %v7350_v40   ;;  %11554 = vst [vmem:[#allocation163_spill] sm:$0xff] %v7885_v3 }
 0x4bd   :  { %v7878_v22 = vpop.permute.xlu0 %3678 }
 0x4be   :  { %11552 = vst [vmem:[#allocation161_spill] sm:$0xff] %v7878_v22  ;;  %v7892_v26 = vpop.permute.xlu1 %859 }
 0x4bf   :  { %11556 = vst [vmem:[#allocation165_spill] sm:$0xff] %v7892_v26 }
 0x4c3   :  { %6539 = vset.pattern.permute.xlu2 %v7215_v50  ;;  %4169 = vperm.xlu0 %6821, %v7380_v13   ;;  %v7894_v22 = vpop.permute.xlu2 %871 }
 0x4c4   :  { %6542 = vset.pattern.permute.xlu1 %v7117_v59  ;;  %11557 = vst [vmem:[#allocation166_spill] sm:$0xff] %v7894_v22 }
 0x4c5   :  { %v7890_v7 = vpop.permute.xlu0 %4066 }
 0x4c6   :  { %11555 = vst [vmem:[#allocation164_spill] sm:$0xff] %v7890_v7  ;;  %v7901_v3 = vpop.permute.xlu1 %877 }
 0x4c7   :  { %11559 = vst [vmem:[#allocation168_spill] sm:$0xff] %v7901_v3 }
 0x4cb   :  { %1004 = vperm.xlu2 %6539, %v7350_v40   ;;  %4460 = vperm.xlu0 %6821, %v7388_v15   ;;  %v7903_v40 = vpop.permute.xlu2 %883 }
 0x4cc   :  { %1029 = vperm.xlu1 %6542, %v7233_v52   ;;  %11560 = vst [vmem:[#allocation169_spill] sm:$0xff] %v7903_v40 }
 0x4ce   :  { %v7910_v22 = vpop.permute.xlu1 %889 }
 0x4cf   :  { %11562 = vst [vmem:[#allocation171_spill] sm:$0xff] %v7910_v22 }
 0x4d3   :  { %6541 = vset.pattern.permute.xlu2 %v7120_v60  ;;  %6831 = vset.pattern.permute.xlu0 %v7291_v16  ;;  %v7912_v26 = vpop.permute.xlu2 %901 }
 0x4d4   :  { %6544 = vset.pattern.permute.xlu1 %v7155_v32  ;;  %11563 = vst [vmem:[#allocation172_spill] sm:$0xff] %v7912_v26 }
 0x4d5   :  { %v7899_v13 = vpop.permute.xlu0 %683 }
 0x4d6   :  { %11558 = vst [vmem:[#allocation167_spill] sm:$0xff] %v7899_v13  ;;  %v7917_v32 = vpop.permute.xlu1 %907 }
 0x4d7   :  { %11564 = vst [vmem:[#allocation173_spill] sm:$0xff] %v7917_v32 }
 0x4db   :  { %1023 = vperm.xlu2 %6541, %v7233_v52   ;;  %319 = vperm.xlu0 %6831, %v7127_v12   ;;  %v7921_v3 = vpop.permute.xlu2 %913 }
 0x4dc   :  { %1041 = vperm.xlu1 %6544, %v7233_v52   ;;  %11566 = vst [vmem:[#allocation175_spill] sm:$0xff] %v7921_v3 }
 0x4dd   :  { %v7908_v7 = vpop.permute.xlu0 %1168 }
 0x4de   :  { %11561 = vst [vmem:[#allocation170_spill] sm:$0xff] %v7908_v7  ;;  %v921_v12 = vpop.permute.xlu1 %920 }
 0x4e3   :  { %6543 = vset.pattern.permute.xlu2 %v7134_v19  ;;  %804 = vperm.xlu0 %6831, %v7439_v45   ;;  %v933_v26 = vpop.permute.xlu2 %932 }
 0x4e4   :  { %6546 = vset.pattern.permute.xlu1 %v7137_v20 }
 0x4e5   :  { %v7919_v40 = vpop.permute.xlu0 %1653 }
 0x4e6   :  { %11565 = vst [vmem:[#allocation174_spill] sm:$0xff] %v7919_v40  ;;  %v939_v45 = vpop.permute.xlu1 %938  ;;  %v1900_v40 = vld [vmem:[%s11338_s2 + $0x380] sm:$0xff] }
 0x4eb   :  { %1035 = vperm.xlu2 %6543, %v7233_v52   ;;  %1289 = vperm.xlu0 %6831, %v7447_v14   ;;  %v1901_v14 = vld [vmem:[%s11338_s2 + $0x388] sm:$0xff]  ;;  %v945_v3 = vpop.permute.xlu2 %944 }
 0x4ec   :  { %1059 = vperm.xlu1 %6546, %v7233_v52   ;;  %v2157_v22 = vmul.f32 %v1901_v14, %v7436_v37 }
 0x4ed   :  { %v7926_v7 = vpop.permute.xlu0 %3284 }
 0x4ee   :  { %11567 = vst [vmem:[#allocation176_spill] sm:$0xff] %v7926_v7  ;;  %v1902_v7 = vld [vmem:[%s11338_s2 + $0x390] sm:$0xff]  ;;  %v951_v55 = vpop.permute.xlu1 %950 }
 0x4ef   :  { %v2158_v13 = vmul.f32 %v1902_v7, %v933_v26 }
 0x4f3   :  { %6545 = vset.pattern.permute.xlu2 %v7173_v42  ;;  %1774 = vperm.xlu0 %6831, %v7455_v11   ;;  %v2156_v11 = vmul.f32 %v1900_v40, %v921_v12  ;;  %v1905_v40 = vld [vmem:[%s11338_s2 + $0x3a8] sm:$0xff]  ;;  %v2561_v12 = vsel %vm2300_vm2, %v2157_v22, 0.0 }
 0x4f4   :  { %6548 = vset.pattern.permute.xlu1 %v7191_v46  ;;  %v1903_v46 = vld [vmem:[%s11338_s2 + $0x398] sm:$0xff]  ;;  %v2161_v14 = vmul.f32 %v1905_v40, %v951_v55  ;;  %v1908_v40 = vld [vmem:[%s11338_s2 + $0x3c0] sm:$0xff] }
 0x4f5   :  { %v7940_v32 = vpop.permute.xlu0 %3769  ;;  %v2560_v2 = vsel %vm2300_vm2, %v2156_v11, 0.0  ;;  %v2159_v43 = vmul.f32 %v1903_v46, %v939_v45  ;;  %v963_v26 = vpop.permute.xlu2 %962 }
 0x4f6   :  { %11568 = vst [vmem:[#allocation177_spill] sm:$0xff] %v7940_v32  ;;  %v1904_v32 = vld [vmem:[%s11338_s2 + $0x3a0] sm:$0xff]  ;;  %v2562_v37 = vadd.f32 %v2561_v12, %v2560_v2  ;;  %v1906_v2 = vld [vmem:[%s11338_s2 + $0x3b0] sm:$0xff]  ;;  %v2569_v55 = vsel %vm2300_vm2, %v2161_v14, 0.0  ;;  %v1909_v14 = vld [vmem:[%s11338_s2 + $0x3c8] sm:$0xff] }
 0x4f7   :  { %v2160_v35 = vmul.f32 %v1904_v32, %v945_v3  ;;  %v2565_v7 = vsel %vm2300_vm2, %v2159_v43, 0.0  ;;  %v1805_v32 = vld [vmem:[%s11338_s2 + $0x88] sm:$0xff]  ;;  %v1907_v43 = vld [vmem:[%s11338_s2 + $0x3b8] sm:$0xff] }
 0x4f8   :  { %v2061_v12 = vmul.f32 %v1805_v32, %v7590_v17 }
 0x4f9   :  { %v2567_v45 = vsel %vm2300_vm2, %v2160_v35, 0.0  ;;  %v1806_v35 = vld [vmem:[%s11338_s2 + $0x90] sm:$0xff] }
 0x4fa   :  { %v2062_v17 = vmul.f32 %v1806_v35, %v7484_v36 }
 0x4fb   :  { %1053 = vperm.xlu2 %6545, %v7233_v52   ;;  %3405 = vperm.xlu0 %6831, %v7461_v10   ;;  %v2563_v10 = vsel %vm2300_vm2, %v2158_v13, 0.0 }
 0x4fc   :  { %1071 = vperm.xlu1 %6548, %v7233_v52   ;;  %v2564_v46 = vadd.f32 %v2563_v10, %v2562_v37  ;;  %v1804_v10 = vld [vmem:[%s11338_s2 + $0x80] sm:$0xff]  ;;  %v2162_v37 = vmul.f32 %v1906_v2, %v7713_v61  ;;  %v2339_v2 = vsel %vm2300_vm2, %v2061_v12, 0.0  ;;  %v2341_v12 = vsel %vm2300_vm2, %v2062_v17, 0.0 }
 0x4fd   :  { %v7962_v11 = vpop.permute.xlu0 %4351 }
 0x4fe   :  { %11569 = vst [vmem:[#allocation178_spill] sm:$0xff] %v7962_v11  ;;  %v969_v22 = vpop.permute.xlu1 %968  ;;  %v2566_v3 = vadd.f32 %v2565_v7, %v2564_v46  ;;  %v2163_v7 = vmul.f32 %v1907_v43, %v963_v26  ;;  %v1910_v26 = vld [vmem:[%s11338_s2 + $0x3d0] sm:$0xff]  ;;  %v2571_v43 = vsel %vm2300_vm2, %v2162_v37, 0.0 }
 0x4ff   :  { %v2164_v61 = vmul.f32 %v1908_v40, %v969_v22 }
 0x500   :  { %v2568_v13 = vadd.f32 %v2567_v45, %v2566_v3  ;;  %v2060_v45 = vmul.f32 %v1804_v10, %v7583_v39  ;;  %v1821_v3 = vld [vmem:[%s11338_s2 + $0x108] sm:$0xff]  ;;  %v1820_v39 = vld [vmem:[%s11338_s2 + $0x100] sm:$0xff]  ;;  %v1807_v10 = vld [vmem:[%s11338_s2 + $0x98] sm:$0xff] }
 0x501   :  { %v2077_v35 = vmul.f32 %v1821_v3, %v7431_v29  ;;  %v2076_v37 = vmul.f32 %v1820_v39, %v7642_v34  ;;  %v1911_v34 = vld [vmem:[%s11338_s2 + $0x3d8] sm:$0xff] }
 0x502   :  { %v2570_v46 = vadd.f32 %v2569_v55, %v2568_v13  ;;  %v2573_v55 = vsel %vm2300_vm2, %v2163_v7, 0.0  ;;  %v2338_v40 = vsel %vm2300_vm2, %v2060_v45, 0.0 }
 0x503   :  { %6547 = vset.pattern.permute.xlu2 %v7261_v62  ;;  %3890 = vperm.xlu0 %6831, %v7469_v25   ;;  %v2376_v45 = vsel %vm2300_vm2, %v2077_v35, 0.0 }
 0x504   :  { %6550 = vset.pattern.permute.xlu1 %v7194_v47  ;;  %v2572_v13 = vadd.f32 %v2571_v43, %v2570_v46  ;;  %v2340_v47 = vadd.f32 %v2339_v2, %v2338_v40  ;;  %v1808_v46 = vld [vmem:[%s11338_s2 + $0xa0] sm:$0xff]  ;;  %v1823_v43 = vld [vmem:[%s11338_s2 + $0x118] sm:$0xff] }
 0x505   :  { %v975_v11 = vpop.permute.xlu2 %974 }
 0x506   :  { %v2165_v36 = vmul.f32 %v1909_v14, %v975_v11  ;;  %v2574_v7 = vadd.f32 %v2573_v55, %v2572_v13  ;;  %v2063_v11 = vmul.f32 %v1807_v10, %v7592_v9  ;;  %v1822_v14 = vld [vmem:[%s11338_s2 + $0x110] sm:$0xff]  ;;  %v2342_v3 = vadd.f32 %v2341_v12, %v2340_v47 }
 0x507   :  { %v2079_v13 = vmul.f32 %v1823_v43, %v7651_v21 }
 0x508   :  { %v2577_v29 = vsel %vm2300_vm2, %v2165_v36, 0.0  ;;  %v2343_v47 = vsel %vm2300_vm2, %v2063_v11, 0.0  ;;  %v1810_v11 = vld [vmem:[%s11338_s2 + $0xb0] sm:$0xff] }
 0x509   :  { %v2380_v21 = vsel %vm2300_vm2, %v2079_v13, 0.0  ;;  %v11574_v13 = vld [vmem:[#allocation68_spill] sm:$0xff] }
 0x50b   :  { %1065 = vperm.xlu2 %6547, %v7233_v52   ;;  %3987 = vperm.xlu0 %6831, %v7321_v31   ;;  %v2575_v31 = vsel %vm2300_vm2, %v2164_v61, 0.0  ;;  %v2375_v61 = vsel %vm2300_vm2, %v2076_v37, 0.0  ;;  %v1824_v37 = vld [vmem:[%s11338_s2 + $0x120] sm:$0xff] }
 0x50c   :  { %1089 = vperm.xlu1 %6550, %v7233_v52   ;;  %v2576_v17 = vadd.f32 %v2575_v31, %v2574_v7  ;;  %v2064_v31 = vmul.f32 %v1808_v46, %v7597_v38  ;;  %v2377_v55 = vadd.f32 %v2376_v45, %v2375_v61  ;;  %v2066_v45 = vmul.f32 %v1810_v11, %v7606_v0  ;;  %v1788_v0 = vld [vmem:[%s11338_s2] sm:$0xff] }
 0x50d   :  { %v8000_v32 = vpop.permute.xlu0 %501 }
 0x50e   :  { %v981_v22 = vpop.permute.xlu1 %980  ;;  %v2578_v2 = vadd.f32 %v2577_v29, %v2576_v17  ;;  %v2345_v38 = vsel %vm2300_vm2, %v2064_v31, 0.0  ;;  %v11571_v31 = vld [vmem:[#allocation19_spill] sm:$0xff] }
 0x50f   :  { %v2166_v25 = vmul.f32 %v1910_v26, %v981_v22  ;;  %v2078_v26 = vmul.f32 %v1822_v14, %v7644_v5  ;;  %v2344_v22 = vadd.f32 %v2343_v47, %v2342_v3  ;;  %v1825_v3 = vld [vmem:[%s11338_s2 + $0x128] sm:$0xff] }
 0x511   :  { %v2579_v9 = vsel %vm2300_vm2, %v2166_v25, 0.0  ;;  %v1809_v25 = vld [vmem:[%s11338_s2 + $0xa8] sm:$0xff]  ;;  %v2378_v35 = vsel %vm2300_vm2, %v2078_v26, 0.0  ;;  %v2346_v14 = vadd.f32 %v2345_v38, %v2344_v22  ;;  %v1827_v38 = vld [vmem:[%s11338_s2 + $0x138] sm:$0xff] }
 0x512   :  { %v2580_v10 = vadd.f32 %v2579_v9, %v2578_v2  ;;  %v2065_v12 = vmul.f32 %v1809_v25, %v7601_v63  ;;  %v2379_v7 = vadd.f32 %v2378_v35, %v2377_v55  ;;  %v2080_v63 = vmul.f32 %v1824_v37, %v7653_v41  ;;  %v1789_v9 = vld [vmem:[%s11338_s2 + $0x8] sm:$0xff]  ;;  %v1811_v41 = vld [vmem:[%s11338_s2 + $0xb8] sm:$0xff] }
 0x513   :  { %6549 = vset.pattern.permute.xlu2 %v7203_v48  ;;  %4278 = vperm.xlu0 %6831, %v7688_v44   ;;  %v2081_v2 = vmul.f32 %v1825_v3, %v7658_v6  ;;  %v2045_v43 = vmul.f32 %v1789_v9, %v11571_v31  ;;  %v11572_v55 = vld [vmem:[#allocation20_spill] sm:$0xff]  ;;  %v2349_v25 = vsel %vm2300_vm2, %v2066_v45, 0.0  ;;  %v11573_v35 = vld [vmem:[#allocation18_spill] sm:$0xff]  ;;  %v2044_v6 = vmul.f32 %v1788_v0, %v11574_v13  ;;  %v1792_v31 = vld [vmem:[%s11338_s2 + $0x20] sm:$0xff] }
 0x514   :  { %6552 = vset.pattern.permute.xlu1 %v7215_v50  ;;  %v2347_v46 = vsel %vm2300_vm2, %v2065_v12, 0.0  ;;  %v2381_v17 = vadd.f32 %v2380_v21, %v2379_v7  ;;  %v2382_v26 = vsel %vm2300_vm2, %v2080_v63, 0.0  ;;  %v1790_v12 = vld [vmem:[%s11338_s2 + $0x10] sm:$0xff]  ;;  %v11575_v21 = vld [vmem:[#allocation90_spill] sm:$0xff] }
 0x515   :  { %v987_v39 = vpop.permute.xlu0 %986  ;;  %v2348_v61 = vadd.f32 %v2347_v46, %v2346_v14  ;;  %v2384_v37 = vsel %vm2300_vm2, %v2081_v2, 0.0  ;;  %v2302_v11 = vsel %vm2300_vm2, %v2045_v43, 0.0  ;;  %v1813_v45 = vld [vmem:[%s11338_s2 + $0xc8] sm:$0xff] }
 0x516   :  { %v2167_v36 = vmul.f32 %v1911_v34, %v987_v39  ;;  %v1826_v34 = vld [vmem:[%s11338_s2 + $0x130] sm:$0xff]  ;;  %v2383_v22 = vadd.f32 %v2382_v26, %v2381_v17  ;;  %v11576_v3 = vld [vmem:[#allocation102_spill] sm:$0xff]  ;;  %v1828_v26 = vld [vmem:[%s11338_s2 + $0x140] sm:$0xff] }
 0x517   :  { %v11570_v39 = vld [vmem:[#allocation115_spill] sm:$0xff]  ;;  %v2083_v17 = vmul.f32 %v1827_v38, %v11576_v3  ;;  %v11580_v13 = vld [vmem:[#allocation70_spill] sm:$0xff] }
 0x518   :  { %v2581_v5 = vsel %vm2300_vm2, %v2167_v36, 0.0  ;;  %v2082_v47 = vmul.f32 %v1826_v34, %v11570_v39  ;;  %v2067_v36 = vmul.f32 %v1811_v41, %v11572_v55  ;;  %v2385_v46 = vadd.f32 %v2384_v37, %v2383_v22  ;;  %v1791_v39 = vld [vmem:[%s11338_s2 + $0x18] sm:$0xff]  ;;  %v11578_v55 = vld [vmem:[#allocation91_spill] sm:$0xff] }
 0x519   :  { %v8045_v40 = vadd.f32 %v2581_v5, %v2580_v10  ;;  %v1812_v10 = vld [vmem:[%s11338_s2 + $0xc0] sm:$0xff]  ;;  %v2350_v5 = vadd.f32 %v2349_v25, %v2348_v61  ;;  %v2301_v41 = vsel %vm2300_vm2, %v2044_v6, 0.0  ;;  %v11577_v61 = vld [vmem:[#allocation71_spill] sm:$0xff]  ;;  %v2388_v22 = vsel %vm2300_vm2, %v2083_v17, 0.0  ;;  %v1815_v17 = vld [vmem:[%s11338_s2 + $0xd8] sm:$0xff] }
 0x51a   :  { %v2386_v7 = vsel %vm2300_vm2, %v2082_v47, 0.0  ;;  %v2351_v14 = vsel %vm2300_vm2, %v2067_v36, 0.0  ;;  %v2068_v63 = vmul.f32 %v1812_v10, %v11575_v21  ;;  %v2046_v0 = vmul.f32 %v1790_v12, %v11577_v61  ;;  %v1814_v25 = vld [vmem:[%s11338_s2 + $0xd0] sm:$0xff]  ;;  %v1829_v12 = vld [vmem:[%s11338_s2 + $0x148] sm:$0xff] }
 0x51b   :  { %1083 = vperm.xlu2 %6549, %v7233_v52   ;;  %6836 = vset.pattern.permute.xlu0 %v7206_v49  ;;  %v2352_v34 = vadd.f32 %v2351_v14, %v2350_v5  ;;  %v2387_v2 = vadd.f32 %v2386_v7, %v2385_v46  ;;  %v2303_v47 = vadd.f32 %v2302_v11, %v2301_v41  ;;  %v11579_v10 = vld [vmem:[#allocation103_spill] sm:$0xff]  ;;  %v11581_v11 = vld [vmem:[#allocation73_spill] sm:$0xff]  ;;  %v1869_v21 = vld [vmem:[%s11338_s2 + $0x288] sm:$0xff] }
 0x51c   :  { %1101 = vperm.xlu1 %6552, %v7233_v52   ;;  %v2353_v43 = vsel %vm2300_vm2, %v2068_v63, 0.0  ;;  %v2069_v36 = vmul.f32 %v1813_v45, %v11578_v55  ;;  %v2084_v5 = vmul.f32 %v1828_v26, %v11579_v10  ;;  %v2047_v6 = vmul.f32 %v1791_v39, %v11580_v13  ;;  %v1794_v63 = vld [vmem:[%s11338_s2 + $0x30] sm:$0xff]  ;;  %v11582_v45 = vld [vmem:[#allocation92_spill] sm:$0xff]  ;;  %v11583_v41 = vld [vmem:[#allocation105_spill] sm:$0xff] }
 0x51d   :  { %v8060_v29 = vpop.permute.xlu0 %1471  ;;  %v2304_v38 = vsel %vm2300_vm2, %v2046_v0, 0.0  ;;  %v2389_v37 = vadd.f32 %v2388_v22, %v2387_v2  ;;  %v2048_v14 = vmul.f32 %v1792_v31, %v11581_v11  ;;  %v2070_v3 = vmul.f32 %v1814_v25, %v11582_v45  ;;  %v1868_v26 = vld [vmem:[%s11338_s2 + $0x280] sm:$0xff]  ;;  %v1870_v2 = vld [vmem:[%s11338_s2 + $0x290] sm:$0xff]  ;;  %v1831_v55 = vld [vmem:[%s11338_s2 + $0x158] sm:$0xff] }
 0x51e   :  { %v2305_v7 = vadd.f32 %v2304_v38, %v2303_v47  ;;  %v2355_v46 = vsel %vm2300_vm2, %v2069_v36, 0.0  ;;  %v2085_v61 = vmul.f32 %v1829_v12, %v11583_v41  ;;  %v2306_v39 = vsel %vm2300_vm2, %v2047_v6, 0.0  ;;  %v1830_v47 = vld [vmem:[%s11338_s2 + $0x150] sm:$0xff]  ;;  %v11584_v22 = vld [vmem:[#allocation74_spill] sm:$0xff]  ;;  %v1795_v6 = vld [vmem:[%s11338_s2 + $0x38] sm:$0xff] }
 0x51f   :  { %v2125_v31 = vmul.f32 %v1869_v21, %v7815_v8  ;;  %v2308_v25 = vsel %vm2300_vm2, %v2048_v14, 0.0  ;;  %v2357_v8 = vsel %vm2300_vm2, %v2070_v3, 0.0  ;;  %v11586_v38 = vld [vmem:[#allocation94_spill] sm:$0xff]  ;;  %v1816_v11 = vld [vmem:[%s11338_s2 + $0xe0] sm:$0xff] }
 0x520   :  { %v2307_v36 = vadd.f32 %v2306_v39, %v2305_v7  ;;  %v2071_v12 = vmul.f32 %v1815_v17, %v11586_v38  ;;  %v2126_v7 = vmul.f32 %v1870_v2, %v7822_v51  ;;  %v2392_v14 = vsel %vm2300_vm2, %v2085_v61, 0.0  ;;  %v11587_v21 = vld [vmem:[#allocation106_spill] sm:$0xff]  ;;  %v1872_v61 = vld [vmem:[%s11338_s2 + $0x2a0] sm:$0xff] }
 0x521   :  { %v2487_v45 = vsel %vm2300_vm2, %v2125_v31, 0.0 }
 0x522   :  { %v2309_v51 = vadd.f32 %v2308_v25, %v2307_v36  ;;  %v2359_v39 = vsel %vm2300_vm2, %v2071_v12, 0.0 }
 0x523   :  { %6551 = vset.pattern.permute.xlu2 %v7291_v16  ;;  %622 = vperm.xlu0 %6836, %v11573_v35   ;;  %v2354_v35 = vadd.f32 %v2353_v43, %v2352_v34  ;;  %v2390_v34 = vsel %vm2300_vm2, %v2084_v5, 0.0  ;;  %v11585_v5 = vld [vmem:[#allocation76_spill] sm:$0xff] }
 0x524   :  { %6554 = vset.pattern.permute.xlu1 %v7120_v60  ;;  %v2391_v43 = vadd.f32 %v2390_v34, %v2389_v37  ;;  %v2124_v37 = vmul.f32 %v1868_v26, %v7813_v30  ;;  %v11588_v34 = vld [vmem:[#allocation77_spill] sm:$0xff]  ;;  %v11589_v26 = vld [vmem:[#allocation28_spill] sm:$0xff] }
 0x525   :  { %v8107_v9 = vpop.permute.xlu0 %3102  ;;  %v2356_v0 = vadd.f32 %v2355_v46, %v2354_v35  ;;  %v2050_v35 = vmul.f32 %v1794_v63, %v11585_v5  ;;  %v2087_v46 = vmul.f32 %v1831_v55, %v8000_v32  ;;  %v2051_v41 = vmul.f32 %v1795_v6, %v11588_v34  ;;  %v1871_v32 = vld [vmem:[%s11338_s2 + $0x298] sm:$0xff]  ;;  %v1817_v5 = vld [vmem:[%s11338_s2 + $0xe8] sm:$0xff] }
 0x526   :  { %v2393_v30 = vadd.f32 %v2392_v14, %v2391_v43  ;;  %v2072_v2 = vmul.f32 %v1816_v11, %v11589_v26  ;;  %v2486_v31 = vsel %vm2300_vm2, %v2124_v37, 0.0  ;;  %v2489_v43 = vsel %vm2300_vm2, %v2126_v7, 0.0  ;;  %v11591_v7 = vld [vmem:[#allocation107_spill] sm:$0xff] }
 0x527   :  { %v2358_v63 = vadd.f32 %v2357_v8, %v2356_v0  ;;  %v2312_v17 = vsel %vm2300_vm2, %v2050_v35, 0.0  ;;  %v1796_v0 = vld [vmem:[%s11338_s2 + $0x40] sm:$0xff]  ;;  %v2488_v25 = vadd.f32 %v2487_v45, %v2486_v31  ;;  %v11590_v35 = vld [vmem:[#allocation67_spill] sm:$0xff]  ;;  %v2128_v8 = vmul.f32 %v1872_v61, %v7824_v18 }
 0x528   :  { %v2127_v6 = vmul.f32 %v1871_v32, %v11590_v35  ;;  %v2052_v38 = vmul.f32 %v1796_v0, %v7768_v23  ;;  %v1798_v35 = vld [vmem:[%s11338_s2 + $0x50] sm:$0xff] }
 0x529   :  { %v2360_v36 = vadd.f32 %v2359_v39, %v2358_v63  ;;  %v2490_v14 = vadd.f32 %v2489_v43, %v2488_v25  ;;  %v2361_v63 = vsel %vm2300_vm2, %v2072_v2, 0.0  ;;  %v2493_v61 = vsel %vm2300_vm2, %v2128_v8, 0.0  ;;  %v11596_v8 = vld [vmem:[#allocation97_spill] sm:$0xff] }
 0x52a   :  { %v2316_v26 = vsel %vm2300_vm2, %v2052_v38, 0.0 }
 0x52b   :  { %1095 = vperm.xlu2 %6551, %v7233_v52   ;;  %1107 = vperm.xlu0 %6836, %v7233_v52   ;;  %v1793_v52 = vld [vmem:[%s11338_s2 + $0x28] sm:$0xff]  ;;  %v2362_v34 = vadd.f32 %v2361_v63, %v2360_v36 }
 0x52c   :  { %1120 = vperm.xlu1 %6554, %v7275_v4   ;;  %v2049_v10 = vmul.f32 %v1793_v52, %v11584_v22  ;;  %v2086_v52 = vmul.f32 %v1830_v47, %v11587_v21  ;;  %v1832_v47 = vld [vmem:[%s11338_s2 + $0x160] sm:$0xff]  ;;  %v1873_v22 = vld [vmem:[%s11338_s2 + $0x2a8] sm:$0xff]  ;;  %v1874_v21 = vld [vmem:[%s11338_s2 + $0x2b0] sm:$0xff] }
 0x52d   :  { %v8169_v13 = vpop.permute.xlu0 %3587  ;;  %v2088_v11 = vmul.f32 %v1832_v47, %v11591_v7  ;;  %v2129_v18 = vmul.f32 %v1873_v22, %v7831_v56  ;;  %v1818_v56 = vld [vmem:[%s11338_s2 + $0xf0] sm:$0xff]  ;;  %v2130_v0 = vmul.f32 %v1874_v21, %v7833_v33  ;;  %v11594_v47 = vld [vmem:[#allocation109_spill] sm:$0xff]  ;;  %v11595_v36 = vld [vmem:[#allocation78_spill] sm:$0xff] }
 0x52e   :  { %v2310_v3 = vsel %vm2300_vm2, %v2049_v10, 0.0  ;;  %v2394_v55 = vsel %vm2300_vm2, %v2086_v52, 0.0  ;;  %v2396_v10 = vsel %vm2300_vm2, %v2087_v46, 0.0  ;;  %v2314_v52 = vsel %vm2300_vm2, %v2051_v41, 0.0  ;;  %v1833_v46 = vld [vmem:[%s11338_s2 + $0x168] sm:$0xff]  ;;  %v1875_v41 = vld [vmem:[%s11338_s2 + $0x2b8] sm:$0xff] }
 0x52f   :  { %v2395_v12 = vadd.f32 %v2394_v55, %v2393_v30  ;;  %v2311_v37 = vadd.f32 %v2310_v3, %v2309_v51  ;;  %v1797_v30 = vld [vmem:[%s11338_s2 + $0x48] sm:$0xff]  ;;  %v11592_v51 = vld [vmem:[#allocation95_spill] sm:$0xff]  ;;  %v2398_v39 = vsel %vm2300_vm2, %v2088_v11, 0.0  ;;  %v2089_v31 = vmul.f32 %v1833_v46, %v11594_v47  ;;  %v1876_v55 = vld [vmem:[%s11338_s2 + $0x2c0] sm:$0xff] }
 0x530   :  { %v2073_v3 = vmul.f32 %v1817_v5, %v11592_v51  ;;  %v2053_v25 = vmul.f32 %v1797_v30, %v11595_v36  ;;  %v1834_v33 = vld [vmem:[%s11338_s2 + $0x170] sm:$0xff]  ;;  %v2495_v22 = vsel %vm2300_vm2, %v2129_v18, 0.0  ;;  %v2074_v38 = vmul.f32 %v1818_v56, %v11596_v8  ;;  %v1819_v7 = vld [vmem:[%s11338_s2 + $0xf8] sm:$0xff]  ;;  %v11600_v47 = vld [vmem:[#allocation113_spill] sm:$0xff] }
 0x531   :  { %v2397_v23 = vadd.f32 %v2396_v10, %v2395_v12  ;;  %v2313_v45 = vadd.f32 %v2312_v17, %v2311_v37  ;;  %v2491_v17 = vsel %vm2300_vm2, %v2127_v6, 0.0  ;;  %v2131_v10 = vmul.f32 %v1875_v41, %v7840_v28  ;;  %v1835_v30 = vld [vmem:[%s11338_s2 + $0x178] sm:$0xff]  ;;  %v11599_v41 = vld [vmem:[#allocation98_spill] sm:$0xff] }
 0x532   :  { %v2492_v43 = vadd.f32 %v2491_v17, %v2490_v14  ;;  %v2363_v6 = vsel %vm2300_vm2, %v2073_v3, 0.0  ;;  %v2497_v14 = vsel %vm2300_vm2, %v2130_v0, 0.0  ;;  %v2132_v28 = vmul.f32 %v1876_v55, %v7777_v24  ;;  %v1799_v24 = vld [vmem:[%s11338_s2 + $0x58] sm:$0xff] }
 0x533   :  { %6553 = vset.pattern.permute.xlu2 %v7113_v58  ;;  %1592 = vperm.xlu0 %6836, %v7239_v53   ;;  %v2315_v2 = vadd.f32 %v2314_v52, %v2313_v45  ;;  %v2399_v5 = vadd.f32 %v2398_v39, %v2397_v23  ;;  %v2364_v11 = vadd.f32 %v2363_v6, %v2362_v34  ;;  %v2400_v21 = vsel %vm2300_vm2, %v2089_v31, 0.0  ;;  %v11597_v52 = vld [vmem:[#allocation111_spill] sm:$0xff]  ;;  %v11598_v23 = vld [vmem:[#allocation80_spill] sm:$0xff] }
 0x534   :  { %6556 = vset.pattern.permute.xlu1 %v7134_v19  ;;  %v2494_v12 = vadd.f32 %v2493_v61, %v2492_v43  ;;  %v2090_v63 = vmul.f32 %v1834_v33, %v11597_v52  ;;  %v2318_v18 = vsel %vm2300_vm2, %v2053_v25, 0.0  ;;  %v2054_v45 = vmul.f32 %v1798_v35, %v11598_v23  ;;  %v1877_v61 = vld [vmem:[%s11338_s2 + $0x2c8] sm:$0xff]  ;;  %v11602_v25 = vld [vmem:[#allocation81_spill] sm:$0xff]  ;;  %v1878_v6 = vld [vmem:[%s11338_s2 + $0x2d0] sm:$0xff] }
 0x535   :  { %v8235_v32 = vpop.permute.xlu0 %4169  ;;  %v2317_v37 = vadd.f32 %v2316_v26, %v2315_v2  ;;  %v2499_v51 = vsel %vm2300_vm2, %v2131_v10, 0.0  ;;  %v2401_v3 = vadd.f32 %v2400_v21, %v2399_v5  ;;  %v2365_v34 = vsel %vm2300_vm2, %v2074_v38, 0.0  ;;  %v11604_v21 = vld [vmem:[#allocation152_spill] sm:$0xff]  ;;  %v11605_v23 = vld [vmem:[#allocation130_spill] sm:$0xff] }
 0x536   :  { %11593 = vst [vmem:[#allocation115_spill] sm:$0xff] %v8235_v32  ;;  %v2496_v46 = vadd.f32 %v2495_v22, %v2494_v12  ;;  %v2075_v56 = vmul.f32 %v1819_v7, %v11599_v41  ;;  %v2366_v26 = vadd.f32 %v2365_v34, %v2364_v11  ;;  %v2501_v2 = vsel %vm2300_vm2, %v2132_v28, 0.0  ;;  %v1800_v22 = vld [vmem:[%s11338_s2 + $0x60] sm:$0xff]  ;;  %v1803_v41 = vld [vmem:[%s11338_s2 + $0x78] sm:$0xff] }
 0x537   :  { %v2319_v0 = vadd.f32 %v2318_v18, %v2317_v37  ;;  %v2402_v39 = vsel %vm2300_vm2, %v2090_v63, 0.0  ;;  %v2091_v31 = vmul.f32 %v1835_v30, %v11600_v47  ;;  %v2320_v36 = vsel %vm2300_vm2, %v2054_v45, 0.0  ;;  %v11603_v37 = vld [vmem:[#allocation83_spill] sm:$0xff]  ;;  %v1801_v45 = vld [vmem:[%s11338_s2 + $0x68] sm:$0xff] }
 0x538   :  { %v2498_v17 = vadd.f32 %v2497_v14, %v2496_v46  ;;  %v2055_v33 = vmul.f32 %v1799_v24, %v11602_v25  ;;  %v2133_v10 = vmul.f32 %v1877_v61, %v7842_v1  ;;  %v2403_v5 = vadd.f32 %v2402_v39, %v2401_v3  ;;  %v1802_v1 = vld [vmem:[%s11338_s2 + $0x70] sm:$0xff]  ;;  %v1879_v46 = vld [vmem:[%s11338_s2 + $0x2d8] sm:$0xff]  ;;  %v11607_v61 = vld [vmem:[#allocation153_spill] sm:$0xff] }
 0x539   :  { %v2367_v35 = vsel %vm2300_vm2, %v2075_v56, 0.0  ;;  %v2321_v8 = vadd.f32 %v2320_v36, %v2319_v0  ;;  %v2056_v7 = vmul.f32 %v1800_v22, %v11603_v37  ;;  %v2404_v11 = vsel %vm2300_vm2, %v2091_v31, 0.0  ;;  %v11606_v24 = vld [vmem:[#allocation84_spill] sm:$0xff]  ;;  %v1880_v39 = vld [vmem:[%s11338_s2 + $0x2e0] sm:$0xff]  ;;  %v1881_v37 = vld [vmem:[%s11338_s2 + $0x2e8] sm:$0xff] }
 0x53a   :  { %v2500_v43 = vadd.f32 %v2499_v51, %v2498_v17  ;;  %v2368_v12 = vadd.f32 %v2367_v35, %v2366_v26  ;;  %v2322_v14 = vsel %vm2300_vm2, %v2055_v33, 0.0  ;;  %v2503_v28 = vsel %vm2300_vm2, %v2133_v10, 0.0 }
 0x53b   :  { %1114 = vperm.xlu2 %6553, %v7275_v4   ;;  %3223 = vperm.xlu0 %6836, %v7245_v54   ;;  %v2134_v52 = vmul.f32 %v1878_v6, %v11604_v21  ;;  %v2405_v63 = vadd.f32 %v2404_v11, %v2403_v5  ;;  %v2323_v30 = vadd.f32 %v2322_v14, %v2321_v8  ;;  %v2324_v3 = vsel %vm2300_vm2, %v2056_v7, 0.0 }
 0x53c   :  { %1132 = vperm.xlu1 %6556, %v7275_v4   ;;  %v2502_v38 = vadd.f32 %v2501_v2, %v2500_v43  ;;  %v2369_v51 = vrot.slane %v2368_v12, 4  ;;  %v2058_v34 = vmul.f32 %v1802_v1, %v11606_v24  ;;  %v2135_v0 = vmul.f32 %v1879_v46, %v11607_v61  ;;  %v11608_v43 = vld [vmem:[#allocation86_spill] sm:$0xff] }
 0x53d   :  { %v8290_v55 = vpop.permute.xlu0 %4460  ;;  %v2505_v17 = vsel %vm2300_vm2, %v2134_v52, 0.0  ;;  %v2406_v26 = vrot.slane %v2405_v63, 4  ;;  %v2325_v31 = vadd.f32 %v2324_v3, %v2323_v30  ;;  %v2059_v36 = vmul.f32 %v1803_v41, %v11608_v43  ;;  %v1854_v41 = vld [vmem:[%s11338_s2 + $0x210] sm:$0xff]  ;;  %v11612_v43 = vld [vmem:[#allocation134_spill] sm:$0xff] }
 0x53e   :  { %11601 = vst [vmem:[#allocation19_spill] sm:$0xff] %v8290_v55  ;;  %v2504_v18 = vadd.f32 %v2503_v28, %v2502_v38  ;;  %v2370_v25 = vadd.f32 %v2369_v51, %v2368_v12  ;;  %v2328_v10 = vsel %vm2300_vm2, %v2058_v34, 0.0  ;;  %v2507_v5 = vsel %vm2300_vm2, %v2135_v0, 0.0  ;;  %v11609_v38 = vld [vmem:[#allocation10_spill] sm:$0xff]  ;;  %v1852_v34 = vld [vmem:[%s11338_s2 + $0x200] sm:$0xff] }
 0x53f   :  { %v2136_v35 = vmul.f32 %v1880_v39, %v7856_v27  ;;  %v2407_v6 = vadd.f32 %v2406_v26, %v2405_v63  ;;  %v2330_v7 = vsel %vm2300_vm2, %v2059_v36, 0.0  ;;  %v1853_v51 = vld [vmem:[%s11338_s2 + $0x208] sm:$0xff]  ;;  %v2110_v36 = vmul.f32 %v1854_v41, %v11612_v43 }
 0x540   :  { %v2506_v47 = vadd.f32 %v2505_v17, %v2504_v18  ;;  %v2371_v11 = vrot.slane %v2370_v25, 2  ;;  %v11610_v17 = vld [vmem:[#allocation133_spill] sm:$0xff]  ;;  %v11657_v55 = vld [vmem:[#allocation126_spill] sm:$0xff] }
 0x541   :  { %v2509_v27 = vsel %vm2300_vm2, %v2136_v35, 0.0  ;;  %v2408_v28 = vrot.slane %v2407_v6, 2  ;;  %v2109_v61 = vmul.f32 %v1853_v51, %v11610_v17  ;;  %v11613_v35 = vld [vmem:[#allocation135_spill] sm:$0xff]  ;;  %v1884_v51 = vld [vmem:[%s11338_s2 + $0x300] sm:$0xff] }
 0x542   :  { %v2508_v12 = vadd.f32 %v2507_v5, %v2506_v47  ;;  %v2372_v46 = vadd.f32 %v2371_v11, %v2370_v25  ;;  %v11611_v47 = vld [vmem:[#allocation131_spill] sm:$0xff]  ;;  %v2452_v11 = vsel %vm2300_vm2, %v2110_v36, 0.0 }
 0x543   :  { %6555 = vset.pattern.permute.xlu2 %v7117_v59  ;;  %3708 = vperm.xlu0 %6836, %v7253_v57   ;;  %v2409_v3 = vadd.f32 %v2408_v28, %v2407_v6  ;;  %v2450_v5 = vsel %vm2300_vm2, %v2109_v61, 0.0  ;;  %v1858_v17 = vld [vmem:[%s11338_s2 + $0x230] sm:$0xff] }
 0x544   :  { %6558 = vset.pattern.permute.xlu1 %v7173_v42  ;;  %v2510_v63 = vadd.f32 %v2509_v27, %v2508_v12  ;;  %v1836_v12 = vld [vmem:[%s11338_s2 + $0x180] sm:$0xff]  ;;  %v1885_v27 = vld [vmem:[%s11338_s2 + $0x308] sm:$0xff]  ;;  %v11617_v61 = vld [vmem:[#allocation159_spill] sm:$0xff] }
 0x545   :  { %v2410_v39 = vrot.slane %v2409_v3, 1  ;;  %v1886_v36 = vld [vmem:[%s11338_s2 + $0x310] sm:$0xff] }
 0x54b   :  { %1126 = vperm.xlu2 %6555, %v7275_v4   ;;  %4096 = vperm.xlu0 %6836, %v11605_v23  }
 0x54c   :  { %1150 = vperm.xlu1 %6558, %v7275_v4  }
 0x54d   :  { %v320_v56 = vpop.permute.xlu0 %319 }
 0x54e   :  { %v2057_v2 = vmul.f32 %v1801_v45, %v320_v56  ;;  %v2373_v56 = vrot.slane %v2372_v46, 1 }
 0x550   :  { %v2326_v33 = vsel %vm2300_vm2, %v2057_v2, 0.0  ;;  %v1855_v2 = vld [vmem:[%s11338_s2 + $0x218] sm:$0xff] }
 0x551   :  { %v2327_v22 = vadd.f32 %v2326_v33, %v2325_v31  ;;  %v2108_v31 = vmul.f32 %v1852_v34, %v11611_v47  ;;  %v1856_v33 = vld [vmem:[%s11338_s2 + $0x220] sm:$0xff]  ;;  %v2111_v6 = vmul.f32 %v1855_v2, %v11613_v35  ;;  %v1839_v2 = vld [vmem:[%s11338_s2 + $0x198] sm:$0xff] }
 0x552   :  { %v11620_v35 = vld [vmem:[#allocation136_spill] sm:$0xff] }
 0x553   :  { %v2329_v8 = vadd.f32 %v2328_v10, %v2327_v22  ;;  %6557 = vset.pattern.permute.xlu2 %v11609_v38  ;;  %4290 = vperm.xlu0 %6836, %v7688_v44   ;;  %v2374_v22 = vadd.f32 %v2373_v56, %v2372_v46  ;;  %v1837_v10 = vld [vmem:[%s11338_s2 + $0x188] sm:$0xff] }
 0x554   :  { %6560 = vset.pattern.permute.xlu1 %v7261_v62  ;;  %v1857_v56 = vld [vmem:[%s11338_s2 + $0x228] sm:$0xff] }
 0x555   :  { %v2331_v14 = vadd.f32 %v2330_v7, %v2329_v8  ;;  %v805_v1 = vpop.permute.xlu0 %804  ;;  %v2449_v7 = vsel %vm2300_vm2, %v2108_v31, 0.0  ;;  %v11618_v31 = vld [vmem:[#allocation116_spill] sm:$0xff] }
 0x556   :  { %v2137_v21 = vmul.f32 %v1881_v37, %v805_v1  ;;  %v2411_v37 = vadd.f32 %v2410_v39, %v2409_v3 }
 0x557   :  { %v2332_v52 = vrot.slane %v2331_v14, 4 }
 0x558   :  { %v2511_v18 = vsel %vm2300_vm2, %v2137_v21, 0.0  ;;  %v11615_v21 = vld [vmem:[#allocation114_spill] sm:$0xff] }
 0x559   :  { %v2333_v45 = vadd.f32 %v2332_v52, %v2331_v14  ;;  %v8343_v30 = vadd.f32 %v2511_v18, %v2510_v63  ;;  %v11614_v14 = vld [vmem:[#allocation85_spill] sm:$0xff]  ;;  %v2093_v52 = vmul.f32 %v1837_v10, %v11615_v21  ;;  %v2451_v63 = vadd.f32 %v2450_v5, %v2449_v7  ;;  %v1838_v18 = vld [vmem:[%s11338_s2 + $0x190] sm:$0xff] }
 0x55a   :  { %v2112_v1 = vmul.f32 %v1856_v33, %v11614_v14  ;;  %v2094_v43 = vmul.f32 %v1838_v18, %v11618_v31  ;;  %v1859_v33 = vld [vmem:[%s11338_s2 + $0x238] sm:$0xff]  ;;  %v1840_v5 = vld [vmem:[%s11338_s2 + $0x1a0] sm:$0xff]  ;;  %v11624_v18 = vld [vmem:[#allocation138_spill] sm:$0xff] }
 0x55b   :  { %v2334_v24 = vrot.slane %v2333_v45, 2  ;;  %1144 = vperm.xlu2 %6557, %v7275_v4   ;;  %4484 = vperm.xlu0 %6836, %v7388_v15   ;;  %v2453_v41 = vadd.f32 %v2452_v11, %v2451_v63  ;;  %v2413_v47 = vsel %vm2300_vm2, %v2093_v52, 0.0  ;;  %v11622_v11 = vld [vmem:[#allocation117_spill] sm:$0xff]  ;;  %v11627_v31 = vld [vmem:[#allocation140_spill] sm:$0xff]  ;;  %v11658_v15 = vld [vmem:[#allocation147_spill] sm:$0xff] }
 0x55c   :  { %1162 = vperm.xlu1 %6560, %v7275_v4   ;;  %v2456_v39 = vsel %vm2300_vm2, %v2112_v1, 0.0  ;;  %v2095_v14 = vmul.f32 %v1839_v2, %v11622_v11  ;;  %v11623_v52 = vld [vmem:[#allocation61_spill] sm:$0xff]  ;;  %v1861_v2 = vld [vmem:[%s11338_s2 + $0x248] sm:$0xff]  ;;  %v11630_v11 = vld [vmem:[#allocation167_spill] sm:$0xff] }
 0x55d   :  { %v2335_v0 = vadd.f32 %v2334_v24, %v2333_v45  ;;  %v8358_v26 = vpop.permute.xlu0 %1289  ;;  %v2454_v45 = vsel %vm2300_vm2, %v2111_v6, 0.0  ;;  %v11616_v24 = vld [vmem:[#allocation35_spill] sm:$0xff]  ;;  %v2113_v6 = vmul.f32 %v1857_v56, %v11620_v35  ;;  %v2142_v63 = vmul.f32 %v1886_v36, %v11623_v52  ;;  %v11629_v35 = vld [vmem:[#allocation162_spill] sm:$0xff] }
 0x55e   :  { %v2092_v34 = vmul.f32 %v1836_v12, %v11616_v24  ;;  %v1887_v12 = vld [vmem:[%s11338_s2 + $0x318] sm:$0xff]  ;;  %v1888_v24 = vld [vmem:[%s11338_s2 + $0x320] sm:$0xff] }
 0x55f   :  { %v2336_v25 = vrot.slane %v2335_v0, 1 }
 0x560   :  { %v2412_v7 = vsel %vm2300_vm2, %v2092_v34, 0.0  ;;  %v2415_v34 = vsel %vm2300_vm2, %v2094_v43, 0.0  ;;  %v1889_v43 = vld [vmem:[%s11338_s2 + $0x328] sm:$0xff] }
 0x561   :  { %v2337_v8 = vadd.f32 %v2336_v25, %v2335_v0  ;;  %v2141_v0 = vmul.f32 %v1885_v27, %v11617_v61  ;;  %v2455_v25 = vadd.f32 %v2454_v45, %v2453_v41  ;;  %v1860_v27 = vld [vmem:[%s11338_s2 + $0x240] sm:$0xff]  ;;  %v2414_v21 = vadd.f32 %v2413_v47, %v2412_v7  ;;  %v11625_v41 = vld [vmem:[#allocation118_spill] sm:$0xff]  ;;  %v11626_v61 = vld [vmem:[#allocation160_spill] sm:$0xff] }
 0x562   :  { %v2115_v45 = vmul.f32 %v1859_v33, %v11624_v18  ;;  %v2096_v56 = vmul.f32 %v1840_v5, %v11625_v41  ;;  %v2116_v36 = vmul.f32 %v1860_v27, %v11627_v31  ;;  %v2417_v33 = vsel %vm2300_vm2, %v2095_v14, 0.0  ;;  %v11631_v18 = vld [vmem:[#allocation163_spill] sm:$0xff]  ;;  %v11633_v31 = vld [vmem:[#allocation13_spill] sm:$0xff] }
 0x563   :  { %v2910_v28 = vsel %vm2909_vm3, %v2374_v22, %v2337_v8  ;;  %6559 = vset.pattern.permute.xlu2 %v7137_v20  ;;  %v11619_v22 = vld [vmem:[#allocation158_spill] sm:$0xff]  ;;  %v11621_v8 = vld [vmem:[#allocation137_spill] sm:$0xff]  ;;  %v2457_v1 = vadd.f32 %v2456_v39, %v2455_v25  ;;  %v2458_v39 = vsel %vm2300_vm2, %v2113_v6, 0.0  ;;  %v2526_v7 = vsel %vm2300_vm2, %v2142_v63, 0.0  ;;  %v1842_v63 = vld [vmem:[%s11338_s2 + $0x1b0] sm:$0xff] }
 0x564   :  { %6562 = vset.pattern.permute.xlu1 %v7203_v48  ;;  %v8387_v46 = vsel %vm2911_vm4, %v2411_v37, %v2910_v28  ;;  %v2140_v10 = vmul.f32 %v1884_v51, %v11619_v22  ;;  %v2114_v37 = vmul.f32 %v1858_v17, %v11621_v8  ;;  %v2524_v28 = vsel %vm2300_vm2, %v2141_v0, 0.0  ;;  %v1841_v51 = vld [vmem:[%s11338_s2 + $0x1a8] sm:$0xff]  ;;  %v1862_v41 = vld [vmem:[%s11338_s2 + $0x250] sm:$0xff] }
 0x565   :  { %v8396_v3 = vpop.permute.xlu0 %1774  ;;  %v2143_v0 = vmul.f32 %v1887_v12, %v11626_v61  ;;  %v2459_v22 = vadd.f32 %v2458_v39, %v2457_v1  ;;  %v2144_v8 = vmul.f32 %v1888_v24, %v11629_v35  ;;  %v2416_v12 = vadd.f32 %v2415_v34, %v2414_v21  ;;  %v11632_v61 = vld [vmem:[#allocation165_spill] sm:$0xff] }
 0x566   :  { %v2523_v17 = vsel %vm2300_vm2, %v2140_v10, 0.0  ;;  %v2460_v47 = vsel %vm2300_vm2, %v2114_v37, 0.0  ;;  %v11628_v10 = vld [vmem:[#allocation99_spill] sm:$0xff]  ;;  %v2462_v6 = vsel %vm2300_vm2, %v2115_v45, 0.0  ;;  %v2117_v27 = vmul.f32 %v1861_v2, %v11630_v11 }
 0x567   :  { %v2525_v25 = vadd.f32 %v2524_v28, %v2523_v17  ;;  %v2097_v5 = vmul.f32 %v1841_v51, %v11628_v10  ;;  %v1890_v37 = vld [vmem:[%s11338_s2 + $0x330] sm:$0xff]  ;;  %v2419_v14 = vsel %vm2300_vm2, %v2096_v56, 0.0  ;;  %v2461_v1 = vadd.f32 %v2460_v47, %v2459_v22  ;;  %v1843_v10 = vld [vmem:[%s11338_s2 + $0x1b8] sm:$0xff] }
 0x568   :  { %v2528_v52 = vsel %vm2300_vm2, %v2143_v0, 0.0  ;;  %v2145_v51 = vmul.f32 %v1889_v43, %v11631_v18  ;;  %v2418_v21 = vadd.f32 %v2417_v33, %v2416_v12  ;;  %v2464_v45 = vsel %vm2300_vm2, %v2116_v36, 0.0  ;;  %v1891_v36 = vld [vmem:[%s11338_s2 + $0x338] sm:$0xff] }
 0x569   :  { %v2527_v24 = vadd.f32 %v2526_v7, %v2525_v25  ;;  %v2463_v34 = vadd.f32 %v2462_v6, %v2461_v1  ;;  %v2421_v56 = vsel %vm2300_vm2, %v2097_v5, 0.0  ;;  %v2530_v17 = vsel %vm2300_vm2, %v2144_v8, 0.0  ;;  %v11634_v25 = vld [vmem:[#allocation119_spill] sm:$0xff]  ;;  %v11635_v5 = vld [vmem:[#allocation141_spill] sm:$0xff]  ;;  %v1863_v6 = vld [vmem:[%s11338_s2 + $0x258] sm:$0xff] }
 0x56a   :  { %v2146_v0 = vmul.f32 %v1890_v37, %v11632_v61  ;;  %v2420_v2 = vadd.f32 %v2419_v14, %v2418_v21  ;;  %v2466_v47 = vsel %vm2300_vm2, %v2117_v27, 0.0  ;;  %v2098_v43 = vmul.f32 %v1842_v63, %v11634_v25  ;;  %v1892_v7 = vld [vmem:[%s11338_s2 + $0x340] sm:$0xff]  ;;  %v11638_v63 = vld [vmem:[#allocation166_spill] sm:$0xff] }
 0x56b   :  { %1156 = vperm.xlu2 %6559, %v7275_v4   ;;  %v2529_v39 = vadd.f32 %v2528_v52, %v2527_v24  ;;  %v2465_v33 = vadd.f32 %v2464_v45, %v2463_v34  ;;  %v2532_v22 = vsel %vm2300_vm2, %v2145_v51, 0.0  ;;  %v2118_v35 = vmul.f32 %v1862_v41, %v11635_v5  ;;  %v11636_v27 = vld [vmem:[#allocation21_spill] sm:$0xff]  ;;  %v1893_v52 = vld [vmem:[%s11338_s2 + $0x348] sm:$0xff]  ;;  %v11637_v51 = vld [vmem:[#allocation120_spill] sm:$0xff] }
 0x56c   :  { %1180 = vperm.xlu1 %6562, %v7275_v4   ;;  %v2422_v8 = vadd.f32 %v2421_v56, %v2420_v2  ;;  %v2534_v37 = vsel %vm2300_vm2, %v2146_v0, 0.0  ;;  %v2147_v14 = vmul.f32 %v1891_v36, %v11636_v27  ;;  %v2423_v18 = vsel %vm2300_vm2, %v2098_v43, 0.0  ;;  %v1844_v24 = vld [vmem:[%s11338_s2 + $0x1c0] sm:$0xff]  ;;  %v11639_v41 = vld [vmem:[#allocation142_spill] sm:$0xff]  ;;  %v1894_v0 = vld [vmem:[%s11338_s2 + $0x350] sm:$0xff] }
 0x56d   :  { %v8465_v28 = vpop.permute.xlu0 %3405  ;;  %v2531_v12 = vadd.f32 %v2530_v17, %v2529_v39  ;;  %v2467_v11 = vadd.f32 %v2466_v47, %v2465_v33  ;;  %v2099_v21 = vmul.f32 %v1843_v10, %v11637_v51  ;;  %v2148_v45 = vmul.f32 %v1892_v7, %v11638_v63  ;;  %v1864_v39 = vld [vmem:[%s11338_s2 + $0x260] sm:$0xff]  ;;  %v11641_v47 = vld [vmem:[#allocation168_spill] sm:$0xff]  ;;  %v11642_v10 = vld [vmem:[#allocation122_spill] sm:$0xff] }
 0x56e   :  { %v2468_v34 = vsel %vm2300_vm2, %v2118_v35, 0.0  ;;  %v2119_v56 = vmul.f32 %v1863_v6, %v11639_v41  ;;  %v2424_v17 = vadd.f32 %v2423_v18, %v2422_v8  ;;  %v2149_v36 = vmul.f32 %v1893_v52, %v11641_v47  ;;  %v1895_v33 = vld [vmem:[%s11338_s2 + $0x358] sm:$0xff]  ;;  %v11643_v8 = vld [vmem:[#allocation169_spill] sm:$0xff]  ;;  %v1845_v7 = vld [vmem:[%s11338_s2 + $0x1c8] sm:$0xff]  ;;  %v993_v52 = vpop.permute.xlu2 %992  ;;  %v999_v41 = vpop.permute.xlu1 %998 }
 0x56f   :  { %v2533_v1 = vadd.f32 %v2532_v22, %v2531_v12  ;;  %v2469_v25 = vadd.f32 %v2468_v34, %v2467_v11  ;;  %v2536_v43 = vsel %vm2300_vm2, %v2147_v14, 0.0  ;;  %v2425_v22 = vsel %vm2300_vm2, %v2099_v21, 0.0  ;;  %v1865_v18 = vld [vmem:[%s11338_s2 + $0x268] sm:$0xff]  ;;  %v11645_v21 = vld [vmem:[#allocation171_spill] sm:$0xff] }
 0x570   :  { %v2100_v5 = vmul.f32 %v1844_v24, %v11642_v10  ;;  %v2538_v35 = vsel %vm2300_vm2, %v2148_v45, 0.0  ;;  %v2150_v12 = vmul.f32 %v1894_v0, %v11643_v8  ;;  %v2470_v6 = vsel %vm2300_vm2, %v2119_v56, 0.0  ;;  %v1896_v24 = vld [vmem:[%s11338_s2 + $0x360] sm:$0xff]  ;;  %v1866_v56 = vld [vmem:[%s11338_s2 + $0x270] sm:$0xff]  ;;  %v11647_v47 = vld [vmem:[#allocation150_spill] sm:$0xff] }
 0x571   :  { %v2535_v61 = vadd.f32 %v2534_v37, %v2533_v1  ;;  %v11644_v37 = vld [vmem:[#allocation144_spill] sm:$0xff]  ;;  %v2426_v27 = vadd.f32 %v2425_v22, %v2424_v17  ;;  %v1846_v1 = vld [vmem:[%s11338_s2 + $0x1d0] sm:$0xff]  ;;  %v2540_v51 = vsel %vm2300_vm2, %v2149_v36, 0.0  ;;  %v2151_v63 = vmul.f32 %v1895_v33, %v11645_v21  ;;  %v11648_v33 = vld [vmem:[#allocation145_spill] sm:$0xff] }
 0x572   :  { %v2120_v11 = vmul.f32 %v1864_v39, %v11644_v37  ;;  %v2471_v45 = vadd.f32 %v2470_v6, %v2469_v25  ;;  %v2427_v17 = vsel %vm2300_vm2, %v2100_v5, 0.0  ;;  %v1847_v39 = vld [vmem:[%s11338_s2 + $0x1d8] sm:$0xff]  ;;  %v2102_v36 = vmul.f32 %v1846_v1, %v11647_v47  ;;  %v1882_v10 = vld [vmem:[%s11338_s2 + $0x2f0] sm:$0xff]  ;;  %v11649_v8 = vld [vmem:[#allocation29_spill] sm:$0xff] }
 0x573   :  { %6561 = vset.pattern.permute.xlu2 %v11633_v31  ;;  %v2537_v14 = vadd.f32 %v2536_v43, %v2535_v61  ;;  %v11646_v61 = vld [vmem:[#allocation123_spill] sm:$0xff]  ;;  %v2542_v25 = vsel %vm2300_vm2, %v2150_v12, 0.0  ;;  %v2121_v22 = vmul.f32 %v1865_v18, %v11648_v33  ;;  %v2428_v5 = vadd.f32 %v2427_v17, %v2426_v27  ;;  %v1897_v37 = vld [vmem:[%s11338_s2 + $0x368] sm:$0xff]  ;;  %v11650_v12 = vld [vmem:[#allocation45_spill] sm:$0xff] }
 0x574   :  { %6564 = vset.pattern.permute.xlu1 %v7291_v16  ;;  %v2101_v0 = vmul.f32 %v1845_v7, %v11646_v61  ;;  %v2472_v43 = vsel %vm2300_vm2, %v2120_v11, 0.0  ;;  %v2152_v7 = vmul.f32 %v1896_v24, %v11649_v8  ;;  %v2544_v6 = vsel %vm2300_vm2, %v2151_v63, 0.0  ;;  %v11651_v11 = vld [vmem:[#allocation125_spill] sm:$0xff]  ;;  %v1913_v27 = vld [vmem:[%s11338_s2 + $0x3e8] sm:$0xff]  ;;  %v1898_v17 = vld [vmem:[%s11338_s2 + $0x370] sm:$0xff] }
 0x575   :  { %v8514_v2 = vpop.permute.xlu0 %3890  ;;  %v2539_v34 = vadd.f32 %v2538_v35, %v2537_v14  ;;  %v2473_v14 = vadd.f32 %v2472_v43, %v2471_v45  ;;  %v2122_v1 = vmul.f32 %v1866_v56, %v11650_v12  ;;  %v2103_v21 = vmul.f32 %v1847_v39, %v11651_v11  ;;  %v1912_v61 = vld [vmem:[%s11338_s2 + $0x3e0] sm:$0xff]  ;;  %v11654_v45 = vld [vmem:[#allocation155_spill] sm:$0xff]  ;;  %v11655_v33 = vld [vmem:[#allocation172_spill] sm:$0xff] }
 0x576   :  { %11640 = vst [vmem:[#allocation20_spill] sm:$0xff] %v8514_v2  ;;  %v11653_v63 = vld [vmem:[#allocation17_spill] sm:$0xff]  ;;  %v2429_v24 = vsel %vm2300_vm2, %v2101_v0, 0.0  ;;  %v2431_v56 = vsel %vm2300_vm2, %v2102_v36, 0.0  ;;  %v2474_v47 = vsel %vm2300_vm2, %v2121_v22, 0.0  ;;  %v1867_v0 = vld [vmem:[%s11338_s2 + $0x278] sm:$0xff]  ;;  %v2153_v36 = vmul.f32 %v1897_v37, %v11655_v33 }
 0x577   :  { %v2541_v35 = vadd.f32 %v2540_v51, %v2539_v34  ;;  %v2138_v34 = vmul.f32 %v1882_v10, %v11654_v45  ;;  %v1848_v39 = vld [vmem:[%s11338_s2 + $0x1e0] sm:$0xff]  ;;  %v1914_v10 = vld [vmem:[%s11338_s2 + $0x3f0] sm:$0xff]  ;;  %v2546_v8 = vsel %vm2300_vm2, %v2152_v7, 0.0  ;;  %v1883_v12 = vld [vmem:[%s11338_s2 + $0x2f8] sm:$0xff]  ;;  %v2475_v11 = vadd.f32 %v2474_v47, %v2473_v14 }
 0x578   :  { %v1899_v22 = vld [vmem:[%s11338_s2 + $0x378] sm:$0xff]  ;;  %v2476_v37 = vsel %vm2300_vm2, %v2122_v1, 0.0  ;;  %v11656_v45 = vld [vmem:[#allocation173_spill] sm:$0xff]  ;;  %v2104_v32 = vmul.f32 %v1848_v39, %v11657_v55  ;;  %v2123_v2 = vmul.f32 %v1867_v0, %v11658_v15 }
 0x579   :  { %v2543_v18 = vadd.f32 %v2542_v25, %v2541_v35  ;;  %v2430_v25 = vadd.f32 %v2429_v24, %v2428_v5  ;;  %v1005_v35 = vpop.permute.xlu2 %1004  ;;  %v2168_v5 = vmul.f32 %v1912_v61, %v993_v52  ;;  %v2154_v33 = vmul.f32 %v1898_v17, %v11656_v45  ;;  %v1915_v7 = vld [vmem:[%s11338_s2 + $0x3f8] sm:$0xff]  ;;  %v1849_v17 = vld [vmem:[%s11338_s2 + $0x1e8] sm:$0xff] }
 0x57a   :  { %v2513_v14 = vsel %vm2300_vm2, %v2138_v34, 0.0  ;;  %v2170_v52 = vmul.f32 %v1914_v10, %v1005_v35  ;;  %v2477_v47 = vadd.f32 %v2476_v37, %v2475_v11 }
 0x57b   :  { %1174 = vperm.xlu2 %6561, %v7275_v4   ;;  %v2545_v43 = vadd.f32 %v2544_v6, %v2543_v18  ;;  %v2169_v6 = vmul.f32 %v1913_v27, %v999_v41  ;;  %v2433_v18 = vsel %vm2300_vm2, %v2103_v21, 0.0  ;;  %v2432_v24 = vadd.f32 %v2431_v56, %v2430_v25  ;;  %v11659_v41 = vld [vmem:[#allocation156_spill] sm:$0xff]  ;;  %v11660_v27 = vld [vmem:[#allocation175_spill] sm:$0xff] }
 0x57c   :  { %1192 = vperm.xlu1 %6564, %v7275_v4   ;;  %v2139_v61 = vmul.f32 %v1883_v12, %v11659_v41  ;;  %v2548_v21 = vsel %vm2300_vm2, %v2153_v36, 0.0  ;;  %v2155_v56 = vmul.f32 %v1899_v22, %v11660_v27  ;;  %v2583_v25 = vsel %vm2300_vm2, %v2168_v5, 0.0  ;;  %v11662_v12 = vld [vmem:[#allocation127_spill] sm:$0xff]  ;;  %v11664_v41 = vld [vmem:[#allocation129_spill] sm:$0xff]  ;;  %v1851_v27 = vld [vmem:[%s11338_s2 + $0x1f8] sm:$0xff] }
 0x57d   :  { %v8574_v51 = vpop.permute.xlu0 %3987  ;;  %v2547_v1 = vadd.f32 %v2546_v8, %v2545_v43  ;;  %v2585_v55 = vsel %vm2300_vm2, %v2169_v6, 0.0  ;;  %v2434_v39 = vadd.f32 %v2433_v18, %v2432_v24  ;;  %v2550_v34 = vsel %vm2300_vm2, %v2154_v33, 0.0  ;;  %v11661_v8 = vld [vmem:[#allocation53_spill] sm:$0xff]  ;;  %v1850_v18 = vld [vmem:[%s11338_s2 + $0x1f0] sm:$0xff] }
 0x57e   :  { %11652 = vst [vmem:[#allocation18_spill] sm:$0xff] %v8574_v51  ;;  %v1011_v51 = vpop.permute.xlu1 %1010  ;;  %v2584_v0 = vadd.f32 %v2583_v25, %v8045_v40  ;;  %v2514_v43 = vadd.f32 %v2513_v14, %v8343_v30  ;;  %v2435_v36 = vsel %vm2300_vm2, %v2104_v32, 0.0  ;;  %v2587_v35 = vsel %vm2300_vm2, %v2170_v52, 0.0 }
 0x57f   :  { %v2171_v15 = vmul.f32 %v1915_v7, %v1011_v51  ;;  %v2549_v10 = vadd.f32 %v2548_v21, %v2547_v1  ;;  %v2105_v22 = vmul.f32 %v1849_v17, %v11662_v12  ;;  %v2478_v51 = vsel %vm2300_vm2, %v2123_v2, 0.0 }
 0x580   :  { %v2552_v11 = vsel %vm2300_vm2, %v2155_v56, 0.0  ;;  %v2586_v5 = vadd.f32 %v2585_v55, %v2584_v0  ;;  %v2515_v40 = vsel %vm2300_vm2, %v2139_v61, 0.0  ;;  %v2479_v37 = vadd.f32 %v2478_v51, %v2477_v47 }
 0x581   :  { %v2551_v30 = vadd.f32 %v2550_v34, %v2549_v10  ;;  %v2589_v32 = vsel %vm2300_vm2, %v2171_v15, 0.0  ;;  %v2436_v24 = vadd.f32 %v2435_v36, %v2434_v39  ;;  %v8636_v33 = vpop.permute.xlu2 %1023  ;;  %v2516_v2 = vadd.f32 %v2515_v40, %v2514_v43 }
 0x582   :  { %v2588_v45 = vadd.f32 %v2587_v35, %v2586_v5  ;;  %v2437_v52 = vsel %vm2300_vm2, %v2105_v22, 0.0  ;;  %v2106_v1 = vmul.f32 %v1850_v18, %v11664_v41  ;;  %v2480_v61 = vrot.slane %v2479_v37, 4 }
 0x583   :  { %6563 = vset.pattern.permute.xlu2 %v11653_v63  ;;  %v2553_v7 = vadd.f32 %v2552_v11, %v2551_v30  ;;  %v2517_v21 = vrot.slane %v2516_v2, 4  ;;  %v2438_v56 = vadd.f32 %v2437_v52, %v2436_v24 }
 0x584   :  { %6566 = vset.pattern.permute.xlu1 %v7113_v58  ;;  %v2590_v14 = vadd.f32 %v2589_v32, %v2588_v45  ;;  %v2439_v15 = vsel %vm2300_vm2, %v2106_v1, 0.0  ;;  %v2481_v39 = vadd.f32 %v2480_v61, %v2479_v37 }
 0x585   :  { %v8629_v6 = vpop.permute.xlu0 %4278  ;;  %v2554_v17 = vrot.slane %v2553_v7, 4  ;;  %v2518_v43 = vadd.f32 %v2517_v21, %v2516_v2  ;;  %v2440_v36 = vadd.f32 %v2439_v15, %v2438_v56 }
 0x586   :  { %11663 = vst [vmem:[#allocation68_spill] sm:$0xff] %v8629_v6  ;;  %v2591_v47 = vrot.slane %v2590_v14, 4  ;;  %v8645_v25 = vpop.permute.xlu1 %1029  ;;  %v2482_v51 = vrot.slane %v2481_v39, 2 }
 0x587   :  { %v2555_v10 = vadd.f32 %v2554_v17, %v2553_v7  ;;  %v2519_v11 = vrot.slane %v2518_v43, 2 }
 0x588   :  { %v2592_v12 = vadd.f32 %v2591_v47, %v2590_v14  ;;  %v2483_v18 = vadd.f32 %v2482_v51, %v2481_v39 }
 0x589   :  { %v8648_v0 = vpop.permute.xlu2 %1035  ;;  %v2556_v40 = vrot.slane %v2555_v10, 2  ;;  %v2520_v45 = vadd.f32 %v2519_v11, %v2518_v43 }
 0x58a   :  { %v2593_v30 = vrot.slane %v2592_v12, 2  ;;  %v2484_v41 = vrot.slane %v2483_v18, 1 }
 0x58b   :  { %1186 = vperm.xlu2 %6563, %v7275_v4   ;;  %v2557_v7 = vadd.f32 %v2556_v40, %v2555_v10  ;;  %v2521_v1 = vrot.slane %v2520_v45, 1 }
 0x58c   :  { %1211 = vperm.xlu1 %6566, %v11661_v8   ;;  %v2594_v52 = vadd.f32 %v2593_v30, %v2592_v12  ;;  %v2485_v17 = vadd.f32 %v2484_v41, %v2483_v18  ;;  %v1917_v30 = vld [vmem:[%s11338_s2 + $0x408] sm:$0xff]  ;;  %v1918_v18 = vld [vmem:[%s11338_s2 + $0x410] sm:$0xff] }
 0x58d   :  { %v2522_v47 = vadd.f32 %v2521_v1, %v2520_v45  ;;  %v2174_v1 = vmul.f32 %v1918_v18, %v8645_v25  ;;  %v1933_v25 = vld [vmem:[%s11338_s2 + $0x488] sm:$0xff]  ;;  %v11667_v18 = vld [vmem:[#allocation100_spill] sm:$0xff] }
 0x58e   :  { %v1042_v37 = vpop.permute.xlu1 %1041  ;;  %v2595_v21 = vrot.slane %v2594_v52, 1 }
 0x590   :  { %v2596_v43 = vadd.f32 %v2595_v21, %v2594_v52 }
 0x591   :  { %v8653_v24 = vpop.permute.xlu2 %1053 }
 0x593   :  { %6565 = vset.pattern.permute.xlu2 %v7206_v49 }
 0x594   :  { %6568 = vset.pattern.permute.xlu1 %v7117_v59 }
 0x595   :  { %v623_v55 = vpop.permute.xlu0 %622 }
 0x596   :  { %v2107_v34 = vmul.f32 %v1851_v27, %v623_v55  ;;  %v8657_v27 = vpop.permute.xlu1 %1059 }
 0x598   :  { %v2441_v35 = vsel %vm2300_vm2, %v2107_v34, 0.0 }
 0x599   :  { %v2442_v22 = vadd.f32 %v2441_v35, %v2440_v36  ;;  %v8659_v55 = vpop.permute.xlu2 %1065 }
 0x59b   :  { %v2443_v5 = vrot.slane %v2442_v22, 4  ;;  %1204 = vperm.xlu2 %6565, %v7275_v4   ;;  %v2558_v4 = vrot.slane %v2557_v7, 1 }
 0x59c   :  { %1223 = vperm.xlu1 %6568, %v11661_v8  }
 0x59d   :  { %v2444_v32 = vadd.f32 %v2443_v5, %v2442_v22  ;;  %v2559_v39 = vadd.f32 %v2558_v4, %v2557_v7  ;;  %v11665_v22 = vld [vmem:[#allocation11_spill] sm:$0xff]  ;;  %v1919_v7 = vld [vmem:[%s11338_s2 + $0x418] sm:$0xff] }
 0x59e   :  { %v8671_v12 = vpop.permute.xlu1 %1071  ;;  %v2175_v21 = vmul.f32 %v1919_v7, %v8648_v0 }
 0x59f   :  { %v2445_v2 = vrot.slane %v2444_v32, 2 }
 0x5a0   :  { %v2602_v0 = vsel %vm2300_vm2, %v2175_v21, 0.0 }
 0x5a1   :  { %v2446_v14 = vadd.f32 %v2445_v2, %v2444_v32  ;;  %v1916_v32 = vld [vmem:[%s11338_s2 + $0x400] sm:$0xff]  ;;  %v2173_v2 = vmul.f32 %v1917_v30, %v8636_v33 }
 0x5a3   :  { %v2447_v61 = vrot.slane %v2446_v14, 1  ;;  %6567 = vset.pattern.permute.xlu2 %v7120_v60  ;;  %v2598_v4 = vsel %vm2300_vm2, %v2173_v2, 0.0 }
 0x5a4   :  { %6570 = vset.pattern.permute.xlu1 %v11609_v38 }
 0x5a5   :  { %v2448_v56 = vadd.f32 %v2447_v61, %v2446_v14  ;;  %v11666_v14 = vld [vmem:[#allocation36_spill] sm:$0xff]  ;;  %v1920_v61 = vld [vmem:[%s11338_s2 + $0x420] sm:$0xff] }
 0x5a6   :  { %v8677_v51 = vpop.permute.xlu1 %1089  ;;  %v2172_v41 = vmul.f32 %v1916_v32, %v11666_v14  ;;  %v1923_v14 = vld [vmem:[%s11338_s2 + $0x438] sm:$0xff] }
 0x5a7   :  { %v2914_v15 = vsel %vm2913_vm5, %v2448_v56, %v8387_v46  ;;  %v8673_v46 = vpop.permute.xlu2 %1083  ;;  %v2600_v56 = vsel %vm2300_vm2, %v2174_v1, 0.0 }
 0x5a8   :  { %v2916_v34 = vsel %vm2915_vm6, %v2485_v17, %v2914_v15  ;;  %v2597_v33 = vsel %vm2300_vm2, %v2172_v41, 0.0  ;;  %v2176_v17 = vmul.f32 %v1920_v61, %v1042_v37  ;;  %v1932_v37 = vld [vmem:[%s11338_s2 + $0x480] sm:$0xff]  ;;  %v1935_v41 = vld [vmem:[%s11338_s2 + $0x498] sm:$0xff] }
 0x5a9   :  { %v2918_v36 = vsel %vm2917_vm7, %v2522_v47, %v2916_v34  ;;  %v2599_v47 = vadd.f32 %v2598_v4, %v2597_v33  ;;  %v11668_v33 = vld [vmem:[#allocation16_spill] sm:$0xff] }
 0x5aa   :  { %v2920_v10 = vsel %vm2919_vm8, %v2559_v39, %v2918_v36  ;;  %v1921_v39 = vld [vmem:[%s11338_s2 + $0x428] sm:$0xff]  ;;  %v1934_v36 = vld [vmem:[%s11338_s2 + $0x490] sm:$0xff]  ;;  %v2604_v30 = vsel %vm2300_vm2, %v2176_v17, 0.0 }
 0x5ab   :  { %1217 = vperm.xlu2 %6567, %v11661_v8   ;;  %v8668_v35 = vsel %vm2921_vm9, %v2596_v43, %v2920_v10  ;;  %v2601_v34 = vadd.f32 %v2600_v56, %v2599_v47  ;;  %v1922_v43 = vld [vmem:[%s11338_s2 + $0x430] sm:$0xff]  ;;  %v2177_v2 = vmul.f32 %v1921_v39, %v11667_v18  ;;  %v2179_v56 = vmul.f32 %v1923_v14, %v8657_v27 }
 0x5ac   :  { %1241 = vperm.xlu1 %6570, %v11661_v8   ;;  %v2178_v1 = vmul.f32 %v1922_v43, %v8653_v24  ;;  %v1925_v24 = vld [vmem:[%s11338_s2 + $0x448] sm:$0xff] }
 0x5ad   :  { %v2603_v7 = vadd.f32 %v2602_v0, %v2601_v34 }
 0x5ae   :  { %v8683_v5 = vpop.permute.xlu1 %1101  ;;  %v2608_v39 = vsel %vm2300_vm2, %v2178_v1, 0.0 }
 0x5af   :  { %v8679_v11 = vpop.permute.xlu2 %1095  ;;  %v2605_v21 = vadd.f32 %v2604_v30, %v2603_v7  ;;  %v2610_v30 = vsel %vm2300_vm2, %v2179_v56, 0.0  ;;  %v1939_v56 = vld [vmem:[%s11338_s2 + $0x4b8] sm:$0xff] }
 0x5b3   :  { %6569 = vset.pattern.permute.xlu2 %v11665_v22 }
 0x5b4   :  { %6572 = vset.pattern.permute.xlu1 %v7137_v20 }
 0x5b6   :  { %v1121_v45 = vpop.permute.xlu1 %1120 }
 0x5b7   :  { %v1115_v40 = vpop.permute.xlu2 %1114  ;;  %v2189_v32 = vmul.f32 %v1933_v25, %v1121_v45  ;;  %v1924_v45 = vld [vmem:[%s11338_s2 + $0x440] sm:$0xff]  ;;  %v2606_v25 = vsel %vm2300_vm2, %v2177_v2, 0.0  ;;  %v11669_v2 = vld [vmem:[#allocation87_spill] sm:$0xff] }
 0x5b8   :  { %v2188_v61 = vmul.f32 %v1932_v37, %v1115_v40  ;;  %v2180_v27 = vmul.f32 %v1924_v45, %v8659_v55  ;;  %v2607_v34 = vadd.f32 %v2606_v25, %v2605_v21  ;;  %v1937_v37 = vld [vmem:[%s11338_s2 + $0x4a8] sm:$0xff] }
 0x5b9   :  { %v2635_v17 = vsel %vm2300_vm2, %v2189_v32, 0.0  ;;  %v2181_v32 = vmul.f32 %v1925_v24, %v8671_v12  ;;  %v1927_v12 = vld [vmem:[%s11338_s2 + $0x458] sm:$0xff]  ;;  %v1928_v24 = vld [vmem:[%s11338_s2 + $0x460] sm:$0xff] }
 0x5ba   :  { %v2634_v0 = vsel %vm2300_vm2, %v2188_v61, 0.0  ;;  %v2609_v55 = vadd.f32 %v2608_v39, %v2607_v34  ;;  %v2612_v1 = vsel %vm2300_vm2, %v2180_v27, 0.0  ;;  %v11670_v27 = vld [vmem:[#allocation151_spill] sm:$0xff] }
 0x5bb   :  { %1235 = vperm.xlu2 %6569, %v11661_v8   ;;  %v2636_v43 = vadd.f32 %v2635_v17, %v2634_v0  ;;  %v2614_v17 = vsel %vm2300_vm2, %v2181_v32, 0.0 }
 0x5bc   :  { %1253 = vperm.xlu1 %6572, %v11661_v8   ;;  %v2611_v21 = vadd.f32 %v2610_v30, %v2609_v55  ;;  %v1930_v55 = vld [vmem:[%s11338_s2 + $0x470] sm:$0xff] }
 0x5be   :  { %v1133_v15 = vpop.permute.xlu1 %1132  ;;  %v2613_v25 = vadd.f32 %v2612_v1, %v2611_v21  ;;  %v1108_v21 = vpop.permute.xlu0 %1107 }
 0x5bf   :  { %v1127_v52 = vpop.permute.xlu2 %1126  ;;  %v2191_v47 = vmul.f32 %v1935_v41, %v1133_v15  ;;  %v1938_v41 = vld [vmem:[%s11338_s2 + $0x4b0] sm:$0xff] }
 0x5c0   :  { %v2190_v4 = vmul.f32 %v1934_v36, %v1127_v52  ;;  %v1936_v52 = vld [vmem:[%s11338_s2 + $0x4a0] sm:$0xff] }
 0x5c1   :  { %v2639_v18 = vsel %vm2300_vm2, %v2191_v47, 0.0  ;;  %v2192_v7 = vmul.f32 %v1936_v52, %v11669_v2  ;;  %v1940_v52 = vld [vmem:[%s11338_s2 + $0x4c0] sm:$0xff] }
 0x5c2   :  { %v2637_v15 = vsel %vm2300_vm2, %v2190_v4, 0.0  ;;  %v1926_v4 = vld [vmem:[%s11338_s2 + $0x450] sm:$0xff] }
 0x5c3   :  { %6571 = vset.pattern.permute.xlu2 %v7173_v42  ;;  %v2638_v14 = vadd.f32 %v2637_v15, %v2636_v43  ;;  %v2182_v0 = vmul.f32 %v1926_v4, %v11670_v27  ;;  %v2183_v15 = vmul.f32 %v1927_v12, %v8673_v46  ;;  %v2615_v43 = vadd.f32 %v2614_v17, %v2613_v25  ;;  %v1931_v4 = vld [vmem:[%s11338_s2 + $0x478] sm:$0xff] }
 0x5c4   :  { %6574 = vset.pattern.permute.xlu1 %v11633_v31  ;;  %v1943_v25 = vld [vmem:[%s11338_s2 + $0x4d8] sm:$0xff] }
 0x5c5   :  { %v2640_v45 = vadd.f32 %v2639_v18, %v2638_v14  ;;  %v2184_v18 = vmul.f32 %v1928_v24, %v8677_v51  ;;  %v2616_v14 = vsel %vm2300_vm2, %v2182_v0, 0.0  ;;  %v1941_v51 = vld [vmem:[%s11338_s2 + $0x4c8] sm:$0xff]  ;;  %v2187_v0 = vmul.f32 %v1931_v4, %v1108_v21  ;;  %v1946_v21 = vld [vmem:[%s11338_s2 + $0x4f0] sm:$0xff] }
 0x5c6   :  { %v1151_v40 = vpop.permute.xlu1 %1150 }
 0x5c7   :  { %v1145_v10 = vpop.permute.xlu2 %1144  ;;  %v2194_v47 = vmul.f32 %v1938_v41, %v1151_v40 }
 0x5c8   :  { %v2193_v61 = vmul.f32 %v1937_v37, %v1145_v10  ;;  %v2641_v10 = vsel %vm2300_vm2, %v2192_v7, 0.0  ;;  %v1929_v37 = vld [vmem:[%s11338_s2 + $0x468] sm:$0xff] }
 0x5c9   :  { %v2642_v30 = vadd.f32 %v2641_v10, %v2640_v45  ;;  %v2645_v2 = vsel %vm2300_vm2, %v2194_v47, 0.0  ;;  %v2185_v41 = vmul.f32 %v1929_v37, %v8679_v11  ;;  %v1942_v45 = vld [vmem:[%s11338_s2 + $0x4d0] sm:$0xff]  ;;  %v2620_v11 = vsel %vm2300_vm2, %v2184_v18, 0.0 }
 0x5ca   :  { %v2643_v40 = vsel %vm2300_vm2, %v2193_v61, 0.0  ;;  %v2617_v61 = vadd.f32 %v2616_v14, %v2615_v43 }
 0x5cb   :  { %1247 = vperm.xlu2 %6571, %v11661_v8   ;;  %v2644_v46 = vadd.f32 %v2643_v40, %v2642_v30  ;;  %v2622_v27 = vsel %vm2300_vm2, %v2185_v41, 0.0  ;;  %v1945_v41 = vld [vmem:[%s11338_s2 + $0x4e8] sm:$0xff] }
 0x5cc   :  { %1271 = vperm.xlu1 %6574, %v11661_v8  }
 0x5cd   :  { %v2646_v12 = vadd.f32 %v2645_v2, %v2644_v46 }
 0x5ce   :  { %v1163_v39 = vpop.permute.xlu1 %1162 }
 0x5cf   :  { %v1157_v36 = vpop.permute.xlu2 %1156  ;;  %v2196_v7 = vmul.f32 %v1940_v52, %v1163_v39  ;;  %v11671_v52 = vld [vmem:[#allocation170_spill] sm:$0xff] }
 0x5d0   :  { %v2195_v34 = vmul.f32 %v1939_v56, %v1157_v36  ;;  %v2618_v36 = vsel %vm2300_vm2, %v2183_v15, 0.0  ;;  %v2186_v56 = vmul.f32 %v1930_v55, %v8683_v5  ;;  %v2197_v39 = vmul.f32 %v1941_v51, %v11671_v52  ;;  %v1944_v5 = vld [vmem:[%s11338_s2 + $0x4e0] sm:$0xff] }
 0x5d1   :  { %v2649_v17 = vsel %vm2300_vm2, %v2196_v7, 0.0  ;;  %v2619_v47 = vadd.f32 %v2618_v36, %v2617_v61  ;;  %v2626_v7 = vsel %vm2300_vm2, %v2187_v0, 0.0 }
 0x5d2   :  { %v2647_v1 = vsel %vm2300_vm2, %v2195_v34, 0.0  ;;  %v2624_v37 = vsel %vm2300_vm2, %v2186_v56, 0.0  ;;  %v2651_v2 = vsel %vm2300_vm2, %v2197_v39, 0.0 }
 0x5d3   :  { %6573 = vset.pattern.permute.xlu2 %v11668_v33  ;;  %v2648_v10 = vadd.f32 %v2647_v1, %v2646_v12  ;;  %v2621_v40 = vadd.f32 %v2620_v11, %v2619_v47  ;;  %v11672_v47 = vld [vmem:[#allocation46_spill] sm:$0xff] }
 0x5d4   :  { %6576 = vset.pattern.permute.xlu1 %v11653_v63 }
 0x5d5   :  { %v2650_v34 = vadd.f32 %v2649_v17, %v2648_v10  ;;  %v2623_v18 = vadd.f32 %v2622_v27, %v2621_v40  ;;  %v2202_v10 = vmul.f32 %v1946_v21, %v11672_v47  ;;  %v1950_v21 = vld [vmem:[%s11338_s2 + $0x510] sm:$0xff]  ;;  %v1951_v47 = vld [vmem:[%s11338_s2 + $0x518] sm:$0xff] }
 0x5d7   :  { %v1175_v32 = vpop.permute.xlu2 %1174  ;;  %v2625_v14 = vadd.f32 %v2624_v37, %v2623_v18  ;;  %v2661_v27 = vsel %vm2300_vm2, %v2202_v10, 0.0  ;;  %v11673_v37 = vld [vmem:[#allocation12_spill] sm:$0xff]  ;;  %v1952_v10 = vld [vmem:[%s11338_s2 + $0x520] sm:$0xff] }
 0x5d8   :  { %v2198_v15 = vmul.f32 %v1942_v45, %v1175_v32  ;;  %v2652_v32 = vadd.f32 %v2651_v2, %v2650_v34 }
 0x5d9   :  { %v2627_v1 = vadd.f32 %v2626_v7, %v2625_v14 }
 0x5da   :  { %v2653_v55 = vsel %vm2300_vm2, %v2198_v15, 0.0 }
 0x5db   :  { %1265 = vperm.xlu2 %6573, %v11661_v8   ;;  %v2654_v51 = vadd.f32 %v2653_v55, %v2652_v32  ;;  %v2628_v11 = vrot.slane %v2627_v1, 4 }
 0x5dc   :  { %1283 = vperm.xlu1 %6576, %v11661_v8  }
 0x5dd   :  { %v2629_v52 = vadd.f32 %v2628_v11, %v2627_v1 }
 0x5de   :  { %v1181_v24 = vpop.permute.xlu1 %1180 }
 0x5df   :  { %v2199_v30 = vmul.f32 %v1943_v25, %v1181_v24  ;;  %v1947_v24 = vld [vmem:[%s11338_s2 + $0x4f8] sm:$0xff]  ;;  %v2630_v34 = vrot.slane %v2629_v52, 2 }
 0x5e1   :  { %v2655_v36 = vsel %vm2300_vm2, %v2199_v30, 0.0  ;;  %v2631_v30 = vadd.f32 %v2630_v34, %v2629_v52 }
 0x5e2   :  { %v2656_v12 = vadd.f32 %v2655_v36, %v2654_v51  ;;  %v1949_v51 = vld [vmem:[%s11338_s2 + $0x508] sm:$0xff] }
 0x5e3   :  { %6575 = vset.pattern.permute.xlu2 %v7203_v48  ;;  %v2632_v7 = vrot.slane %v2631_v30, 1 }
 0x5e4   :  { %6578 = vset.pattern.permute.xlu1 %v7206_v49 }
 0x5e5   :  { %v1187_v43 = vpop.permute.xlu2 %1186  ;;  %v2633_v14 = vadd.f32 %v2632_v7, %v2631_v30  ;;  %v1955_v30 = vld [vmem:[%s11338_s2 + $0x538] sm:$0xff] }
 0x5e6   :  { %v2200_v46 = vmul.f32 %v1944_v5, %v1187_v43 }
 0x5e8   :  { %v2657_v61 = vsel %vm2300_vm2, %v2200_v46, 0.0 }
 0x5e9   :  { %v2658_v56 = vadd.f32 %v2657_v61, %v2656_v12 }
 0x5eb   :  { %1277 = vperm.xlu2 %6575, %v11661_v8  }
 0x5ec   :  { %1301 = vperm.xlu1 %6578, %v11661_v8  }
 0x5ee   :  { %v1193_v4 = vpop.permute.xlu1 %1192 }
 0x5ef   :  { %v2201_v45 = vmul.f32 %v1945_v41, %v1193_v4  ;;  %v1948_v4 = vld [vmem:[%s11338_s2 + $0x500] sm:$0xff] }
 0x5f1   :  { %v2659_v17 = vsel %vm2300_vm2, %v2201_v45, 0.0 }
 0x5f2   :  { %v2660_v25 = vadd.f32 %v2659_v17, %v2658_v56 }
 0x5f3   :  { %6577 = vset.pattern.permute.xlu2 %v7215_v50 }
 0x5f4   :  { %6580 = vset.pattern.permute.xlu1 %v7120_v60  ;;  %v2662_v15 = vadd.f32 %v2661_v27, %v2660_v25  ;;  %v1953_v27 = vld [vmem:[%s11338_s2 + $0x528] sm:$0xff] }
 0x5f5   :  { %v1205_v39 = vpop.permute.xlu2 %1204 }
 0x5f6   :  { %v2203_v0 = vmul.f32 %v1947_v24, %v1205_v39 }
 0x5f8   :  { %v2663_v40 = vsel %vm2300_vm2, %v2203_v0, 0.0  ;;  %v11674_v0 = vld [vmem:[#allocation69_spill] sm:$0xff] }
 0x5f9   :  { %v2664_v5 = vadd.f32 %v2663_v40, %v2662_v15  ;;  %v2207_v15 = vmul.f32 %v1951_v47, %v11674_v0 }
 0x5fb   :  { %v2665_v43 = vrot.slane %v2664_v5, 4  ;;  %1295 = vperm.xlu2 %6577, %v11661_v8  }
 0x5fc   :  { %1314 = vperm.xlu1 %6580, %v11673_v37  }
 0x5fd   :  { %v2666_v18 = vadd.f32 %v2665_v43, %v2664_v5  ;;  %v1954_v5 = vld [vmem:[%s11338_s2 + $0x530] sm:$0xff] }
 0x5fe   :  { %v1212_v8 = vpop.permute.xlu1 %1211 }
 0x5ff   :  { %v2667_v2 = vrot.slane %v2666_v18, 2  ;;  %v2204_v45 = vmul.f32 %v1948_v4, %v1212_v8  ;;  %v1957_v4 = vld [vmem:[%s11338_s2 + $0x548] sm:$0xff] }
 0x601   :  { %v2668_v55 = vadd.f32 %v2667_v2, %v2666_v18  ;;  %v2671_v24 = vsel %vm2300_vm2, %v2204_v45, 0.0  ;;  %v2676_v2 = vsel %vm2300_vm2, %v2207_v15, 0.0  ;;  %v1958_v45 = vld [vmem:[%s11338_s2 + $0x550] sm:$0xff] }
 0x603   :  { %v2669_v46 = vrot.slane %v2668_v55, 1  ;;  %6579 = vset.pattern.permute.xlu2 %v7113_v58 }
 0x604   :  { %6582 = vset.pattern.permute.xlu1 %v11665_v22 }
 0x605   :  { %v2670_v32 = vadd.f32 %v2669_v46, %v2668_v55  ;;  %v1218_v41 = vpop.permute.xlu2 %1217 }
 0x606   :  { %v2205_v12 = vmul.f32 %v1949_v51, %v1218_v41  ;;  %v1956_v51 = vld [vmem:[%s11338_s2 + $0x540] sm:$0xff] }
 0x607   :  { %v8849_v36 = vsel %vm2909_vm3, %v2670_v32, %v2633_v14 }
 0x608   :  { %v2672_v17 = vsel %vm2300_vm2, %v2205_v12, 0.0 }
 0x609   :  { %v2673_v39 = vadd.f32 %v2672_v17, %v2671_v24 }
 0x60b   :  { %1308 = vperm.xlu2 %6579, %v11673_v37  }
 0x60c   :  { %1332 = vperm.xlu1 %6582, %v11673_v37  }
 0x60e   :  { %v1224_v1 = vpop.permute.xlu1 %1223 }
 0x60f   :  { %v2206_v11 = vmul.f32 %v1950_v21, %v1224_v1 }
 0x611   :  { %v2674_v52 = vsel %vm2300_vm2, %v2206_v11, 0.0 }
 0x612   :  { %v2675_v34 = vadd.f32 %v2674_v52, %v2673_v39 }
 0x613   :  { %6581 = vset.pattern.permute.xlu2 %v7134_v19 }
 0x614   :  { %6584 = vset.pattern.permute.xlu1 %v7173_v42  ;;  %v2677_v46 = vadd.f32 %v2676_v2, %v2675_v34  ;;  %v1961_v34 = vld [vmem:[%s11338_s2 + $0x568] sm:$0xff] }
 0x615   :  { %v1236_v61 = vpop.permute.xlu2 %1235 }
 0x616   :  { %v2208_v40 = vmul.f32 %v1952_v10, %v1236_v61 }
 0x618   :  { %v2678_v7 = vsel %vm2300_vm2, %v2208_v40, 0.0 }
 0x619   :  { %v2679_v41 = vadd.f32 %v2678_v7, %v2677_v46  ;;  %v2217_v7 = vmul.f32 %v1961_v34, %v8358_v26  ;;  %v11676_v26 = vld [vmem:[#allocation37_spill] sm:$0xff] }
 0x61b   :  { %1326 = vperm.xlu2 %6581, %v11673_v37  }
 0x61c   :  { %1344 = vperm.xlu1 %6584, %v11673_v37  }
 0x61e   :  { %v1242_v56 = vpop.permute.xlu1 %1241 }
 0x61f   :  { %v2209_v43 = vmul.f32 %v1953_v27, %v1242_v56  ;;  %v11675_v56 = vld [vmem:[#allocation139_spill] sm:$0xff] }
 0x620   :  { %v2212_v17 = vmul.f32 %v1956_v51, %v11675_v56 }
 0x621   :  { %v2680_v32 = vsel %vm2300_vm2, %v2209_v43, 0.0  ;;  %v1960_v43 = vld [vmem:[%s11338_s2 + $0x560] sm:$0xff] }
 0x622   :  { %v2681_v61 = vadd.f32 %v2680_v32, %v2679_v41  ;;  %v2686_v39 = vsel %vm2300_vm2, %v2212_v17, 0.0 }
 0x623   :  { %6583 = vset.pattern.permute.xlu2 %v11609_v38 }
 0x624   :  { %6586 = vset.pattern.permute.xlu1 %v11668_v33 }
 0x625   :  { %v1248_v25 = vpop.permute.xlu2 %1247 }
 0x626   :  { %v2210_v55 = vmul.f32 %v1954_v5, %v1248_v25  ;;  %v1959_v25 = vld [vmem:[%s11338_s2 + $0x558] sm:$0xff] }
 0x628   :  { %v2682_v1 = vsel %vm2300_vm2, %v2210_v55, 0.0 }
 0x629   :  { %v2683_v12 = vadd.f32 %v2682_v1, %v2681_v61  ;;  %v1962_v1 = vld [vmem:[%s11338_s2 + $0x570] sm:$0xff] }
 0x62b   :  { %1338 = vperm.xlu2 %6583, %v11673_v37  }
 0x62c   :  { %1362 = vperm.xlu1 %6586, %v11673_v37  }
 0x62e   :  { %v1254_v18 = vpop.permute.xlu1 %1253 }
 0x62f   :  { %v2211_v8 = vmul.f32 %v1955_v30, %v1254_v18 }
 0x631   :  { %v2684_v21 = vsel %vm2300_vm2, %v2211_v8, 0.0  ;;  %v2696_v8 = vsel %vm2300_vm2, %v2217_v7, 0.0 }
 0x632   :  { %v2685_v10 = vadd.f32 %v2684_v21, %v2683_v12 }
 0x633   :  { %6585 = vset.pattern.permute.xlu2 %v7261_v62 }
 0x634   :  { %6588 = vset.pattern.permute.xlu1 %v7203_v48  ;;  %v2687_v15 = vadd.f32 %v2686_v39, %v2685_v10 }
 0x635   :  { %v1266_v14 = vpop.permute.xlu2 %1265 }
 0x636   :  { %v2213_v47 = vmul.f32 %v1957_v4, %v1266_v14  ;;  %v1963_v4 = vld [vmem:[%s11338_s2 + $0x578] sm:$0xff] }
 0x638   :  { %v2688_v27 = vsel %vm2300_vm2, %v2213_v47, 0.0 }
 0x639   :  { %v2689_v5 = vadd.f32 %v2688_v27, %v2687_v15 }
 0x63b   :  { %1356 = vperm.xlu2 %6585, %v11673_v37  }
 0x63c   :  { %1374 = vperm.xlu1 %6588, %v11673_v37  }
 0x63e   :  { %v1272_v11 = vpop.permute.xlu1 %1271 }
 0x63f   :  { %v2214_v52 = vmul.f32 %v1958_v45, %v1272_v11 }
 0x641   :  { %v2690_v40 = vsel %vm2300_vm2, %v2214_v52, 0.0 }
 0x642   :  { %v2691_v18 = vadd.f32 %v2690_v40, %v2689_v5 }
 0x643   :  { %6587 = vset.pattern.permute.xlu2 %v11633_v31 }
 0x644   :  { %6590 = vset.pattern.permute.xlu1 %v7215_v50 }
 0x645   :  { %v1278_v24 = vpop.permute.xlu2 %1277 }
 0x646   :  { %v2215_v0 = vmul.f32 %v1959_v25, %v1278_v24 }
 0x648   :  { %v2692_v30 = vsel %vm2300_vm2, %v2215_v0, 0.0 }
 0x649   :  { %v2693_v46 = vadd.f32 %v2692_v30, %v2691_v18 }
 0x64b   :  { %1368 = vperm.xlu2 %6587, %v11673_v37  }
 0x64c   :  { %1392 = vperm.xlu1 %6590, %v11673_v37  }
 0x64e   :  { %v1284_v2 = vpop.permute.xlu1 %1283 }
 0x64f   :  { %v2216_v55 = vmul.f32 %v1960_v43, %v1284_v2 }
 0x651   :  { %v2694_v14 = vsel %vm2300_vm2, %v2216_v55, 0.0 }
 0x652   :  { %v2695_v32 = vadd.f32 %v2694_v14, %v2693_v46 }
 0x653   :  { %6589 = vset.pattern.permute.xlu2 %v7291_v16 }
 0x654   :  { %6592 = vset.pattern.permute.xlu1 %v7113_v58  ;;  %v2697_v41 = vadd.f32 %v2696_v8, %v2695_v32  ;;  %v1980_v32 = vld [vmem:[%s11338_s2 + $0x600] sm:$0xff] }
 0x655   :  { %v1296_v51 = vpop.permute.xlu2 %1295 }
 0x656   :  { %v2218_v61 = vmul.f32 %v1962_v1, %v1296_v51  ;;  %v1982_v1 = vld [vmem:[%s11338_s2 + $0x610] sm:$0xff] }
 0x658   :  { %v2698_v21 = vsel %vm2300_vm2, %v2218_v61, 0.0  ;;  %v1965_v61 = vld [vmem:[%s11338_s2 + $0x588] sm:$0xff] }
 0x659   :  { %v2699_v11 = vadd.f32 %v2698_v21, %v2697_v41  ;;  %v1981_v41 = vld [vmem:[%s11338_s2 + $0x608] sm:$0xff]  ;;  %v11677_v21 = vld [vmem:[#allocation52_spill] sm:$0xff] }
 0x65b   :  { %1386 = vperm.xlu2 %6589, %v11673_v37  }
 0x65c   :  { %1405 = vperm.xlu1 %6592, %v11676_v26  }
 0x65e   :  { %v1302_v12 = vpop.permute.xlu1 %1301 }
 0x65f   :  { %v2219_v45 = vmul.f32 %v1963_v4, %v1302_v12  ;;  %v1983_v4 = vld [vmem:[%s11338_s2 + $0x618] sm:$0xff]  ;;  %v2237_v12 = vmul.f32 %v1981_v41, %v11677_v21 }
 0x661   :  { %v2700_v56 = vsel %vm2300_vm2, %v2219_v45, 0.0  ;;  %v1964_v45 = vld [vmem:[%s11338_s2 + $0x580] sm:$0xff] }
 0x662   :  { %v2701_v17 = vadd.f32 %v2700_v56, %v2699_v11 }
 0x663   :  { %6591 = vset.pattern.permute.xlu2 %v7206_v49 }
 0x664   :  { %v2702_v47 = vrot.slane %v2701_v17, 4  ;;  %6594 = vset.pattern.permute.xlu1 %v7134_v19 }
 0x666   :  { %v2703_v10 = vadd.f32 %v2702_v47, %v2701_v17  ;;  %v1984_v17 = vld [vmem:[%s11338_s2 + $0x620] sm:$0xff] }
 0x668   :  { %v2704_v25 = vrot.slane %v2703_v10, 2 }
 0x66a   :  { %v2705_v24 = vadd.f32 %v2704_v25, %v2703_v10 }
 0x66b   :  { %1398 = vperm.xlu2 %6591, %v11673_v37   ;;  %v1309_v37 = vpop.permute.xlu2 %1308 }
 0x66c   :  { %v2706_v52 = vrot.slane %v2705_v24, 1  ;;  %1423 = vperm.xlu1 %6594, %v11676_v26   ;;  %v2220_v25 = vmul.f32 %v1964_v45, %v1309_v37 }
 0x66e   :  { %v2707_v39 = vadd.f32 %v2706_v52, %v2705_v24  ;;  %v1985_v24 = vld [vmem:[%s11338_s2 + $0x628] sm:$0xff] }
 0x670   :  { %v8946_v27 = vsel %vm2911_vm4, %v2707_v39, %v8849_v36  ;;  %v1315_v36 = vpop.permute.xlu1 %1314  ;;  %v2746_v39 = vsel %vm2300_vm2, %v2237_v12, 0.0  ;;  %v2708_v12 = vsel %vm2300_vm2, %v2220_v25, 0.0 }
 0x671   :  { %v2221_v56 = vmul.f32 %v1965_v61, %v1315_v36  ;;  %v1966_v36 = vld [vmem:[%s11338_s2 + $0x590] sm:$0xff] }
 0x673   :  { %6593 = vset.pattern.permute.xlu2 %v7117_v59 }
 0x674   :  { %6596 = vset.pattern.permute.xlu1 %v11609_v38 }
 0x675   :  { %v1327_v0 = vpop.permute.xlu2 %1326 }
 0x67b   :  { %1417 = vperm.xlu2 %6593, %v11676_v26  }
 0x67c   :  { %1435 = vperm.xlu1 %6596, %v11676_v26  }
 0x67e   :  { %v8969_v15 = vpop.permute.xlu1 %1332 }
 0x683   :  { %6595 = vset.pattern.permute.xlu2 %v11665_v22 }
 0x684   :  { %6598 = vset.pattern.permute.xlu1 %v7261_v62 }
 0x685   :  { %v8972_v40 = vpop.permute.xlu2 %1338 }
 0x68b   :  { %1429 = vperm.xlu2 %6595, %v11676_v26  }
 0x68c   :  { %1453 = vperm.xlu1 %6598, %v11676_v26  }
 0x68e   :  { %v8975_v34 = vpop.permute.xlu1 %1344 }
 0x693   :  { %6597 = vset.pattern.permute.xlu2 %v7137_v20 }
 0x694   :  { %6600 = vset.pattern.permute.xlu1 %v11633_v31 }
 0x695   :  { %v8978_v5 = vpop.permute.xlu2 %1356 }
 0x69b   :  { %1447 = vperm.xlu2 %6597, %v11676_v26  }
 0x69c   :  { %1465 = vperm.xlu1 %6600, %v11676_v26  }
 0x69e   :  { %v8981_v43 = vpop.permute.xlu1 %1362 }
 0x6a3   :  { %6599 = vset.pattern.permute.xlu2 %v11668_v33 }
 0x6a4   :  { %6602 = vset.pattern.permute.xlu1 %v7291_v16 }
 0x6a5   :  { %v8984_v30 = vpop.permute.xlu2 %1368 }
 0x6ab   :  { %1459 = vperm.xlu2 %6599, %v11676_v26  }
 0x6ac   :  { %1483 = vperm.xlu1 %6602, %v11676_v26  }
 0x6ae   :  { %v8987_v18 = vpop.permute.xlu1 %1374 }
 0x6b3   :  { %6601 = vset.pattern.permute.xlu2 %v11653_v63 }
 0x6b4   :  { %6604 = vset.pattern.permute.xlu1 %v7206_v49 }
 0x6b5   :  { %v8990_v2 = vpop.permute.xlu2 %1386 }
 0x6bb   :  { %1477 = vperm.xlu2 %6601, %v11676_v26  }
 0x6bc   :  { %1495 = vperm.xlu1 %6604, %v11676_v26  }
 0x6be   :  { %v8993_v7 = vpop.permute.xlu1 %1392 }
 0x6c3   :  { %6603 = vset.pattern.permute.xlu2 %v7215_v50 }
 0x6c4   :  { %6606 = vset.pattern.permute.xlu1 %v7117_v59 }
 0x6c5   :  { %v8996_v55 = vpop.permute.xlu2 %1398 }
 0x6cb   :  { %1489 = vperm.xlu2 %6603, %v11676_v26  }
 0x6cc   :  { %1514 = vperm.xlu1 %6606, %v7239_v53  }
 0x6ce   :  { %v1406_v46 = vpop.permute.xlu1 %1405 }
 0x6cf   :  { %v2236_v26 = vmul.f32 %v1980_v32, %v1406_v46  ;;  %v1967_v46 = vld [vmem:[%s11338_s2 + $0x598] sm:$0xff]  ;;  %v2709_v32 = vsel %vm2300_vm2, %v2221_v56, 0.0  ;;  %v1986_v56 = vld [vmem:[%s11338_s2 + $0x630] sm:$0xff] }
 0x6d0   :  { %v2223_v45 = vmul.f32 %v1967_v46, %v1327_v0  ;;  %v2710_v44 = vadd.f32 %v2709_v32, %v2708_v12  ;;  %v1970_v0 = vld [vmem:[%s11338_s2 + $0x5b0] sm:$0xff]  ;;  %v11679_v46 = vld [vmem:[#allocation121_spill] sm:$0xff] }
 0x6d1   :  { %v2745_v47 = vsel %vm2300_vm2, %v2236_v26, 0.0 }
 0x6d3   :  { %6605 = vset.pattern.permute.xlu2 %v7120_v60 }
 0x6d4   :  { %6608 = vset.pattern.permute.xlu1 %v11665_v22 }
 0x6d5   :  { %v1418_v14 = vpop.permute.xlu2 %1417 }
 0x6d6   :  { %v2238_v11 = vmul.f32 %v1982_v1, %v1418_v14  ;;  %v1968_v1 = vld [vmem:[%s11338_s2 + $0x5a0] sm:$0xff] }
 0x6d8   :  { %v2748_v14 = vsel %vm2300_vm2, %v2238_v11, 0.0 }
 0x6db   :  { %1508 = vperm.xlu2 %6605, %v7239_v53  }
 0x6dc   :  { %1526 = vperm.xlu1 %6608, %v7239_v53  }
 0x6de   :  { %v1424_v8 = vpop.permute.xlu1 %1423 }
 0x6df   :  { %v2239_v10 = vmul.f32 %v1983_v4, %v1424_v8  ;;  %v2747_v8 = vadd.f32 %v2746_v39, %v2745_v47  ;;  %v11678_v4 = vld [vmem:[#allocation62_spill] sm:$0xff] }
 0x6e0   :  { %v2222_v21 = vmul.f32 %v1966_v36, %v11678_v4 }
 0x6e1   :  { %v2750_v61 = vsel %vm2300_vm2, %v2239_v10, 0.0  ;;  %v2749_v6 = vadd.f32 %v2748_v14, %v2747_v8  ;;  %v1987_v10 = vld [vmem:[%s11338_s2 + $0x638] sm:$0xff]  ;;  %v2242_v14 = vmul.f32 %v1986_v56, %v11679_v46  ;;  %v1974_v46 = vld [vmem:[%s11338_s2 + $0x5d0] sm:$0xff] }
 0x6e3   :  { %6607 = vset.pattern.permute.xlu2 %v7134_v19  ;;  %v2751_v47 = vadd.f32 %v2750_v61, %v2749_v6  ;;  %v1988_v6 = vld [vmem:[%s11338_s2 + $0x640] sm:$0xff] }
 0x6e4   :  { %6610 = vset.pattern.permute.xlu1 %v7137_v20 }
 0x6e5   :  { %v1430_v51 = vpop.permute.xlu2 %1429 }
 0x6e6   :  { %v2240_v37 = vmul.f32 %v1984_v17, %v1430_v51  ;;  %v1969_v51 = vld [vmem:[%s11338_s2 + $0x5a8] sm:$0xff]  ;;  %v2224_v17 = vmul.f32 %v1968_v1, %v8969_v15  ;;  %v2226_v1 = vmul.f32 %v1970_v0, %v8975_v34  ;;  %v1972_v34 = vld [vmem:[%s11338_s2 + $0x5c0] sm:$0xff] }
 0x6e7   :  { %v2225_v39 = vmul.f32 %v1969_v51, %v8972_v40  ;;  %v1989_v40 = vld [vmem:[%s11338_s2 + $0x648] sm:$0xff] }
 0x6e8   :  { %v2752_v11 = vsel %vm2300_vm2, %v2240_v37, 0.0  ;;  %v2715_v8 = vsel %vm2300_vm2, %v2224_v17, 0.0  ;;  %v2719_v56 = vsel %vm2300_vm2, %v2226_v1, 0.0  ;;  %v1975_v1 = vld [vmem:[%s11338_s2 + $0x5d8] sm:$0xff] }
 0x6e9   :  { %v2753_v15 = vadd.f32 %v2752_v11, %v2751_v47  ;;  %v2717_v12 = vsel %vm2300_vm2, %v2225_v39, 0.0  ;;  %v2228_v39 = vmul.f32 %v1972_v34, %v8978_v5 }
 0x6eb   :  { %1520 = vperm.xlu2 %6607, %v7239_v53  }
 0x6ec   :  { %1544 = vperm.xlu1 %6610, %v7239_v53  }
 0x6ee   :  { %v1436_v52 = vpop.permute.xlu1 %1435 }
 0x6ef   :  { %v2241_v26 = vmul.f32 %v1985_v24, %v1436_v52  ;;  %v2711_v24 = vsel %vm2300_vm2, %v2222_v21, 0.0  ;;  %v2713_v52 = vsel %vm2300_vm2, %v2223_v45, 0.0  ;;  %v1971_v45 = vld [vmem:[%s11338_s2 + $0x5b8] sm:$0xff] }
 0x6f0   :  { %v2712_v37 = vadd.f32 %v2711_v24, %v2710_v44  ;;  %v2756_v44 = vsel %vm2300_vm2, %v2242_v14, 0.0 }
 0x6f1   :  { %v2754_v25 = vsel %vm2300_vm2, %v2241_v26, 0.0 }
 0x6f2   :  { %v2755_v61 = vadd.f32 %v2754_v25, %v2753_v15  ;;  %v2714_v4 = vadd.f32 %v2713_v52, %v2712_v37  ;;  %v11680_v25 = vld [vmem:[#allocation22_spill] sm:$0xff]  ;;  %v1991_v52 = vld [vmem:[%s11338_s2 + $0x658] sm:$0xff] }
 0x6f3   :  { %6609 = vset.pattern.permute.xlu2 %v7173_v42  ;;  %v2227_v24 = vmul.f32 %v1971_v45, %v11680_v25  ;;  %v2247_v5 = vmul.f32 %v1991_v52, %v8060_v29 }
 0x6f4   :  { %6612 = vset.pattern.permute.xlu1 %v11668_v33  ;;  %v2757_v17 = vadd.f32 %v2756_v44, %v2755_v61  ;;  %v2231_v44 = vmul.f32 %v1975_v1, %v8987_v18  ;;  %v1977_v18 = vld [vmem:[%s11338_s2 + $0x5e8] sm:$0xff] }
 0x6f5   :  { %v1448_v41 = vpop.permute.xlu2 %1447 }
 0x6f6   :  { %v2243_v32 = vmul.f32 %v1987_v10, %v1448_v41  ;;  %v2716_v41 = vadd.f32 %v2715_v8, %v2714_v4  ;;  %v1973_v10 = vld [vmem:[%s11338_s2 + $0x5c8] sm:$0xff]  ;;  %v2230_v4 = vmul.f32 %v1974_v46, %v8984_v30  ;;  %v1976_v30 = vld [vmem:[%s11338_s2 + $0x5e0] sm:$0xff] }
 0x6f7   :  { %v2229_v37 = vmul.f32 %v1973_v10, %v8981_v43  ;;  %v1978_v10 = vld [vmem:[%s11338_s2 + $0x5f0] sm:$0xff] }
 0x6f8   :  { %v2758_v51 = vsel %vm2300_vm2, %v2243_v32, 0.0  ;;  %v2718_v47 = vadd.f32 %v2717_v12, %v2716_v41  ;;  %v2766_v41 = vsel %vm2300_vm2, %v2247_v5, 0.0 }
 0x6f9   :  { %v2759_v15 = vadd.f32 %v2758_v51, %v2757_v17  ;;  %v2725_v43 = vsel %vm2300_vm2, %v2229_v37, 0.0  ;;  %v2727_v51 = vsel %vm2300_vm2, %v2230_v4, 0.0  ;;  %v2729_v17 = vsel %vm2300_vm2, %v2231_v44, 0.0 }
 0x6fb   :  { %1538 = vperm.xlu2 %6609, %v7239_v53  }
 0x6fc   :  { %1556 = vperm.xlu1 %6612, %v7239_v53  }
 0x6fe   :  { %v1454_v36 = vpop.permute.xlu1 %1453 }
 0x6ff   :  { %v2244_v21 = vmul.f32 %v1988_v6, %v1454_v36  ;;  %v1990_v6 = vld [vmem:[%s11338_s2 + $0x650] sm:$0xff]  ;;  %v2720_v36 = vadd.f32 %v2719_v56, %v2718_v47 }
 0x701   :  { %v2760_v0 = vsel %vm2300_vm2, %v2244_v21, 0.0 }
 0x702   :  { %v2761_v32 = vadd.f32 %v2760_v0, %v2759_v15  ;;  %v11681_v0 = vld [vmem:[#allocation31_spill] sm:$0xff]  ;;  %v2234_v15 = vmul.f32 %v1978_v10, %v8993_v7  ;;  %v1992_v7 = vld [vmem:[%s11338_s2 + $0x660] sm:$0xff] }
 0x703   :  { %6611 = vset.pattern.permute.xlu2 %v7261_v62  ;;  %v2232_v25 = vmul.f32 %v1976_v30, %v11681_v0 }
 0x704   :  { %6614 = vset.pattern.permute.xlu1 %v11653_v63 }
 0x705   :  { %v1460_v26 = vpop.permute.xlu2 %1459 }
 0x706   :  { %v2245_v11 = vmul.f32 %v1989_v40, %v1460_v26  ;;  %v2721_v40 = vsel %vm2300_vm2, %v2227_v24, 0.0  ;;  %v2723_v26 = vsel %vm2300_vm2, %v2228_v39, 0.0  ;;  %v2233_v24 = vmul.f32 %v1977_v18, %v8990_v2  ;;  %v1979_v39 = vld [vmem:[%s11338_s2 + $0x5f8] sm:$0xff] }
 0x707   :  { %v2722_v12 = vadd.f32 %v2721_v40, %v2720_v36  ;;  %v2235_v46 = vmul.f32 %v1979_v39, %v8996_v55  ;;  %v2735_v2 = vsel %vm2300_vm2, %v2234_v15, 0.0  ;;  %v1993_v55 = vld [vmem:[%s11338_s2 + $0x668] sm:$0xff] }
 0x708   :  { %v2762_v14 = vsel %vm2300_vm2, %v2245_v11, 0.0  ;;  %v2733_v36 = vsel %vm2300_vm2, %v2233_v24, 0.0 }
 0x709   :  { %v2763_v21 = vadd.f32 %v2762_v14, %v2761_v32  ;;  %v2724_v34 = vadd.f32 %v2723_v26, %v2722_v12  ;;  %v1994_v26 = vld [vmem:[%s11338_s2 + $0x670] sm:$0xff] }
 0x70b   :  { %1550 = vperm.xlu2 %6611, %v7239_v53   ;;  %v2726_v56 = vadd.f32 %v2725_v43, %v2724_v34  ;;  %v11682_v34 = vld [vmem:[#allocation23_spill] sm:$0xff] }
 0x70c   :  { %1574 = vperm.xlu1 %6614, %v7239_v53  }
 0x70d   :  { %v2728_v47 = vadd.f32 %v2727_v51, %v2726_v56  ;;  %v1995_v51 = vld [vmem:[%s11338_s2 + $0x678] sm:$0xff] }
 0x70e   :  { %v1466_v8 = vpop.permute.xlu1 %1465 }
 0x70f   :  { %v2246_v61 = vmul.f32 %v1990_v6, %v1466_v8  ;;  %v2730_v52 = vadd.f32 %v2729_v17, %v2728_v47  ;;  %v2731_v6 = vsel %vm2300_vm2, %v2232_v25, 0.0  ;;  %v2737_v8 = vsel %vm2300_vm2, %v2235_v46, 0.0 }
 0x711   :  { %v2764_v45 = vsel %vm2300_vm2, %v2246_v61, 0.0  ;;  %v2732_v14 = vadd.f32 %v2731_v6, %v2730_v52 }
 0x712   :  { %v2765_v29 = vadd.f32 %v2764_v45, %v2763_v21 }
 0x713   :  { %6613 = vset.pattern.permute.xlu2 %v7203_v48  ;;  %v2734_v32 = vadd.f32 %v2733_v36, %v2732_v14 }
 0x714   :  { %6616 = vset.pattern.permute.xlu1 %v7215_v50  ;;  %v2767_v11 = vadd.f32 %v2766_v41, %v2765_v29 }
 0x715   :  { %v1478_v37 = vpop.permute.xlu2 %1477  ;;  %v2736_v5 = vadd.f32 %v2735_v2, %v2734_v32 }
 0x716   :  { %v2248_v40 = vmul.f32 %v1992_v7, %v1478_v37  ;;  %v1998_v7 = vld [vmem:[%s11338_s2 + $0x690] sm:$0xff] }
 0x717   :  { %v2738_v1 = vadd.f32 %v2737_v8, %v2736_v5  ;;  %v1997_v8 = vld [vmem:[%s11338_s2 + $0x688] sm:$0xff]  ;;  %v1996_v5 = vld [vmem:[%s11338_s2 + $0x680] sm:$0xff] }
 0x718   :  { %v2768_v45 = vsel %vm2300_vm2, %v2248_v40, 0.0 }
 0x719   :  { %v2739_v21 = vrot.slane %v2738_v1, 4  ;;  %v2769_v41 = vadd.f32 %v2768_v45, %v2767_v11 }
 0x71b   :  { %1568 = vperm.xlu2 %6613, %v7239_v53   ;;  %v2740_v44 = vadd.f32 %v2739_v21, %v2738_v1 }
 0x71c   :  { %1586 = vperm.xlu1 %6616, %v7239_v53  }
 0x71d   :  { %v2741_v17 = vrot.slane %v2740_v44, 2 }
 0x71e   :  { %v1484_v61 = vpop.permute.xlu1 %1483 }
 0x71f   :  { %v2249_v12 = vmul.f32 %v1993_v55, %v1484_v61  ;;  %v2742_v24 = vadd.f32 %v2741_v17, %v2740_v44  ;;  %v1999_v61 = vld [vmem:[%s11338_s2 + $0x698] sm:$0xff] }
 0x721   :  { %v2770_v29 = vsel %vm2300_vm2, %v2249_v12, 0.0  ;;  %v2743_v52 = vrot.slane %v2742_v24, 1  ;;  %v2000_v12 = vld [vmem:[%s11338_s2 + $0x6a0] sm:$0xff] }
 0x722   :  { %v2771_v56 = vadd.f32 %v2770_v29, %v2769_v41 }
 0x723   :  { %6615 = vset.pattern.permute.xlu2 %v7291_v16  ;;  %v2744_v6 = vadd.f32 %v2743_v52, %v2742_v24  ;;  %v2003_v24 = vld [vmem:[%s11338_s2 + $0x6b8] sm:$0xff] }
 0x724   :  { %6618 = vset.pattern.permute.xlu1 %v7120_v60 }
 0x725   :  { %v1490_v4 = vpop.permute.xlu2 %1489  ;;  %v2925_v14 = vsel %vm2913_vm5, %v2744_v6, %v8946_v27 }
 0x726   :  { %v2250_v43 = vmul.f32 %v1994_v26, %v1490_v4  ;;  %v11683_v26 = vld [vmem:[#allocation39_spill] sm:$0xff] }
 0x727   :  { %v2252_v4 = vmul.f32 %v1996_v5, %v11683_v26  ;;  %v2007_v26 = vld [vmem:[%s11338_s2 + $0x6d8] sm:$0xff] }
 0x728   :  { %v2772_v30 = vsel %vm2300_vm2, %v2250_v43, 0.0 }
 0x729   :  { %v2773_v10 = vadd.f32 %v2772_v30, %v2771_v56  ;;  %v2782_v44 = vsel %vm2300_vm2, %v2252_v4, 0.0 }
 0x72b   :  { %1580 = vperm.xlu2 %6615, %v7239_v53  }
 0x72c   :  { %1605 = vperm.xlu1 %6618, %v11682_v34  }
 0x72e   :  { %v1496_v18 = vpop.permute.xlu1 %1495 }
 0x72f   :  { %v2251_v47 = vmul.f32 %v1995_v51, %v1496_v18  ;;  %v2001_v18 = vld [vmem:[%s11338_s2 + $0x6a8] sm:$0xff] }
 0x731   :  { %v2774_v0 = vsel %vm2300_vm2, %v2251_v47, 0.0  ;;  %v2002_v47 = vld [vmem:[%s11338_s2 + $0x6b0] sm:$0xff] }
 0x732   :  { %v2775_v25 = vadd.f32 %v2774_v0, %v2773_v10 }
 0x733   :  { %6617 = vset.pattern.permute.xlu2 %v7113_v58 }
 0x734   :  { %v2776_v53 = vrot.slane %v2775_v25, 4  ;;  %6620 = vset.pattern.permute.xlu1 %v7134_v19 }
 0x735   :  { %v1509_v27 = vpop.permute.xlu2 %1508 }
 0x736   :  { %v2777_v11 = vadd.f32 %v2776_v53, %v2775_v25  ;;  %v2253_v55 = vmul.f32 %v1997_v8, %v1509_v27  ;;  %v11684_v53 = vld [vmem:[#allocation101_spill] sm:$0xff] }
 0x738   :  { %v2778_v39 = vrot.slane %v2777_v11, 2  ;;  %v2783_v45 = vsel %vm2300_vm2, %v2253_v55, 0.0 }
 0x739   :  { %v2784_v51 = vadd.f32 %v2783_v45, %v2782_v44 }
 0x73a   :  { %v2779_v15 = vadd.f32 %v2778_v39, %v2777_v11  ;;  %v2257_v11 = vmul.f32 %v2001_v18, %v11684_v53 }
 0x73b   :  { %1599 = vperm.xlu2 %6617, %v11682_v34  }
 0x73c   :  { %v2780_v36 = vrot.slane %v2779_v15, 1  ;;  %1617 = vperm.xlu1 %6620, %v11682_v34  }
 0x73e   :  { %v2781_v46 = vadd.f32 %v2780_v36, %v2779_v15  ;;  %v1515_v37 = vpop.permute.xlu1 %1514  ;;  %v2004_v15 = vld [vmem:[%s11338_s2 + $0x6c0] sm:$0xff]  ;;  %v2005_v36 = vld [vmem:[%s11338_s2 + $0x6c8] sm:$0xff] }
 0x73f   :  { %v2254_v21 = vmul.f32 %v1998_v7, %v1515_v37 }
 0x740   :  { %v9167_v2 = vsel %vm2915_vm6, %v2781_v46, %v2925_v14  ;;  %v2791_v14 = vsel %vm2300_vm2, %v2257_v11, 0.0  ;;  %v11686_v11 = vld [vmem:[#allocation55_spill] sm:$0xff] }
 0x741   :  { %v2785_v29 = vsel %vm2300_vm2, %v2254_v21, 0.0 }
 0x742   :  { %v2786_v17 = vadd.f32 %v2785_v29, %v2784_v51  ;;  %v2009_v51 = vld [vmem:[%s11338_s2 + $0x6e8] sm:$0xff] }
 0x743   :  { %6619 = vset.pattern.permute.xlu2 %v7117_v59 }
 0x744   :  { %6622 = vset.pattern.permute.xlu1 %v7173_v42 }
 0x745   :  { %v1521_v32 = vpop.permute.xlu2 %1520 }
 0x746   :  { %v2255_v43 = vmul.f32 %v1999_v61, %v1521_v32  ;;  %v2006_v61 = vld [vmem:[%s11338_s2 + $0x6d0] sm:$0xff] }
 0x748   :  { %v2787_v56 = vsel %vm2300_vm2, %v2255_v43, 0.0  ;;  %v11685_v43 = vld [vmem:[#allocation154_spill] sm:$0xff] }
 0x749   :  { %v2788_v25 = vadd.f32 %v2787_v56, %v2786_v17  ;;  %v2262_v44 = vmul.f32 %v2006_v61, %v11685_v43  ;;  %v2014_v43 = vld [vmem:[%s11338_s2 + $0x710] sm:$0xff] }
 0x74b   :  { %1611 = vperm.xlu2 %6619, %v11682_v34   ;;  %v2801_v18 = vsel %vm2300_vm2, %v2262_v44, 0.0 }
 0x74c   :  { %1635 = vperm.xlu1 %6622, %v11682_v34  }
 0x74e   :  { %v1527_v1 = vpop.permute.xlu1 %1526 }
 0x74f   :  { %v2256_v41 = vmul.f32 %v2000_v12, %v1527_v1  ;;  %v2008_v12 = vld [vmem:[%s11338_s2 + $0x6e0] sm:$0xff] }
 0x751   :  { %v2789_v0 = vsel %vm2300_vm2, %v2256_v41, 0.0 }
 0x752   :  { %v2790_v39 = vadd.f32 %v2789_v0, %v2788_v25  ;;  %v2011_v25 = vld [vmem:[%s11338_s2 + $0x6f8] sm:$0xff] }
 0x753   :  { %6621 = vset.pattern.permute.xlu2 %v11609_v38 }
 0x754   :  { %6624 = vset.pattern.permute.xlu1 %v7261_v62  ;;  %v2792_v32 = vadd.f32 %v2791_v14, %v2790_v39 }
 0x755   :  { %v1539_v40 = vpop.permute.xlu2 %1538 }
 0x756   :  { %v2258_v52 = vmul.f32 %v2002_v47, %v1539_v40 }
 0x758   :  { %v2793_v27 = vsel %vm2300_vm2, %v2258_v52, 0.0  ;;  %v2010_v52 = vld [vmem:[%s11338_s2 + $0x6f0] sm:$0xff] }
 0x759   :  { %v2794_v1 = vadd.f32 %v2793_v27, %v2792_v32 }
 0x75b   :  { %1629 = vperm.xlu2 %6621, %v11682_v34  }
 0x75c   :  { %1647 = vperm.xlu1 %6624, %v11682_v34  }
 0x75e   :  { %v1545_v30 = vpop.permute.xlu1 %1544 }
 0x75f   :  { %v2259_v6 = vmul.f32 %v2003_v24, %v1545_v30  ;;  %v1593_v24 = vpop.permute.xlu0 %1592 }
 0x761   :  { %v2795_v5 = vsel %vm2300_vm2, %v2259_v6, 0.0 }
 0x762   :  { %v2796_v40 = vadd.f32 %v2795_v5, %v2794_v1 }
 0x763   :  { %6623 = vset.pattern.permute.xlu2 %v7137_v20 }
 0x764   :  { %6626 = vset.pattern.permute.xlu1 %v7203_v48 }
 0x765   :  { %v1551_v10 = vpop.permute.xlu2 %1550 }
 0x766   :  { %v2260_v37 = vmul.f32 %v2004_v15, %v1551_v10 }
 0x768   :  { %v2797_v55 = vsel %vm2300_vm2, %v2260_v37, 0.0 }
 0x769   :  { %v2798_v21 = vadd.f32 %v2797_v55, %v2796_v40 }
 0x76b   :  { %1641 = vperm.xlu2 %6623, %v11682_v34  }
 0x76c   :  { %1665 = vperm.xlu1 %6626, %v11682_v34  }
 0x76e   :  { %v1557_v46 = vpop.permute.xlu1 %1556 }
 0x76f   :  { %v2261_v7 = vmul.f32 %v2005_v36, %v1557_v46  ;;  %v2267_v36 = vmul.f32 %v2011_v25, %v1593_v24  ;;  %v2017_v24 = vld [vmem:[%s11338_s2 + $0x728] sm:$0xff] }
 0x771   :  { %v2799_v4 = vsel %vm2300_vm2, %v2261_v7, 0.0  ;;  %v2811_v32 = vsel %vm2300_vm2, %v2267_v36, 0.0 }
 0x772   :  { %v2800_v41 = vadd.f32 %v2799_v4, %v2798_v21  ;;  %v2013_v21 = vld [vmem:[%s11338_s2 + $0x708] sm:$0xff] }
 0x773   :  { %6625 = vset.pattern.permute.xlu2 %v11633_v31 }
 0x774   :  { %6628 = vset.pattern.permute.xlu1 %v7291_v16  ;;  %v2802_v10 = vadd.f32 %v2801_v18, %v2800_v41  ;;  %v2015_v41 = vld [vmem:[%s11338_s2 + $0x718] sm:$0xff] }
 0x775   :  { %v1569_v8 = vpop.permute.xlu2 %1568 }
 0x776   :  { %v2263_v29 = vmul.f32 %v2007_v26, %v1569_v8 }
 0x778   :  { %v2803_v17 = vsel %vm2300_vm2, %v2263_v29, 0.0 }
 0x779   :  { %v2804_v53 = vadd.f32 %v2803_v17, %v2802_v10 }
 0x77b   :  { %1659 = vperm.xlu2 %6625, %v11682_v34  }
 0x77c   :  { %1677 = vperm.xlu1 %6628, %v11682_v34  }
 0x77e   :  { %v1575_v45 = vpop.permute.xlu1 %1574 }
 0x77f   :  { %v2264_v56 = vmul.f32 %v2008_v12, %v1575_v45  ;;  %v2012_v45 = vld [vmem:[%s11338_s2 + $0x700] sm:$0xff] }
 0x781   :  { %v2805_v0 = vsel %vm2300_vm2, %v2264_v56, 0.0 }
 0x782   :  { %v2806_v15 = vadd.f32 %v2805_v0, %v2804_v53  ;;  %v2016_v0 = vld [vmem:[%s11338_s2 + $0x720] sm:$0xff] }
 0x783   :  { %6627 = vset.pattern.permute.xlu2 %v11653_v63 }
 0x784   :  { %6630 = vset.pattern.permute.xlu1 %v7113_v58 }
 0x785   :  { %v1581_v30 = vpop.permute.xlu2 %1580 }
 0x786   :  { %v2265_v47 = vmul.f32 %v2009_v51, %v1581_v30 }
 0x788   :  { %v2807_v39 = vsel %vm2300_vm2, %v2265_v47, 0.0 }
 0x789   :  { %v2808_v14 = vadd.f32 %v2807_v39, %v2806_v15  ;;  %v2018_v15 = vld [vmem:[%s11338_s2 + $0x730] sm:$0xff] }
 0x78b   :  { %1671 = vperm.xlu2 %6627, %v11682_v34  }
 0x78c   :  { %1696 = vperm.xlu1 %6630, %v11686_v11  }
 0x78e   :  { %v1587_v6 = vpop.permute.xlu1 %1586 }
 0x78f   :  { %v2266_v46 = vmul.f32 %v2010_v52, %v1587_v6  ;;  %v11687_v6 = vld [vmem:[#allocation88_spill] sm:$0xff] }
 0x790   :  { %v2272_v36 = vmul.f32 %v2016_v0, %v11687_v6 }
 0x791   :  { %v2809_v27 = vsel %vm2300_vm2, %v2266_v46, 0.0 }
 0x792   :  { %v2810_v37 = vadd.f32 %v2809_v27, %v2808_v14  ;;  %v2019_v27 = vld [vmem:[%s11338_s2 + $0x738] sm:$0xff] }
 0x793   :  { %6629 = vset.pattern.permute.xlu2 %v7206_v49 }
 0x794   :  { %v2812_v8 = vadd.f32 %v2811_v32, %v2810_v37  ;;  %6632 = vset.pattern.permute.xlu1 %v7117_v59  ;;  %v2020_v32 = vld [vmem:[%s11338_s2 + $0x740] sm:$0xff] }
 0x796   :  { %v2813_v5 = vrot.slane %v2812_v8, 4 }
 0x798   :  { %v2814_v7 = vadd.f32 %v2813_v5, %v2812_v8  ;;  %v2826_v5 = vsel %vm2300_vm2, %v2272_v36, 0.0 }
 0x79a   :  { %v2815_v1 = vrot.slane %v2814_v7, 2 }
 0x79b   :  { %1689 = vperm.xlu2 %6629, %v11682_v34   ;;  %v1600_v34 = vpop.permute.xlu2 %1599 }
 0x79c   :  { %v2816_v55 = vadd.f32 %v2815_v1, %v2814_v7  ;;  %1708 = vperm.xlu1 %6632, %v11686_v11   ;;  %v2268_v51 = vmul.f32 %v2012_v45, %v1600_v34  ;;  %v2022_v45 = vld [vmem:[%s11338_s2 + $0x750] sm:$0xff] }
 0x79e   :  { %v2817_v61 = vrot.slane %v2816_v55, 1  ;;  %v2819_v47 = vsel %vm2300_vm2, %v2268_v51, 0.0  ;;  %v11688_v51 = vld [vmem:[#allocation174_spill] sm:$0xff] }
 0x7a0   :  { %v2818_v40 = vadd.f32 %v2817_v61, %v2816_v55 }
 0x7a2   :  { %v9262_v26 = vsel %vm2917_vm7, %v2818_v40, %v9167_v2  ;;  %v1606_v2 = vpop.permute.xlu1 %1605 }
 0x7a3   :  { %6631 = vset.pattern.permute.xlu2 %v7120_v60  ;;  %v2269_v29 = vmul.f32 %v2013_v21, %v1606_v2  ;;  %v2021_v21 = vld [vmem:[%s11338_s2 + $0x748] sm:$0xff] }
 0x7a4   :  { %6634 = vset.pattern.permute.xlu1 %v11609_v38 }
 0x7a5   :  { %v1612_v4 = vpop.permute.xlu2 %1611  ;;  %v2820_v56 = vsel %vm2300_vm2, %v2269_v29, 0.0  ;;  %v2023_v29 = vld [vmem:[%s11338_s2 + $0x758] sm:$0xff] }
 0x7a6   :  { %v2270_v30 = vmul.f32 %v2014_v43, %v1612_v4  ;;  %v2821_v25 = vadd.f32 %v2820_v56, %v2819_v47 }
 0x7a8   :  { %v2822_v10 = vsel %vm2300_vm2, %v2270_v30, 0.0  ;;  %v2277_v30 = vmul.f32 %v2021_v21, %v11688_v51 }
 0x7a9   :  { %v2823_v39 = vadd.f32 %v2822_v10, %v2821_v25 }
 0x7aa   :  { %v2836_v0 = vsel %vm2300_vm2, %v2277_v30, 0.0 }
 0x7ab   :  { %1702 = vperm.xlu2 %6631, %v11686_v11  }
 0x7ac   :  { %1726 = vperm.xlu1 %6634, %v11686_v11  }
 0x7ae   :  { %v1618_v12 = vpop.permute.xlu1 %1617 }
 0x7af   :  { %v2271_v18 = vmul.f32 %v2015_v41, %v1618_v12 }
 0x7b1   :  { %v2824_v52 = vsel %vm2300_vm2, %v2271_v18, 0.0 }
 0x7b2   :  { %v2825_v14 = vadd.f32 %v2824_v52, %v2823_v39  ;;  %v2025_v39 = vld [vmem:[%s11338_s2 + $0x768] sm:$0xff] }
 0x7b3   :  { %6633 = vset.pattern.permute.xlu2 %v11665_v22 }
 0x7b4   :  { %6636 = vset.pattern.permute.xlu1 %v7137_v20  ;;  %v2827_v55 = vadd.f32 %v2826_v5, %v2825_v14 }
 0x7b5   :  { %v1630_v44 = vpop.permute.xlu2 %1629 }
 0x7b6   :  { %v2273_v46 = vmul.f32 %v2017_v24, %v1630_v44 }
 0x7b8   :  { %v2828_v7 = vsel %vm2300_vm2, %v2273_v46, 0.0  ;;  %v2026_v46 = vld [vmem:[%s11338_s2 + $0x770] sm:$0xff] }
 0x7b9   :  { %v2829_v2 = vadd.f32 %v2828_v7, %v2827_v55 }
 0x7bb   :  { %1720 = vperm.xlu2 %6633, %v11686_v11  }
 0x7bc   :  { %1738 = vperm.xlu1 %6636, %v11686_v11  }
 0x7be   :  { %v1636_v17 = vpop.permute.xlu1 %1635 }
 0x7bf   :  { %v2274_v37 = vmul.f32 %v2018_v15, %v1636_v17  ;;  %v2024_v17 = vld [vmem:[%s11338_s2 + $0x760] sm:$0xff] }
 0x7c1   :  { %v2830_v40 = vsel %vm2300_vm2, %v2274_v37, 0.0 }
 0x7c2   :  { %v2831_v12 = vadd.f32 %v2830_v40, %v2829_v2 }
 0x7c3   :  { %6635 = vset.pattern.permute.xlu2 %v7173_v42 }
 0x7c4   :  { %6638 = vset.pattern.permute.xlu1 %v11633_v31 }
 0x7c5   :  { %v1642_v53 = vpop.permute.xlu2 %1641 }
 0x7c6   :  { %v2275_v1 = vmul.f32 %v2019_v27, %v1642_v53 }
 0x7c8   :  { %v2832_v4 = vsel %vm2300_vm2, %v2275_v1, 0.0  ;;  %v2027_v1 = vld [vmem:[%s11338_s2 + $0x778] sm:$0xff] }
 0x7c9   :  { %v2833_v44 = vadd.f32 %v2832_v4, %v2831_v12  ;;  %v11690_v12 = vld [vmem:[#allocation14_spill] sm:$0xff] }
 0x7cb   :  { %1732 = vperm.xlu2 %6635, %v11686_v11  }
 0x7cc   :  { %1756 = vperm.xlu1 %6638, %v11686_v11  }
 0x7ce   :  { %v1648_v8 = vpop.permute.xlu1 %1647 }
 0x7cf   :  { %v2276_v34 = vmul.f32 %v2020_v32, %v1648_v8  ;;  %v11689_v8 = vld [vmem:[#allocation47_spill] sm:$0xff] }
 0x7d0   :  { %v2282_v5 = vmul.f32 %v2026_v46, %v11689_v8 }
 0x7d1   :  { %v2834_v43 = vsel %vm2300_vm2, %v2276_v34, 0.0 }
 0x7d2   :  { %v2835_v18 = vadd.f32 %v2834_v43, %v2833_v44 }
 0x7d3   :  { %6637 = vset.pattern.permute.xlu2 %v11668_v33 }
 0x7d4   :  { %6640 = vset.pattern.permute.xlu1 %v11653_v63  ;;  %v2837_v53 = vadd.f32 %v2836_v0, %v2835_v18 }
 0x7d5   :  { %v1660_v61 = vpop.permute.xlu2 %1659 }
 0x7d6   :  { %v2278_v56 = vmul.f32 %v2022_v45, %v1660_v61  ;;  %v2846_v61 = vsel %vm2300_vm2, %v2282_v5, 0.0  ;;  %v2034_v5 = vld [vmem:[%s11338_s2 + $0x7b0] sm:$0xff] }
 0x7d8   :  { %v2838_v25 = vsel %vm2300_vm2, %v2278_v56, 0.0  ;;  %v2029_v56 = vld [vmem:[%s11338_s2 + $0x788] sm:$0xff] }
 0x7d9   :  { %v2839_v15 = vadd.f32 %v2838_v25, %v2837_v53 }
 0x7db   :  { %1750 = vperm.xlu2 %6637, %v11686_v11  }
 0x7dc   :  { %1768 = vperm.xlu1 %6640, %v11686_v11  }
 0x7de   :  { %v1666_v41 = vpop.permute.xlu1 %1665 }
 0x7df   :  { %v2279_v10 = vmul.f32 %v2023_v29, %v1666_v41 }
 0x7e1   :  { %v2840_v52 = vsel %vm2300_vm2, %v2279_v10, 0.0 }
 0x7e2   :  { %v2841_v14 = vadd.f32 %v2840_v52, %v2839_v15  ;;  %v2031_v52 = vld [vmem:[%s11338_s2 + $0x798] sm:$0xff] }
 0x7e3   :  { %6639 = vset.pattern.permute.xlu2 %v7203_v48 }
 0x7e4   :  { %6642 = vset.pattern.permute.xlu1 %v7206_v49 }
 0x7e5   :  { %v1672_v47 = vpop.permute.xlu2 %1671 }
 0x7e6   :  { %v2280_v24 = vmul.f32 %v2024_v17, %v1672_v47  ;;  %v2028_v17 = vld [vmem:[%s11338_s2 + $0x780] sm:$0xff]  ;;  %v2030_v47 = vld [vmem:[%s11338_s2 + $0x790] sm:$0xff] }
 0x7e8   :  { %v2842_v6 = vsel %vm2300_vm2, %v2280_v24, 0.0 }
 0x7e9   :  { %v2843_v37 = vadd.f32 %v2842_v6, %v2841_v14  ;;  %v2033_v14 = vld [vmem:[%s11338_s2 + $0x7a8] sm:$0xff] }
 0x7eb   :  { %1762 = vperm.xlu2 %6639, %v11686_v11  }
 0x7ec   :  { %1786 = vperm.xlu1 %6642, %v11686_v11  }
 0x7ee   :  { %v1678_v36 = vpop.permute.xlu1 %1677 }
 0x7ef   :  { %v2281_v27 = vmul.f32 %v2025_v39, %v1678_v36  ;;  %v2032_v39 = vld [vmem:[%s11338_s2 + $0x7a0] sm:$0xff] }
 0x7f1   :  { %v2844_v32 = vsel %vm2300_vm2, %v2281_v27, 0.0  ;;  %v11691_v27 = vld [vmem:[#allocation72_spill] sm:$0xff] }
 0x7f2   :  { %v2845_v7 = vadd.f32 %v2844_v32, %v2843_v37  ;;  %v2287_v37 = vmul.f32 %v2031_v52, %v11691_v27  ;;  %v2040_v27 = vld [vmem:[%s11338_s2 + $0x7e0] sm:$0xff] }
 0x7f3   :  { %6641 = vset.pattern.permute.xlu2 %v7215_v50 }
 0x7f4   :  { %6644 = vset.pattern.permute.xlu1 %v7120_v60  ;;  %v2847_v34 = vadd.f32 %v2846_v61, %v2845_v7  ;;  %v2861_v61 = vsel %vm2300_vm2, %v2287_v37, 0.0 }
 0x7f5   :  { %v1690_v55 = vpop.permute.xlu2 %1689 }
 0x7f6   :  { %v2283_v40 = vmul.f32 %v2027_v1, %v1690_v55  ;;  %v2035_v1 = vld [vmem:[%s11338_s2 + $0x7b8] sm:$0xff] }
 0x7f8   :  { %v2848_v2 = vsel %vm2300_vm2, %v2283_v40, 0.0 }
 0x7f9   :  { %v2849_v4 = vadd.f32 %v2848_v2, %v2847_v34 }
 0x7fb   :  { %v2850_v21 = vrot.slane %v2849_v4, 4  ;;  %1780 = vperm.xlu2 %6641, %v11686_v11  }
 0x7fc   :  { %2945 = vperm.xlu1 %6644, %v11690_v12  }
 0x7fd   :  { %v2851_v45 = vadd.f32 %v2850_v21, %v2849_v4 }
 0x7fe   :  { %v1697_v11 = vpop.permute.xlu1 %1696 }
 0x7ff   :  { %v2852_v43 = vrot.slane %v2851_v45, 2  ;;  %v2284_v0 = vmul.f32 %v2028_v17, %v1697_v11  ;;  %v2037_v11 = vld [vmem:[%s11338_s2 + $0x7c8] sm:$0xff]  ;;  %v11692_v17 = vld [vmem:[#allocation143_spill] sm:$0xff] }
 0x801   :  { %v2853_v44 = vadd.f32 %v2852_v43, %v2851_v45  ;;  %v2856_v6 = vsel %vm2300_vm2, %v2284_v0, 0.0 }
 0x803   :  { %v2854_v29 = vrot.slane %v2853_v44, 1  ;;  %6643 = vset.pattern.permute.xlu2 %v7113_v58 }
 0x804   :  { %6646 = vset.pattern.permute.xlu1 %v11665_v22 }
 0x805   :  { %v2855_v41 = vadd.f32 %v2854_v29, %v2853_v44  ;;  %v1703_v30 = vpop.permute.xlu2 %1702  ;;  %v2036_v29 = vld [vmem:[%s11338_s2 + $0x7c0] sm:$0xff] }
 0x806   :  { %v2285_v10 = vmul.f32 %v2029_v56, %v1703_v30  ;;  %v2038_v56 = vld [vmem:[%s11338_s2 + $0x7d0] sm:$0xff] }
 0x807   :  { %v9359_v51 = vsel %vm2919_vm8, %v2855_v41, %v9262_v26 }
 0x808   :  { %v2857_v53 = vsel %vm2300_vm2, %v2285_v10, 0.0 }
 0x809   :  { %v2858_v46 = vadd.f32 %v2857_v53, %v2856_v6 }
 0x80b   :  { %2939 = vperm.xlu2 %6643, %v11690_v12  }
 0x80c   :  { %2963 = vperm.xlu1 %6646, %v11690_v12  }
 0x80e   :  { %v1709_v26 = vpop.permute.xlu1 %1708 }
 0x80f   :  { %v2286_v25 = vmul.f32 %v2030_v47, %v1709_v26  ;;  %v2292_v47 = vmul.f32 %v2036_v29, %v11692_v17 }
 0x811   :  { %v2859_v36 = vsel %vm2300_vm2, %v2286_v25, 0.0  ;;  %v2039_v25 = vld [vmem:[%s11338_s2 + $0x7d8] sm:$0xff]  ;;  %v2871_v52 = vsel %vm2300_vm2, %v2292_v47, 0.0 }
 0x812   :  { %v2860_v8 = vadd.f32 %v2859_v36, %v2858_v46  ;;  %v2041_v46 = vld [vmem:[%s11338_s2 + $0x7e8] sm:$0xff] }
 0x813   :  { %6645 = vset.pattern.permute.xlu2 %v7134_v19 }
 0x814   :  { %6648 = vset.pattern.permute.xlu1 %v7173_v42  ;;  %v2862_v2 = vadd.f32 %v2861_v61, %v2860_v8 }
 0x815   :  { %v1721_v18 = vpop.permute.xlu2 %1720 }
 0x816   :  { %v2288_v32 = vmul.f32 %v2032_v39, %v1721_v18 }
 0x818   :  { %v2863_v40 = vsel %vm2300_vm2, %v2288_v32, 0.0 }
 0x819   :  { %v2864_v43 = vadd.f32 %v2863_v40, %v2862_v2  ;;  %v2042_v2 = vld [vmem:[%s11338_s2 + $0x7f0] sm:$0xff] }
 0x81b   :  { %2957 = vperm.xlu2 %6645, %v11690_v12  }
 0x81c   :  { %2975 = vperm.xlu1 %6648, %v11690_v12  }
 0x81e   :  { %v1727_v24 = vpop.permute.xlu1 %1726 }
 0x81f   :  { %v2289_v7 = vmul.f32 %v2033_v14, %v1727_v24 }
 0x821   :  { %v2865_v21 = vsel %vm2300_vm2, %v2289_v7, 0.0 }
 0x822   :  { %v2866_v41 = vadd.f32 %v2865_v21, %v2864_v43 }
 0x823   :  { %6647 = vset.pattern.permute.xlu2 %v11609_v38 }
 0x824   :  { %6650 = vset.pattern.permute.xlu1 %v11668_v33 }
 0x825   :  { %v1733_v15 = vpop.permute.xlu2 %1732 }
 0x826   :  { %v2290_v34 = vmul.f32 %v2034_v5, %v1733_v15  ;;  %v2297_v5 = vmul.f32 %v2041_v46, %v8396_v3  ;;  %v11693_v3 = vld [vmem:[#allocation38_spill] sm:$0xff] }
 0x828   :  { %v2867_v44 = vsel %vm2300_vm2, %v2290_v34, 0.0  ;;  %v2881_v40 = vsel %vm2300_vm2, %v2297_v5, 0.0 }
 0x829   :  { %v2868_v26 = vadd.f32 %v2867_v44, %v2866_v41 }
 0x82b   :  { %2969 = vperm.xlu2 %6647, %v11690_v12  }
 0x82c   :  { %2993 = vperm.xlu1 %6650, %v11690_v12  }
 0x82e   :  { %v1739_v55 = vpop.permute.xlu1 %1738 }
 0x82f   :  { %v2291_v45 = vmul.f32 %v2035_v1, %v1739_v55 }
 0x831   :  { %v2869_v30 = vsel %vm2300_vm2, %v2291_v45, 0.0  ;;  %v2043_v45 = vld [vmem:[%s11338_s2 + $0x7f8] sm:$0xff]  ;;  %s6966_s2 = smov 512  }
 0x832   :  { %v2870_v0 = vadd.f32 %v2869_v30, %v2868_v26 }
 0x833   :  { %6649 = vset.pattern.permute.xlu2 %v7261_v62 }
 0x834   :  { %6652 = vset.pattern.permute.xlu1 %v7203_v48  ;;  %v2872_v6 = vadd.f32 %v2871_v52, %v2870_v0 }
 0x835   :  { %v1751_v4 = vpop.permute.xlu2 %1750 }
 0x836   :  { %v2293_v10 = vmul.f32 %v2037_v11, %v1751_v4 }
 0x838   :  { %v2873_v39 = vsel %vm2300_vm2, %v2293_v10, 0.0 }
 0x839   :  { %v2874_v14 = vadd.f32 %v2873_v39, %v2872_v6 }
 0x83b   :  { %2987 = vperm.xlu2 %6649, %v11690_v12  }
 0x83c   :  { %3005 = vperm.xlu1 %6652, %v11690_v12  }
 0x83e   :  { %v1757_v18 = vpop.permute.xlu1 %1756 }
 0x83f   :  { %v2294_v53 = vmul.f32 %v2038_v56, %v1757_v18 }
 0x841   :  { %v2875_v36 = vsel %vm2300_vm2, %v2294_v53, 0.0 }
 0x842   :  { %v2876_v32 = vadd.f32 %v2875_v36, %v2874_v14 }
 0x843   :  { %6651 = vset.pattern.permute.xlu2 %v11633_v31 }
 0x844   :  { %6654 = vset.pattern.permute.xlu1 %v7215_v50 }
 0x845   :  { %v1763_v24 = vpop.permute.xlu2 %1762 }
 0x846   :  { %v2295_v15 = vmul.f32 %v2039_v25, %v1763_v24 }
 0x848   :  { %v2877_v37 = vsel %vm2300_vm2, %v2295_v15, 0.0 }
 0x849   :  { %v2878_v1 = vadd.f32 %v2877_v37, %v2876_v32 }
 0x84b   :  { %2999 = vperm.xlu2 %6651, %v11690_v12  }
 0x84c   :  { %3023 = vperm.xlu1 %6654, %v11690_v12  }
 0x84e   :  { %v1769_v8 = vpop.permute.xlu1 %1768 }
 0x84f   :  { %v2296_v7 = vmul.f32 %v2040_v27, %v1769_v8  ;;  %v4502_v8 = vld [vmem:[%s11339_s3 + $0x80] sm:$0xff] }
 0x851   :  { %v2879_v55 = vsel %vm2300_vm2, %v2296_v7, 0.0  ;;  %v4503_v7 = vld [vmem:[%s11339_s3 + $0x88] sm:$0xff] }
 0x852   :  { %v2880_v61 = vadd.f32 %v2879_v55, %v2878_v1  ;;  %v4504_v1 = vld [vmem:[%s11339_s3 + $0x90] sm:$0xff] }
 0x853   :  { %6653 = vset.pattern.permute.xlu2 %v7291_v16 }
 0x854   :  { %6656 = vset.pattern.permute.xlu1 %v7113_v58  ;;  %v2882_v34 = vadd.f32 %v2881_v40, %v2880_v61  ;;  %v4505_v40 = vld [vmem:[%s11339_s3 + $0x98] sm:$0xff] }
 0x855   :  { %v1781_v4 = vpop.permute.xlu2 %1780 }
 0x856   :  { %v2298_v21 = vmul.f32 %v2042_v2, %v1781_v4 }
 0x858   :  { %v2883_v43 = vsel %vm2300_vm2, %v2298_v21, 0.0  ;;  %v4506_v21 = vld [vmem:[%s11339_s3 + $0xa0] sm:$0xff] }
 0x859   :  { %v2884_v41 = vadd.f32 %v2883_v43, %v2882_v34  ;;  %v11694_v34 = vld [vmem:[#allocation54_spill] sm:$0xff] }
 0x85a   :  { %v4759_v2 = vmul.f32 %v4503_v7, %v11694_v34  ;;  %v4507_v43 = vld [vmem:[%s11339_s3 + $0xa8] sm:$0xff]  ;;  %v4510_v7 = vld [vmem:[%s11339_s3 + $0xc0] sm:$0xff] }
 0x85b   :  { %3017 = vperm.xlu2 %6653, %v11690_v12  }
 0x85c   :  { %3036 = vperm.xlu1 %6656, %v11693_v3  }
 0x85e   :  { %v1787_v44 = vpop.permute.xlu1 %1786 }
 0x85f   :  { %v2299_v29 = vmul.f32 %v2043_v45, %v1787_v44 }
 0x861   :  { %v2885_v11 = vsel %vm2300_vm2, %v2299_v29, 0.0  ;;  %v5036_v29 = vsel %vm2300_vm2, %v4759_v2, 0.0  ;;  %v4511_v2 = vld [vmem:[%s11339_s3 + $0xc8] sm:$0xff] }
 0x862   :  { %v2886_v30 = vadd.f32 %v2885_v11, %v2884_v41 }
 0x863   :  { %6655 = vset.pattern.permute.xlu2 %v7206_v49 }
 0x864   :  { %v2887_v26 = vrot.slane %v2886_v30, 4  ;;  %6658 = vset.pattern.permute.xlu1 %v7134_v19 }
 0x866   :  { %v2888_v56 = vadd.f32 %v2887_v26, %v2886_v30 }
 0x868   :  { %v2889_v18 = vrot.slane %v2888_v56, 2 }
 0x86a   :  { %v2890_v17 = vadd.f32 %v2889_v18, %v2888_v56 }
 0x86b   :  { %3029 = vperm.xlu2 %6655, %v11690_v12   ;;  %v9476_v12 = vpop.permute.xlu2 %2939 }
 0x86c   :  { %v2891_v47 = vrot.slane %v2890_v17, 1  ;;  %3054 = vperm.xlu1 %6658, %v11693_v3  }
 0x86e   :  { %v2892_v10 = vadd.f32 %v2891_v47, %v2890_v17 }
 0x870   :  { %v9456_v0 = vsel %vm2921_vm9, %v2892_v10, %v9359_v51  ;;  %v9479_v51 = vpop.permute.xlu1 %2945  ;;  %v4508_v10 = vld [vmem:[%s11339_s3 + $0xb0] sm:$0xff] }
 0x873   :  { %6657 = vset.pattern.permute.xlu2 %v7117_v59 }
 0x874   :  { %6660 = vset.pattern.permute.xlu1 %v11609_v38 }
 0x875   :  { %v9482_v25 = vpop.permute.xlu2 %2957 }
 0x87b   :  { %3048 = vperm.xlu2 %6657, %v11693_v3  }
 0x87c   :  { %3066 = vperm.xlu1 %6660, %v11693_v3  }
 0x87e   :  { %v9485_v24 = vpop.permute.xlu1 %2963 }
 0x883   :  { %6659 = vset.pattern.permute.xlu2 %v11665_v22 }
 0x884   :  { %6662 = vset.pattern.permute.xlu1 %v7261_v62 }
 0x885   :  { %v9488_v53 = vpop.permute.xlu2 %2969 }
 0x88b   :  { %3060 = vperm.xlu2 %6659, %v11693_v3  }
 0x88c   :  { %3084 = vperm.xlu1 %6662, %v11693_v3  }
 0x88e   :  { %v9491_v52 = vpop.permute.xlu1 %2975 }
 0x893   :  { %6661 = vset.pattern.permute.xlu2 %v7137_v20 }
 0x894   :  { %6664 = vset.pattern.permute.xlu1 %v11633_v31 }
 0x895   :  { %v9494_v39 = vpop.permute.xlu2 %2987 }
 0x89b   :  { %3078 = vperm.xlu2 %6661, %v11693_v3  }
 0x89c   :  { %3096 = vperm.xlu1 %6664, %v11693_v3  }
 0x89e   :  { %v9497_v15 = vpop.permute.xlu1 %2993 }
 0x8a3   :  { %6663 = vset.pattern.permute.xlu2 %v11668_v33 }
 0x8a4   :  { %6666 = vset.pattern.permute.xlu1 %v7291_v16 }
 0x8a5   :  { %v9500_v6 = vpop.permute.xlu2 %2999 }
 0x8ab   :  { %3090 = vperm.xlu2 %6663, %v11693_v3  }
 0x8ac   :  { %3114 = vperm.xlu1 %6666, %v11693_v3  }
 0x8ae   :  { %v9503_v36 = vpop.permute.xlu1 %3005 }
 0x8b3   :  { %6665 = vset.pattern.permute.xlu2 %v11653_v63 }
 0x8b4   :  { %6668 = vset.pattern.permute.xlu1 %v7206_v49 }
 0x8b5   :  { %v9506_v46 = vpop.permute.xlu2 %3017 }
 0x8bb   :  { %3108 = vperm.xlu2 %6665, %v11693_v3  }
 0x8bc   :  { %3126 = vperm.xlu1 %6668, %v11693_v3  }
 0x8be   :  { %v9509_v14 = vpop.permute.xlu1 %3023 }
 0x8c3   :  { %6667 = vset.pattern.permute.xlu2 %v7215_v50 }
 0x8c4   :  { %6670 = vset.pattern.permute.xlu1 %v7117_v59 }
 0x8c5   :  { %v9512_v27 = vpop.permute.xlu2 %3029 }
 0x8cb   :  { %3120 = vperm.xlu2 %6667, %v11693_v3  }
 0x8cc   :  { %3145 = vperm.xlu1 %6670, %v7245_v54  }
 0x8ce   :  { %v3037_v37 = vpop.permute.xlu1 %3036 }
 0x8cf   :  { %v4758_v61 = vmul.f32 %v4502_v8, %v3037_v37 }
 0x8d1   :  { %v5035_v3 = vsel %vm2300_vm2, %v4758_v61, 0.0 }
 0x8d2   :  { %v5037_v30 = vadd.f32 %v5036_v29, %v5035_v3 }
 0x8d3   :  { %6669 = vset.pattern.permute.xlu2 %v7120_v60 }
 0x8d4   :  { %6672 = vset.pattern.permute.xlu1 %v11665_v22 }
 0x8d5   :  { %v3049_v32 = vpop.permute.xlu2 %3048 }
 0x8d6   :  { %v4760_v4 = vmul.f32 %v4504_v1, %v3049_v32  ;;  %v4509_v32 = vld [vmem:[%s11339_s3 + $0xb8] sm:$0xff] }
 0x8d8   :  { %v5038_v41 = vsel %vm2300_vm2, %v4760_v4, 0.0 }
 0x8d9   :  { %v5039_v17 = vadd.f32 %v5038_v41, %v5037_v30  ;;  %v4513_v41 = vld [vmem:[%s11339_s3 + $0xd8] sm:$0xff]  ;;  %v4512_v30 = vld [vmem:[%s11339_s3 + $0xd0] sm:$0xff] }
 0x8db   :  { %3139 = vperm.xlu2 %6669, %v7245_v54  }
 0x8dc   :  { %3157 = vperm.xlu1 %6672, %v7245_v54  }
 0x8de   :  { %v3055_v5 = vpop.permute.xlu1 %3054 }
 0x8df   :  { %v4761_v45 = vmul.f32 %v4505_v40, %v3055_v5 }
 0x8e1   :  { %v5040_v56 = vsel %vm2300_vm2, %v4761_v45, 0.0 }
 0x8e2   :  { %v5041_v37 = vadd.f32 %v5040_v56, %v5039_v17  ;;  %v4769_v17 = vmul.f32 %v4513_v41, %v8107_v9  ;;  %v11696_v9 = vld [vmem:[#allocation25_spill] sm:$0xff] }
 0x8e3   :  { %6671 = vset.pattern.permute.xlu2 %v7134_v19 }
 0x8e4   :  { %6674 = vset.pattern.permute.xlu1 %v7137_v20 }
 0x8e5   :  { %v3061_v55 = vpop.permute.xlu2 %3060 }
 0x8e6   :  { %v4762_v11 = vmul.f32 %v4506_v21, %v3061_v55  ;;  %v11695_v55 = vld [vmem:[#allocation124_spill] sm:$0xff] }
 0x8e7   :  { %v4764_v61 = vmul.f32 %v4508_v10, %v11695_v55  ;;  %v4487_v55 = vld [vmem:[%s11339_s3 + $0x8] sm:$0xff] }
 0x8e8   :  { %v5042_v47 = vsel %vm2300_vm2, %v4762_v11, 0.0 }
 0x8e9   :  { %v5043_v5 = vadd.f32 %v5042_v47, %v5041_v37  ;;  %v5046_v3 = vsel %vm2300_vm2, %v4764_v61, 0.0 }
 0x8eb   :  { %3151 = vperm.xlu2 %6671, %v7245_v54  }
 0x8ec   :  { %3175 = vperm.xlu1 %6674, %v7245_v54  }
 0x8ee   :  { %v3067_v44 = vpop.permute.xlu1 %3066 }
 0x8ef   :  { %v4763_v18 = vmul.f32 %v4507_v43, %v3067_v44 }
 0x8f1   :  { %v5044_v8 = vsel %vm2300_vm2, %v4763_v18, 0.0 }
 0x8f2   :  { %v5045_v34 = vadd.f32 %v5044_v8, %v5043_v5  ;;  %v5056_v8 = vsel %vm2300_vm2, %v4769_v17, 0.0 }
 0x8f3   :  { %6673 = vset.pattern.permute.xlu2 %v7173_v42 }
 0x8f4   :  { %6676 = vset.pattern.permute.xlu1 %v11668_v33  ;;  %v5047_v44 = vadd.f32 %v5046_v3, %v5045_v34  ;;  %v4743_v34 = vmul.f32 %v4487_v55, %v9479_v51  ;;  %v4489_v3 = vld [vmem:[%s11339_s3 + $0x18] sm:$0xff]  ;;  %v11697_v51 = vld [vmem:[#allocation63_spill] sm:$0xff]  ;;  %v4518_v55 = vld [vmem:[%s11339_s3 + $0x100] sm:$0xff] }
 0x8f5   :  { %v3079_v26 = vpop.permute.xlu2 %3078 }
 0x8f6   :  { %v4765_v40 = vmul.f32 %v4509_v32, %v3079_v26 }
 0x8f8   :  { %v5048_v45 = vsel %vm2300_vm2, %v4765_v40, 0.0  ;;  %v4486_v40 = vld [vmem:[%s11339_s3] sm:$0xff] }
 0x8f9   :  { %v5049_v11 = vadd.f32 %v5048_v45, %v5047_v44  ;;  %v4999_v45 = vsel %vm2300_vm2, %v4743_v34, 0.0 }
 0x8fb   :  { %3169 = vperm.xlu2 %6673, %v7245_v54  }
 0x8fc   :  { %3187 = vperm.xlu1 %6676, %v7245_v54  }
 0x8fe   :  { %v3085_v1 = vpop.permute.xlu1 %3084 }
 0x8ff   :  { %v4766_v21 = vmul.f32 %v4510_v7, %v3085_v1 }
 0x901   :  { %v5050_v29 = vsel %vm2300_vm2, %v4766_v21, 0.0  ;;  %v4488_v21 = vld [vmem:[%s11339_s3 + $0x10] sm:$0xff] }
 0x902   :  { %v5051_v56 = vadd.f32 %v5050_v29, %v5049_v11  ;;  %v4744_v44 = vmul.f32 %v4488_v21, %v11697_v51  ;;  %v4745_v29 = vmul.f32 %v4489_v3, %v9482_v25  ;;  %v4494_v21 = vld [vmem:[%s11339_s3 + $0x40] sm:$0xff] }
 0x903   :  { %6675 = vset.pattern.permute.xlu2 %v7261_v62 }
 0x904   :  { %6678 = vset.pattern.permute.xlu1 %v11653_v63  ;;  %v5001_v17 = vsel %vm2300_vm2, %v4744_v44, 0.0  ;;  %v11698_v44 = vld [vmem:[#allocation41_spill] sm:$0xff] }
 0x905   :  { %v3091_v4 = vpop.permute.xlu2 %3090 }
 0x906   :  { %v4767_v43 = vmul.f32 %v4511_v2, %v3091_v4  ;;  %v4742_v4 = vmul.f32 %v4486_v40, %v9476_v12 }
 0x908   :  { %v5052_v26 = vsel %vm2300_vm2, %v4767_v43, 0.0  ;;  %v4490_v43 = vld [vmem:[%s11339_s3 + $0x20] sm:$0xff]  ;;  %v4998_v12 = vsel %vm2300_vm2, %v4742_v4, 0.0 }
 0x909   :  { %v5053_v10 = vadd.f32 %v5052_v26, %v5051_v56  ;;  %v5000_v11 = vadd.f32 %v4999_v45, %v4998_v12  ;;  %v4746_v26 = vmul.f32 %v4490_v43, %v9485_v24  ;;  %v4519_v24 = vld [vmem:[%s11339_s3 + $0x108] sm:$0xff]  ;;  %v4521_v43 = vld [vmem:[%s11339_s3 + $0x118] sm:$0xff]  ;;  %v4774_v12 = vmul.f32 %v4518_v55, %v11698_v44 }
 0x90b   :  { %3181 = vperm.xlu2 %6675, %v7245_v54  }
 0x90c   :  { %3205 = vperm.xlu1 %6678, %v7245_v54  }
 0x90e   :  { %v3097_v18 = vpop.permute.xlu1 %3096 }
 0x90f   :  { %v4768_v47 = vmul.f32 %v4512_v30, %v3097_v18  ;;  %v4491_v30 = vld [vmem:[%s11339_s3 + $0x28] sm:$0xff]  ;;  %v4492_v18 = vld [vmem:[%s11339_s3 + $0x30] sm:$0xff] }
 0x910   :  { %v4747_v25 = vmul.f32 %v4491_v30, %v9488_v53  ;;  %v4520_v53 = vld [vmem:[%s11339_s3 + $0x110] sm:$0xff] }
 0x911   :  { %v5054_v37 = vsel %vm2300_vm2, %v4768_v47, 0.0  ;;  %v5003_v47 = vsel %vm2300_vm2, %v4745_v29, 0.0 }
 0x912   :  { %v5055_v32 = vadd.f32 %v5054_v37, %v5053_v10  ;;  %v5002_v10 = vadd.f32 %v5001_v17, %v5000_v11  ;;  %v5005_v37 = vsel %vm2300_vm2, %v4746_v26, 0.0  ;;  %v5007_v40 = vsel %vm2300_vm2, %v4747_v25, 0.0  ;;  %v4495_v11 = vld [vmem:[%s11339_s3 + $0x48] sm:$0xff]  ;;  %v11699_v26 = vld [vmem:[#allocation24_spill] sm:$0xff]  ;;  %v4496_v25 = vld [vmem:[%s11339_s3 + $0x50] sm:$0xff] }
 0x913   :  { %6677 = vset.pattern.permute.xlu2 %v7203_v48  ;;  %v4750_v17 = vmul.f32 %v4494_v21, %v9494_v39  ;;  %v4497_v39 = vld [vmem:[%s11339_s3 + $0x58] sm:$0xff] }
 0x914   :  { %6680 = vset.pattern.permute.xlu1 %v7215_v50  ;;  %v9577_v5 = vadd.f32 %v5056_v8, %v5055_v32  ;;  %v4748_v32 = vmul.f32 %v4492_v18, %v9491_v52  ;;  %v5004_v8 = vadd.f32 %v5003_v47, %v5002_v10  ;;  %v4493_v52 = vld [vmem:[%s11339_s3 + $0x38] sm:$0xff] }
 0x915   :  { %v9593_v7 = vpop.permute.xlu2 %3108  ;;  %v4749_v18 = vmul.f32 %v4493_v52, %v11699_v26 }
 0x916   :  { %v5006_v4 = vadd.f32 %v5005_v37, %v5004_v8  ;;  %v5009_v45 = vsel %vm2300_vm2, %v4748_v32, 0.0  ;;  %v4751_v32 = vmul.f32 %v4495_v11, %v9497_v15 }
 0x917   :  { %v5011_v55 = vsel %vm2300_vm2, %v4749_v18, 0.0 }
 0x918   :  { %v5008_v29 = vadd.f32 %v5007_v40, %v5006_v4  ;;  %v5013_v40 = vsel %vm2300_vm2, %v4750_v17, 0.0  ;;  %v4514_v4 = vld [vmem:[%s11339_s3 + $0xe0] sm:$0xff]  ;;  %v4525_v17 = vld [vmem:[%s11339_s3 + $0x138] sm:$0xff] }
 0x91a   :  { %v5010_v47 = vadd.f32 %v5009_v45, %v5008_v29  ;;  %v4753_v45 = vmul.f32 %v4497_v39, %v9503_v36  ;;  %v4515_v29 = vld [vmem:[%s11339_s3 + $0xe8] sm:$0xff]  ;;  %v4770_v36 = vmul.f32 %v4514_v4, %v9593_v7 }
 0x91b   :  { %3199 = vperm.xlu2 %6677, %v7245_v54  }
 0x91c   :  { %3217 = vperm.xlu1 %6680, %v7245_v54   ;;  %v5012_v15 = vadd.f32 %v5011_v55, %v5010_v47 }
 0x923   :  { %6679 = vset.pattern.permute.xlu2 %v7291_v16 }
 0x924   :  { %6682 = vset.pattern.permute.xlu1 %v7120_v60 }
 0x925   :  { %v9599_v1 = vpop.permute.xlu2 %3120 }
 0x92b   :  { %3211 = vperm.xlu2 %6679, %v7245_v54   ;;  %v9596_v54 = vpop.permute.xlu1 %3114 }
 0x92c   :  { %3236 = vperm.xlu1 %6682, %v11696_v9   ;;  %v4771_v7 = vmul.f32 %v4515_v29, %v9596_v54 }
 0x933   :  { %6681 = vset.pattern.permute.xlu2 %v7113_v58  ;;  %v9605_v61 = vpop.permute.xlu1 %3126 }
 0x934   :  { %6684 = vset.pattern.permute.xlu1 %v7134_v19 }
 0x935   :  { %v3140_v2 = vpop.permute.xlu2 %3139 }
 0x936   :  { %v4775_v3 = vmul.f32 %v4519_v24, %v3140_v2  ;;  %v4522_v2 = vld [vmem:[%s11339_s3 + $0x120] sm:$0xff] }
 0x938   :  { %v5073_v10 = vsel %vm2300_vm2, %v4775_v3, 0.0  ;;  %v5015_v3 = vsel %vm2300_vm2, %v4751_v32, 0.0 }
 0x93b   :  { %3230 = vperm.xlu2 %6681, %v11696_v9  }
 0x93c   :  { %3248 = vperm.xlu1 %6684, %v11696_v9  }
 0x93e   :  { %v3146_v41 = vpop.permute.xlu1 %3145 }
 0x93f   :  { %v4776_v30 = vmul.f32 %v4520_v53, %v3146_v41  ;;  %v5072_v41 = vsel %vm2300_vm2, %v4774_v12, 0.0  ;;  %v4752_v53 = vmul.f32 %v4496_v25, %v9500_v6  ;;  %v5014_v12 = vadd.f32 %v5013_v40, %v5012_v15 }
 0x940   :  { %v5058_v15 = vsel %vm2300_vm2, %v4770_v36, 0.0 }
 0x941   :  { %v5075_v24 = vsel %vm2300_vm2, %v4776_v30, 0.0  ;;  %v4498_v30 = vld [vmem:[%s11339_s3 + $0x60] sm:$0xff]  ;;  %v5017_v26 = vsel %vm2300_vm2, %v4752_v53, 0.0  ;;  %v5016_v25 = vadd.f32 %v5015_v3, %v5014_v12  ;;  %v4500_v53 = vld [vmem:[%s11339_s3 + $0x70] sm:$0xff] }
 0x943   :  { %6683 = vset.pattern.permute.xlu2 %v7117_v59  ;;  %v5018_v40 = vadd.f32 %v5017_v26, %v5016_v25  ;;  %v5059_v26 = vadd.f32 %v5058_v15, %v9577_v5 }
 0x944   :  { %6686 = vset.pattern.permute.xlu1 %v7173_v42 }
 0x945   :  { %v3152_v56 = vpop.permute.xlu2 %3151 }
 0x946   :  { %v4777_v37 = vmul.f32 %v4521_v43, %v3152_v56  ;;  %v5074_v56 = vadd.f32 %v5073_v10, %v5072_v41  ;;  %v4524_v43 = vld [vmem:[%s11339_s3 + $0x130] sm:$0xff]  ;;  %v4499_v10 = vld [vmem:[%s11339_s3 + $0x68] sm:$0xff]  ;;  %v5019_v41 = vsel %vm2300_vm2, %v4753_v45, 0.0 }
 0x947   :  { %v4755_v54 = vmul.f32 %v4499_v10, %v9506_v46  ;;  %v5020_v45 = vadd.f32 %v5019_v41, %v5018_v40  ;;  %v4528_v10 = vld [vmem:[%s11339_s3 + $0x150] sm:$0xff] }
 0x948   :  { %v5077_v21 = vsel %vm2300_vm2, %v4777_v37, 0.0  ;;  %v5076_v6 = vadd.f32 %v5075_v24, %v5074_v56  ;;  %v4516_v37 = vld [vmem:[%s11339_s3 + $0xf0] sm:$0xff]  ;;  %v4526_v24 = vld [vmem:[%s11339_s3 + $0x140] sm:$0xff] }
 0x949   :  { %v4772_v4 = vmul.f32 %v4516_v37, %v9599_v1  ;;  %v5060_v1 = vsel %vm2300_vm2, %v4771_v7, 0.0 }
 0x94a   :  { %v5078_v18 = vadd.f32 %v5077_v21, %v5076_v6  ;;  %v4527_v21 = vld [vmem:[%s11339_s3 + $0x148] sm:$0xff]  ;;  %v5061_v25 = vadd.f32 %v5060_v1, %v5059_v26 }
 0x94b   :  { %3242 = vperm.xlu2 %6683, %v11696_v9  }
 0x94c   :  { %3266 = vperm.xlu1 %6686, %v11696_v9  }
 0x94e   :  { %v3158_v34 = vpop.permute.xlu1 %3157 }
 0x94f   :  { %v4778_v8 = vmul.f32 %v4522_v2, %v3158_v34  ;;  %v4523_v34 = vld [vmem:[%s11339_s3 + $0x128] sm:$0xff]  ;;  %v11700_v2 = vld [vmem:[#allocation104_spill] sm:$0xff] }
 0x950   :  { %v4779_v47 = vmul.f32 %v4523_v34, %v11700_v2 }
 0x951   :  { %v5079_v11 = vsel %vm2300_vm2, %v4778_v8, 0.0  ;;  %v11701_v8 = vld [vmem:[#allocation33_spill] sm:$0xff] }
 0x952   :  { %v5080_v39 = vadd.f32 %v5079_v11, %v5078_v18  ;;  %v4754_v55 = vmul.f32 %v4498_v30, %v11701_v8  ;;  %v5081_v3 = vsel %vm2300_vm2, %v4779_v47, 0.0 }
 0x953   :  { %6685 = vset.pattern.permute.xlu2 %v11609_v38 }
 0x954   :  { %6688 = vset.pattern.permute.xlu1 %v7261_v62  ;;  %v5082_v29 = vadd.f32 %v5081_v3, %v5080_v39  ;;  %v5021_v30 = vsel %vm2300_vm2, %v4754_v55, 0.0  ;;  %v4530_v55 = vld [vmem:[%s11339_s3 + $0x160] sm:$0xff] }
 0x955   :  { %v3170_v51 = vpop.permute.xlu2 %3169  ;;  %v5022_v47 = vadd.f32 %v5021_v30, %v5020_v45  ;;  %v3224_v30 = vpop.permute.xlu0 %3223 }
 0x956   :  { %v4780_v32 = vmul.f32 %v4524_v43, %v3170_v51  ;;  %v4517_v51 = vld [vmem:[%s11339_s3 + $0xf8] sm:$0xff]  ;;  %v4756_v43 = vmul.f32 %v4500_v53, %v9509_v14  ;;  %v11702_v53 = vld [vmem:[#allocation157_spill] sm:$0xff] }
 0x957   :  { %v4773_v12 = vmul.f32 %v4517_v51, %v9605_v61  ;;  %v4784_v51 = vmul.f32 %v4528_v10, %v11702_v53 }
 0x958   :  { %v5083_v46 = vsel %vm2300_vm2, %v4780_v32, 0.0  ;;  %v5025_v5 = vsel %vm2300_vm2, %v4756_v43, 0.0 }
 0x959   :  { %v5084_v14 = vadd.f32 %v5083_v46, %v5082_v29  ;;  %v5064_v37 = vsel %vm2300_vm2, %v4773_v12, 0.0 }
 0x95b   :  { %3260 = vperm.xlu2 %6685, %v11696_v9  }
 0x95c   :  { %3278 = vperm.xlu1 %6688, %v11696_v9  }
 0x95e   :  { %v3176_v52 = vpop.permute.xlu1 %3175 }
 0x95f   :  { %v4781_v56 = vmul.f32 %v4525_v17, %v3176_v52  ;;  %v4501_v52 = vld [vmem:[%s11339_s3 + $0x78] sm:$0xff]  ;;  %v5023_v17 = vsel %vm2300_vm2, %v4755_v54, 0.0 }
 0x960   :  { %v4757_v2 = vmul.f32 %v4501_v52, %v9512_v27  ;;  %v4529_v27 = vld [vmem:[%s11339_s3 + $0x158] sm:$0xff]  ;;  %v5024_v41 = vadd.f32 %v5023_v17, %v5022_v47  ;;  %v5091_v52 = vsel %vm2300_vm2, %v4784_v51, 0.0 }
 0x961   :  { %v5085_v36 = vsel %vm2300_vm2, %v4781_v56, 0.0 }
 0x962   :  { %v5086_v32 = vadd.f32 %v5085_v36, %v5084_v14  ;;  %v5026_v56 = vadd.f32 %v5025_v5, %v5024_v41  ;;  %v11703_v36 = vld [vmem:[#allocation56_spill] sm:$0xff] }
 0x963   :  { %6687 = vset.pattern.permute.xlu2 %v7137_v20 }
 0x964   :  { %6690 = vset.pattern.permute.xlu1 %v7203_v48 }
 0x965   :  { %v3182_v44 = vpop.permute.xlu2 %3181 }
 0x966   :  { %v4782_v6 = vmul.f32 %v4526_v24, %v3182_v44  ;;  %v5062_v44 = vsel %vm2300_vm2, %v4772_v4, 0.0  ;;  %v5027_v24 = vsel %vm2300_vm2, %v4757_v2, 0.0 }
 0x967   :  { %v5063_v7 = vadd.f32 %v5062_v44, %v5061_v25  ;;  %v5028_v3 = vadd.f32 %v5027_v24, %v5026_v56 }
 0x968   :  { %v5087_v61 = vsel %vm2300_vm2, %v4782_v6, 0.0 }
 0x969   :  { %v5088_v8 = vadd.f32 %v5087_v61, %v5086_v32  ;;  %v5065_v54 = vadd.f32 %v5064_v37, %v5063_v7  ;;  %v5029_v12 = vrot.slane %v5028_v3, 4 }
 0x96b   :  { %3272 = vperm.xlu2 %6687, %v11696_v9   ;;  %v5066_v46 = vrot.slane %v5065_v54, 4  ;;  %v5030_v25 = vadd.f32 %v5029_v12, %v5028_v3 }
 0x96c   :  { %3296 = vperm.xlu1 %6690, %v11696_v9  }
 0x96d   :  { %v5067_v17 = vadd.f32 %v5066_v46, %v5065_v54  ;;  %v5031_v41 = vrot.slane %v5030_v25, 2  ;;  %v4535_v46 = vld [vmem:[%s11339_s3 + $0x188] sm:$0xff] }
 0x96e   :  { %v3188_v34 = vpop.permute.xlu1 %3187 }
 0x96f   :  { %v4783_v18 = vmul.f32 %v4527_v21, %v3188_v34  ;;  %v4531_v21 = vld [vmem:[%s11339_s3 + $0x168] sm:$0xff]  ;;  %v5068_v5 = vrot.slane %v5067_v17, 2 }
 0x971   :  { %v5089_v39 = vsel %vm2300_vm2, %v4783_v18, 0.0  ;;  %v4532_v18 = vld [vmem:[%s11339_s3 + $0x170] sm:$0xff] }
 0x972   :  { %v5090_v4 = vadd.f32 %v5089_v39, %v5088_v8  ;;  %v5069_v39 = vadd.f32 %v5068_v5, %v5067_v17  ;;  %v5032_v8 = vadd.f32 %v5031_v41, %v5030_v25 }
 0x973   :  { %6689 = vset.pattern.permute.xlu2 %v11633_v31 }
 0x974   :  { %6692 = vset.pattern.permute.xlu1 %v7291_v16  ;;  %v5092_v1 = vadd.f32 %v5091_v52, %v5090_v4  ;;  %v5033_v51 = vrot.slane %v5032_v8, 1 }
 0x975   :  { %v3200_v11 = vpop.permute.xlu2 %3199 }
 0x976   :  { %v4785_v15 = vmul.f32 %v4529_v27, %v3200_v11  ;;  %v4533_v11 = vld [vmem:[%s11339_s3 + $0x178] sm:$0xff]  ;;  %v5034_v4 = vadd.f32 %v5033_v51, %v5032_v8 }
 0x977   :  { %v4789_v47 = vmul.f32 %v4533_v11, %v3224_v30  ;;  %v4537_v11 = vld [vmem:[%s11339_s3 + $0x198] sm:$0xff] }
 0x978   :  { %v5093_v6 = vsel %vm2300_vm2, %v4785_v15, 0.0 }
 0x979   :  { %v5094_v26 = vadd.f32 %v5093_v6, %v5092_v1  ;;  %v5101_v27 = vsel %vm2300_vm2, %v4789_v47, 0.0  ;;  %v4536_v1 = vld [vmem:[%s11339_s3 + $0x190] sm:$0xff]  ;;  %v4538_v47 = vld [vmem:[%s11339_s3 + $0x1a0] sm:$0xff] }
 0x97b   :  { %3290 = vperm.xlu2 %6689, %v11696_v9  }
 0x97c   :  { %3308 = vperm.xlu1 %6692, %v11696_v9  }
 0x97e   :  { %v3206_v40 = vpop.permute.xlu1 %3205 }
 0x97f   :  { %v4786_v45 = vmul.f32 %v4530_v55, %v3206_v40  ;;  %v5070_v40 = vrot.slane %v5069_v39, 1 }
 0x981   :  { %v5095_v29 = vsel %vm2300_vm2, %v4786_v45, 0.0  ;;  %v5071_v54 = vadd.f32 %v5070_v40, %v5069_v39 }
 0x982   :  { %v5096_v44 = vadd.f32 %v5095_v29, %v5094_v26 }
 0x983   :  { %6691 = vset.pattern.permute.xlu2 %v11653_v63 }
 0x984   :  { %6694 = vset.pattern.permute.xlu1 %v7113_v58 }
 0x985   :  { %v3212_v34 = vpop.permute.xlu2 %3211 }
 0x986   :  { %v4787_v43 = vmul.f32 %v4531_v21, %v3212_v34  ;;  %v5606_v34 = vsel %vm2909_vm3, %v5071_v54, %v5034_v4 }
 0x988   :  { %v5097_v2 = vsel %vm2300_vm2, %v4787_v43, 0.0  ;;  %v4534_v43 = vld [vmem:[%s11339_s3 + $0x180] sm:$0xff] }
 0x989   :  { %v5098_v10 = vadd.f32 %v5097_v2, %v5096_v44 }
 0x98b   :  { %3302 = vperm.xlu2 %6691, %v11696_v9  }
 0x98c   :  { %3327 = vperm.xlu1 %6694, %v11703_v36  }
 0x98e   :  { %v3218_v14 = vpop.permute.xlu1 %3217 }
 0x98f   :  { %v4788_v61 = vmul.f32 %v4532_v18, %v3218_v14 }
 0x991   :  { %v5099_v37 = vsel %vm2300_vm2, %v4788_v61, 0.0  ;;  %v4539_v61 = vld [vmem:[%s11339_s3 + $0x1a8] sm:$0xff] }
 0x992   :  { %v5100_v32 = vadd.f32 %v5099_v37, %v5098_v10 }
 0x993   :  { %6693 = vset.pattern.permute.xlu2 %v7206_v49 }
 0x994   :  { %v5102_v7 = vadd.f32 %v5101_v27, %v5100_v32  ;;  %6696 = vset.pattern.permute.xlu1 %v7117_v59  ;;  %v4540_v32 = vld [vmem:[%s11339_s3 + $0x1b0] sm:$0xff]  ;;  %v11704_v27 = vld [vmem:[#allocation89_spill] sm:$0xff] }
 0x995   :  { %v4794_v41 = vmul.f32 %v4538_v47, %v11704_v27  ;;  %v4548_v27 = vld [vmem:[%s11339_s3 + $0x1f0] sm:$0xff] }
 0x996   :  { %v5103_v24 = vrot.slane %v5102_v7, 4 }
 0x998   :  { %v5104_v55 = vadd.f32 %v5103_v24, %v5102_v7  ;;  %v4541_v24 = vld [vmem:[%s11339_s3 + $0x1b8] sm:$0xff] }
 0x99a   :  { %v5105_v53 = vrot.slane %v5104_v55, 2 }
 0x99b   :  { %3320 = vperm.xlu2 %6693, %v11696_v9   ;;  %v3231_v9 = vpop.permute.xlu2 %3230 }
 0x99c   :  { %v5106_v56 = vadd.f32 %v5105_v53, %v5104_v55  ;;  %3339 = vperm.xlu1 %6696, %v11703_v36   ;;  %v4790_v30 = vmul.f32 %v4534_v43, %v3231_v9  ;;  %v4542_v55 = vld [vmem:[%s11339_s3 + $0x1c0] sm:$0xff]  ;;  %v5116_v53 = vsel %vm2300_vm2, %v4794_v41, 0.0 }
 0x99e   :  { %v5107_v15 = vrot.slane %v5106_v56, 1  ;;  %v3237_v45 = vpop.permute.xlu1 %3236  ;;  %v5109_v44 = vsel %vm2300_vm2, %v4790_v30, 0.0 }
 0x99f   :  { %v4791_v29 = vmul.f32 %v4535_v46, %v3237_v45  ;;  %v4543_v45 = vld [vmem:[%s11339_s3 + $0x1c8] sm:$0xff]  ;;  %v4544_v46 = vld [vmem:[%s11339_s3 + $0x1d0] sm:$0xff] }
 0x9a0   :  { %v5108_v21 = vadd.f32 %v5107_v15, %v5106_v56 }
 0x9a1   :  { %v5110_v18 = vsel %vm2300_vm2, %v4791_v29, 0.0  ;;  %v11705_v29 = vld [vmem:[#allocation176_spill] sm:$0xff] }
 0x9a2   :  { %v9791_v3 = vsel %vm2911_vm4, %v5108_v21, %v5606_v34  ;;  %v5111_v25 = vadd.f32 %v5110_v18, %v5109_v44  ;;  %v4546_v18 = vld [vmem:[%s11339_s3 + $0x1e0] sm:$0xff] }
 0x9a3   :  { %6695 = vset.pattern.permute.xlu2 %v7120_v60 }
 0x9a4   :  { %6698 = vset.pattern.permute.xlu1 %v11609_v38 }
 0x9a5   :  { %v3243_v52 = vpop.permute.xlu2 %3242 }
 0x9a6   :  { %v4792_v26 = vmul.f32 %v4536_v1, %v3243_v52  ;;  %v4545_v1 = vld [vmem:[%s11339_s3 + $0x1d8] sm:$0xff] }
 0x9a8   :  { %v5112_v14 = vsel %vm2300_vm2, %v4792_v26, 0.0 }
 0x9a9   :  { %v5113_v37 = vadd.f32 %v5112_v14, %v5111_v25 }
 0x9ab   :  { %3333 = vperm.xlu2 %6695, %v11703_v36  }
 0x9ac   :  { %3357 = vperm.xlu1 %6698, %v11703_v36  }
 0x9ae   :  { %v3249_v6 = vpop.permute.xlu1 %3248 }
 0x9af   :  { %v4793_v17 = vmul.f32 %v4537_v11, %v3249_v6  ;;  %v4799_v11 = vmul.f32 %v4543_v45, %v11705_v29  ;;  %v4551_v29 = vld [vmem:[%s11339_s3 + $0x208] sm:$0xff] }
 0x9b1   :  { %v5114_v5 = vsel %vm2300_vm2, %v4793_v17, 0.0  ;;  %v5126_v44 = vsel %vm2300_vm2, %v4799_v11, 0.0 }
 0x9b2   :  { %v5115_v39 = vadd.f32 %v5114_v5, %v5113_v37 }
 0x9b3   :  { %6697 = vset.pattern.permute.xlu2 %v11665_v22 }
 0x9b4   :  { %6700 = vset.pattern.permute.xlu1 %v7137_v20  ;;  %v5117_v54 = vadd.f32 %v5116_v53, %v5115_v39  ;;  %v4549_v53 = vld [vmem:[%s11339_s3 + $0x1f8] sm:$0xff] }
 0x9b5   :  { %v3261_v12 = vpop.permute.xlu2 %3260 }
 0x9b6   :  { %v4795_v7 = vmul.f32 %v4539_v61, %v3261_v12 }
 0x9b8   :  { %v5118_v51 = vsel %vm2300_vm2, %v4795_v7, 0.0 }
 0x9b9   :  { %v5119_v34 = vadd.f32 %v5118_v51, %v5117_v54 }
 0x9bb   :  { %3351 = vperm.xlu2 %6697, %v11703_v36  }
 0x9bc   :  { %3369 = vperm.xlu1 %6700, %v11703_v36  }
 0x9be   :  { %v3267_v2 = vpop.permute.xlu1 %3266 }
 0x9bf   :  { %v4796_v8 = vmul.f32 %v4540_v32, %v3267_v2 }
 0x9c1   :  { %v5120_v4 = vsel %vm2300_vm2, %v4796_v8, 0.0  ;;  %v11706_v8 = vld [vmem:[#allocation48_spill] sm:$0xff] }
 0x9c2   :  { %v5121_v52 = vadd.f32 %v5120_v4, %v5119_v34 }
 0x9c3   :  { %6699 = vset.pattern.permute.xlu2 %v7173_v42 }
 0x9c4   :  { %6702 = vset.pattern.permute.xlu1 %v11633_v31 }
 0x9c5   :  { %v3273_v10 = vpop.permute.xlu2 %3272 }
 0x9c6   :  { %v4797_v56 = vmul.f32 %v4541_v24, %v3273_v10  ;;  %v4547_v10 = vld [vmem:[%s11339_s3 + $0x1e8] sm:$0xff] }
 0x9c8   :  { %v5122_v9 = vsel %vm2300_vm2, %v4797_v56, 0.0 }
 0x9c9   :  { %v5123_v43 = vadd.f32 %v5122_v9, %v5121_v52  ;;  %v11707_v9 = vld [vmem:[#allocation15_spill] sm:$0xff] }
 0x9cb   :  { %3363 = vperm.xlu2 %6699, %v11703_v36  }
 0x9cc   :  { %3387 = vperm.xlu1 %6702, %v11703_v36  }
 0x9ce   :  { %v3279_v40 = vpop.permute.xlu1 %3278 }
 0x9cf   :  { %v4798_v21 = vmul.f32 %v4542_v55, %v3279_v40  ;;  %v4804_v55 = vmul.f32 %v4548_v27, %v11706_v8  ;;  %v11708_v27 = vld [vmem:[#allocation75_spill] sm:$0xff] }
 0x9d1   :  { %v5124_v6 = vsel %vm2300_vm2, %v4798_v21, 0.0  ;;  %v5136_v56 = vsel %vm2300_vm2, %v4804_v55, 0.0  ;;  %v4557_v55 = vld [vmem:[%s11339_s3 + $0x238] sm:$0xff] }
 0x9d2   :  { %v5125_v26 = vadd.f32 %v5124_v6, %v5123_v43 }
 0x9d3   :  { %6701 = vset.pattern.permute.xlu2 %v11668_v33 }
 0x9d4   :  { %6704 = vset.pattern.permute.xlu1 %v11653_v63  ;;  %v5127_v25 = vadd.f32 %v5126_v44, %v5125_v26  ;;  %v4552_v26 = vld [vmem:[%s11339_s3 + $0x210] sm:$0xff] }
 0x9d5   :  { %v3291_v15 = vpop.permute.xlu2 %3290 }
 0x9d6   :  { %v4800_v30 = vmul.f32 %v4544_v46, %v3291_v15 }
 0x9d8   :  { %v5128_v14 = vsel %vm2300_vm2, %v4800_v30, 0.0  ;;  %v4550_v30 = vld [vmem:[%s11339_s3 + $0x200] sm:$0xff] }
 0x9d9   :  { %v5129_v5 = vadd.f32 %v5128_v14, %v5127_v25  ;;  %v4554_v25 = vld [vmem:[%s11339_s3 + $0x220] sm:$0xff] }
 0x9db   :  { %3381 = vperm.xlu2 %6701, %v11703_v36  }
 0x9dc   :  { %3399 = vperm.xlu1 %6704, %v11703_v36  }
 0x9de   :  { %v3297_v12 = vpop.permute.xlu1 %3296 }
 0x9df   :  { %v4801_v2 = vmul.f32 %v4545_v1, %v3297_v12 }
 0x9e1   :  { %v5130_v61 = vsel %vm2300_vm2, %v4801_v2, 0.0 }
 0x9e2   :  { %v5131_v41 = vadd.f32 %v5130_v61, %v5129_v5 }
 0x9e3   :  { %6703 = vset.pattern.permute.xlu2 %v7203_v48 }
 0x9e4   :  { %6706 = vset.pattern.permute.xlu1 %v7206_v49 }
 0x9e5   :  { %v3303_v17 = vpop.permute.xlu2 %3302 }
 0x9e6   :  { %v4802_v47 = vmul.f32 %v4546_v18, %v3303_v17 }
 0x9e8   :  { %v5132_v37 = vsel %vm2300_vm2, %v4802_v47, 0.0  ;;  %v4553_v47 = vld [vmem:[%s11339_s3 + $0x218] sm:$0xff] }
 0x9e9   :  { %v5133_v39 = vadd.f32 %v5132_v37, %v5131_v41  ;;  %v4809_v41 = vmul.f32 %v4553_v47, %v11708_v27 }
 0x9eb   :  { %3393 = vperm.xlu2 %6703, %v11703_v36  }
 0x9ec   :  { %3417 = vperm.xlu1 %6706, %v11703_v36  }
 0x9ee   :  { %v3309_v32 = vpop.permute.xlu1 %3308 }
 0x9ef   :  { %v4803_v7 = vmul.f32 %v4547_v10, %v3309_v32  ;;  %v4555_v32 = vld [vmem:[%s11339_s3 + $0x228] sm:$0xff] }
 0x9f1   :  { %v5134_v24 = vsel %vm2300_vm2, %v4803_v7, 0.0 }
 0x9f2   :  { %v5135_v40 = vadd.f32 %v5134_v24, %v5133_v39  ;;  %v4556_v24 = vld [vmem:[%s11339_s3 + $0x230] sm:$0xff] }
 0x9f3   :  { %6705 = vset.pattern.permute.xlu2 %v7215_v50 }
 0x9f4   :  { %6708 = vset.pattern.permute.xlu1 %v7120_v60  ;;  %v5137_v15 = vadd.f32 %v5136_v56, %v5135_v40 }
 0x9f5   :  { %v3321_v51 = vpop.permute.xlu2 %3320 }
 0x9f6   :  { %v4805_v54 = vmul.f32 %v4549_v53, %v3321_v51  ;;  %v5151_v53 = vsel %vm2300_vm2, %v4809_v41, 0.0 }
 0x9f8   :  { %v5138_v4 = vsel %vm2300_vm2, %v4805_v54, 0.0 }
 0x9f9   :  { %v5139_v21 = vadd.f32 %v5138_v4, %v5137_v15 }
 0x9fb   :  { %v5140_v34 = vrot.slane %v5139_v21, 4  ;;  %3411 = vperm.xlu2 %6705, %v11703_v36  }
 0x9fc   :  { %3430 = vperm.xlu1 %6708, %v11707_v9  }
 0x9fd   :  { %v5141_v45 = vadd.f32 %v5140_v34, %v5139_v21 }
 0x9fe   :  { %v3328_v36 = vpop.permute.xlu1 %3327 }
 0x9ff   :  { %v5142_v52 = vrot.slane %v5141_v45, 2  ;;  %v4806_v17 = vmul.f32 %v4550_v30, %v3328_v36 }
 0xa01   :  { %v5143_v46 = vadd.f32 %v5142_v52, %v5141_v45  ;;  %v5146_v10 = vsel %vm2300_vm2, %v4806_v17, 0.0  ;;  %v4558_v52 = vld [vmem:[%s11339_s3 + $0x240] sm:$0xff] }
 0xa03   :  { %v5144_v6 = vrot.slane %v5143_v46, 1  ;;  %6707 = vset.pattern.permute.xlu2 %v7113_v58 }
 0xa04   :  { %6710 = vset.pattern.permute.xlu1 %v11665_v22 }
 0xa05   :  { %v5145_v43 = vadd.f32 %v5144_v6, %v5143_v46  ;;  %v3334_v12 = vpop.permute.xlu2 %3333  ;;  %v4559_v6 = vld [vmem:[%s11339_s3 + $0x248] sm:$0xff] }
 0xa06   :  { %v4807_v18 = vmul.f32 %v4551_v29, %v3334_v12  ;;  %v4560_v12 = vld [vmem:[%s11339_s3 + $0x250] sm:$0xff]  ;;  %v11709_v29 = vld [vmem:[#allocation146_spill] sm:$0xff] }
 0xa07   :  { %v9888_v1 = vsel %vm2913_vm5, %v5145_v43, %v9791_v3 }
 0xa08   :  { %v5147_v14 = vsel %vm2300_vm2, %v4807_v18, 0.0  ;;  %v4561_v18 = vld [vmem:[%s11339_s3 + $0x258] sm:$0xff] }
 0xa09   :  { %v5148_v37 = vadd.f32 %v5147_v14, %v5146_v10  ;;  %v4563_v10 = vld [vmem:[%s11339_s3 + $0x268] sm:$0xff] }
 0xa0b   :  { %3424 = vperm.xlu2 %6707, %v11707_v9  }
 0xa0c   :  { %3448 = vperm.xlu1 %6710, %v11707_v9  }
 0xa0e   :  { %v3340_v3 = vpop.permute.xlu1 %3339 }
 0xa0f   :  { %v4808_v2 = vmul.f32 %v4552_v26, %v3340_v3 }
 0xa11   :  { %v5149_v5 = vsel %vm2300_vm2, %v4808_v2, 0.0 }
 0xa12   :  { %v5150_v39 = vadd.f32 %v5149_v5, %v5148_v37  ;;  %v4562_v37 = vld [vmem:[%s11339_s3 + $0x260] sm:$0xff] }
 0xa13   :  { %6709 = vset.pattern.permute.xlu2 %v7134_v19 }
 0xa14   :  { %6712 = vset.pattern.permute.xlu1 %v7173_v42  ;;  %v5152_v54 = vadd.f32 %v5151_v53, %v5150_v39 }
 0xa15   :  { %v3352_v11 = vpop.permute.xlu2 %3351 }
 0xa16   :  { %v4810_v7 = vmul.f32 %v4554_v25, %v3352_v11  ;;  %v4814_v11 = vmul.f32 %v4558_v52, %v11709_v29 }
 0xa18   :  { %v5153_v51 = vsel %vm2300_vm2, %v4810_v7, 0.0  ;;  %v4819_v7 = vmul.f32 %v4563_v10, %v8465_v28  ;;  %v11710_v28 = vld [vmem:[#allocation40_spill] sm:$0xff] }
 0xa19   :  { %v5154_v34 = vadd.f32 %v5153_v51, %v5152_v54  ;;  %v4564_v51 = vld [vmem:[%s11339_s3 + $0x270] sm:$0xff] }
 0xa1b   :  { %3442 = vperm.xlu2 %6709, %v11707_v9  }
 0xa1c   :  { %3460 = vperm.xlu1 %6712, %v11707_v9  }
 0xa1e   :  { %v3358_v44 = vpop.permute.xlu1 %3357 }
 0xa1f   :  { %v4811_v8 = vmul.f32 %v4555_v32, %v3358_v44  ;;  %v5161_v44 = vsel %vm2300_vm2, %v4814_v11, 0.0 }
 0xa21   :  { %v5155_v4 = vsel %vm2300_vm2, %v4811_v8, 0.0 }
 0xa22   :  { %v5156_v46 = vadd.f32 %v5155_v4, %v5154_v34 }
 0xa23   :  { %6711 = vset.pattern.permute.xlu2 %v11609_v38 }
 0xa24   :  { %6715 = vset.pattern.permute.xlu1 %v11668_v33 }
 0xa25   :  { %v3364_v61 = vpop.permute.xlu2 %3363 }
 0xa26   :  { %v4812_v56 = vmul.f32 %v4556_v24, %v3364_v61 }
 0xa28   :  { %v5157_v45 = vsel %vm2300_vm2, %v4812_v56, 0.0 }
 0xa29   :  { %v5158_v36 = vadd.f32 %v5157_v45, %v5156_v46 }
 0xa2b   :  { %3454 = vperm.xlu2 %6711, %v11707_v9  }
 0xa2c   :  { %3478 = vperm.xlu1 %6715, %v11707_v9  }
 0xa2e   :  { %v3370_v40 = vpop.permute.xlu1 %3369 }
 0xa2f   :  { %v4813_v21 = vmul.f32 %v4557_v55, %v3370_v40  ;;  %v5171_v40 = vsel %vm2300_vm2, %v4819_v7, 0.0  ;;  %v4584_v7 = vld [vmem:[%s11339_s3 + $0x310] sm:$0xff] }
 0xa31   :  { %v5159_v43 = vsel %vm2300_vm2, %v4813_v21, 0.0 }
 0xa32   :  { %v5160_v26 = vadd.f32 %v5159_v43, %v5158_v36 }
 0xa33   :  { %6714 = vset.pattern.permute.xlu2 %v7261_v62 }
 0xa34   :  { %6717 = vset.pattern.permute.xlu1 %v7203_v48  ;;  %v5162_v25 = vadd.f32 %v5161_v44, %v5160_v26 }
 0xa35   :  { %v3382_v15 = vpop.permute.xlu2 %3381 }
 0xa36   :  { %v4815_v30 = vmul.f32 %v4559_v6, %v3382_v15  ;;  %v4565_v15 = vld [vmem:[%s11339_s3 + $0x278] sm:$0xff] }
 0xa38   :  { %v5163_v14 = vsel %vm2300_vm2, %v4815_v30, 0.0 }
 0xa39   :  { %v5164_v5 = vadd.f32 %v5163_v14, %v5162_v25 }
 0xa3b   :  { %3472 = vperm.xlu2 %6714, %v11707_v9  }
 0xa3c   :  { %3490 = vperm.xlu1 %6717, %v11707_v9  }
 0xa3e   :  { %v3388_v3 = vpop.permute.xlu1 %3387 }
 0xa3f   :  { %v4816_v2 = vmul.f32 %v4560_v12, %v3388_v3 }
 0xa41   :  { %v5165_v61 = vsel %vm2300_vm2, %v4816_v2, 0.0 }
 0xa42   :  { %v5166_v27 = vadd.f32 %v5165_v61, %v5164_v5 }
 0xa43   :  { %6716 = vset.pattern.permute.xlu2 %v11633_v31 }
 0xa44   :  { %6720 = vset.pattern.permute.xlu1 %v7215_v50 }
 0xa45   :  { %v3394_v17 = vpop.permute.xlu2 %3393 }
 0xa46   :  { %v4817_v47 = vmul.f32 %v4561_v18, %v3394_v17 }
 0xa48   :  { %v5167_v32 = vsel %vm2300_vm2, %v4817_v47, 0.0 }
 0xa49   :  { %v5168_v24 = vadd.f32 %v5167_v32, %v5166_v27  ;;  %v4582_v32 = vld [vmem:[%s11339_s3 + $0x300] sm:$0xff] }
 0xa4b   :  { %3484 = vperm.xlu2 %6716, %v11707_v9  }
 0xa4c   :  { %3508 = vperm.xlu1 %6720, %v11707_v9  }
 0xa4e   :  { %v3400_v41 = vpop.permute.xlu1 %3399 }
 0xa4f   :  { %v4818_v39 = vmul.f32 %v4562_v37, %v3400_v41  ;;  %v4583_v41 = vld [vmem:[%s11339_s3 + $0x308] sm:$0xff] }
 0xa51   :  { %v5169_v8 = vsel %vm2300_vm2, %v4818_v39, 0.0 }
 0xa52   :  { %v5170_v55 = vadd.f32 %v5169_v8, %v5168_v24  ;;  %v4567_v24 = vld [vmem:[%s11339_s3 + $0x288] sm:$0xff] }
 0xa53   :  { %6719 = vset.pattern.permute.xlu2 %v7291_v16 }
 0xa54   :  { %6722 = vset.pattern.permute.xlu1 %v7113_v58  ;;  %v5172_v53 = vadd.f32 %v5171_v40, %v5170_v55  ;;  %v4585_v55 = vld [vmem:[%s11339_s3 + $0x318] sm:$0xff]  ;;  %v11711_v40 = vld [vmem:[#allocation57_spill] sm:$0xff] }
 0xa55   :  { %v3412_v56 = vpop.permute.xlu2 %3411 }
 0xa56   :  { %v4820_v54 = vmul.f32 %v4564_v51, %v3412_v56  ;;  %v4566_v51 = vld [vmem:[%s11339_s3 + $0x280] sm:$0xff] }
 0xa58   :  { %v5173_v4 = vsel %vm2300_vm2, %v4820_v54, 0.0 }
 0xa59   :  { %v5174_v45 = vadd.f32 %v5173_v4, %v5172_v53  ;;  %v4839_v53 = vmul.f32 %v4583_v41, %v11711_v40 }
 0xa5b   :  { %3502 = vperm.xlu2 %6719, %v11707_v9  }
 0xa5c   :  { %3521 = vperm.xlu1 %6722, %v11710_v28  }
 0xa5e   :  { %v3418_v21 = vpop.permute.xlu1 %3417 }
 0xa5f   :  { %v4821_v34 = vmul.f32 %v4565_v15, %v3418_v21 }
 0xa61   :  { %v5175_v52 = vsel %vm2300_vm2, %v4821_v34, 0.0  ;;  %v4587_v34 = vld [vmem:[%s11339_s3 + $0x328] sm:$0xff] }
 0xa62   :  { %v5176_v46 = vadd.f32 %v5175_v52, %v5174_v45  ;;  %v5221_v52 = vsel %vm2300_vm2, %v4839_v53, 0.0 }
 0xa63   :  { %6721 = vset.pattern.permute.xlu2 %v7206_v49 }
 0xa64   :  { %v5177_v6 = vrot.slane %v5176_v46, 4  ;;  %6724 = vset.pattern.permute.xlu1 %v7134_v19 }
 0xa66   :  { %v5178_v43 = vadd.f32 %v5177_v6, %v5176_v46  ;;  %v4568_v46 = vld [vmem:[%s11339_s3 + $0x290] sm:$0xff]  ;;  %v4569_v6 = vld [vmem:[%s11339_s3 + $0x298] sm:$0xff] }
 0xa68   :  { %v5179_v36 = vrot.slane %v5178_v43, 2 }
 0xa6a   :  { %v5180_v12 = vadd.f32 %v5179_v36, %v5178_v43 }
 0xa6b   :  { %3514 = vperm.xlu2 %6721, %v11707_v9   ;;  %v3425_v9 = vpop.permute.xlu2 %3424 }
 0xa6c   :  { %v5181_v3 = vrot.slane %v5180_v12, 1  ;;  %3539 = vperm.xlu1 %6724, %v11710_v28   ;;  %v4822_v21 = vmul.f32 %v4566_v51, %v3425_v9  ;;  %v4570_v9 = vld [vmem:[%s11339_s3 + $0x2a0] sm:$0xff]  ;;  %v4589_v51 = vld [vmem:[%s11339_s3 + $0x338] sm:$0xff] }
 0xa6e   :  { %v5182_v29 = vadd.f32 %v5181_v3, %v5180_v12 }
 0xa70   :  { %v9985_v11 = vsel %vm2915_vm6, %v5182_v29, %v9888_v1  ;;  %v3431_v1 = vpop.permute.xlu1 %3430 }
 0xa71   :  { %v4823_v54 = vmul.f32 %v4567_v24, %v3431_v1 }
 0xa73   :  { %6723 = vset.pattern.permute.xlu2 %v7117_v59  ;;  %v5184_v12 = vsel %vm2300_vm2, %v4823_v54, 0.0 }
 0xa74   :  { %6726 = vset.pattern.permute.xlu1 %v11609_v38 }
 0xa75   :  { %v3443_v30 = vpop.permute.xlu2 %3442 }
 0xa76   :  { %v4825_v41 = vmul.f32 %v4569_v6, %v3443_v30  ;;  %v4572_v30 = vld [vmem:[%s11339_s3 + $0x2b0] sm:$0xff] }
 0xa7b   :  { %3533 = vperm.xlu2 %6723, %v11710_v28  }
 0xa7c   :  { %3551 = vperm.xlu1 %6726, %v11710_v28  }
 0xa7e   :  { %v10008_v26 = vpop.permute.xlu1 %3448 }
 0xa7f   :  { %v4826_v40 = vmul.f32 %v4570_v9, %v10008_v26 }
 0xa81   :  { %v5190_v6 = vsel %vm2300_vm2, %v4826_v40, 0.0 }
 0xa83   :  { %6725 = vset.pattern.permute.xlu2 %v11665_v22 }
 0xa84   :  { %6728 = vset.pattern.permute.xlu1 %v7261_v62 }
 0xa85   :  { %v10011_v18 = vpop.permute.xlu2 %3454 }
 0xa8b   :  { %3545 = vperm.xlu2 %6725, %v11710_v28  }
 0xa8c   :  { %3569 = vperm.xlu1 %6728, %v11710_v28  }
 0xa8e   :  { %v10014_v17 = vpop.permute.xlu1 %3460 }
 0xa93   :  { %6727 = vset.pattern.permute.xlu2 %v7137_v20 }
 0xa94   :  { %6730 = vset.pattern.permute.xlu1 %v11633_v31 }
 0xa95   :  { %v10017_v2 = vpop.permute.xlu2 %3472 }
 0xa9b   :  { %3563 = vperm.xlu2 %6727, %v11710_v28  }
 0xa9c   :  { %3581 = vperm.xlu1 %6730, %v11710_v28  }
 0xa9e   :  { %v10020_v44 = vpop.permute.xlu1 %3478 }
 0xaa3   :  { %6729 = vset.pattern.permute.xlu2 %v11668_v33 }
 0xaa4   :  { %6732 = vset.pattern.permute.xlu1 %v7291_v16 }
 0xaa5   :  { %v10023_v14 = vpop.permute.xlu2 %3484 }
 0xaab   :  { %3575 = vperm.xlu2 %6729, %v11710_v28  }
 0xaac   :  { %3599 = vperm.xlu1 %6732, %v11710_v28  }
 0xaae   :  { %v10026_v47 = vpop.permute.xlu1 %3490 }
 0xab3   :  { %6731 = vset.pattern.permute.xlu2 %v11653_v63 }
 0xab4   :  { %6734 = vset.pattern.permute.xlu1 %v7206_v49 }
 0xab5   :  { %v10029_v25 = vpop.permute.xlu2 %3502 }
 0xabb   :  { %3593 = vperm.xlu2 %6731, %v11710_v28  }
 0xabc   :  { %3611 = vperm.xlu1 %6734, %v11710_v28  }
 0xabe   :  { %v10032_v61 = vpop.permute.xlu1 %3508 }
 0xac3   :  { %6733 = vset.pattern.permute.xlu2 %v7215_v50 }
 0xac4   :  { %6737 = vset.pattern.permute.xlu1 %v7117_v59 }
 0xac5   :  { %v10035_v10 = vpop.permute.xlu2 %3514 }
 0xacb   :  { %3605 = vperm.xlu2 %6733, %v11710_v28   ;;  %v4586_v28 = vld [vmem:[%s11339_s3 + $0x320] sm:$0xff] }
 0xacc   :  { %3630 = vperm.xlu1 %6737, %v7253_v57  }
 0xace   :  { %v3522_v5 = vpop.permute.xlu1 %3521 }
 0xacf   :  { %v4838_v8 = vmul.f32 %v4582_v32, %v3522_v5 }
 0xad1   :  { %v5220_v15 = vsel %vm2300_vm2, %v4838_v8, 0.0 }
 0xad2   :  { %v5222_v3 = vadd.f32 %v5221_v52, %v5220_v15 }
 0xad3   :  { %6736 = vset.pattern.permute.xlu2 %v7120_v60 }
 0xad4   :  { %6739 = vset.pattern.permute.xlu1 %v11665_v22 }
 0xad5   :  { %v3534_v37 = vpop.permute.xlu2 %3533 }
 0xad6   :  { %v4840_v56 = vmul.f32 %v4584_v7, %v3534_v37  ;;  %v11712_v37 = vld [vmem:[#allocation64_spill] sm:$0xff] }
 0xad7   :  { %v4824_v32 = vmul.f32 %v4568_v46, %v11712_v37 }
 0xad8   :  { %v5223_v43 = vsel %vm2300_vm2, %v4840_v56, 0.0 }
 0xad9   :  { %v5224_v7 = vadd.f32 %v5223_v43, %v5222_v3  ;;  %v5186_v54 = vsel %vm2300_vm2, %v4824_v32, 0.0  ;;  %v4828_v43 = vmul.f32 %v4572_v30, %v10014_v17  ;;  %v4574_v17 = vld [vmem:[%s11339_s3 + $0x2c0] sm:$0xff] }
 0xadb   :  { %3624 = vperm.xlu2 %6736, %v7253_v57  }
 0xadc   :  { %3642 = vperm.xlu1 %6739, %v7253_v57  }
 0xade   :  { %v3540_v27 = vpop.permute.xlu1 %3539 }
 0xadf   :  { %v4841_v4 = vmul.f32 %v4585_v55, %v3540_v27  ;;  %v5183_v27 = vsel %vm2300_vm2, %v4822_v21, 0.0  ;;  %v4588_v55 = vld [vmem:[%s11339_s3 + $0x330] sm:$0xff] }
 0xae0   :  { %v5185_v24 = vadd.f32 %v5184_v12, %v5183_v27 }
 0xae1   :  { %v5225_v1 = vsel %vm2300_vm2, %v4841_v4, 0.0  ;;  %v4590_v4 = vld [vmem:[%s11339_s3 + $0x340] sm:$0xff] }
 0xae2   :  { %v5226_v53 = vadd.f32 %v5225_v1, %v5224_v7  ;;  %v5187_v52 = vadd.f32 %v5186_v54, %v5185_v24 }
 0xae3   :  { %6738 = vset.pattern.permute.xlu2 %v7134_v19 }
 0xae4   :  { %6741 = vset.pattern.permute.xlu1 %v7137_v20 }
 0xae5   :  { %v3546_v39 = vpop.permute.xlu2 %3545 }
 0xae6   :  { %v4842_v36 = vmul.f32 %v4586_v28, %v3546_v39  ;;  %v4571_v39 = vld [vmem:[%s11339_s3 + $0x2a8] sm:$0xff]  ;;  %v5188_v28 = vsel %vm2300_vm2, %v4825_v41, 0.0  ;;  %v5194_v41 = vsel %vm2300_vm2, %v4828_v43, 0.0 }
 0xae7   :  { %v4827_v15 = vmul.f32 %v4571_v39, %v10011_v18  ;;  %v4591_v18 = vld [vmem:[%s11339_s3 + $0x348] sm:$0xff]  ;;  %v5189_v3 = vadd.f32 %v5188_v28, %v5187_v52  ;;  %v4576_v28 = vld [vmem:[%s11339_s3 + $0x2d0] sm:$0xff] }
 0xae8   :  { %v5227_v8 = vsel %vm2300_vm2, %v4842_v36, 0.0  ;;  %v4575_v39 = vld [vmem:[%s11339_s3 + $0x2c8] sm:$0xff] }
 0xae9   :  { %v5228_v26 = vadd.f32 %v5227_v8, %v5226_v53  ;;  %v5192_v1 = vsel %vm2300_vm2, %v4827_v15, 0.0  ;;  %v5191_v37 = vadd.f32 %v5190_v6, %v5189_v3  ;;  %v4593_v53 = vld [vmem:[%s11339_s3 + $0x358] sm:$0xff]  ;;  %v4832_v6 = vmul.f32 %v4576_v28, %v10023_v14  ;;  %v4578_v14 = vld [vmem:[%s11339_s3 + $0x2e0] sm:$0xff] }
 0xaeb   :  { %3636 = vperm.xlu2 %6738, %v7253_v57   ;;  %v5193_v24 = vadd.f32 %v5192_v1, %v5191_v37  ;;  %v5202_v1 = vsel %vm2300_vm2, %v4832_v6, 0.0 }
 0xaec   :  { %3660 = vperm.xlu1 %6741, %v7253_v57  }
 0xaed   :  { %v5195_v54 = vadd.f32 %v5194_v41, %v5193_v24 }
 0xaee   :  { %v3552_v45 = vpop.permute.xlu1 %3551 }
 0xaef   :  { %v4843_v5 = vmul.f32 %v4587_v34, %v3552_v45  ;;  %v11713_v34 = vld [vmem:[#allocation128_spill] sm:$0xff] }
 0xaf0   :  { %v4844_v45 = vmul.f32 %v4588_v55, %v11713_v34  ;;  %v11714_v55 = vld [vmem:[#allocation26_spill] sm:$0xff]  ;;  %v4577_v34 = vld [vmem:[%s11339_s3 + $0x2d8] sm:$0xff] }
 0xaf1   :  { %v5229_v56 = vsel %vm2300_vm2, %v4843_v5, 0.0  ;;  %v4573_v5 = vld [vmem:[%s11339_s3 + $0x2b8] sm:$0xff] }
 0xaf2   :  { %v5230_v36 = vadd.f32 %v5229_v56, %v5228_v26  ;;  %v4829_v40 = vmul.f32 %v4573_v5, %v11714_v55  ;;  %v4592_v56 = vld [vmem:[%s11339_s3 + $0x350] sm:$0xff]  ;;  %v4831_v26 = vmul.f32 %v4575_v39, %v10020_v44  ;;  %v4581_v39 = vld [vmem:[%s11339_s3 + $0x2f8] sm:$0xff] }
 0xaf3   :  { %6740 = vset.pattern.permute.xlu2 %v7173_v42 }
 0xaf4   :  { %6743 = vset.pattern.permute.xlu1 %v11668_v33  ;;  %v5196_v52 = vsel %vm2300_vm2, %v4829_v40, 0.0  ;;  %v5200_v44 = vsel %vm2300_vm2, %v4831_v26, 0.0 }
 0xaf5   :  { %v3564_v29 = vpop.permute.xlu2 %3563 }
 0xaf6   :  { %v4845_v46 = vmul.f32 %v4589_v51, %v3564_v29  ;;  %v5231_v29 = vsel %vm2300_vm2, %v4844_v45, 0.0  ;;  %v4830_v51 = vmul.f32 %v4574_v17, %v10017_v2  ;;  %v4849_v2 = vmul.f32 %v4593_v53, %v8169_v13 }
 0xaf7   :  { %v5232_v7 = vadd.f32 %v5231_v29, %v5230_v36  ;;  %v5197_v36 = vadd.f32 %v5196_v52, %v5195_v54  ;;  %v4837_v53 = vmul.f32 %v4581_v39, %v10035_v10  ;;  %v4595_v10 = vld [vmem:[%s11339_s3 + $0x368] sm:$0xff] }
 0xaf8   :  { %v5233_v32 = vsel %vm2300_vm2, %v4845_v46, 0.0  ;;  %v5198_v46 = vsel %vm2300_vm2, %v4830_v51, 0.0  ;;  %v5241_v3 = vsel %vm2300_vm2, %v4849_v2, 0.0 }
 0xaf9   :  { %v5234_v30 = vadd.f32 %v5233_v32, %v5232_v7  ;;  %v4580_v32 = vld [vmem:[%s11339_s3 + $0x2f0] sm:$0xff]  ;;  %v5212_v54 = vsel %vm2300_vm2, %v4837_v53, 0.0  ;;  %v4599_v53 = vld [vmem:[%s11339_s3 + $0x388] sm:$0xff] }
 0xafb   :  { %3654 = vperm.xlu2 %6740, %v7253_v57  }
 0xafc   :  { %3672 = vperm.xlu1 %6743, %v7253_v57  }
 0xafe   :  { %v3570_v21 = vpop.permute.xlu1 %3569 }
 0xaff   :  { %v4846_v9 = vmul.f32 %v4590_v4, %v3570_v21 }
 0xb01   :  { %v5235_v8 = vsel %vm2300_vm2, %v4846_v9, 0.0  ;;  %v5199_v9 = vadd.f32 %v5198_v46, %v5197_v36 }
 0xb02   :  { %v5236_v4 = vadd.f32 %v5235_v8, %v5234_v30  ;;  %v4836_v8 = vmul.f32 %v4580_v32, %v10032_v61  ;;  %v4594_v61 = vld [vmem:[%s11339_s3 + $0x360] sm:$0xff] }
 0xb03   :  { %6742 = vset.pattern.permute.xlu2 %v7261_v62  ;;  %v5201_v29 = vadd.f32 %v5200_v44, %v5199_v9  ;;  %v4597_v44 = vld [vmem:[%s11339_s3 + $0x378] sm:$0xff] }
 0xb04   :  { %6745 = vset.pattern.permute.xlu1 %v11653_v63 }
 0xb05   :  { %v3576_v12 = vpop.permute.xlu2 %3575  ;;  %v5203_v17 = vadd.f32 %v5202_v1, %v5201_v29 }
 0xb06   :  { %v4847_v27 = vmul.f32 %v4591_v18, %v3576_v12  ;;  %v4833_v12 = vmul.f32 %v4577_v34, %v10026_v47  ;;  %v4579_v47 = vld [vmem:[%s11339_s3 + $0x2e8] sm:$0xff] }
 0xb07   :  { %v4835_v7 = vmul.f32 %v4579_v47, %v10029_v25  ;;  %v5210_v25 = vsel %vm2300_vm2, %v4836_v8, 0.0 }
 0xb08   :  { %v5237_v15 = vsel %vm2300_vm2, %v4847_v27, 0.0  ;;  %v5204_v37 = vsel %vm2300_vm2, %v4833_v12, 0.0  ;;  %v11715_v27 = vld [vmem:[#allocation34_spill] sm:$0xff] }
 0xb09   :  { %v5238_v43 = vadd.f32 %v5237_v15, %v5236_v4  ;;  %v4834_v41 = vmul.f32 %v4578_v14, %v11715_v27  ;;  %v5205_v24 = vadd.f32 %v5204_v37, %v5203_v17  ;;  %v5208_v40 = vsel %vm2300_vm2, %v4835_v7, 0.0 }
 0xb0b   :  { %3666 = vperm.xlu2 %6742, %v7253_v57   ;;  %v5206_v55 = vsel %vm2300_vm2, %v4834_v41, 0.0 }
 0xb0c   :  { %3690 = vperm.xlu1 %6745, %v7253_v57   ;;  %v5207_v51 = vadd.f32 %v5206_v55, %v5205_v24 }
 0xb0e   :  { %v3582_v21 = vpop.permute.xlu1 %3581 }
 0xb0f   :  { %v4848_v45 = vmul.f32 %v4592_v56, %v3582_v21  ;;  %v5209_v56 = vadd.f32 %v5208_v40, %v5207_v51  ;;  %v4596_v21 = vld [vmem:[%s11339_s3 + $0x370] sm:$0xff]  ;;  %v4598_v51 = vld [vmem:[%s11339_s3 + $0x380] sm:$0xff] }
 0xb11   :  { %v5239_v18 = vsel %vm2300_vm2, %v4848_v45, 0.0  ;;  %v5211_v28 = vadd.f32 %v5210_v25, %v5209_v56  ;;  %v4600_v25 = vld [vmem:[%s11339_s3 + $0x390] sm:$0xff] }
 0xb12   :  { %v5240_v13 = vadd.f32 %v5239_v18, %v5238_v43  ;;  %v11716_v18 = vld [vmem:[#allocation27_spill] sm:$0xff] }
 0xb13   :  { %6744 = vset.pattern.permute.xlu2 %v7203_v48  ;;  %v5213_v15 = vadd.f32 %v5212_v54, %v5211_v28  ;;  %v4601_v54 = vld [vmem:[%s11339_s3 + $0x398] sm:$0xff] }
 0xb14   :  { %6747 = vset.pattern.permute.xlu1 %v7215_v50  ;;  %v5242_v5 = vadd.f32 %v5241_v3, %v5240_v13 }
 0xb15   :  { %v3594_v30 = vpop.permute.xlu2 %3593  ;;  %v5214_v34 = vrot.slane %v5213_v15, 4 }
 0xb16   :  { %v4850_v4 = vmul.f32 %v4594_v61, %v3594_v30  ;;  %v11717_v61 = vld [vmem:[#allocation43_spill] sm:$0xff] }
 0xb17   :  { %v5215_v6 = vadd.f32 %v5214_v34, %v5213_v15  ;;  %v4854_v15 = vmul.f32 %v4598_v51, %v11717_v61  ;;  %v11719_v61 = vld [vmem:[#allocation161_spill] sm:$0xff] }
 0xb18   :  { %v5243_v52 = vsel %vm2300_vm2, %v4850_v4, 0.0 }
 0xb19   :  { %v5244_v36 = vadd.f32 %v5243_v52, %v5242_v5  ;;  %v5216_v9 = vrot.slane %v5215_v6, 2 }
 0xb1b   :  { %3684 = vperm.xlu2 %6744, %v7253_v57   ;;  %v5217_v37 = vadd.f32 %v5216_v9, %v5215_v6  ;;  %v4605_v9 = vld [vmem:[%s11339_s3 + $0x3b8] sm:$0xff] }
 0xb1c   :  { %3702 = vperm.xlu1 %6747, %v7253_v57  }
 0xb1d   :  { %v5218_v17 = vrot.slane %v5217_v37, 1 }
 0xb1e   :  { %v3600_v26 = vpop.permute.xlu1 %3599 }
 0xb1f   :  { %v4851_v45 = vmul.f32 %v4595_v10, %v3600_v26  ;;  %v5219_v41 = vadd.f32 %v5218_v17, %v5217_v37  ;;  %v4602_v26 = vld [vmem:[%s11339_s3 + $0x3a0] sm:$0xff] }
 0xb20   :  { %v4606_v37 = vld [vmem:[%s11339_s3 + $0x3c0] sm:$0xff] }
 0xb21   :  { %v5245_v43 = vsel %vm2300_vm2, %v4851_v45, 0.0  ;;  %v5610_v39 = vsel %vm2917_vm7, %v5219_v41, %v9985_v11 }
 0xb22   :  { %v5246_v13 = vadd.f32 %v5245_v43, %v5244_v36  ;;  %v4603_v43 = vld [vmem:[%s11339_s3 + $0x3a8] sm:$0xff] }
 0xb23   :  { %6746 = vset.pattern.permute.xlu2 %v7291_v16 }
 0xb24   :  { %6749 = vset.pattern.permute.xlu1 %v7120_v60 }
 0xb25   :  { %v3606_v2 = vpop.permute.xlu2 %3605 }
 0xb26   :  { %v4852_v46 = vmul.f32 %v4596_v21, %v3606_v2  ;;  %v5257_v2 = vsel %vm2300_vm2, %v4854_v15, 0.0 }
 0xb28   :  { %v5247_v12 = vsel %vm2300_vm2, %v4852_v46, 0.0 }
 0xb29   :  { %v5248_v14 = vadd.f32 %v5247_v12, %v5246_v13 }
 0xb2b   :  { %3696 = vperm.xlu2 %6746, %v7253_v57  }
 0xb2c   :  { %3721 = vperm.xlu1 %6749, %v11716_v18  }
 0xb2e   :  { %v3612_v3 = vpop.permute.xlu1 %3611 }
 0xb2f   :  { %v4853_v1 = vmul.f32 %v4597_v44, %v3612_v3  ;;  %v4604_v44 = vld [vmem:[%s11339_s3 + $0x3b0] sm:$0xff] }
 0xb31   :  { %v5249_v29 = vsel %vm2300_vm2, %v4853_v1, 0.0  ;;  %v11718_v1 = vld [vmem:[#allocation108_spill] sm:$0xff] }
 0xb32   :  { %v5250_v47 = vadd.f32 %v5249_v29, %v5248_v14  ;;  %v4859_v14 = vmul.f32 %v4603_v43, %v11718_v1  ;;  %v4613_v43 = vld [vmem:[%s11339_s3 + $0x3f8] sm:$0xff] }
 0xb33   :  { %6748 = vset.pattern.permute.xlu2 %v7113_v58 }
 0xb34   :  { %v5251_v57 = vrot.slane %v5250_v47, 4  ;;  %6751 = vset.pattern.permute.xlu1 %v7134_v19 }
 0xb35   :  { %v3625_v11 = vpop.permute.xlu2 %3624 }
 0xb36   :  { %v5252_v5 = vadd.f32 %v5251_v57, %v5250_v47  ;;  %v4855_v56 = vmul.f32 %v4599_v53, %v3625_v11  ;;  %v4608_v53 = vld [vmem:[%s11339_s3 + $0x3d0] sm:$0xff] }
 0xb37   :  { %v4864_v15 = vmul.f32 %v4608_v53, %v11719_v61 }
 0xb38   :  { %v5253_v32 = vrot.slane %v5252_v5, 2  ;;  %v5258_v4 = vsel %vm2300_vm2, %v4855_v56, 0.0 }
 0xb39   :  { %v5259_v52 = vadd.f32 %v5258_v4, %v5257_v2  ;;  %v4611_v4 = vld [vmem:[%s11339_s3 + $0x3e8] sm:$0xff] }
 0xb3a   :  { %v5254_v27 = vadd.f32 %v5253_v32, %v5252_v5  ;;  %v4607_v5 = vld [vmem:[%s11339_s3 + $0x3c8] sm:$0xff]  ;;  %v5266_v32 = vsel %vm2300_vm2, %v4859_v14, 0.0 }
 0xb3b   :  { %3715 = vperm.xlu2 %6748, %v11716_v18  }
 0xb3c   :  { %v5255_v7 = vrot.slane %v5254_v27, 1  ;;  %3733 = vperm.xlu1 %6751, %v11716_v18  }
 0xb3e   :  { %v5256_v24 = vadd.f32 %v5255_v7, %v5254_v27  ;;  %v3631_v55 = vpop.permute.xlu1 %3630 }
 0xb3f   :  { %v4856_v10 = vmul.f32 %v4600_v25, %v3631_v55  ;;  %v4609_v25 = vld [vmem:[%s11339_s3 + $0x3d8] sm:$0xff] }
 0xb40   :  { %v10206_v8 = vsel %vm2919_vm8, %v5256_v24, %v5610_v39 }
 0xb41   :  { %v5260_v34 = vsel %vm2300_vm2, %v4856_v10, 0.0 }
 0xb42   :  { %v5261_v36 = vadd.f32 %v5260_v34, %v5259_v52  ;;  %v5276_v34 = vsel %vm2300_vm2, %v4864_v15, 0.0 }
 0xb43   :  { %6750 = vset.pattern.permute.xlu2 %v7117_v59 }
 0xb44   :  { %6753 = vset.pattern.permute.xlu1 %v7173_v42 }
 0xb45   :  { %v3637_v40 = vpop.permute.xlu2 %3636 }
 0xb46   :  { %v4857_v21 = vmul.f32 %v4601_v54, %v3637_v40  ;;  %v4610_v54 = vld [vmem:[%s11339_s3 + $0x3e0] sm:$0xff] }
 0xb48   :  { %v5262_v6 = vsel %vm2300_vm2, %v4857_v21, 0.0 }
 0xb49   :  { %v5263_v3 = vadd.f32 %v5262_v6, %v5261_v36  ;;  %v3709_v36 = vpop.permute.xlu0 %3708 }
 0xb4a   :  { %v4869_v14 = vmul.f32 %v4613_v43, %v3709_v36  ;;  %v4620_v36 = vld [vmem:[%s11339_s3 + $0x430] sm:$0xff] }
 0xb4b   :  { %3727 = vperm.xlu2 %6750, %v11716_v18  }
 0xb4c   :  { %3751 = vperm.xlu1 %6753, %v11716_v18  }
 0xb4e   :  { %v3643_v30 = vpop.permute.xlu1 %3642 }
 0xb4f   :  { %v4858_v45 = vmul.f32 %v4602_v26, %v3643_v30 }
 0xb51   :  { %v5264_v13 = vsel %vm2300_vm2, %v4858_v45, 0.0 }
 0xb52   :  { %v5265_v47 = vadd.f32 %v5264_v13, %v5263_v3  ;;  %v4612_v13 = vld [vmem:[%s11339_s3 + $0x3f0] sm:$0xff] }
 0xb53   :  { %6752 = vset.pattern.permute.xlu2 %v11609_v38 }
 0xb54   :  { %6755 = vset.pattern.permute.xlu1 %v7261_v62  ;;  %v5267_v7 = vadd.f32 %v5266_v32, %v5265_v47 }
 0xb55   :  { %v3655_v28 = vpop.permute.xlu2 %3654 }
 0xb56   :  { %v4860_v29 = vmul.f32 %v4604_v44, %v3655_v28 }
 0xb58   :  { %v5268_v27 = vsel %vm2300_vm2, %v4860_v29, 0.0 }
 0xb59   :  { %v5269_v55 = vadd.f32 %v5268_v27, %v5267_v7 }
 0xb5b   :  { %3745 = vperm.xlu2 %6752, %v11716_v18  }
 0xb5c   :  { %3763 = vperm.xlu1 %6755, %v11716_v18  }
 0xb5e   :  { %v3661_v46 = vpop.permute.xlu1 %3660 }
 0xb5f   :  { %v4861_v57 = vmul.f32 %v4605_v9, %v3661_v46 }
 0xb61   :  { %v5270_v39 = vsel %vm2300_vm2, %v4861_v57, 0.0 }
 0xb62   :  { %v5271_v51 = vadd.f32 %v5270_v39, %v5269_v55  ;;  %v60_v39 = vld [vmem:[%s11336_s0 + $0x10] sm:$0xff] }
 0xb63   :  { %6754 = vset.pattern.permute.xlu2 %v7137_v20  ;;  %v2932_v55 = vadd.f32 %v8668_v35, %v60_v39  ;;  %v4623_v39 = vld [vmem:[%s11339_s3 + $0x448] sm:$0xff] }
 0xb64   :  { %6757 = vset.pattern.permute.xlu1 %v7203_v48 }
 0xb65   :  { %v3667_v12 = vpop.permute.xlu2 %3666 }
 0xb66   :  { %v4862_v41 = vmul.f32 %v4606_v37, %v3667_v12  ;;  %v11720_v12 = vld [vmem:[#allocation58_spill] sm:$0xff] }
 0xb68   :  { %v5272_v40 = vsel %vm2300_vm2, %v4862_v41, 0.0 }
 0xb69   :  { %v5273_v56 = vadd.f32 %v5272_v40, %v5271_v51  ;;  %v4615_v51 = vld [vmem:[%s11339_s3 + $0x408] sm:$0xff] }
 0xb6b   :  { %3757 = vperm.xlu2 %6754, %v11716_v18  }
 0xb6c   :  { %3781 = vperm.xlu1 %6757, %v11716_v18  }
 0xb6e   :  { %v3673_v17 = vpop.permute.xlu1 %3672 }
 0xb6f   :  { %v4863_v11 = vmul.f32 %v4607_v5, %v3673_v17  ;;  %v5286_v5 = vsel %vm2300_vm2, %v4869_v14, 0.0 }
 0xb71   :  { %v5274_v30 = vsel %vm2300_vm2, %v4863_v11, 0.0 }
 0xb72   :  { %v5275_v26 = vadd.f32 %v5274_v30, %v5273_v56  ;;  %v4614_v30 = vld [vmem:[%s11339_s3 + $0x400] sm:$0xff]  ;;  %v4616_v56 = vld [vmem:[%s11339_s3 + $0x410] sm:$0xff] }
 0xb73   :  { %6756 = vset.pattern.permute.xlu2 %v11633_v31 }
 0xb74   :  { %6759 = vset.pattern.permute.xlu1 %v7291_v16  ;;  %v5277_v46 = vadd.f32 %v5276_v34, %v5275_v26 }
 0xb75   :  { %v3685_v24 = vpop.permute.xlu2 %3684 }
 0xb76   :  { %v4865_v10 = vmul.f32 %v4609_v25, %v3685_v24 }
 0xb78   :  { %v5278_v45 = vsel %vm2300_vm2, %v4865_v10, 0.0 }
 0xb79   :  { %v5279_v44 = vadd.f32 %v5278_v45, %v5277_v46  ;;  %v4618_v45 = vld [vmem:[%s11339_s3 + $0x420] sm:$0xff]  ;;  %v4619_v46 = vld [vmem:[%s11339_s3 + $0x428] sm:$0xff] }
 0xb7b   :  { %3775 = vperm.xlu2 %6756, %v11716_v18  }
 0xb7c   :  { %3793 = vperm.xlu1 %6759, %v11716_v18  }
 0xb7e   :  { %v3691_v28 = vpop.permute.xlu1 %3690 }
 0xb7f   :  { %v4866_v2 = vmul.f32 %v4610_v54, %v3691_v28  ;;  %v4617_v28 = vld [vmem:[%s11339_s3 + $0x418] sm:$0xff] }
 0xb81   :  { %v5280_v6 = vsel %vm2300_vm2, %v4866_v2, 0.0 }
 0xb82   :  { %v5281_v9 = vadd.f32 %v5280_v6, %v5279_v44  ;;  %v11721_v44 = vld [vmem:[#allocation93_spill] sm:$0xff] }
 0xb83   :  { %6758 = vset.pattern.permute.xlu2 %v11653_v63 }
 0xb84   :  { %6761 = vset.pattern.permute.xlu1 %v7113_v58 }
 0xb85   :  { %v3697_v21 = vpop.permute.xlu2 %3696 }
 0xb86   :  { %v4867_v52 = vmul.f32 %v4611_v4, %v3697_v21 }
 0xb88   :  { %v5282_v3 = vsel %vm2300_vm2, %v4867_v52, 0.0 }
 0xb89   :  { %v5283_v47 = vadd.f32 %v5282_v3, %v5281_v9 }
 0xb8b   :  { %3787 = vperm.xlu2 %6758, %v11716_v18  }
 0xb8c   :  { %3812 = vperm.xlu1 %6761, %v11720_v12  }
 0xb8e   :  { %v3703_v1 = vpop.permute.xlu1 %3702 }
 0xb8f   :  { %v4868_v29 = vmul.f32 %v4612_v13, %v3703_v1  ;;  %v4874_v13 = vmul.f32 %v4618_v45, %v11721_v44  ;;  %v4621_v1 = vld [vmem:[%s11339_s3 + $0x438] sm:$0xff] }
 0xb91   :  { %v5284_v37 = vsel %vm2300_vm2, %v4868_v29, 0.0 }
 0xb92   :  { %v5285_v57 = vadd.f32 %v5284_v37, %v5283_v47  ;;  %v4622_v47 = vld [vmem:[%s11339_s3 + $0x440] sm:$0xff] }
 0xb93   :  { %6760 = vset.pattern.permute.xlu2 %v7206_v49 }
 0xb94   :  { %v5287_v17 = vadd.f32 %v5286_v5, %v5285_v57  ;;  %6763 = vset.pattern.permute.xlu1 %v7117_v59  ;;  %v5301_v57 = vsel %vm2300_vm2, %v4874_v13, 0.0 }
 0xb96   :  { %v5288_v32 = vrot.slane %v5287_v17, 4 }
 0xb98   :  { %v5289_v27 = vadd.f32 %v5288_v32, %v5287_v17 }
 0xb9a   :  { %v5290_v41 = vrot.slane %v5289_v27, 2 }
 0xb9b   :  { %3805 = vperm.xlu2 %6760, %v11716_v18   ;;  %v3716_v18 = vpop.permute.xlu2 %3715 }
 0xb9c   :  { %v5291_v7 = vadd.f32 %v5290_v41, %v5289_v27  ;;  %3824 = vperm.xlu1 %6763, %v11720_v12   ;;  %v4870_v61 = vmul.f32 %v4614_v30, %v3716_v18 }
 0xb9e   :  { %v5292_v24 = vrot.slane %v5291_v7, 1  ;;  %v3722_v35 = vpop.permute.xlu1 %3721  ;;  %v5294_v2 = vsel %vm2300_vm2, %v4870_v61, 0.0 }
 0xb9f   :  { %v4871_v54 = vmul.f32 %v4615_v51, %v3722_v35  ;;  %v11722_v51 = vld [vmem:[#allocation177_spill] sm:$0xff] }
 0xba0   :  { %v5293_v11 = vadd.f32 %v5292_v24, %v5291_v7 }
 0xba1   :  { %v5295_v26 = vsel %vm2300_vm2, %v4871_v54, 0.0 }
 0xba2   :  { %v5612_v40 = vsel %vm2921_vm9, %v5293_v11, %v10206_v8  ;;  %v5296_v52 = vadd.f32 %v5295_v26, %v5294_v2  ;;  %v4626_v26 = vld [vmem:[%s11339_s3 + $0x460] sm:$0xff] }
 0xba3   :  { %6762 = vset.pattern.permute.xlu2 %v7120_v60  ;;  %v10306_v53 = vadd.f32 %v5612_v40, %v2932_v55  ;;  %v4624_v55 = vld [vmem:[%s11339_s3 + $0x450] sm:$0xff] }
 0xba4   :  { %6765 = vset.pattern.permute.xlu1 %v11609_v38 }
 0xba5   :  { %v3728_v8 = vpop.permute.xlu2 %3727  ;;  %vm5624_vm10 = vcmp.gt.f32.partialorder %v10306_v53, 0.0 }
 0xba6   :  { %v4872_v15 = vmul.f32 %v4616_v56, %v3728_v8  ;;  %v4625_v8 = vld [vmem:[%s11339_s3 + $0x458] sm:$0xff] }
 0xba8   :  { %v5297_v34 = vsel %vm2300_vm2, %v4872_v15, 0.0 }
 0xba9   :  { %v5298_v43 = vadd.f32 %v5297_v34, %v5296_v52 }
 0xbab   :  { %3818 = vperm.xlu2 %6762, %v11720_v12  }
 0xbac   :  { %3842 = vperm.xlu1 %6765, %v11720_v12  }
 0xbae   :  { %v3734_v25 = vpop.permute.xlu1 %3733 }
 0xbaf   :  { %v4873_v4 = vmul.f32 %v4617_v28, %v3734_v25  ;;  %v4879_v25 = vmul.f32 %v4623_v39, %v11722_v51 }
 0xbb1   :  { %v5299_v6 = vsel %vm2300_vm2, %v4873_v4, 0.0  ;;  %v5311_v61 = vsel %vm2300_vm2, %v4879_v25, 0.0 }
 0xbb2   :  { %v5300_v9 = vadd.f32 %v5299_v6, %v5298_v43  ;;  %v4627_v6 = vld [vmem:[%s11339_s3 + $0x468] sm:$0xff] }
 0xbb3   :  { %6764 = vset.pattern.permute.xlu2 %v11665_v22 }
 0xbb4   :  { %6767 = vset.pattern.permute.xlu1 %v7137_v20  ;;  %v5302_v32 = vadd.f32 %v5301_v57, %v5300_v9 }
 0xbb5   :  { %v3746_v10 = vpop.permute.xlu2 %3745 }
 0xbb6   :  { %v4875_v3 = vmul.f32 %v4619_v46, %v3746_v10 }
 0xbb8   :  { %v5303_v5 = vsel %vm2300_vm2, %v4875_v3, 0.0  ;;  %v11723_v3 = vld [vmem:[#allocation49_spill] sm:$0xff] }
 0xbb9   :  { %v5304_v7 = vadd.f32 %v5303_v5, %v5302_v32  ;;  %v11724_v32 = vld [vmem:[#allocation30_spill] sm:$0xff] }
 0xbbb   :  { %3836 = vperm.xlu2 %6764, %v11720_v12  }
 0xbbc   :  { %3854 = vperm.xlu1 %6767, %v11720_v12  }
 0xbbe   :  { %v3752_v21 = vpop.permute.xlu1 %3751 }
 0xbbf   :  { %v4876_v29 = vmul.f32 %v4620_v36, %v3752_v21  ;;  %v4628_v36 = vld [vmem:[%s11339_s3 + $0x470] sm:$0xff] }
 0xbc0   :  { %v4884_v9 = vmul.f32 %v4628_v36, %v11723_v3  ;;  %v4638_v3 = vld [vmem:[%s11339_s3 + $0x4c0] sm:$0xff] }
 0xbc1   :  { %v5305_v27 = vsel %vm2300_vm2, %v4876_v29, 0.0 }
 0xbc2   :  { %v5306_v11 = vadd.f32 %v5305_v27, %v5304_v7  ;;  %v4630_v27 = vld [vmem:[%s11339_s3 + $0x480] sm:$0xff]  ;;  %v4631_v7 = vld [vmem:[%s11339_s3 + $0x488] sm:$0xff] }
 0xbc3   :  { %6766 = vset.pattern.permute.xlu2 %v7173_v42 }
 0xbc4   :  { %6769 = vset.pattern.permute.xlu1 %v11633_v31 }
 0xbc5   :  { %v3758_v14 = vpop.permute.xlu2 %3757 }
 0xbc6   :  { %v4877_v17 = vmul.f32 %v4621_v1, %v3758_v14  ;;  %v4629_v14 = vld [vmem:[%s11339_s3 + $0x478] sm:$0xff] }
 0xbc8   :  { %v5307_v24 = vsel %vm2300_vm2, %v4877_v17, 0.0 }
 0xbc9   :  { %v5308_v35 = vadd.f32 %v5307_v24, %v5306_v11 }
 0xbcb   :  { %3848 = vperm.xlu2 %6766, %v11720_v12  }
 0xbcc   :  { %3872 = vperm.xlu1 %6769, %v11720_v12  }
 0xbce   :  { %v3764_v37 = vpop.permute.xlu1 %3763 }
 0xbcf   :  { %v4878_v41 = vmul.f32 %v4622_v47, %v3764_v37  ;;  %v5321_v47 = vsel %vm2300_vm2, %v4884_v9, 0.0  ;;  %v4637_v9 = vld [vmem:[%s11339_s3 + $0x4b8] sm:$0xff] }
 0xbd1   :  { %v5309_v18 = vsel %vm2300_vm2, %v4878_v41, 0.0 }
 0xbd2   :  { %v5310_v54 = vadd.f32 %v5309_v18, %v5308_v35  ;;  %v4632_v18 = vld [vmem:[%s11339_s3 + $0x490] sm:$0xff] }
 0xbd3   :  { %6768 = vset.pattern.permute.xlu2 %v11668_v33 }
 0xbd4   :  { %6771 = vset.pattern.permute.xlu1 %v11653_v63  ;;  %v5312_v10 = vadd.f32 %v5311_v61, %v5310_v54 }
 0xbd5   :  { %v3776_v40 = vpop.permute.xlu2 %3775 }
 0xbd6   :  { %v4880_v30 = vmul.f32 %v4624_v55, %v3776_v40 }
 0xbd8   :  { %v5313_v15 = vsel %vm2300_vm2, %v4880_v30, 0.0  ;;  %v11725_v30 = vld [vmem:[#allocation79_spill] sm:$0xff] }
 0xbd9   :  { %v5314_v21 = vadd.f32 %v5313_v15, %v5312_v10 }
 0xbdb   :  { %3866 = vperm.xlu2 %6768, %v11720_v12  }
 0xbdc   :  { %3884 = vperm.xlu1 %6771, %v11720_v12  }
 0xbde   :  { %v3782_v56 = vpop.permute.xlu1 %3781 }
 0xbdf   :  { %v4881_v28 = vmul.f32 %v4625_v8, %v3782_v56  ;;  %v4633_v8 = vld [vmem:[%s11339_s3 + $0x498] sm:$0xff] }
 0xbe0   :  { %v4889_v56 = vmul.f32 %v4633_v8, %v11725_v30 }
 0xbe1   :  { %v5315_v4 = vsel %vm2300_vm2, %v4881_v28, 0.0  ;;  %v4634_v28 = vld [vmem:[%s11339_s3 + $0x4a0] sm:$0xff] }
 0xbe2   :  { %v5316_v45 = vadd.f32 %v5315_v4, %v5314_v21  ;;  %v5336_v15 = vsel %vm2300_vm2, %v4889_v56, 0.0 }
 0xbe3   :  { %6770 = vset.pattern.permute.xlu2 %v7203_v48 }
 0xbe4   :  { %6773 = vset.pattern.permute.xlu1 %v7206_v49 }
 0xbe5   :  { %v3788_v2 = vpop.permute.xlu2 %3787 }
 0xbe6   :  { %v4882_v34 = vmul.f32 %v4626_v26, %v3788_v2  ;;  %v4635_v2 = vld [vmem:[%s11339_s3 + $0x4a8] sm:$0xff] }
 0xbe8   :  { %v5317_v52 = vsel %vm2300_vm2, %v4882_v34, 0.0 }
 0xbe9   :  { %v5318_v46 = vadd.f32 %v5317_v52, %v5316_v45 }
 0xbeb   :  { %3878 = vperm.xlu2 %6770, %v11720_v12  }
 0xbec   :  { %3902 = vperm.xlu1 %6773, %v11720_v12  }
 0xbee   :  { %v3794_v43 = vpop.permute.xlu1 %3793 }
 0xbef   :  { %v4883_v44 = vmul.f32 %v4627_v6, %v3794_v43  ;;  %v4636_v6 = vld [vmem:[%s11339_s3 + $0x4b0] sm:$0xff] }
 0xbf1   :  { %v5319_v13 = vsel %vm2300_vm2, %v4883_v44, 0.0 }
 0xbf2   :  { %v5320_v1 = vadd.f32 %v5319_v13, %v5318_v46 }
 0xbf3   :  { %6772 = vset.pattern.permute.xlu2 %v7215_v50 }
 0xbf4   :  { %6775 = vset.pattern.permute.xlu1 %v7120_v60  ;;  %v5322_v57 = vadd.f32 %v5321_v47, %v5320_v1 }
 0xbf5   :  { %v3806_v29 = vpop.permute.xlu2 %3805 }
 0xbf6   :  { %v4885_v37 = vmul.f32 %v4629_v14, %v3806_v29  ;;  %v11726_v14 = vld [vmem:[#allocation148_spill] sm:$0xff] }
 0xbf7   :  { %v4894_v29 = vmul.f32 %v4638_v3, %v11726_v14  ;;  %v4645_v3 = vld [vmem:[%s11339_s3 + $0x4f8] sm:$0xff] }
 0xbf8   :  { %v5323_v5 = vsel %vm2300_vm2, %v4885_v37, 0.0 }
 0xbf9   :  { %v10396_v17 = vadd.f32 %v5323_v5, %v5322_v57  ;;  %v5346_v5 = vsel %vm2300_vm2, %v4894_v29, 0.0 }
 0xbfb   :  { %3896 = vperm.xlu2 %6772, %v11720_v12  }
 0xbfc   :  { %3915 = vperm.xlu1 %6775, %v11724_v32  }
 0xbfe   :  { %v3813_v41 = vpop.permute.xlu1 %3812 }
 0xbff   :  { %v4886_v24 = vmul.f32 %v4630_v27, %v3813_v41  ;;  %v4639_v27 = vld [vmem:[%s11339_s3 + $0x4c8] sm:$0xff] }
 0xc00   :  { %v11727_v41 = vld [vmem:[#allocation42_spill] sm:$0xff] }
 0xc01   :  { %v5331_v12 = vsel %vm2300_vm2, %v4886_v24, 0.0 }
 0xc03   :  { %6774 = vset.pattern.permute.xlu2 %v7113_v58 }
 0xc04   :  { %6777 = vset.pattern.permute.xlu1 %v11665_v22 }
 0xc05   :  { %v3819_v39 = vpop.permute.xlu2 %3818 }
 0xc06   :  { %v4887_v11 = vmul.f32 %v4631_v7, %v3819_v39 }
 0xc08   :  { %v5332_v55 = vsel %vm2300_vm2, %v4887_v11, 0.0 }
 0xc09   :  { %v5333_v40 = vadd.f32 %v5332_v55, %v5331_v12  ;;  %v11728_v55 = vld [vmem:[#allocation110_spill] sm:$0xff] }
 0xc0b   :  { %3909 = vperm.xlu2 %6774, %v11724_v32  }
 0xc0c   :  { %3933 = vperm.xlu1 %6777, %v11724_v32  }
 0xc0e   :  { %v3825_v35 = vpop.permute.xlu1 %3824 }
 0xc0f   :  { %v4888_v51 = vmul.f32 %v4632_v18, %v3825_v35 }
 0xc11   :  { %v5334_v25 = vsel %vm2300_vm2, %v4888_v51, 0.0 }
 0xc12   :  { %v5335_v54 = vadd.f32 %v5334_v25, %v5333_v40  ;;  %v4640_v40 = vld [vmem:[%s11339_s3 + $0x4d0] sm:$0xff]  ;;  %v4641_v25 = vld [vmem:[%s11339_s3 + $0x4d8] sm:$0xff] }
 0xc13   :  { %6776 = vset.pattern.permute.xlu2 %v7134_v19 }
 0xc14   :  { %6779 = vset.pattern.permute.xlu1 %v7173_v42  ;;  %v5337_v26 = vadd.f32 %v5336_v15, %v5335_v54  ;;  %v4642_v15 = vld [vmem:[%s11339_s3 + $0x4e0] sm:$0xff] }
 0xc15   :  { %v3837_v61 = vpop.permute.xlu2 %3836 }
 0xc16   :  { %v4890_v10 = vmul.f32 %v4634_v28, %v3837_v61  ;;  %v4643_v61 = vld [vmem:[%s11339_s3 + $0x4e8] sm:$0xff] }
 0xc18   :  { %v5338_v4 = vsel %vm2300_vm2, %v4890_v10, 0.0 }
 0xc19   :  { %v5339_v21 = vadd.f32 %v5338_v4, %v5337_v26  ;;  %v11729_v26 = vld [vmem:[#allocation20_spill] sm:$0xff] }
 0xc1a   :  { %v4899_v4 = vmul.f32 %v4643_v61, %v11729_v26  ;;  %v4649_v26 = vld [vmem:[%s11339_s3 + $0x518] sm:$0xff] }
 0xc1b   :  { %3927 = vperm.xlu2 %6776, %v11724_v32  }
 0xc1c   :  { %3945 = vperm.xlu1 %6779, %v11724_v32  }
 0xc1e   :  { %v3843_v34 = vpop.permute.xlu1 %3842 }
 0xc1f   :  { %v4891_v45 = vmul.f32 %v4635_v2, %v3843_v34 }
 0xc21   :  { %v5340_v52 = vsel %vm2300_vm2, %v4891_v45, 0.0  ;;  %v5356_v45 = vsel %vm2300_vm2, %v4899_v4, 0.0 }
 0xc22   :  { %v5341_v46 = vadd.f32 %v5340_v52, %v5339_v21  ;;  %v4644_v52 = vld [vmem:[%s11339_s3 + $0x4f0] sm:$0xff] }
 0xc23   :  { %6778 = vset.pattern.permute.xlu2 %v11609_v38 }
 0xc24   :  { %6782 = vset.pattern.permute.xlu1 %v7113_v58 }
 0xc25   :  { %v3849_v43 = vpop.permute.xlu2 %3848 }
 0xc26   :  { %v4892_v36 = vmul.f32 %v4636_v6, %v3849_v43 }
 0xc28   :  { %v5342_v44 = vsel %vm2300_vm2, %v4892_v36, 0.0 }
 0xc29   :  { %v5343_v13 = vadd.f32 %v5342_v44, %v5341_v46 }
 0xc2b   :  { %3939 = vperm.xlu2 %6778, %v11724_v32  }
 0xc2c   :  { %4006 = vperm.xlu1 %6782, %v11605_v23  }
 0xc2e   :  { %v3855_v1 = vpop.permute.xlu1 %3854 }
 0xc2f   :  { %v4893_v47 = vmul.f32 %v4637_v9, %v3855_v1 }
 0xc31   :  { %v5344_v37 = vsel %vm2300_vm2, %v4893_v47, 0.0 }
 0xc32   :  { %v5345_v57 = vadd.f32 %v5344_v37, %v5343_v13  ;;  %v5325_v13 = vrot.slane %v10396_v17, 4 }
 0xc33   :  { %6781 = vset.pattern.permute.xlu2 %v7261_v62 }
 0xc34   :  { %4103 = vperm.xlu1 %6782, %v11727_v41   ;;  %v5347_v7 = vadd.f32 %v5346_v5, %v5345_v57  ;;  %v5326_v9 = vadd.f32 %v5325_v13, %v10396_v17  ;;  %v4646_v17 = vld [vmem:[%s11339_s3 + $0x500] sm:$0xff]  ;;  %v4651_v13 = vld [vmem:[%s11339_s3 + $0x528] sm:$0xff] }
 0xc35   :  { %v3867_v24 = vpop.permute.xlu2 %3866 }
 0xc36   :  { %v4895_v39 = vmul.f32 %v4639_v27, %v3867_v24  ;;  %v5327_v47 = vrot.slane %v5326_v9, 2 }
 0xc38   :  { %v5348_v11 = vsel %vm2300_vm2, %v4895_v39, 0.0  ;;  %v5328_v5 = vadd.f32 %v5327_v47, %v5326_v9  ;;  %v4653_v47 = vld [vmem:[%s11339_s3 + $0x538] sm:$0xff] }
 0xc39   :  { %v5349_v12 = vadd.f32 %v5348_v11, %v5347_v7 }
 0xc3a   :  { %v5329_v24 = vrot.slane %v5328_v5, 1 }
 0xc3b   :  { %3957 = vperm.xlu2 %6781, %v11724_v32  }
 0xc3c   :  { %4200 = vperm.xlu1 %6782, %v11728_v55  }
 0xc3e   :  { %v3873_v18 = vpop.permute.xlu1 %3872 }
 0xc3f   :  { %v4896_v35 = vmul.f32 %v4640_v40, %v3873_v18  ;;  %v11730_v40 = vld [vmem:[#allocation44_spill] sm:$0xff]  ;;  %v5330_v18 = vadd.f32 %v5329_v24, %v5328_v5  ;;  %v11733_v5 = vld [vmem:[#allocation50_spill] sm:$0xff] }
 0xc41   :  { %v5350_v8 = vsel %vm2300_vm2, %v4896_v35, 0.0 }
 0xc42   :  { %v5351_v51 = vadd.f32 %v5350_v8, %v5349_v12 }
 0xc43   :  { %6783 = vset.pattern.permute.xlu2 %v7120_v60 }
 0xc44   :  { %6786 = vset.pattern.permute.xlu1 %v7117_v59 }
 0xc45   :  { %v3879_v30 = vpop.permute.xlu2 %3878 }
 0xc46   :  { %v4897_v56 = vmul.f32 %v4641_v25, %v3879_v30 }
 0xc48   :  { %v5352_v54 = vsel %vm2300_vm2, %v4897_v56, 0.0 }
 0xc49   :  { %v5353_v28 = vadd.f32 %v5352_v54, %v5351_v51  ;;  %v4648_v51 = vld [vmem:[%s11339_s3 + $0x510] sm:$0xff] }
 0xc4b   :  { %4012 = vperm.xlu2 %6783, %v11605_v23  }
 0xc4c   :  { %4115 = vperm.xlu1 %6786, %v11727_v41  }
 0xc4e   :  { %v3885_v10 = vpop.permute.xlu1 %3884 }
 0xc4f   :  { %v4898_v21 = vmul.f32 %v4642_v15, %v3885_v10  ;;  %v11732_v10 = vld [vmem:[#allocation32_spill] sm:$0xff] }
 0xc51   :  { %v5354_v2 = vsel %vm2300_vm2, %v4898_v21, 0.0 }
 0xc52   :  { %v5355_v34 = vadd.f32 %v5354_v2, %v5353_v28  ;;  %v11731_v28 = vld [vmem:[#allocation65_spill] sm:$0xff] }
 0xc53   :  { %6784 = vset.pattern.permute.xlu2 %v7117_v59  ;;  %v4904_v61 = vmul.f32 %v4648_v51, %v11731_v28 }
 0xc54   :  { %6789 = vset.pattern.permute.xlu1 %v7134_v19  ;;  %v5357_v46 = vadd.f32 %v5356_v45, %v5355_v34 }
 0xc55   :  { %v3897_v6 = vpop.permute.xlu2 %3896  ;;  %v5371_v21 = vsel %vm2300_vm2, %v4904_v61, 0.0  ;;  %v4664_v61 = vld [vmem:[%s11339_s3 + $0x590] sm:$0xff] }
 0xc56   :  { %v4900_v43 = vmul.f32 %v4644_v52, %v3897_v6 }
 0xc58   :  { %v5358_v36 = vsel %vm2300_vm2, %v4900_v43, 0.0 }
 0xc59   :  { %v5359_v44 = vadd.f32 %v5358_v36, %v5357_v46  ;;  %v4650_v46 = vld [vmem:[%s11339_s3 + $0x520] sm:$0xff] }
 0xc5b   :  { %4018 = vperm.xlu2 %6784, %v11605_v23  }
 0xc5c   :  { %4024 = vperm.xlu1 %6789, %v11605_v23  }
 0xc5e   :  { %v3903_v1 = vpop.permute.xlu1 %3902 }
 0xc5f   :  { %v4901_v14 = vmul.f32 %v4645_v3, %v3903_v1 }
 0xc61   :  { %v5360_v29 = vsel %vm2300_vm2, %v4901_v14, 0.0  ;;  %v4652_v14 = vld [vmem:[%s11339_s3 + $0x530] sm:$0xff] }
 0xc62   :  { %v5361_v37 = vadd.f32 %v5360_v29, %v5359_v44 }
 0xc63   :  { %6785 = vset.pattern.permute.xlu2 %v7120_v60  ;;  %v4647_v60 = vld [vmem:[%s11339_s3 + $0x508] sm:$0xff] }
 0xc64   :  { %v5362_v57 = vrot.slane %v5361_v37, 4  ;;  %6791 = vset.pattern.permute.xlu1 %v7113_v58 }
 0xc65   :  { %v3910_v11 = vpop.permute.xlu2 %3909 }
 0xc66   :  { %v5363_v27 = vadd.f32 %v5362_v57, %v5361_v37  ;;  %v4902_v58 = vmul.f32 %v4646_v17, %v3910_v11 }
 0xc68   :  { %v5364_v7 = vrot.slane %v5363_v27, 2  ;;  %v5368_v56 = vsel %vm2300_vm2, %v4902_v58, 0.0  ;;  %v4662_v58 = vld [vmem:[%s11339_s3 + $0x580] sm:$0xff] }
 0xc6a   :  { %v5365_v39 = vadd.f32 %v5364_v7, %v5363_v27  ;;  %v4909_v27 = vmul.f32 %v4653_v47, %v11733_v5 }
 0xc6b   :  { %4206 = vperm.xlu2 %6785, %v11728_v55  }
 0xc6c   :  { %v5366_v12 = vrot.slane %v5365_v39, 1  ;;  %4394 = vperm.xlu1 %6791, %v11730_v40  }
 0xc6e   :  { %v5367_v35 = vadd.f32 %v5366_v12, %v5365_v39  ;;  %v3916_v8 = vpop.permute.xlu1 %3915  ;;  %v5381_v39 = vsel %vm2300_vm2, %v4909_v27, 0.0 }
 0xc6f   :  { %v4903_v25 = vmul.f32 %v4647_v60, %v3916_v8 }
 0xc70   :  { %v10507_v30 = vsel %vm2909_vm3, %v5367_v35, %v5330_v18  ;;  %v4663_v35 = vld [vmem:[%s11339_s3 + $0x588] sm:$0xff] }
 0xc71   :  { %v5369_v54 = vsel %vm2300_vm2, %v4903_v25, 0.0 }
 0xc72   :  { %v5370_v15 = vadd.f32 %v5369_v54, %v5368_v56 }
 0xc73   :  { %4303 = vperm.xlu2 %6785, %v11732_v10  }
 0xc74   :  { %6794 = vset.pattern.permute.xlu1 %v7117_v59  ;;  %v5372_v34 = vadd.f32 %v5371_v21, %v5370_v15 }
 0xc75   :  { %v3928_v4 = vpop.permute.xlu2 %3927 }
 0xc76   :  { %v4905_v2 = vmul.f32 %v4649_v26, %v3928_v4  ;;  %v4678_v26 = vld [vmem:[%s11339_s3 + $0x600] sm:$0xff] }
 0xc78   :  { %v5373_v45 = vsel %vm2300_vm2, %v4905_v2, 0.0  ;;  %v4679_v2 = vld [vmem:[%s11339_s3 + $0x608] sm:$0xff] }
 0xc79   :  { %v5374_v52 = vadd.f32 %v5373_v45, %v5372_v34 }
 0xc7b   :  { %6790 = vset.pattern.permute.xlu2 %v7117_v59 }
 0xc7c   :  { %4309 = vperm.xlu1 %6794, %v11732_v10  }
 0xc7e   :  { %v3934_v6 = vpop.permute.xlu1 %3933 }
 0xc7f   :  { %v4906_v43 = vmul.f32 %v4650_v46, %v3934_v6  ;;  %v11734_v46 = vld [vmem:[#allocation59_spill] sm:$0xff] }
 0xc80   :  { %v4935_v6 = vmul.f32 %v4679_v2, %v11734_v46 }
 0xc81   :  { %v5375_v36 = vsel %vm2300_vm2, %v4906_v43, 0.0 }
 0xc82   :  { %v5376_v44 = vadd.f32 %v5375_v36, %v5374_v52 }
 0xc83   :  { %4212 = vperm.xlu2 %6790, %v11728_v55  }
 0xc84   :  { %6796 = vset.pattern.permute.xlu1 %v7134_v19 }
 0xc85   :  { %v3940_v59 = vpop.permute.xlu2 %3939 }
 0xc86   :  { %v4907_v3 = vmul.f32 %v4651_v13, %v3940_v59 }
 0xc88   :  { %v5377_v9 = vsel %vm2300_vm2, %v4907_v3, 0.0  ;;  %v4694_v3 = vld [vmem:[%s11339_s3 + $0x680] sm:$0xff] }
 0xc89   :  { %v5378_v1 = vadd.f32 %v5377_v9, %v5376_v44  ;;  %v5443_v44 = vsel %vm2300_vm2, %v4935_v6, 0.0 }
 0xc8b   :  { %6793 = vset.pattern.permute.xlu2 %v7134_v19  ;;  %v4654_v19 = vld [vmem:[%s11339_s3 + $0x540] sm:$0xff] }
 0xc8c   :  { %4218 = vperm.xlu1 %6796, %v11728_v55  }
 0xc8e   :  { %v3946_v29 = vpop.permute.xlu1 %3945 }
 0xc8f   :  { %v4908_v37 = vmul.f32 %v4652_v14, %v3946_v29  ;;  %v4695_v14 = vld [vmem:[%s11339_s3 + $0x688] sm:$0xff] }
 0xc91   :  { %v5379_v57 = vsel %vm2300_vm2, %v4908_v37, 0.0 }
 0xc92   :  { %v5380_v7 = vadd.f32 %v5379_v57, %v5378_v1 }
 0xc93   :  { %4121 = vperm.xlu2 %6793, %v11727_v41  }
 0xc94   :  { %4315 = vperm.xlu1 %6796, %v11732_v10   ;;  %v5382_v11 = vadd.f32 %v5381_v39, %v5380_v7  ;;  %v4665_v7 = vld [vmem:[%s11339_s3 + $0x598] sm:$0xff] }
 0xc95   :  { %v3958_v24 = vpop.permute.xlu2 %3957 }
 0xc96   :  { %v4910_v17 = vmul.f32 %v4654_v19, %v3958_v24 }
 0xc98   :  { %v5383_v12 = vsel %vm2300_vm2, %v4910_v17, 0.0 }
 0xc99   :  { %v10548_v60 = vadd.f32 %v5383_v12, %v5382_v11  ;;  %v4727_v12 = vld [vmem:[%s11339_s3 + $0x788] sm:$0xff] }
 0xc9b   :  { %6795 = vset.pattern.permute.xlu2 %v11665_v22 }
 0xc9c   :  { %6799 = vset.pattern.permute.xlu1 %v11665_v22 }
 0xc9e   :  { %v4007_v18 = vpop.permute.xlu1 %4006 }
 0xc9f   :  { %v4918_v8 = vmul.f32 %v4662_v58, %v4007_v18  ;;  %v4728_v58 = vld [vmem:[%s11339_s3 + $0x790] sm:$0xff]  ;;  %v4726_v18 = vld [vmem:[%s11339_s3 + $0x780] sm:$0xff] }
 0xca1   :  { %v5405_v56 = vsel %vm2300_vm2, %v4918_v8, 0.0 }
 0xca3   :  { %4030 = vperm.xlu2 %6795, %v11605_v23  }
 0xca4   :  { %4224 = vperm.xlu1 %6799, %v11728_v55  }
 0xca5   :  { %v4013_v51 = vpop.permute.xlu2 %4012 }
 0xca6   :  { %v4919_v25 = vmul.f32 %v4663_v35, %v4013_v51  ;;  %v4104_v28 = vpop.permute.xlu1 %4103  ;;  %v11735_v35 = vld [vmem:[#allocation60_spill] sm:$0xff] }
 0xca7   :  { %v4934_v45 = vmul.f32 %v4678_v26, %v4104_v28  ;;  %v4983_v8 = vmul.f32 %v4727_v12, %v11735_v35 }
 0xca8   :  { %v5406_v22 = vsel %vm2300_vm2, %v4919_v25, 0.0  ;;  %v4729_v25 = vld [vmem:[%s11339_s3 + $0x798] sm:$0xff] }
 0xca9   :  { %v5407_v54 = vadd.f32 %v5406_v22, %v5405_v56  ;;  %v5442_v43 = vsel %vm2300_vm2, %v4934_v45, 0.0 }
 0xcaa   :  { %v5444_v59 = vadd.f32 %v5443_v44, %v5442_v43 }
 0xcab   :  { %4127 = vperm.xlu2 %6795, %v11727_v41  }
 0xcac   :  { %4321 = vperm.xlu1 %6799, %v11732_v10  }
 0xcae   :  { %v4201_v4 = vpop.permute.xlu1 %4200 }
 0xcaf   :  { %v4950_v29 = vmul.f32 %v4694_v3, %v4201_v4  ;;  %v5554_v4 = vsel %vm2300_vm2, %v4983_v8, 0.0 }
 0xcb1   :  { %v5479_v57 = vsel %vm2300_vm2, %v4950_v29, 0.0 }
 0xcb3   :  { %6798 = vset.pattern.permute.xlu2 %v11609_v38 }
 0xcb4   :  { %6802 = vset.pattern.permute.xlu1 %v11609_v38  ;;  %v4680_v38 = vld [vmem:[%s11339_s3 + $0x610] sm:$0xff] }
 0xcb5   :  { %v4019_v15 = vpop.permute.xlu2 %4018 }
 0xcb6   :  { %v4920_v21 = vmul.f32 %v4664_v61, %v4019_v15  ;;  %v4730_v15 = vld [vmem:[%s11339_s3 + $0x7a0] sm:$0xff] }
 0xcb8   :  { %v5408_v34 = vsel %vm2300_vm2, %v4920_v21, 0.0  ;;  %v11737_v21 = vld [vmem:[#allocation82_spill] sm:$0xff] }
 0xcb9   :  { %v5409_v52 = vadd.f32 %v5408_v34, %v5407_v54  ;;  %v11736_v54 = vld [vmem:[#allocation66_spill] sm:$0xff]  ;;  %v4985_v2 = vmul.f32 %v4729_v25, %v11737_v21 }
 0xcba   :  { %v4984_v28 = vmul.f32 %v4728_v58, %v11736_v54  ;;  %v4712_v58 = vld [vmem:[%s11339_s3 + $0x710] sm:$0xff] }
 0xcbb   :  { %4036 = vperm.xlu2 %6798, %v11605_v23  }
 0xcbc   :  { %4230 = vperm.xlu1 %6802, %v11728_v55   ;;  %v5556_v6 = vsel %vm2300_vm2, %v4984_v28, 0.0 }
 0xcbe   :  { %v4116_v36 = vpop.permute.xlu1 %4115 }
 0xcbf   :  { %v4936_v13 = vmul.f32 %v4680_v38, %v4116_v36  ;;  %v11738_v38 = vld [vmem:[#allocation96_spill] sm:$0xff]  ;;  %v4732_v36 = vld [vmem:[%s11339_s3 + $0x7b0] sm:$0xff] }
 0xcc0   :  { %v4986_v43 = vmul.f32 %v4730_v15, %v11738_v38 }
 0xcc1   :  { %v5445_v9 = vsel %vm2300_vm2, %v4936_v13, 0.0  ;;  %v5558_v13 = vsel %vm2300_vm2, %v4985_v2, 0.0 }
 0xcc2   :  { %v10588_v1 = vadd.f32 %v5445_v9, %v5444_v59  ;;  %v11739_v59 = vld [vmem:[#allocation112_spill] sm:$0xff]  ;;  %v4711_v9 = vld [vmem:[%s11339_s3 + $0x708] sm:$0xff]  ;;  %v5560_v29 = vsel %vm2300_vm2, %v4986_v43, 0.0  ;;  %v4682_v43 = vld [vmem:[%s11339_s3 + $0x620] sm:$0xff] }
 0xcc3   :  { %4133 = vperm.xlu2 %6798, %v11727_v41  }
 0xcc4   :  { %4327 = vperm.xlu1 %6802, %v11732_v10  }
 0xcc5   :  { %v4207_v47 = vpop.permute.xlu2 %4206 }
 0xcc6   :  { %v4951_v37 = vmul.f32 %v4695_v14, %v4207_v47  ;;  %v11740_v47 = vld [vmem:[#allocation132_spill] sm:$0xff] }
 0xcc8   :  { %v5480_v5 = vsel %vm2300_vm2, %v4951_v37, 0.0  ;;  %v4988_v37 = vmul.f32 %v4732_v36, %v11740_v47  ;;  %v4713_v36 = vld [vmem:[%s11339_s3 + $0x718] sm:$0xff]  ;;  %v4698_v47 = vld [vmem:[%s11339_s3 + $0x6a0] sm:$0xff] }
 0xcc9   :  { %v5481_v27 = vadd.f32 %v5480_v5, %v5479_v57  ;;  %v4710_v57 = vld [vmem:[%s11339_s3 + $0x700] sm:$0xff] }
 0xcca   :  { %v5564_v12 = vsel %vm2300_vm2, %v4988_v37, 0.0 }
 0xccb   :  { %6801 = vset.pattern.permute.xlu2 %v7173_v42 }
 0xccc   :  { %6805 = vset.pattern.permute.xlu1 %v7173_v42  ;;  %v4696_v42 = vld [vmem:[%s11339_s3 + $0x690] sm:$0xff] }
 0xccd   :  { %v4304_v11 = vpop.permute.xlu2 %4303 }
 0xcce   :  { %v4025_v19 = vpop.permute.xlu1 %4024 }
 0xccf   :  { %v4921_v24 = vmul.f32 %v4665_v7, %v4025_v19  ;;  %v4967_v7 = vmul.f32 %v4711_v9, %v4304_v11 }
 0xcd1   :  { %v5410_v39 = vsel %vm2300_vm2, %v4921_v24, 0.0  ;;  %v11741_v24 = vld [vmem:[#allocation51_spill] sm:$0xff]  ;;  %v5517_v11 = vsel %vm2300_vm2, %v4967_v7, 0.0 }
 0xcd2   :  { %v10603_v17 = vadd.f32 %v5410_v39, %v5409_v52  ;;  %v4731_v52 = vld [vmem:[%s11339_s3 + $0x7a8] sm:$0xff]  ;;  %v4966_v39 = vmul.f32 %v4710_v57, %v11741_v24 }
 0xcd3   :  { %4042 = vperm.xlu2 %6801, %v11605_v23   ;;  %v4987_v3 = vmul.f32 %v4731_v52, %v11739_v59 }
 0xcd4   :  { %4236 = vperm.xlu1 %6805, %v11728_v55   ;;  %v5516_v25 = vsel %vm2300_vm2, %v4966_v39, 0.0 }
 0xcdb   :  { %4139 = vperm.xlu2 %6801, %v11727_v41  }
 0xcdc   :  { %4333 = vperm.xlu1 %6805, %v11732_v10  }
 0xcdd   :  { %v4213_v51 = vpop.permute.xlu2 %4212 }
 0xcde   :  { %v4395_v56 = vpop.permute.xlu1 %4394  ;;  %v4952_v22 = vmul.f32 %v4696_v42, %v4213_v51  ;;  %v4681_v42 = vld [vmem:[%s11339_s3 + $0x618] sm:$0xff] }
 0xcdf   :  { %v4982_v61 = vmul.f32 %v4726_v18, %v4395_v56 }
 0xce0   :  { %v5482_v26 = vsel %vm2300_vm2, %v4952_v22, 0.0  ;;  %v5518_v22 = vadd.f32 %v5517_v11, %v5516_v25 }
 0xce1   :  { %v5553_v34 = vsel %vm2300_vm2, %v4982_v61, 0.0  ;;  %v5483_v45 = vadd.f32 %v5482_v26, %v5481_v27  ;;  %v5562_v27 = vsel %vm2300_vm2, %v4987_v3, 0.0  ;;  %v4666_v26 = vld [vmem:[%s11339_s3 + $0x5a0] sm:$0xff] }
 0xce2   :  { %v5555_v46 = vadd.f32 %v5554_v4, %v5553_v34  ;;  %v4697_v4 = vld [vmem:[%s11339_s3 + $0x698] sm:$0xff] }
 0xce3   :  { %6804 = vset.pattern.permute.xlu2 %v7137_v20 }
 0xce4   :  { %v5557_v44 = vadd.f32 %v5556_v6, %v5555_v46  ;;  %6808 = vset.pattern.permute.xlu1 %v7137_v20 }
 0xce6   :  { %v5559_v14 = vadd.f32 %v5558_v13, %v5557_v44 }
 0xce8   :  { %v5561_v5 = vadd.f32 %v5560_v29, %v5559_v14  ;;  %v4667_v29 = vld [vmem:[%s11339_s3 + $0x5a8] sm:$0xff] }
 0xcea   :  { %v5563_v19 = vadd.f32 %v5562_v27, %v5561_v5 }
 0xceb   :  { %4048 = vperm.xlu2 %6804, %v11605_v23  }
 0xcec   :  { %4242 = vperm.xlu1 %6808, %v11728_v55   ;;  %v10664_v18 = vadd.f32 %v5564_v12, %v5563_v19  ;;  %v4683_v12 = vld [vmem:[%s11339_s3 + $0x628] sm:$0xff] }
 0xced   :  { %v4122_v35 = vpop.permute.xlu2 %4121 }
 0xcee   :  { %v4310_v8 = vpop.permute.xlu1 %4309  ;;  %v4937_v51 = vmul.f32 %v4681_v42, %v4122_v35  ;;  %v4714_v42 = vld [vmem:[%s11339_s3 + $0x720] sm:$0xff] }
 0xcef   :  { %v4968_v56 = vmul.f32 %v4712_v58, %v4310_v8 }
 0xcf0   :  { %v5447_v54 = vsel %vm2300_vm2, %v4937_v51, 0.0 }
 0xcf1   :  { %v5519_v28 = vsel %vm2300_vm2, %v4968_v56, 0.0  ;;  %v5448_v61 = vadd.f32 %v5447_v54, %v10588_v1  ;;  %v4699_v54 = vld [vmem:[%s11339_s3 + $0x6a8] sm:$0xff] }
 0xcf2   :  { %v5520_v15 = vadd.f32 %v5519_v28, %v5518_v22  ;;  %v4668_v22 = vld [vmem:[%s11339_s3 + $0x5b0] sm:$0xff] }
 0xcf3   :  { %4145 = vperm.xlu2 %6804, %v11727_v41  }
 0xcf4   :  { %6811 = vset.pattern.permute.xlu1 %v7261_v62 }
 0xcfb   :  { %6807 = vset.pattern.permute.xlu2 %v7261_v62 }
 0xcfc   :  { %4151 = vperm.xlu1 %6811, %v11727_v41  }
 0xcfd   :  { %v4031_v21 = vpop.permute.xlu2 %4030 }
 0xcfe   :  { %v4219_v2 = vpop.permute.xlu1 %4218  ;;  %v4922_v1 = vmul.f32 %v4666_v26, %v4031_v21 }
 0xcff   :  { %v4953_v34 = vmul.f32 %v4697_v4, %v4219_v2 }
 0xd00   :  { %v5412_v52 = vsel %vm2300_vm2, %v4922_v1, 0.0  ;;  %v4684_v1 = vld [vmem:[%s11339_s3 + $0x630] sm:$0xff] }
 0xd01   :  { %v5484_v46 = vsel %vm2300_vm2, %v4953_v34, 0.0  ;;  %v5413_v6 = vadd.f32 %v5412_v52, %v10603_v17  ;;  %v4715_v34 = vld [vmem:[%s11339_s3 + $0x728] sm:$0xff] }
 0xd02   :  { %v5485_v38 = vadd.f32 %v5484_v46, %v5483_v45 }
 0xd03   :  { %4054 = vperm.xlu2 %6807, %v11605_v23  }
 0xd04   :  { %6813 = vset.pattern.permute.xlu1 %v11668_v33 }
 0xd05   :  { %v4128_v44 = vpop.permute.xlu2 %4127 }
 0xd06   :  { %v4316_v13 = vpop.permute.xlu1 %4315  ;;  %v4938_v59 = vmul.f32 %v4682_v43, %v4128_v44 }
 0xd07   :  { %v4969_v3 = vmul.f32 %v4713_v36, %v4316_v13 }
 0xd08   :  { %v5449_v9 = vsel %vm2300_vm2, %v4938_v59, 0.0  ;;  %v4669_v59 = vld [vmem:[%s11339_s3 + $0x5b8] sm:$0xff] }
 0xd09   :  { %v5521_v17 = vsel %vm2300_vm2, %v4969_v3, 0.0  ;;  %v5450_v45 = vadd.f32 %v5449_v9, %v5448_v61  ;;  %v4700_v3 = vld [vmem:[%s11339_s3 + $0x6b0] sm:$0xff] }
 0xd0a   :  { %v5522_v14 = vadd.f32 %v5521_v17, %v5520_v15 }
 0xd0b   :  { %6810 = vset.pattern.permute.xlu2 %v11668_v33 }
 0xd0c   :  { %4060 = vperm.xlu1 %6813, %v11605_v23  }
 0xd13   :  { %3963 = vperm.xlu2 %6810, %v11724_v32  }
 0xd14   :  { %6815 = vset.pattern.permute.xlu1 %v11633_v31 }
 0xd15   :  { %v4037_v37 = vpop.permute.xlu2 %4036 }
 0xd16   :  { %v4225_v57 = vpop.permute.xlu1 %4224  ;;  %v4923_v5 = vmul.f32 %v4667_v29, %v4037_v37 }
 0xd17   :  { %v4954_v27 = vmul.f32 %v4698_v47, %v4225_v57 }
 0xd18   :  { %v5414_v7 = vsel %vm2300_vm2, %v4923_v5, 0.0  ;;  %v4685_v5 = vld [vmem:[%s11339_s3 + $0x638] sm:$0xff] }
 0xd19   :  { %v5486_v19 = vsel %vm2300_vm2, %v4954_v27, 0.0  ;;  %v5415_v24 = vadd.f32 %v5414_v7, %v5413_v6  ;;  %v4716_v27 = vld [vmem:[%s11339_s3 + $0x730] sm:$0xff] }
 0xd1a   :  { %v5487_v39 = vadd.f32 %v5486_v19, %v5485_v38 }
 0xd1b   :  { %6812 = vset.pattern.permute.xlu2 %v7137_v20 }
 0xd1c   :  { %3969 = vperm.xlu1 %6815, %v11724_v32  }
 0xd1d   :  { %v4134_v58 = vpop.permute.xlu2 %4133 }
 0xd1e   :  { %v4322_v11 = vpop.permute.xlu1 %4321  ;;  %v4939_v35 = vmul.f32 %v4683_v12, %v4134_v58 }
 0xd1f   :  { %v4970_v8 = vmul.f32 %v4714_v42, %v4322_v11 }
 0xd20   :  { %v5451_v51 = vsel %vm2300_vm2, %v4939_v35, 0.0  ;;  %v4670_v35 = vld [vmem:[%s11339_s3 + $0x5c0] sm:$0xff] }
 0xd21   :  { %v5523_v25 = vsel %vm2300_vm2, %v4970_v8, 0.0  ;;  %v5452_v56 = vadd.f32 %v5451_v51, %v5450_v45  ;;  %v4702_v8 = vld [vmem:[%s11339_s3 + $0x6c0] sm:$0xff]  ;;  %v4701_v51 = vld [vmem:[%s11339_s3 + $0x6b8] sm:$0xff] }
 0xd22   :  { %v5524_v20 = vadd.f32 %v5523_v25, %v5522_v14 }
 0xd23   :  { %4339 = vperm.xlu2 %6812, %v11732_v10  }
 0xd24   :  { %6817 = vset.pattern.permute.xlu1 %v7261_v62 }
 0xd2b   :  { %4436 = vperm.xlu2 %6812, %v11730_v40  }
 0xd2c   :  { %4345 = vperm.xlu1 %6817, %v11732_v10  }
 0xd2d   :  { %v4043_v28 = vpop.permute.xlu2 %4042 }
 0xd2e   :  { %v4231_v61 = vpop.permute.xlu1 %4230  ;;  %v4924_v15 = vmul.f32 %v4668_v22, %v4043_v28  ;;  %v11742_v22 = vld [vmem:[#allocation149_spill] sm:$0xff] }
 0xd2f   :  { %v4955_v26 = vmul.f32 %v4699_v54, %v4231_v61  ;;  %v4958_v54 = vmul.f32 %v4702_v8, %v11742_v22  ;;  %v4718_v22 = vld [vmem:[%s11339_s3 + $0x740] sm:$0xff] }
 0xd30   :  { %v5416_v4 = vsel %vm2300_vm2, %v4924_v15, 0.0 }
 0xd31   :  { %v5488_v62 = vsel %vm2300_vm2, %v4955_v26, 0.0  ;;  %v5417_v21 = vadd.f32 %v5416_v4, %v5415_v24 }
 0xd32   :  { %v5489_v2 = vadd.f32 %v5488_v62, %v5487_v39  ;;  %v5494_v62 = vsel %vm2300_vm2, %v4958_v54, 0.0 }
 0xd33   :  { %6816 = vset.pattern.permute.xlu2 %v11668_v33 }
 0xd34   :  { %4442 = vperm.xlu1 %6817, %v11730_v40  }
 0xd35   :  { %v4140_v52 = vpop.permute.xlu2 %4139 }
 0xd36   :  { %v4328_v46 = vpop.permute.xlu1 %4327  ;;  %v4940_v6 = vmul.f32 %v4684_v1, %v4140_v52  ;;  %v4686_v1 = vld [vmem:[%s11339_s3 + $0x640] sm:$0xff] }
 0xd37   :  { %v4971_v38 = vmul.f32 %v4715_v34, %v4328_v46 }
 0xd38   :  { %v5453_v43 = vsel %vm2300_vm2, %v4940_v6, 0.0 }
 0xd39   :  { %v5525_v36 = vsel %vm2300_vm2, %v4971_v38, 0.0  ;;  %v5454_v44 = vadd.f32 %v5453_v43, %v5452_v56 }
 0xd3a   :  { %v5526_v13 = vadd.f32 %v5525_v36, %v5524_v20 }
 0xd3b   :  { %4157 = vperm.xlu2 %6816, %v11727_v41  }
 0xd3c   :  { %6820 = vset.pattern.permute.xlu1 %v11633_v31 }
 0xd43   :  { %4254 = vperm.xlu2 %6816, %v11728_v55  }
 0xd44   :  { %4163 = vperm.xlu1 %6820, %v11727_v41  }
 0xd45   :  { %v4049_v9 = vpop.permute.xlu2 %4048 }
 0xd46   :  { %v4237_v17 = vpop.permute.xlu1 %4236  ;;  %v4925_v45 = vmul.f32 %v4669_v59, %v4049_v9  ;;  %v11743_v9 = vld [vmem:[#allocation164_spill] sm:$0xff] }
 0xd47   :  { %v4956_v14 = vmul.f32 %v4700_v3, %v4237_v17 }
 0xd48   :  { %v5418_v29 = vsel %vm2300_vm2, %v4925_v45, 0.0 }
 0xd49   :  { %v5490_v47 = vsel %vm2300_vm2, %v4956_v14, 0.0  ;;  %v5419_v37 = vadd.f32 %v5418_v29, %v5417_v21 }
 0xd4a   :  { %v5491_v57 = vadd.f32 %v5490_v47, %v5489_v2  ;;  %v4655_v2 = vld [vmem:[%s11339_s3 + $0x548] sm:$0xff] }
 0xd4b   :  { %6819 = vset.pattern.permute.xlu2 %v7203_v48 }
 0xd4c   :  { %4260 = vperm.xlu1 %6820, %v11728_v55  }
 0xd4d   :  { %v4146_v7 = vpop.permute.xlu2 %4145 }
 0xd4e   :  { %v4334_v19 = vpop.permute.xlu1 %4333  ;;  %v4941_v24 = vmul.f32 %v4685_v5, %v4146_v7  ;;  %v4733_v5 = vld [vmem:[%s11339_s3 + $0x7b8] sm:$0xff] }
 0xd4f   :  { %v4972_v39 = vmul.f32 %v4716_v27, %v4334_v19 }
 0xd50   :  { %v5455_v12 = vsel %vm2300_vm2, %v4941_v24, 0.0 }
 0xd51   :  { %v5527_v42 = vsel %vm2300_vm2, %v4972_v39, 0.0  ;;  %v5456_v58 = vadd.f32 %v5455_v12, %v5454_v44  ;;  %v4717_v44 = vld [vmem:[%s11339_s3 + $0x738] sm:$0xff] }
 0xd52   :  { %v5528_v11 = vadd.f32 %v5527_v42, %v5526_v13  ;;  %v4672_v13 = vld [vmem:[%s11339_s3 + $0x5d0] sm:$0xff] }
 0xd53   :  { %3975 = vperm.xlu2 %6819, %v11724_v32   ;;  %v4928_v17 = vmul.f32 %v4672_v13, %v11743_v9  ;;  %v4688_v9 = vld [vmem:[%s11339_s3 + $0x650] sm:$0xff] }
 0xd54   :  { %6823 = vset.pattern.permute.xlu1 %v11653_v63 }
 0xd5b   :  { %4072 = vperm.xlu2 %6819, %v11605_v23  }
 0xd5c   :  { %3981 = vperm.xlu1 %6823, %v11724_v32  }
 0xd5d   :  { %v4055_v25 = vpop.permute.xlu2 %4054 }
 0xd5e   :  { %v4243_v56 = vpop.permute.xlu1 %4242  ;;  %v4926_v20 = vmul.f32 %v4670_v35, %v4055_v25  ;;  %v4687_v35 = vld [vmem:[%s11339_s3 + $0x648] sm:$0xff] }
 0xd5f   :  { %v4957_v28 = vmul.f32 %v4701_v51, %v4243_v56  ;;  %v4703_v56 = vld [vmem:[%s11339_s3 + $0x6c8] sm:$0xff] }
 0xd60   :  { %v5420_v61 = vsel %vm2300_vm2, %v4926_v20, 0.0  ;;  %v4719_v20 = vld [vmem:[%s11339_s3 + $0x748] sm:$0xff] }
 0xd61   :  { %v5492_v15 = vsel %vm2300_vm2, %v4957_v28, 0.0  ;;  %v5421_v26 = vadd.f32 %v5420_v61, %v5419_v37 }
 0xd62   :  { %v5493_v4 = vadd.f32 %v5492_v15, %v5491_v57  ;;  %v5424_v57 = vsel %vm2300_vm2, %v4928_v17, 0.0  ;;  %v11744_v15 = vld [vmem:[#allocation178_spill] sm:$0xff] }
 0xd63   :  { %6822 = vset.pattern.permute.xlu2 %v11668_v33 }
 0xd64   :  { %4078 = vperm.xlu1 %6823, %v11605_v23   ;;  %v10779_v21 = vadd.f32 %v5494_v62, %v5493_v4 }
 0xd6b   :  { %4448 = vperm.xlu2 %6822, %v11730_v40  }
 0xd6c   :  { %6826 = vset.pattern.permute.xlu1 %v11633_v31 }
 0xd6d   :  { %v3964_v34 = vpop.permute.xlu2 %3963 }
 0xd6e   :  { %v4152_v52 = vpop.permute.xlu1 %4151  ;;  %v4911_v46 = vmul.f32 %v4655_v2, %v3964_v34 }
 0xd6f   :  { %v4942_v33 = vmul.f32 %v4686_v1, %v4152_v52 }
 0xd70   :  { %v5385_v6 = vsel %vm2300_vm2, %v4911_v46, 0.0  ;;  %v4734_v46 = vld [vmem:[%s11339_s3 + $0x7c0] sm:$0xff] }
 0xd71   :  { %v5457_v38 = vsel %vm2300_vm2, %v4942_v33, 0.0  ;;  %v5386_v43 = vadd.f32 %v5385_v6, %v10548_v60  ;;  %v4671_v60 = vld [vmem:[%s11339_s3 + $0x5c8] sm:$0xff] }
 0xd72   :  { %v5458_v36 = vadd.f32 %v5457_v38, %v5456_v58 }
 0xd73   :  { %6824 = vset.pattern.permute.xlu2 %v11633_v31 }
 0xd74   :  { %4454 = vperm.xlu1 %6826, %v11730_v40  }
 0xd7b   :  { %4357 = vperm.xlu2 %6824, %v11732_v10  }
 0xd7c   :  { %6828 = vset.pattern.permute.xlu1 %v7203_v48 }
 0xd7d   :  { %v4340_v59 = vpop.permute.xlu2 %4339 }
 0xd7e   :  { %v4061_v31 = vpop.permute.xlu1 %4060  ;;  %v4973_v3 = vmul.f32 %v4717_v44, %v4340_v59 }
 0xd7f   :  { %v4927_v45 = vmul.f32 %v4671_v60, %v4061_v31  ;;  %v4673_v31 = vld [vmem:[%s11339_s3 + $0x5d8] sm:$0xff] }
 0xd80   :  { %v5529_v14 = vsel %vm2300_vm2, %v4973_v3, 0.0  ;;  %v4689_v3 = vld [vmem:[%s11339_s3 + $0x658] sm:$0xff] }
 0xd81   :  { %v5422_v29 = vsel %vm2300_vm2, %v4927_v45, 0.0  ;;  %v5530_v47 = vadd.f32 %v5529_v14, %v5528_v11 }
 0xd82   :  { %v5423_v37 = vadd.f32 %v5422_v29, %v5421_v26  ;;  %v4975_v26 = vmul.f32 %v4719_v20, %v11744_v15  ;;  %v11745_v29 = vld [vmem:[#allocation115_spill] sm:$0xff] }
 0xd83   :  { %6825 = vset.pattern.permute.xlu2 %v7203_v48  ;;  %v4656_v48 = vld [vmem:[%s11339_s3 + $0x550] sm:$0xff] }
 0xd84   :  { %4363 = vperm.xlu1 %6828, %v11732_v10   ;;  %v5425_v27 = vadd.f32 %v5424_v57, %v5423_v37  ;;  %v5533_v52 = vsel %vm2300_vm2, %v4975_v26, 0.0 }
 0xd85   :  { %v4437_v7 = vpop.permute.xlu2 %4436 }
 0xd86   :  { %v4989_v19 = vmul.f32 %v4733_v5, %v4437_v7 }
 0xd88   :  { %v5566_v24 = vsel %vm2300_vm2, %v4989_v19, 0.0 }
 0xd89   :  { %v5567_v39 = vadd.f32 %v5566_v24, %v10664_v18 }
 0xd8b   :  { %4266 = vperm.xlu2 %6825, %v11728_v55  }
 0xd8c   :  { %6830 = vset.pattern.permute.xlu1 %v11653_v63 }
 0xd8e   :  { %v3970_v12 = vpop.permute.xlu1 %3969 }
 0xd8f   :  { %v4912_v42 = vmul.f32 %v4656_v48, %v3970_v12 }
 0xd91   :  { %v5387_v58 = vsel %vm2300_vm2, %v4912_v42, 0.0 }
 0xd92   :  { %v5388_v11 = vadd.f32 %v5387_v58, %v5386_v43 }
 0xd93   :  { %6827 = vset.pattern.permute.xlu2 %v11653_v63 }
 0xd94   :  { %4272 = vperm.xlu1 %6830, %v11728_v55  }
 0xd95   :  { %v4158_v18 = vpop.permute.xlu2 %4157 }
 0xd96   :  { %v4943_v8 = vmul.f32 %v4687_v35, %v4158_v18 }
 0xd98   :  { %v5459_v51 = vsel %vm2300_vm2, %v4943_v8, 0.0 }
 0xd99   :  { %v5460_v25 = vadd.f32 %v5459_v51, %v5458_v36  ;;  %v4658_v51 = vld [vmem:[%s11339_s3 + $0x560] sm:$0xff] }
 0xd9b   :  { %4175 = vperm.xlu2 %6827, %v11727_v41  }
 0xd9c   :  { %6833 = vset.pattern.permute.xlu1 %v7291_v16 }
 0xd9d   :  { %v4255_v54 = vpop.permute.xlu2 %4254 }
 0xd9e   :  { %v4346_v28 = vpop.permute.xlu1 %4345  ;;  %v4959_v61 = vmul.f32 %v4703_v56, %v4255_v54 }
 0xd9f   :  { %v4974_v4 = vmul.f32 %v4718_v22, %v4346_v28 }
 0xda0   :  { %v5496_v62 = vsel %vm2300_vm2, %v4959_v61, 0.0 }
 0xda1   :  { %v5531_v2 = vsel %vm2300_vm2, %v4974_v4, 0.0  ;;  %v5497_v1 = vadd.f32 %v5496_v62, %v10779_v21  ;;  %v4657_v21 = vld [vmem:[%s11339_s3 + $0x558] sm:$0xff] }
 0xda2   :  { %v5532_v34 = vadd.f32 %v5531_v2, %v5530_v47  ;;  %v4945_v47 = vmul.f32 %v4689_v3, %v11745_v29  ;;  %v4705_v2 = vld [vmem:[%s11339_s3 + $0x6d8] sm:$0xff]  ;;  %v4097_v29 = vpop.permute.xlu0 %4096 }
 0xda3   :  { %6829 = vset.pattern.permute.xlu2 %v7291_v16 }
 0xda4   :  { %4181 = vperm.xlu1 %6833, %v11727_v41   ;;  %v5534_v33 = vadd.f32 %v5533_v52, %v5532_v34  ;;  %v5463_v24 = vsel %vm2300_vm2, %v4945_v47, 0.0  ;;  %v4736_v34 = vld [vmem:[%s11339_s3 + $0x7d0] sm:$0xff] }
 0xda6   :  { %v4443_v6 = vpop.permute.xlu1 %4442 }
 0xda7   :  { %v4990_v38 = vmul.f32 %v4734_v46, %v4443_v6  ;;  %v11746_v6 = vld [vmem:[#allocation19_spill] sm:$0xff] }
 0xda9   :  { %v5568_v43 = vsel %vm2300_vm2, %v4990_v38, 0.0 }
 0xdaa   :  { %v5569_v36 = vadd.f32 %v5568_v43, %v5567_v39 }
 0xdab   :  { %4084 = vperm.xlu2 %6829, %v11605_v23  }
 0xdac   :  { %6835 = vset.pattern.permute.xlu1 %v7215_v50 }
 0xdad   :  { %v3976_v44 = vpop.permute.xlu2 %3975 }
 0xdae   :  { %v4913_v13 = vmul.f32 %v4657_v21, %v3976_v44 }
 0xdb0   :  { %v5389_v60 = vsel %vm2300_vm2, %v4913_v13, 0.0 }
 0xdb1   :  { %v5390_v59 = vadd.f32 %v5389_v60, %v5388_v11 }
 0xdb3   :  { %6832 = vset.pattern.permute.xlu2 %v7215_v50 }
 0xdb4   :  { %4090 = vperm.xlu1 %6835, %v11605_v23   ;;  %v4704_v23 = vld [vmem:[%s11339_s3 + $0x6d0] sm:$0xff] }
 0xdb5   :  { %v4073_v17 = vpop.permute.xlu2 %4072 }
 0xdb6   :  { %v4164_v45 = vpop.permute.xlu1 %4163  ;;  %v4929_v14 = vmul.f32 %v4673_v31, %v4073_v17 }
 0xdb7   :  { %v4944_v37 = vmul.f32 %v4688_v9, %v4164_v45 }
 0xdb8   :  { %v5426_v57 = vsel %vm2300_vm2, %v4929_v14, 0.0  ;;  %v4677_v14 = vld [vmem:[%s11339_s3 + $0x5f8] sm:$0xff] }
 0xdb9   :  { %v5461_v5 = vsel %vm2300_vm2, %v4944_v37, 0.0  ;;  %v5427_v7 = vadd.f32 %v5426_v57, %v5425_v27  ;;  %v4735_v27 = vld [vmem:[%s11339_s3 + $0x7c8] sm:$0xff] }
 0xdba   :  { %v5462_v19 = vadd.f32 %v5461_v5, %v5460_v25  ;;  %v4933_v5 = vmul.f32 %v4677_v14, %v4097_v29  ;;  %v4690_v14 = vld [vmem:[%s11339_s3 + $0x660] sm:$0xff] }
 0xdbb   :  { %3993 = vperm.xlu2 %6832, %v11724_v32  }
 0xdbc   :  { %6837 = vset.pattern.permute.xlu1 %v7206_v49  ;;  %v10876_v39 = vadd.f32 %v5463_v24, %v5462_v19  ;;  %v4659_v24 = vld [vmem:[%s11339_s3 + $0x568] sm:$0xff] }
 0xdbe   :  { %v4261_v48 = vpop.permute.xlu1 %4260 }
 0xdbf   :  { %v4960_v12 = vmul.f32 %v4704_v23, %v4261_v48  ;;  %v5434_v23 = vsel %vm2300_vm2, %v4933_v5, 0.0  ;;  %v4660_v48 = vld [vmem:[%s11339_s3 + $0x570] sm:$0xff] }
 0xdc1   :  { %v5498_v42 = vsel %vm2300_vm2, %v4960_v12, 0.0 }
 0xdc2   :  { %v5499_v58 = vadd.f32 %v5498_v42, %v5497_v1  ;;  %v4737_v1 = vld [vmem:[%s11339_s3 + $0x7d8] sm:$0xff]  ;;  %v11747_v42 = vld [vmem:[#allocation18_spill] sm:$0xff] }
 0xdc3   :  { %6834 = vset.pattern.permute.xlu2 %v11653_v63  ;;  %v4993_v38 = vmul.f32 %v4737_v1, %v11746_v6 }
 0xdc4   :  { %3999 = vperm.xlu1 %6837, %v11724_v32   ;;  %v4720_v32 = vld [vmem:[%s11339_s3 + $0x750] sm:$0xff] }
 0xdc5   :  { %v4449_v11 = vpop.permute.xlu2 %4448  ;;  %v5574_v60 = vsel %vm2300_vm2, %v4993_v38, 0.0 }
 0xdc6   :  { %v4991_v35 = vmul.f32 %v4735_v27, %v4449_v11 }
 0xdc8   :  { %v5570_v18 = vsel %vm2300_vm2, %v4991_v35, 0.0  ;;  %v4661_v35 = vld [vmem:[%s11339_s3 + $0x578] sm:$0xff] }
 0xdc9   :  { %v5571_v8 = vadd.f32 %v5570_v18, %v5569_v36 }
 0xdcb   :  { %4369 = vperm.xlu2 %6834, %v11732_v10  }
 0xdcc   :  { %6839 = vset.pattern.permute.xlu1 %v7291_v16  ;;  %v4674_v16 = vld [vmem:[%s11339_s3 + $0x5e0] sm:$0xff] }
 0xdce   :  { %v3982_v63 = vpop.permute.xlu1 %3981 }
 0xdcf   :  { %v4914_v25 = vmul.f32 %v4658_v51, %v3982_v63 }
 0xdd1   :  { %v5391_v56 = vsel %vm2300_vm2, %v4914_v25, 0.0 }
 0xdd2   :  { %v10891_v20 = vadd.f32 %v5391_v56, %v5390_v59 }
 0xdd3   :  { %4466 = vperm.xlu2 %6834, %v11730_v40  }
 0xdd4   :  { %4375 = vperm.xlu1 %6839, %v11732_v10  }
 0xdd5   :  { %v4358_v22 = vpop.permute.xlu2 %4357 }
 0xdd6   :  { %v4079_v54 = vpop.permute.xlu1 %4078  ;;  %v4976_v28 = vmul.f32 %v4720_v32, %v4358_v22  ;;  %v4706_v22 = vld [vmem:[%s11339_s3 + $0x6e0] sm:$0xff] }
 0xdd7   :  { %v4930_v61 = vmul.f32 %v4674_v16, %v4079_v54 }
 0xdd8   :  { %v5535_v15 = vsel %vm2300_vm2, %v4976_v28, 0.0 }
 0xdd9   :  { %v5428_v26 = vsel %vm2300_vm2, %v4930_v61, 0.0  ;;  %v10903_v4 = vadd.f32 %v5535_v15, %v5534_v33 }
 0xdda   :  { %v5429_v62 = vadd.f32 %v5428_v26, %v5427_v7 }
 0xddb   :  { %6838 = vset.pattern.permute.xlu2 %v7215_v50 }
 0xddc   :  { %4472 = vperm.xlu1 %6839, %v11730_v40  }
 0xde3   :  { %4187 = vperm.xlu2 %6838, %v11727_v41  }
 0xde4   :  { %6841 = vset.pattern.permute.xlu1 %v7215_v50 }
 0xde5   :  { %v4267_v52 = vpop.permute.xlu2 %4266 }
 0xde6   :  { %v4455_v46 = vpop.permute.xlu1 %4454  ;;  %v4961_v33 = vmul.f32 %v4705_v2, %v4267_v52 }
 0xde7   :  { %v4992_v43 = vmul.f32 %v4736_v34, %v4455_v46  ;;  %v11748_v46 = vld [vmem:[#allocation68_spill] sm:$0xff] }
 0xde8   :  { %v5500_v36 = vsel %vm2300_vm2, %v4961_v33, 0.0 }
 0xde9   :  { %v5572_v21 = vsel %vm2300_vm2, %v4992_v43, 0.0  ;;  %v5501_v44 = vadd.f32 %v5500_v36, %v5499_v58  ;;  %v4915_v58 = vmul.f32 %v4659_v24, %v11747_v42  ;;  %v4708_v36 = vld [vmem:[%s11339_s3 + $0x6f0] sm:$0xff] }
 0xdea   :  { %v5573_v13 = vadd.f32 %v5572_v21, %v5571_v8 }
 0xdeb   :  { %4284 = vperm.xlu2 %6838, %v11728_v55   ;;  %v5393_v18 = vsel %vm2300_vm2, %v4915_v58, 0.0 }
 0xdec   :  { %4381 = vperm.xlu1 %6841, %v11732_v10   ;;  %v10924_v59 = vadd.f32 %v5574_v60, %v5573_v13  ;;  %v5394_v63 = vadd.f32 %v5393_v18, %v10891_v20  ;;  %v4707_v20 = vld [vmem:[%s11339_s3 + $0x6e8] sm:$0xff]  ;;  %v4709_v13 = vld [vmem:[%s11339_s3 + $0x6f8] sm:$0xff]  ;;  %v4291_v60 = vpop.permute.xlu0 %4290 }
 0xded   :  { %v4963_v33 = vmul.f32 %v4707_v20, %v11748_v46  ;;  %v6403_v46 = vld [vmem:[%s11341_s5 + $0x1c] sm:$0xf] }
 0xdf3   :  { %6840 = vset.pattern.permute.xlu2 %v7206_v49 }
 0xdf4   :  { %6843 = vset.pattern.permute.xlu1 %v7206_v49  ;;  %v4675_v49 = vld [vmem:[%s11339_s3 + $0x5e8] sm:$0xff] }
 0xdf5   :  { %v10934_v3 = vpop.permute.xlu2 %4175 }
 0xdf6   :  { %v10932_v31 = vpop.permute.xlu1 %4363  ;;  %v4946_v5 = vmul.f32 %v4690_v14, %v10934_v3  ;;  %v4693_v3 = vld [vmem:[%s11339_s3 + $0x678] sm:$0xff]  ;;  %v4485_v14 = vpop.permute.xlu0 %4484 }
 0xdfb   :  { %4193 = vperm.xlu2 %6840, %v11727_v41  }
 0xdfc   :  { %4387 = vperm.xlu1 %6843, %v11732_v10  }
 0xe03   :  { %6842 = vset.pattern.permute.xlu2 %v7215_v50  ;;  %v4676_v50 = vld [vmem:[%s11339_s3 + $0x5f0] sm:$0xff] }
 0xe05   :  { %v4085_v9 = vpop.permute.xlu2 %4084 }
 0xe06   :  { %v4273_v55 = vpop.permute.xlu1 %4272  ;;  %v4931_v45 = vmul.f32 %v4675_v49, %v4085_v9  ;;  %v5504_v9 = vsel %vm2300_vm2, %v4963_v33, 0.0 }
 0xe07   :  { %v4962_v15 = vmul.f32 %v4706_v22, %v4273_v55 }
 0xe09   :  { %v5502_v34 = vsel %vm2300_vm2, %v4962_v15, 0.0 }
 0xe0a   :  { %v5503_v38 = vadd.f32 %v5502_v34, %v5501_v44 }
 0xe0b   :  { %4478 = vperm.xlu2 %6842, %v11730_v40   ;;  %v5430_v40 = vsel %vm2300_vm2, %v4931_v45, 0.0 }
 0xe0c   :  { %v5431_v37 = vadd.f32 %v5430_v40, %v5429_v62  ;;  %v4965_v40 = vmul.f32 %v4709_v13, %v4291_v60 }
 0xe15   :  { %v3994_v41 = vpop.permute.xlu2 %3993 }
 0xe16   :  { %v10936_v17 = vpop.permute.xlu1 %4181  ;;  %v4916_v27 = vmul.f32 %v4660_v48, %v3994_v41 }
 0xe18   :  { %v5395_v8 = vsel %vm2300_vm2, %v4916_v27, 0.0 }
 0xe19   :  { %v5396_v16 = vadd.f32 %v5395_v8, %v5394_v63 }
 0xe25   :  { %v10949_v19 = vpop.permute.xlu2 %4369 }
 0xe26   :  { %v4091_v10 = vpop.permute.xlu1 %4090 }
 0xe27   :  { %v4932_v47 = vmul.f32 %v4676_v50, %v4091_v10  ;;  %v5505_v50 = vadd.f32 %v5504_v9, %v5503_v38  ;;  %v6273_v38 = vld [vmem:[%s11341_s5 + $0x24] sm:$0xf0] }
 0xe29   :  { %v5432_v57 = vsel %vm2300_vm2, %v4932_v47, 0.0 }
 0xe2a   :  { %v5433_v7 = vadd.f32 %v5432_v57, %v5431_v37  ;;  %v4691_v37 = vld [vmem:[%s11339_s3 + $0x668] sm:$0xff]  ;;  %v5508_v57 = vsel %vm2300_vm2, %v4965_v40, 0.0  ;;  %v6261_v40 = vld [vmem:[%s11341_s5 + $0xc] sm:$0xf0] }
 0xe2b   :  { %v4947_v24 = vmul.f32 %v4691_v37, %v10936_v17 }
 0xe2c   :  { %v5435_v12 = vadd.f32 %v5434_v23, %v5433_v7  ;;  %v5465_v23 = vsel %vm2300_vm2, %v4946_v5, 0.0 }
 0xe2d   :  { %v4467_v51 = vpop.permute.xlu2 %4466  ;;  %v5467_v42 = vsel %vm2300_vm2, %v4947_v24, 0.0  ;;  %v5466_v58 = vadd.f32 %v5465_v23, %v10876_v39 }
 0xe2e   :  { %v5436_v11 = vrot.slane %v5435_v12, 4 }
 0xe30   :  { %v5437_v56 = vadd.f32 %v5436_v11, %v5435_v12 }
 0xe32   :  { %v5438_v61 = vrot.slane %v5437_v56, 2 }
 0xe34   :  { %v5439_v1 = vadd.f32 %v5438_v61, %v5437_v56 }
 0xe36   :  { %v4000_v25 = vpop.permute.xlu1 %3999  ;;  %v5440_v43 = vrot.slane %v5439_v1, 1 }
 0xe37   :  { %v4917_v32 = vmul.f32 %v4661_v35, %v4000_v25  ;;  %v5468_v35 = vadd.f32 %v5467_v42, %v5466_v58  ;;  %v4738_v25 = vld [vmem:[%s11339_s3 + $0x7e0] sm:$0xff] }
 0xe38   :  { %v5441_v41 = vadd.f32 %v5440_v43, %v5439_v1  ;;  %v6412_v43 = vld [vmem:[%s11343_s7 + $0x34] sm:$0xf] }
 0xe39   :  { %v5397_v54 = vsel %vm2300_vm2, %v4917_v32, 0.0 }
 0xe3a   :  { %v5398_v28 = vadd.f32 %v5397_v54, %v5396_v16  ;;  %v4994_v16 = vmul.f32 %v4738_v25, %v4467_v51  ;;  %v6324_v51 = vld [vmem:[%s11343_s7 + $0x54] sm:$0xf0] }
 0xe3c   :  { %v5399_v26 = vrot.slane %v5398_v28, 4  ;;  %v5576_v20 = vsel %vm2300_vm2, %v4994_v16, 0.0 }
 0xe3d   :  { %v4188_v62 = vpop.permute.xlu2 %4187 }
 0xe3e   :  { %v5400_v2 = vadd.f32 %v5399_v26, %v5398_v28  ;;  %v4739_v28 = vld [vmem:[%s11339_s3 + $0x7e8] sm:$0xff]  ;;  %v4721_v26 = vld [vmem:[%s11339_s3 + $0x758] sm:$0xff] }
 0xe40   :  { %v5401_v52 = vrot.slane %v5400_v2, 2 }
 0xe42   :  { %v5402_v6 = vadd.f32 %v5401_v52, %v5400_v2  ;;  %v6271_v2 = vld [vmem:[%s11341_s5 + $0x18] sm:$0xf]  ;;  %v6404_v52 = vld [vmem:[%s11341_s5 + $0x20] sm:$0xf0] }
 0xe44   :  { %v5403_v21 = vrot.slane %v5402_v6, 1 }
 0xe45   :  { %v4285_v55 = vpop.permute.xlu2 %4284 }
 0xe46   :  { %v5404_v49 = vadd.f32 %v5403_v21, %v5402_v6  ;;  %v4964_v45 = vmul.f32 %v4708_v36, %v4285_v55  ;;  %v11002_v27 = vpop.permute.xlu1 %4375  ;;  %v6272_v6 = vor.u32 %v6404_v52, %v6271_v2  ;;  %v6312_v36 = vld [vmem:[%s11343_s7 + $0x3c] sm:$0xf0]  ;;  %v6276_v55 = vor.u32 %v6403_v46, %v6273_v38 }
 0xe47   :  { %v4722_v21 = vld [vmem:[%s11339_s3 + $0x760] sm:$0xff]  ;;  %v6315_v9 = vor.u32 %v6412_v43, %v6312_v36  ;;  %v6322_v43 = vld [vmem:[%s11343_s7 + $0x48] sm:$0xf]  ;;  %v6416_v36 = vld [vmem:[%s11343_s7 + $0x50] sm:$0xf0] }
 0xe48   :  { %v5614_v44 = vsel %vm2911_vm4, %v5404_v49, %v10507_v30  ;;  %v5506_v10 = vsel %vm2300_vm2, %v4964_v45, 0.0  ;;  %v4692_v30 = vld [vmem:[%s11339_s3 + $0x670] sm:$0xff]  ;;  %v6259_v49 = vld [vmem:[%s11341_s5] sm:$0xf]  ;;  %v6401_v45 = vld [vmem:[%s11341_s5 + $0x8] sm:$0xf0]  ;;  %5698 = vmatpush.bf16.msra.mxu2 %v6272_v6  ;;  %5712 = vmatpush.bf16.msra.mxu3 %v6276_v55  ;;  %v4978_v23 = vmul.f32 %v4722_v21, %v10949_v19  ;;  %v6323_v21 = vor.u32 %v6416_v36, %v6322_v43 }
 0xe49   :  { %v5507_v29 = vadd.f32 %v5506_v10, %v5505_v50  ;;  %v10988_v47 = vsel %vm2913_vm5, %v5441_v41, %v5614_v44  ;;  %v4948_v48 = vmul.f32 %v4692_v30, %v4188_v62  ;;  %v6415_v62 = vld [vmem:[%s11343_s7 + $0x4c] sm:$0xf]  ;;  %v6260_v41 = vor.u32 %v6401_v45, %v6259_v49  ;;  %v6400_v50 = vld [vmem:[%s11341_s5 + $0x4] sm:$0xf]  ;;  %v6409_v44 = vld [vmem:[%s11343_s7 + $0x1c] sm:$0xf] }
 0xe4a   :  { %v6327_v34 = vor.u32 %v6415_v62, %v6324_v51  ;;  %v4741_v10 = vld [vmem:[%s11339_s3 + $0x7f8] sm:$0xff]  ;;  %v6264_v5 = vor.u32 %v6400_v50, %v6261_v40  ;;  %v6300_v30 = vld [vmem:[%s11343_s7 + $0x24] sm:$0xf0]  ;;  %v5626_v6 = vmin.f32 %v10306_v53, 0.0  ;;  %v6310_v55 = vld [vmem:[%s11343_s7 + $0x30] sm:$0xf] }
 0xe4b   :  { %v5509_v7 = vadd.f32 %v5508_v57, %v5507_v29  ;;  %v5469_v11 = vsel %vm2300_vm2, %v4948_v48, 0.0  ;;  %v4977_v29 = vmul.f32 %v4721_v26, %v10932_v31  ;;  %v4740_v57 = vld [vmem:[%s11339_s3 + $0x7f0] sm:$0xff]  ;;  %v5577_v31 = vadd.f32 %v5576_v20, %v10924_v59  ;;  %v6413_v50 = vld [vmem:[%s11343_s7 + $0x38] sm:$0xf0] }
 0xe4c   :  { %v5470_v63 = vadd.f32 %v5469_v11, %v5468_v35  ;;  %5840 = vmatpush.bf16.msrb.mxu0 %v6327_v34  ;;  %v6303_v42 = vor.u32 %v6409_v44, %v6300_v30  ;;  %v4997_v58 = vmul.f32 %v4741_v10, %v4485_v14  ;;  %v4724_v11 = vld [vmem:[%s11339_s3 + $0x770] sm:$0xff]  ;;  %5699 = vmatpush.bf16.msra.mxu2 %v6260_v41  ;;  %v5628_v45 = vmul.f32 1.442695, %v5626_v6  ;;  %v6298_v44 = vld [vmem:[%s11343_s7 + $0x18] sm:$0xf]  ;;  %v63_v30 = vld [vmem:[%s11336_s0 + $0x28] sm:$0xff] }
 0xe4d   :  { %v5510_v12 = vrot.slane %v5509_v7, 4  ;;  %5713 = vmatpush.bf16.msra.mxu3 %v6264_v5  ;;  %v6311_v40 = vor.u32 %v6413_v50, %v6310_v55  ;;  %v6279_v10 = vld [vmem:[%s11341_s5 + $0x20] sm:$0xf]  ;;  %v6405_v14 = vld [vmem:[%s11341_s5 + $0x28] sm:$0xf0]  ;;  %s6191_s0 = sshll.u32 %s11347_s11, 4  ;;  %s6192_s0 = int_to_ptr.hbm [resolvable:$true] %s6191_s0 }
 0xe4e   :  { %v4473_v61 = vpop.permute.xlu1 %4472  ;;  %v5582_v16 = vsel %vm2300_vm2, %v4997_v58, 0.0  ;;  %v6267_v5 = vld [vmem:[%s11341_s5 + $0x8] sm:$0xf]  ;;  %6860 = vpow2.f32 %v5628_v45 }
 0xe4f   :  { %v5511_v18 = vadd.f32 %v5510_v12, %v5509_v7  ;;  %v4995_v33 = vmul.f32 %v4739_v28, %v4473_v61  ;;  %v4723_v7 = vld [vmem:[%s11339_s3 + $0x768] sm:$0xff] }
 0xe50   :  { %5841 = vmatpush.bf16.msrb.mxu0 %v6315_v9 }
 0xe51   :  { %v5512_v39 = vrot.slane %v5511_v18, 2  ;;  %v5578_v24 = vsel %vm2300_vm2, %v4995_v33, 0.0  ;;  %5826 = vmatpush.bf16.msrb.mxu3 %v6323_v21 }
 0xe52   :  { %v5579_v19 = vadd.f32 %v5578_v24, %v5577_v31 }
 0xe53   :  { %v5513_v54 = vadd.f32 %v5512_v39, %v5511_v18 }
 0xe54   :  { %5842 = vmatpush.bf16.msrb.mxu0 %v6303_v42  ;;  %v2933_v42 = vadd.f32 %v9456_v0, %v63_v30 }
 0xe55   :  { %v4194_v8 = vpop.permute.xlu2 %4193  ;;  %v5514_v13 = vrot.slane %v5513_v54, 1  ;;  %5827 = vmatpush.bf16.msrb.mxu3 %v6311_v40 }
 0xe56   :  { %v4949_v17 = vmul.f32 %v4693_v3, %v4194_v8  ;;  %v5537_v8 = vsel %vm2300_vm2, %v4977_v29, 0.0 }
 0xe57   :  { %v5515_v3 = vadd.f32 %v5514_v13, %v5513_v54  ;;  %v6406_v13 = vld [vmem:[%s11343_s7 + $0x4] sm:$0xf] }
 0xe58   :  { %v5471_v56 = vsel %vm2300_vm2, %v4949_v17, 0.0  ;;  %v4979_v17 = vmul.f32 %v4723_v7, %v11002_v27  ;;  %v6402_v7 = vld [vmem:[%s11341_s5 + $0x10] sm:$0xf0]  ;;  %s6967_s5 = smov 32  }
 0xe59   :  { %v5472_v32 = vadd.f32 %v5471_v56, %v5470_v63  ;;  %v5539_v56 = vsel %vm2300_vm2, %v4978_v23, 0.0  ;;  %v6268_v23 = vor.u32 %v6402_v7, %v6267_v5 }
 0xe5a   :  { %v5541_v27 = vsel %vm2300_vm2, %v4979_v17, 0.0 }
 0xe5b   :  { %v5473_v22 = vrot.slane %v5472_v32, 4 }
 0xe5d   :  { %v5474_v15 = vadd.f32 %v5473_v22, %v5472_v32  ;;  %v5538_v22 = vadd.f32 %v5537_v8, %v10903_v4 }
 0xe5e   :  { %v4382_v35 = vpop.permute.xlu1 %4381 }
 0xe5f   :  { %v5475_v1 = vrot.slane %v5474_v15, 2  ;;  %v4980_v39 = vmul.f32 %v4724_v11, %v4382_v35  ;;  %v5540_v28 = vadd.f32 %v5539_v56, %v5538_v22  ;;  %v6407_v11 = vld [vmem:[%s11343_s7 + $0x8] sm:$0xf0]  ;;  %v6306_v22 = vld [vmem:[%s11343_s7 + $0x20] sm:$0xf] }
 0xe61   :  { %v5476_v60 = vadd.f32 %v5475_v1, %v5474_v15  ;;  %v5543_v61 = vsel %vm2300_vm2, %v4980_v39, 0.0  ;;  %v5542_v26 = vadd.f32 %v5541_v27, %v5540_v28  ;;  %v6411_v27 = vld [vmem:[%s11343_s7 + $0x28] sm:$0xf0] }
 0xe63   :  { %v5477_v37 = vrot.slane %v5476_v60, 1  ;;  %v5544_v20 = vadd.f32 %v5543_v61, %v5542_v26  ;;  %v6307_v61 = vor.u32 %v6411_v27, %v6306_v22  ;;  %v6408_v26 = vld [vmem:[%s11343_s7 + $0x10] sm:$0xf0]  ;;  %v6425_v27 = vld [vmem:[%s11345_s9 + $0x38] sm:$0xf0] }
 0xe65   :  { %v5478_v48 = vadd.f32 %v5477_v37, %v5476_v60  ;;  %v4479_v12 = vpop.permute.xlu2 %4478  ;;  %v6288_v60 = vld [vmem:[%s11343_s7 + $0xc] sm:$0xf0]  ;;  %v6410_v37 = vld [vmem:[%s11343_s7 + $0x20] sm:$0xf0] }
 0xe66   :  { %v4996_v18 = vmul.f32 %v4740_v57, %v4479_v12  ;;  %v6291_v41 = vor.u32 %v6406_v13, %v6288_v60  ;;  %v6280_v57 = vor.u32 %v6405_v14, %v6279_v10  ;;  %v6299_v12 = vor.u32 %v6410_v37, %v6298_v44 }
 0xe67   :  { %v5616_v59 = vsel %vm2915_vm6, %v5478_v48, %v10988_v47  ;;  %v4725_v47 = vld [vmem:[%s11339_s3 + $0x778] sm:$0xff]  ;;  %v11749_v48 = vld [vmem:[#allocation9_spill] sm:$0xff]  ;;  %s6204_s3 = sshll.u32 %s11348_s12, 4  ;;  %s6965_s12 = smov [#allocation3]   ;;  %s6205_s3 = int_to_ptr.hbm [resolvable:$true] %s6204_s3 }
 0xe68   :  { %v5580_v63 = vsel %vm2300_vm2, %v4996_v18, 0.0  ;;  %v5617_v25 = vsel %vm2917_vm7, %v5515_v3, %v5616_v59  ;;  %5843 = vmatpush.bf16.msrb.mxu0 %v6291_v41  ;;  %5726 = vmatpush.bf16.msrb.mxu2 %v6280_v57  ;;  %v6286_v3 = vld [vmem:[%s11343_s7] sm:$0xf]  ;;  %v6330_v59 = vld [vmem:[%s11343_s7 + $0x50] sm:$0xf] }
 0xe69   :  { %v5581_v32 = vadd.f32 %v5580_v63, %v5579_v19  ;;  %5828 = vmatpush.bf16.msrb.mxu3 %v6299_v12  ;;  %v6287_v8 = vor.u32 %v6407_v11, %v6286_v3  ;;  %v6861_v19 = vpop.eup %6860  ;;  %v6417_v63 = vld [vmem:[%s11343_s7 + $0x58] sm:$0xf0]  ;;  %v6427_v3 = vld [vmem:[%s11345_s9 + $0x4c] sm:$0xf]  ;;  %v6379_v11 = vld [vmem:[%s11345_s9 + $0x54] sm:$0xf0] }
 0xe6a   :  { %v6255_v56 = vadd.f32 -1.0, %v6861_v19  ;;  %v6331_v39 = vor.u32 %v6417_v63, %v6330_v59  ;;  %v6429_v59 = vld [vmem:[%s11345_s9 + $0x58] sm:$0xf0] }
 0xe6b   :  { %v5583_v54 = vadd.f32 %v5582_v16, %v5581_v32  ;;  %6333 = vmatmul.msk.bf16.vlgmr.msrb.gmra.mxu0 %vm49_vm0, %v11749_v48  ;;  %v6414_v32 = vld [vmem:[%s11343_s7 + $0x40] sm:$0xf0] }
 0xe6c   :  { %5727 = vmatpush.bf16.msrb.mxu2 %v6268_v23  ;;  %5854 = vmatpush.bf16.msrb.mxu1 %v6331_v39  ;;  %v6424_v39 = vld [vmem:[%s11345_s9 + $0x34] sm:$0xf] }
 0xe6d   :  { %v5584_v15 = vrot.slane %v5583_v54, 4  ;;  %5829 = vmatpush.bf16.msrb.mxu3 %v6287_v8  ;;  %v6377_v8 = vld [vmem:[%s11345_s9 + $0x48] sm:$0xf] }
 0xe6e   :  { %v4388_v62 = vpop.permute.xlu1 %4387 }
 0xe6f   :  { %v5585_v51 = vadd.f32 %v5584_v15, %v5583_v54  ;;  %v4981_v2 = vmul.f32 %v4725_v47, %v4388_v62  ;;  %v5634_v54 = vmul.f32 1.6732632, %v6255_v56  ;;  %v6294_v15 = vld [vmem:[%s11343_s7 + $0x8] sm:$0xf] }
 0xe71   :  { %v5545_v1 = vsel %vm2300_vm2, %v4981_v2, 0.0  ;;  %v5586_v34 = vrot.slane %v5585_v51, 2 }
 0xe72   :  { %v5546_v4 = vadd.f32 %v5545_v1, %v5544_v20  ;;  %v6295_v20 = vor.u32 %v6408_v26, %v6294_v15 }
 0xe73   :  { %v5587_v46 = vadd.f32 %v5586_v34, %v5585_v51  ;;  %v5636_v51 = vsel %vm5624_vm10, %v10306_v53, %v5634_v54  ;;  %v11182_v53 = vld [vmem:[%s11342_s6] sm:$0x7]  ;;  %v6373_v54 = vld [vmem:[%s11345_s9 + $0x38] sm:$0xf]  ;;  %s6964_s6 = smov 8  }
 0xe74   :  { %v5547_v52 = vrot.slane %v5546_v4, 4  ;;  %v5638_v1 = vmul.f32 1.050701, %v5636_v51  ;;  %v5651_v41 = vperm.slane %v11182_v53, 0  ;;  %v6355_v51 = vld [vmem:[%s11345_s9 + $0x24] sm:$0xf0] }
 0xe75   :  { %v5588_v9 = vrot.slane %v5587_v46, 1 }
 0xe76   :  { %v5548_v33 = vadd.f32 %v5547_v52, %v5546_v4  ;;  %v11187_v52 = vld [vmem:[%s11344_s8] sm:$0x7]  ;;  %s6189_s8 = sshll.u32 %s6965_s12, 4  ;;  %s6190_s8 = int_to_ptr.vmem [resolvable:$true] %s6189_s8 }
 0xe77   :  { %v5589_v31 = vadd.f32 %v5588_v9, %v5587_v46  ;;  %v5753_v6 = vperm.slane %v11187_v52, 1  ;;  %v5752_v50 = vperm.slane %v11187_v52, 0 }
 0xe78   :  { %v5549_v38 = vrot.slane %v5548_v33, 2 }
 0xe7a   :  { %v5550_v49 = vadd.f32 %v5549_v38, %v5548_v33  ;;  %v5652_v33 = vperm.slane %v11182_v53, 1 }
 0xe7c   :  { %v5551_v29 = vrot.slane %v5550_v49, 1 }
 0xe7e   :  { %v5552_v24 = vadd.f32 %v5551_v29, %v5550_v49 }
 0xe80   :  { %v5618_v58 = vsel %vm2919_vm8, %v5552_v24, %v5617_v25  ;;  %v6318_v25 = vld [vmem:[%s11343_s7 + $0x38] sm:$0xf] }
 0xe81   :  { %v5619_v35 = vsel %vm2921_vm9, %v5589_v31, %v5618_v58  ;;  %v6319_v16 = vor.u32 %v6414_v32, %v6318_v25  ;;  %v6367_v32 = vld [vmem:[%s11345_s9 + $0x3c] sm:$0xf0] }
 0xe82   :  { %v5623_v18 = vadd.f32 %v5619_v35, %v2933_v42  ;;  %v6370_v22 = vor.u32 %v6424_v39, %v6367_v32 }
 0xe83   :  { %5855 = vmatpush.bf16.msrb.mxu1 %v6319_v16  ;;  %v6365_v16 = vld [vmem:[%s11345_s9 + $0x30] sm:$0xf] }
 0xe84   :  { %v5627_v17 = vmin.f32 %v5623_v18, 0.0  ;;  %vm5625_vm11 = vcmp.gt.f32.partialorder %v5623_v18, 0.0 }
 0xe86   :  { %v5630_v0 = vmul.f32 1.442695, %v5627_v17  ;;  %v6428_v17 = vld [vmem:[%s11345_s9 + $0x50] sm:$0xf0] }
 0xe87   :  { %5856 = vmatpush.bf16.msrb.mxu1 %v6307_v61  ;;  %v6378_v25 = vor.u32 %v6428_v17, %v6377_v8  ;;  %v6366_v61 = vor.u32 %v6425_v27, %v6365_v16 }
 0xe88   :  { %6862 = vpow2.f32 %v5630_v0  ;;  %v6385_v0 = vld [vmem:[%s11345_s9 + $0x50] sm:$0xf] }
 0xe89   :  { %v6386_v56 = vor.u32 %v6429_v59, %v6385_v0 }
 0xe8b   :  { %5857 = vmatpush.bf16.msrb.mxu1 %v6295_v20  ;;  %6082 = vmatpush.bf16.msra.mxu0 %v6386_v56 }
 0xe8e   :  { %v6863_v28 = vpop.eup %6862  ;;  %6334 = vmatmul.msk.bf16.vlgmr.msrb.gmra.mxu1 %vm49_vm0, %v11749_v48 }
 0xe8f   :  { %v6256_v47 = vadd.f32 -1.0, %v6863_v28  ;;  %v6426_v28 = vld [vmem:[%s11345_s9 + $0x40] sm:$0xf0] }
 0xe90   :  { %v6374_v15 = vor.u32 %v6426_v28, %v6373_v54 }
 0xe91   :  { %v5635_v62 = vmul.f32 1.6732632, %v6256_v47 }
 0xe92   :  { %6083 = vmatpush.bf16.msra.mxu0 %v6374_v15 }
 0xe93   :  { %v5637_v2 = vsel %vm5625_vm11, %v5623_v18, %v5635_v62  ;;  %v6382_v18 = vor.u32 %v6427_v3, %v6379_v11  ;;  %v6421_v62 = vld [vmem:[%s11345_s9 + $0x1c] sm:$0xf] }
 0xe94   :  { %v5639_v34 = vmul.f32 1.050701, %v5637_v2  ;;  %v6353_v2 = vld [vmem:[%s11345_s9 + $0x18] sm:$0xf] }
 0xe96   :  { %v5640_v4 = vpack.c.bf16 %v5639_v34, %v5638_v1  ;;  %v6358_v34 = vor.u32 %v6421_v62, %v6355_v51 }
 0xe98   :  { %6281 = vmatmul.msk.bf16.vlgmr.msra.gmra.mxu2 %vm2300_vm2, %v5640_v4  ;;  %6282 = vmatmul.msk.bf16.vlgmr.msra.gmra.mxu3 %vm2300_vm2, %v5640_v4 }
 0xe99   :  { %6068 = vmatpush.bf16.msra.mxu3 %v6382_v18  ;;  %6054 = vmatpush.bf16.msra.mxu2 %v6378_v25 }
 0xe9d   :  { %6069 = vmatpush.bf16.msra.mxu3 %v6370_v22  ;;  %6055 = vmatpush.bf16.msra.mxu2 %v6366_v61 }
 0xea1   :  { %6070 = vmatpush.bf16.msra.mxu3 %v6358_v34 }
 0xea8   :  { %6283 = vmatmul.msk.bf16.vlgmr.msrb.gmra.mxu2 %vm2300_vm2, %v5640_v4  ;;  %6332 = vmatmul.msk.bf16.vlgmr.msrb.gmra.mxu3 %vm49_vm0, %v11749_v48  ;;  %v6422_v4 = vld [vmem:[%s11345_s9 + $0x20] sm:$0xf0] }
 0xee8   :  { %v5845_v46 = vpop.f32.mrf.mxu0 }
 0xee9   :  { %v5846_v36 = vadd.f32 %v5845_v46, %v5753_v6  ;;  %v6361_v46 = vld [vmem:[%s11345_s9 + $0x20] sm:$0xf] }
 0xef0   :  { %v5847_v13 = vpop.f32.mrf.mxu0 }
 0xef1   :  { %v5848_v49 = vadd.f32 %v5847_v13, %v5753_v6  ;;  %v6354_v6 = vor.u32 %v6422_v4, %v6353_v2 }
 0xef3   :  { %6056 = vmatpush.bf16.msra.mxu2 %v6354_v6  ;;  %v6908_v6 = vld [vmem:[#allocation2] sm:$0xff] }
 0xf1b   :  { %v5715_v38 = vpop.f32.mrf.mxu3  ;;  %v5701_v45 = vpop.f32.mrf.mxu2 }
 0xf1c   :  { %v5716_v43 = vadd.f32 %v5715_v38, %v5652_v33  ;;  %v5702_v10 = vadd.f32 %v5701_v45, %v5651_v41  ;;  %v6423_v38 = vld [vmem:[%s11345_s9 + $0x28] sm:$0xf0] }
 0xf1e   :  { %v5904_v21 = vadd.f32 %v5846_v36, %v5716_v43 }
 0xf20   :  { %v6337_v55 = vmul.f32 -1.442695, %v5904_v21  ;;  %v5754_v21 = vperm.slane %v11187_v52, 2 }
 0xf22   :  { %6864 = vpow2.f32 %v6337_v55  ;;  %v6418_v55 = vld [vmem:[%s11345_s9 + $0x4] sm:$0xf] }
 0xf23   :  { %v5717_v60 = vpop.f32.mrf.mxu3  ;;  %v5703_v30 = vpop.f32.mrf.mxu2 }
 0xf24   :  { %v5718_v9 = vadd.f32 %v5717_v60, %v5652_v33  ;;  %v5704_v23 = vadd.f32 %v5703_v30, %v5651_v41  ;;  %v6362_v60 = vor.u32 %v6423_v38, %v6361_v46 }
 0xf26   :  { %v5905_v40 = vadd.f32 %v5848_v49, %v5718_v9  ;;  %v6343_v9 = vld [vmem:[%s11345_s9 + $0xc] sm:$0xf0]  ;;  %v5859_v49 = vpop.f32.mrf.mxu1  ;;  %6084 = vmatpush.bf16.msra.mxu0 %v6362_v60 }
 0xf28   :  { %v6338_v29 = vmul.f32 -1.442695, %v5905_v40  ;;  %v6865_v57 = vpop.eup %6864 }
 0xf29   :  { %v11193_v7 = vadd.f32 1.0, %v6865_v57 }
 0xf2a   :  { %6866 = vpow2.f32 %v6338_v29  ;;  %v6420_v29 = vld [vmem:[%s11345_s9 + $0x10] sm:$0xf0] }
 0xf2b   :  { %v5831_v44 = vpop.f32.mrf.mxu3  ;;  %v5925_v8 = vand.u32 2147483648, %v11193_v7  ;;  %vm5919_vm2 = vweird.f32 %v11193_v7  ;;  %v5923_v59 = vand.u32 2147483647, %v11193_v7 }
 0xf2c   :  { %v5832_v14 = vadd.f32 %v5831_v44, %v5752_v50  ;;  %v6346_v44 = vor.u32 %v6418_v55, %v6343_v9 }
 0xf2d   :  { %v5926_v28 = vor.u32 1.1754944e-38, %v5925_v8  ;;  %vm5924_vm6 = vcmp.eq.f32.partialorder %v5923_v59, 8.507059e+37 }
 0xf2e   :  { %v5864_v37 = vadd.f32 %v5832_v14, %v5702_v10  ;;  %v6419_v10 = vld [vmem:[%s11345_s9 + $0x8] sm:$0xf0]  ;;  %v6349_v14 = vld [vmem:[%s11345_s9 + $0x8] sm:$0xf]  ;;  %6071 = vmatpush.bf16.msra.mxu3 %v6346_v44  ;;  %v5861_v54 = vpop.f32.mrf.mxu1 }
 0xf30   :  { %v6335_v5 = vmul.f32 -1.442695, %v5864_v37  ;;  %v6867_v12 = vpop.eup %6866 }
 0xf31   :  { %v11210_v19 = vadd.f32 1.0, %v6867_v12 }
 0xf32   :  { %6868 = vpow2.f32 %v6335_v5  ;;  %v5729_v5 = vpop.f32.mrf.mxu2 }
 0xf33   :  { %v5833_v24 = vpop.f32.mrf.mxu3  ;;  %6870 = vrcp.f32 %v11193_v7  ;;  %v5940_v2 = vand.u32 2147483648, %v11210_v19  ;;  %vm5934_vm10 = vweird.f32 %v11210_v19  ;;  %v5938_v4 = vand.u32 2147483647, %v11210_v19 }
 0xf34   :  { %v5834_v31 = vadd.f32 %v5833_v24, %v5752_v50  ;;  %v6341_v50 = vld [vmem:[%s11345_s9] sm:$0xf]  ;;  %v6350_v24 = vor.u32 %v6420_v29, %v6349_v14 }
 0xf35   :  { %v6342_v30 = vor.u32 %v6419_v10, %v6341_v50 }
 0xf36   :  { %v5865_v48 = vadd.f32 %v5834_v31, %v5704_v23  ;;  %v5653_v23 = vperm.slane %v11182_v53, 2  ;;  %v5860_v31 = vadd.f32 %v5859_v49, %v5754_v21  ;;  %6085 = vmatpush.bf16.msra.mxu0 %v6350_v24  ;;  %v6909_v49 = vld [vmem:[#allocation2 + $0x8] sm:$0xff] }
 0xf37   :  { %6057 = vmatpush.bf16.msra.mxu2 %v6342_v30 }
 0xf38   :  { %v6869_v42 = vpop.eup %6868  ;;  %v6336_v58 = vmul.f32 -1.442695, %v5865_v48 }
 0xf39   :  { %v11202_v35 = vadd.f32 1.0, %v6869_v42  ;;  %v11219_v63 = vpop.eup %6870 }
 0xf3a   :  { %6872 = vpow2.f32 %v6336_v58  ;;  %v5915_v47 = vmul.f32 %v11219_v63, %v11193_v7  ;;  %vm5920_vm1 = vweird.f32 %v11219_v63 }
 0xf3b   :  { %6874 = vrcp.f32 %v11202_v35  ;;  %v5883_v45 = vand.u32 2147483647, %v11202_v35  ;;  %v5885_v41 = vand.u32 2147483648, %v11202_v35  ;;  %vm5879_vm13 = vweird.f32 %v11202_v35  ;;  %vm11302_vm3 = vmor %vm5919_vm2, %vm5920_vm1 }
 0xf3c   :  { %6876 = vrcp.f32 %v11210_v19  ;;  %v5916_v43 = vsub.f32 1.0, %v5915_v47  ;;  %v5731_v47 = vpop.f32.mrf.mxu2 }
 0xf3d   :  { %v5886_v42 = vor.u32 1.1754944e-38, %v5885_v41  ;;  %vm5884_vm15 = vcmp.eq.f32.partialorder %v5883_v45, 8.507059e+37 }
 0xf3e   :  { %v5917_v37 = vmul.f32 %v11219_v63, %v5916_v43 }
 0xf40   :  { %v6873_v26 = vpop.eup %6872  ;;  %v5918_v18 = vadd.f32 %v11219_v63, %v5917_v37 }
 0xf41   :  { %v6875_v20 = vpop.eup %6874  ;;  %v11251_v1 = vadd.f32 1.0, %v6873_v26  ;;  %v5862_v26 = vadd.f32 %v5861_v54, %v5754_v21  ;;  %v5941_v21 = vor.u32 1.1754944e-38, %v5940_v2 }
 0xf42   :  { %v5875_v33 = vmul.f32 %v6875_v20, %v11202_v35  ;;  %v11264_v36 = vpop.eup %6876  ;;  %vm5880_vm12 = vweird.f32 %v6875_v20  ;;  %v5730_v35 = vadd.f32 %v5729_v5, %v5653_v23  ;;  %v5922_v27 = vsel %vm11302_vm3, %v11219_v63, %v5918_v18 }
 0xf43   :  { %6878 = vrcp.f32 %v11251_v1  ;;  %v5930_v57 = vmul.f32 %v11264_v36, %v11210_v19  ;;  %vm5881_vm14 = vmor %vm5879_vm13, %vm5880_vm12  ;;  %v5900_v25 = vand.u32 2147483648, %v11251_v1  ;;  %v5898_v16 = vand.u32 2147483647, %v11251_v1 }
 0xf44   :  { %v5876_v13 = vsub.f32 1.0, %v5875_v33  ;;  %vm5894_vm5 = vweird.f32 %v11251_v1  ;;  %v5927_v15 = vsel %vm5924_vm6, %v5926_v28, %v5922_v27  ;;  %vm5935_vm9 = vweird.f32 %v11264_v36 }
 0xf45   :  { %v5931_v53 = vsub.f32 1.0, %v5930_v57  ;;  %v5901_v61 = vor.u32 1.1754944e-38, %v5900_v25  ;;  %vm5899_vm8 = vcmp.eq.f32.partialorder %v5898_v16, 8.507059e+37  ;;  %vm5936_vm11 = vmor %vm5934_vm10, %vm5935_vm9  ;;  %v5954_v38 = vmul.f32 %v6908_v6, %v5927_v15 }
 0xf46   :  { %v5877_v40 = vmul.f32 %v6875_v20, %v5876_v13  ;;  %vm5939_vm12 = vcmp.eq.f32.partialorder %v5938_v4, 8.507059e+37 }
 0xf47   :  { %v5932_v22 = vmul.f32 %v11264_v36, %v5931_v53 }
 0xf48   :  { %v5878_v48 = vadd.f32 %v6875_v20, %v5877_v40 }
 0xf49   :  { %v6879_v12 = vpop.eup %6878  ;;  %v5933_v63 = vadd.f32 %v11264_v36, %v5932_v22 }
 0xf4a   :  { %v5882_v58 = vsel %vm5881_vm14, %v6875_v20, %v5878_v48  ;;  %v5890_v3 = vmul.f32 %v6879_v12, %v11251_v1  ;;  %vm5895_vm4 = vweird.f32 %v6879_v12  ;;  %v5732_v20 = vadd.f32 %v5731_v47, %v5653_v23 }
 0xf4b   :  { %v5887_v11 = vsel %vm5884_vm15, %v5886_v42, %v5882_v58  ;;  %vm5896_vm7 = vmor %vm5894_vm5, %vm5895_vm4  ;;  %v5950_v1 = vsub.f32 1.0, %v5927_v15  ;;  %v5937_v43 = vsel %vm5936_vm11, %v11264_v36, %v5933_v63  ;;  %v5975_v36 = vld [vmem:[%s11346_s10] sm:$0x7]  ;;  %s6962_s10 = smov [#allocation5]  }
 0xf4c   :  { %v5944_v17 = vmul.f32 %v5887_v11, %v5860_v31  ;;  %v5891_v0 = vsub.f32 1.0, %v5890_v3  ;;  %v5942_v60 = vsel %vm5939_vm12, %v5941_v21, %v5937_v43  ;;  %v5979_v40 = vperm.slane %v5975_v36, 2  ;;  %s6202_s16 = sshll.u32 %s6962_s10, 4  ;;  %s6203_s16 = int_to_ptr.vmem [resolvable:$true] %s6202_s16 }
 0xf4d   :  { %v5951_v55 = vsub.f32 1.0, %v5942_v60  ;;  %v5955_v45 = vmul.f32 %v6909_v49, %v5942_v60  ;;  %v5977_v14 = vperm.slane %v5975_v36, 0  ;;  %v5978_v29 = vperm.slane %v5975_v36, 1 }
 0xf4e   :  { %v5946_v39 = vadd.f32 %v5944_v17, %v5730_v35  ;;  %v5892_v32 = vmul.f32 %v6879_v12, %v5891_v0 }
 0xf50   :  { %6880 = vtanh.f32 %v5946_v39  ;;  %v5893_v7 = vadd.f32 %v6879_v12, %v5892_v32 }
 0xf52   :  { %v5897_v62 = vsel %vm5896_vm7, %v6879_v12, %v5893_v7 }
 0xf53   :  { %v5902_v51 = vsel %vm5899_vm8, %v5901_v61, %v5897_v62 }
 0xf54   :  { %v5945_v34 = vmul.f32 %v5902_v51, %v5862_v26 }
 0xf56   :  { %v6881_v46 = vpop.eup %6880  ;;  %v5947_v52 = vadd.f32 %v5945_v34, %v5732_v20 }
 0xf57   :  { %v5952_v33 = vmul.f32 %v6881_v46, %v5950_v1 }
 0xf58   :  { %6882 = vtanh.f32 %v5947_v52 }
 0xf59   :  { %v5956_v13 = vadd.f32 %v5954_v38, %v5952_v33 }
 0xf5b   :  { %6170 = vst.msk [vmem:[#allocation2] sm:$0xff] %vm49_vm0, %v5956_v13 }
 0xf5c   :  { %6183 = vst.msk [vmem:[#allocation5] sm:$0xff] %vm49_vm0, %v5956_v13 }
 0xf5e   :  { %v6883_v9 = vpop.eup %6882 }
 0xf5f   :  { %v5953_v19 = vmul.f32 %v6883_v9, %v5951_v55 }
 0xf61   :  { %v5957_v41 = vadd.f32 %v5955_v45, %v5953_v19 }
 0xf63   :  { %6171 = vst.msk [vmem:[#allocation2 + $0x8] sm:$0xff] %vm49_vm0, %v5957_v41  ;;  %v5958_v50 = vpack.c.bf16 %v5957_v41, %v5956_v13 }
 0xf64   :  { %6184 = vst.msk [vmem:[#allocation5 + $0x8] sm:$0xff] %vm49_vm0, %v5957_v41 }
 0xf65   :  { %6387 = vmatmul.msk.bf16.vlgmr.msra.gmra.mxu2 %vm49_vm0, %v5958_v50  ;;  %6388 = vmatmul.msk.bf16.vlgmr.msra.gmra.mxu3 %vm49_vm0, %v5958_v50  ;;  %6210 = dma.vmem_to_hbm [thread:$0]  %s6203_s16, 256, %s6205_s3, [#allocation6], %s6963_s1, %s6963_s1, %s6964_s6  }
 0xf66   :  { %6389 = vmatmul.msk.bf16.vlgmr.msra.gmra.mxu0 %vm49_vm0, %v5958_v50 }
 0xfe3   :  { %v6087_v44 = vpop.f32.mrf.mxu0 }
 0xfe4   :  { %v6088_v10 = vadd.f32 %v6087_v44, %v5979_v40 }
 0xfe6   :  { %6150 = vmax.xlane.f32.xlu0 %v6088_v10 }
 0xfe8   :  { %v6059_v37 = vpop.f32.mrf.mxu2  ;;  %v6073_v57 = vpop.f32.mrf.mxu3 }
 0xfe9   :  { %v6060_v5 = vadd.f32 %v6059_v37, %v5977_v14  ;;  %v6074_v30 = vadd.f32 %v6073_v57, %v5978_v29 }
 0xfeb   :  { %v6390_v24 = vmul.f32 -1.442695, %v6060_v5  ;;  %6130 = vmax.xlane.f32.xlu2 %v6074_v30  ;;  %v6089_v23 = vpop.f32.mrf.mxu0 }
 0xfec   :  { %v6090_v12 = vadd.f32 %v6089_v23, %v5979_v40 }
 0xfed   :  { %6884 = vpow2.f32 %v6390_v24 }
 0xff0   :  { %v6061_v31 = vpop.f32.mrf.mxu2  ;;  %v6075_v48 = vpop.f32.mrf.mxu3 }
 0xff1   :  { %v6062_v42 = vadd.f32 %v6061_v31, %v5977_v14  ;;  %v6076_v58 = vadd.f32 %v6075_v48, %v5978_v29 }
 0xff3   :  { %v6885_v3 = vpop.eup %6884  ;;  %v6391_v53 = vmul.f32 -1.442695, %v6062_v42  ;;  %6132 = vmax.xlane.f32.xlu1 %v6076_v58  ;;  %6152 = vmax.xlane.f32.xlu2 %v6090_v12 }
 0xff4   :  { %v6098_v11 = vadd.f32 1.0, %v6885_v3 }
 0xff5   :  { %6886 = vpow2.f32 %v6391_v53 }
 0xff6   :  { %6888 = vrcp.f32 %v6098_v11  ;;  %v6111_v59 = vand.u32 2147483648, %v6098_v11  ;;  %v6109_v56 = vand.u32 2147483647, %v6098_v11  ;;  %vm6105_vm13 = vweird.f32 %v6098_v11 }
 0xff8   :  { %v6112_v16 = vor.u32 1.1754944e-38, %v6111_v59  ;;  %vm6110_vm15 = vcmp.eq.f32.partialorder %v6109_v56, 8.507059e+37 }
 0xffb   :  { %v6887_v18 = vpop.eup %6886 }
 0xffc   :  { %v6889_v8 = vpop.eup %6888  ;;  %v6099_v35 = vadd.f32 1.0, %v6887_v18 }
 0xffd   :  { %v6101_v17 = vmul.f32 %v6889_v8, %v6098_v11  ;;  %vm6106_vm0 = vweird.f32 %v6889_v8 }
 0xffe   :  { %6890 = vrcp.f32 %v6099_v35  ;;  %vm6107_vm14 = vmor %vm6105_vm13, %vm6106_vm0  ;;  %v6126_v7 = vand.u32 2147483648, %v6099_v35  ;;  %v6124_v61 = vand.u32 2147483647, %v6099_v35  ;;  %vm6120_vm2 = vweird.f32 %v6099_v35 }
 0xfff   :  { %v6102_v0 = vsub.f32 1.0, %v6101_v17 }
0x1000   :  { %v6127_v26 = vor.u32 1.1754944e-38, %v6126_v7  ;;  %vm6125_vm4 = vcmp.eq.f32.partialorder %v6124_v61, 8.507059e+37 }
0x1001   :  { %v6103_v25 = vmul.f32 %v6889_v8, %v6102_v0 }
0x1003   :  { %v6104_v39 = vadd.f32 %v6889_v8, %v6103_v25 }
0x1004   :  { %v6891_v32 = vpop.eup %6890 }
0x1005   :  { %v6108_v22 = vsel %vm6107_vm14, %v6889_v8, %v6104_v39  ;;  %v6116_v27 = vmul.f32 %v6891_v32, %v6099_v35  ;;  %vm6121_vm1 = vweird.f32 %v6891_v32 }
0x1006   :  { %v6113_v54 = vsel %vm6110_vm15, %v6112_v16, %v6108_v22  ;;  %vm6122_vm3 = vmor %vm6120_vm2, %vm6121_vm1 }
0x1007   :  { %6172 = vst [vmem:[#allocation3] sm:$0xff] %v6113_v54  ;;  %v6117_v28 = vsub.f32 1.0, %v6116_v27 }
0x1009   :  { %v6118_v47 = vmul.f32 %v6891_v32, %v6117_v28 }
0x100b   :  { %v6119_v15 = vadd.f32 %v6891_v32, %v6118_v47 }
0x100d   :  { %v6123_v62 = vsel %vm6122_vm3, %v6891_v32, %v6119_v15 }
0x100e   :  { %v6128_v51 = vsel %vm6125_vm4, %v6127_v26, %v6123_v62 }
0x100f   :  { %6176 = vst [vmem:[#allocation3 + $0x20] sm:$0xff] %v6128_v51 }
0x1059   :  { %v6151_v63 = vpop.xlane.xlu0 %6150 }
0x105a   :  { %v6154_v2 = vsub.f32 %v6088_v10, %v6151_v63 }
0x105c   :  { %v6156_v20 = vmul.f32 1.442695, %v6154_v2 }
0x105e   :  { %6892 = vpow2.f32 %v6156_v20  ;;  %v6131_v34 = vpop.xlane.xlu2 %6130 }
0x105f   :  { %v6134_v1 = vsub.f32 %v6074_v30, %v6131_v34 }
0x1061   :  { %v6136_v4 = vmul.f32 1.442695, %v6134_v1 }
0x1063   :  { %6894 = vpow2.f32 %v6136_v4 }
0x1064   :  { %v6893_v46 = vpop.eup %6892 }
0x1065   :  { %6160 = vadd.xlane.f32.xlu0 %v6893_v46 }
0x1066   :  { %v6133_v52 = vpop.xlane.xlu1 %6132  ;;  %v6153_v33 = vpop.xlane.xlu2 %6152 }
0x1067   :  { %v6135_v6 = vsub.f32 %v6076_v58, %v6133_v52  ;;  %v6155_v38 = vsub.f32 %v6090_v12, %v6153_v33 }
0x1069   :  { %v6895_v43 = vpop.eup %6894  ;;  %v6138_v21 = vmul.f32 1.442695, %v6135_v6  ;;  %v6158_v13 = vmul.f32 1.442695, %v6155_v38 }
0x106a   :  { %6140 = vadd.xlane.f32.xlu1 %v6895_v43 }
0x106b   :  { %6896 = vpow2.f32 %v6138_v21 }
0x106c   :  { %6898 = vpow2.f32 %v6158_v13 }
0x1071   :  { %v6897_v60 = vpop.eup %6896 }
0x1072   :  { %v6899_v55 = vpop.eup %6898  ;;  %6142 = vadd.xlane.f32.xlu2 %v6897_v60 }
0x1073   :  { %6162 = vadd.xlane.f32.xlu1 %v6899_v55 }
0x10d8   :  { %v6161_v9 = vpop.xlane.xlu0 %6160 }
0x10d9   :  { %6900 = vlog2.f32 %v6161_v9 }
0x10dd   :  { %v6141_v19 = vpop.xlane.xlu1 %6140 }
0x10de   :  { %6902 = vlog2.f32 %v6141_v19 }
0x10df   :  { %v6901_v49 = vpop.eup %6900 }
0x10e0   :  { %v6165_v45 = vmul.f32 0.6931472, %v6901_v49 }
0x10e2   :  { %v6168_v41 = vsub.f32 %v6154_v2, %v6165_v45 }
0x10e4   :  { %v6903_v50 = vpop.eup %6902  ;;  %6174 = vst [vmem:[#allocation3 + $0x10] sm:$0xff] %v6168_v41 }
0x10e5   :  { %v6145_v36 = vmul.f32 0.6931472, %v6903_v50  ;;  %v6143_v40 = vpop.xlane.xlu2 %6142 }
0x10e6   :  { %v6163_v44 = vpop.xlane.xlu1 %6162  ;;  %6904 = vlog2.f32 %v6143_v40 }
0x10e7   :  { %v6148_v10 = vsub.f32 %v6134_v1, %v6145_v36  ;;  %6906 = vlog2.f32 %v6163_v44 }
0x10e9   :  { %6173 = vst [vmem:[#allocation3 + $0x8] sm:$0xff] %v6148_v10 }
0x10ec   :  { %v6905_v14 = vpop.eup %6904 }
0x10ed   :  { %v6907_v29 = vpop.eup %6906  ;;  %v6147_v37 = vmul.f32 0.6931472, %v6905_v14 }
0x10ee   :  { %v6167_v57 = vmul.f32 0.6931472, %v6907_v29 }
0x10ef   :  { %v6149_v5 = vsub.f32 %v6135_v6, %v6147_v37 }
0x10f0   :  { %v6169_v30 = vsub.f32 %v6155_v38, %v6167_v57 }
0x10f1   :  { %6177 = vst [vmem:[#allocation3 + $0x28] sm:$0xff] %v6149_v5 }
0x10f2   :  { %6178 = vst [vmem:[#allocation3 + $0x30] sm:$0xff] %v6169_v30 }
0x10f3   :  { %6197 = dma.vmem_to_hbm [thread:$0]  %s6190_s8, 1024, %s6192_s0, [#allocation4], %s6966_s2, %s6966_s2, %s6967_s5  }
0x10f4   :  { %6958 = dma.done.wait [#allocation4], 1024  }
0x10f5   :  { %6959 = vsyncadd [#allocation4], 4294966272 }
0x10f6   :  { %6960 = dma.done.wait [#allocation6], 256  }
0x10f7   :  { %6961 = vsyncadd [#allocation6], 4294967040 }
0x10f8   :  { %6219 = vsyncpa [#allocation4], 1 }
0x10f9   :  { %6220 = vsyncpa [#allocation6], 1 }

</bundles_post_ra>
